<compile_context>
chip_gen: v6e
topology: v6e:2x2x1
jax: 0.10.0
libtpu: 0.0.40
codegen_flags: <defaults>
</compile_context>

<pallas_src>
import jax
import jax.numpy as jnp
from jax import lax
from jax.experimental import pallas as pl
from jax.experimental.pallas import tpu as pltpu


# ----------------------------------------------------------------------------
# Fused kernel: input_proj + num_layers x LSTM + output_proj
#   x_ref        : (T*B, Din)   time-major flattened input (row = t*B + b)
#   w_in_ref     : (Din, H)     input projection weight
#   b/g/beta_in  : (1, H)       input projection bias / LayerNorm gamma,beta
#   wih_ref      : (4L, H, H)   per-gate input->hidden weights (i,f,g,o per layer)
#   whh_ref      : (4L, H, H)   per-gate hidden->hidden weights
#   b_lstm_ref   : (4L, 1, H)   per-gate bias (= b_ih + b_hh slice)
#   w1/b1/g/beta : output projection Linear(H,H/2) + LayerNorm params
#   w2/b2        : Linear(H/2, out_dim)
#   o_ref        : (B, out_dim)
#   seq_a/seq_b  : (T*B, H) VMEM ping-pong buffers for inter-layer sequences
# ----------------------------------------------------------------------------
def fused_tsf_kernel(x_ref, w_in_ref, b_in_ref, g_in_ref, beta_in_ref,
                     wih_ref, whh_ref, b_lstm_ref,
                     w1_ref, b1_ref, g_out_ref, beta_out_ref, w2_ref, b2_ref,
                     o_ref, seq_a, seq_b):
    TB = x_ref.shape[0]
    B = o_ref.shape[0]
    T = TB // B
    H = w_in_ref.shape[1]
    L = wih_ref.shape[0] // 4

    def layer_norm(v, gamma, beta):
        m = jnp.mean(v, axis=-1, keepdims=True)
        var = jnp.mean((v - m) ** 2, axis=-1, keepdims=True)
        return (v - m) * lax.rsqrt(var + 1e-5) * gamma + beta

    # ---- input projection: Linear -> LayerNorm -> ReLU (Dropout = identity)
    x = x_ref[...]                                                  # (T*B, Din)
    y = jnp.dot(x, w_in_ref[...], preferred_element_type=jnp.float32) + b_in_ref[...]
    cur = jnp.maximum(layer_norm(y, g_in_ref[...], beta_in_ref[...]), 0.0)  # (T*B, H)

    bufs = (seq_a, seq_b)
    h = jnp.zeros((B, H), jnp.float32)

    # ---- stacked LSTM (PyTorch gate order i, f, g, o; h0 = c0 = 0)
    for l in range(L):                                   # static, fully unrolled
        last_layer = (l == L - 1)
        out_buf = bufs[l % 2]

        # Hoisted input-path matmuls: one (T*B,H)x(H,H) per gate, outside the
        # time recurrence.  Results are lane-aligned (B,H) slabs per step.
        pre = []
        whh = []
        for k in range(4):
            idx = l * 4 + k
            pre.append(
                jnp.dot(cur, wih_ref[idx], preferred_element_type=jnp.float32)
                + b_lstm_ref[idx]
            )                                                        # (T*B, H)
            whh.append(whh_ref[idx])                                 # (H, H)
        pre_i, pre_f, pre_g, pre_o = pre
        whh_i, whh_f, whh_g, whh_o = whh

        h = jnp.zeros((B, H), jnp.float32)
        c = jnp.zeros((B, H), jnp.float32)
        for t in range(T):                               # static, fully unrolled
            r0 = t * B
            i_g = jax.nn.sigmoid(
                pre_i[r0:r0 + B, :]
                + jnp.dot(h, whh_i, preferred_element_type=jnp.float32))
            f_g = jax.nn.sigmoid(
                pre_f[r0:r0 + B, :]
                + jnp.dot(h, whh_f, preferred_element_type=jnp.float32))
            g_g = jnp.tanh(
                pre_g[r0:r0 + B, :]
                + jnp.dot(h, whh_g, preferred_element_type=jnp.float32))
            o_g = jax.nn.sigmoid(
                pre_o[r0:r0 + B, :]
                + jnp.dot(h, whh_o, preferred_element_type=jnp.float32))
            c = f_g * c + i_g * g_g
            h = o_g * jnp.tanh(c)
            if not last_layer:
                out_buf[pl.ds(r0, B), :] = h             # sequence stays in VMEM
        if not last_layer:
            cur = out_buf[...]                           # input to next layer

    # ---- output projection on the final hidden state of the last layer:
    #      Linear(H, H/2) -> LayerNorm -> ReLU -> (Dropout=id) -> Linear(H/2, out)
    z = jnp.dot(h, w1_ref[...], preferred_element_type=jnp.float32) + b1_ref[...]
    z = jnp.maximum(layer_norm(z, g_out_ref[...], beta_out_ref[...]), 0.0)
    o_ref[...] = (jnp.dot(z, w2_ref[...], preferred_element_type=jnp.float32)
                  + b2_ref[...])


# ----------------------------------------------------------------------------
# Wrapper: weight repacking (per-gate split) + single pallas_call
# ----------------------------------------------------------------------------
def _pack_lstm_params(lstm_params, H):
    wih_split, whh_split, b_split = [], [], []
    for (wih_t, whh_t, bias) in lstm_params:          # wih_t/whh_t: (H, 4H)
        for k in range(4):                            # gate order i, f, g, o
            wih_split.append(wih_t[:, k * H:(k + 1) * H])
            whh_split.append(whh_t[:, k * H:(k + 1) * H])
            b_split.append(bias[k * H:(k + 1) * H].reshape(1, H))
    return jnp.stack(wih_split), jnp.stack(whh_split), jnp.stack(b_split)


def tsf_forward(x, params, output_dim):
    B, T, Din = x.shape
    H = params["w_in"].shape[1]
    out_dim = params["w2"].shape[1]

    wih_s, whh_s, b_s = _pack_lstm_params(params["lstm"], H)
    # time-major flattening so step t is the static row slab [t*B, (t+1)*B)
    x_flat = jnp.transpose(x, (1, 0, 2)).reshape(T * B, Din)

    out = pl.pallas_call(
        fused_tsf_kernel,
        out_shape=jax.ShapeDtypeStruct((B, out_dim), jnp.float32),
        scratch_shapes=[
            pltpu.VMEM((T * B, H), jnp.float32),   # ping
            pltpu.VMEM((T * B, H), jnp.float32),   # pong
        ],
    )(x_flat,
      params["w_in"], params["b_in"].reshape(1, -1),
      params["g_in"].reshape(1, -1), params["beta_in"].reshape(1, -1),
      wih_s, whh_s, b_s,
      params["w1"], params["b1"].reshape(1, -1),
      params["g_out"].reshape(1, -1), params["beta_out"].reshape(1, -1),
      params["w2"], params["b2"].reshape(1, -1))

    if output_dim == 1:
        out = out[..., None]                            # unsqueeze(-1)
    return out


# ----------------------------------------------------------------------------
# Pure-JAX reference (same math) used to sanity-check the fused kernel
# ----------------------------------------------------------------------------
def tsf_forward_ref(x, params, output_dim):
    def ln(v, g, b):
        m = v.mean(-1, keepdims=True)
        var = ((v - m) ** 2).mean(-1, keepdims=True)
        return (v - m) / jnp.sqrt(var + 1e-5) * g + b

    y = jnp.maximum(ln(x @ params["w_in"] + params["b_in"],
                       params["g_in"], params["beta_in"]), 0.0)
    B, T, H = y.shape
    seq = y
    for (wih_t, whh_t, bias) in params["lstm"]:
        h = jnp.zeros((B, H), jnp.float32)
        c = jnp.zeros((B, H), jnp.float32)
        outs = []
        for t in range(T):
            gates = seq[:, t] @ wih_t + h @ whh_t + bias
            i = jax.nn.sigmoid(gates[:, 0 * H:1 * H])
            f = jax.nn.sigmoid(gates[:, 1 * H:2 * H])
            g = jnp.tanh(gates[:, 2 * H:3 * H])
            o = jax.nn.sigmoid(gates[:, 3 * H:4 * H])
            c = f * c + i * g
            h = o * jnp.tanh(c)
            outs.append(h)
        seq = jnp.stack(outs, axis=1)
    last = seq[:, -1]
    z = jnp.maximum(ln(last @ params["w1"] + params["b1"],
                       params["g_out"], params["beta_out"]), 0.0)
    out = z @ params["w2"] + params["b2"]
    if output_dim == 1:
        out = out[..., None]
    return out


# ----------------------------------------------------------------------------
def make_params(key, input_dim, hidden_dim, output_dim, num_layers):
    ks = jax.random.split(key, 6 + 4 * num_layers)
    H, H2 = hidden_dim, hidden_dim // 2
    s = 0.1
    params = {
        "w_in": s * jax.random.normal(ks[0], (input_dim, H), jnp.float32),
        "b_in": s * jax.random.normal(ks[1], (H,), jnp.float32),
        "g_in": jnp.ones((H,), jnp.float32),
        "beta_in": jnp.zeros((H,), jnp.float32),
        "w1": s * jax.random.normal(ks[2], (H, H2), jnp.float32),
        "b1": s * jax.random.normal(ks[3], (H2,), jnp.float32),
        "g_out": jnp.ones((H2,), jnp.float32),
        "beta_out": jnp.zeros((H2,), jnp.float32),
        "w2": s * jax.random.normal(ks[4], (H2, output_dim), jnp.float32),
        "b2": s * jax.random.normal(ks[5], (output_dim,), jnp.float32),
        "lstm": [],
    }
    for l in range(num_layers):
        k0, k1, k2 = jax.random.split(ks[6 + l], 3)
        wih_t = s * jax.random.normal(k0, (H, 4 * H), jnp.float32)   # weight_ih.T
        whh_t = s * jax.random.normal(k1, (H, 4 * H), jnp.float32)   # weight_hh.T
        bias = s * jax.random.normal(k2, (4 * H,), jnp.float32)      # b_ih + b_hh
        params["lstm"].append((wih_t, whh_t, bias))
    return params


if __name__ == "__main__":
    # Small shapes consistent with the module: batch=2, seq=8, input_dim=4,
    # hidden_dim=32, output_dim=1, num_layers=4.
    B, T, INPUT_DIM, HIDDEN_DIM, OUTPUT_DIM, NUM_LAYERS = 2, 8, 4, 32, 1, 4

    key = jax.random.PRNGKey(0)
    kx, kp = jax.random.split(key)
    x = jax.random.normal(kx, (B, T, INPUT_DIM), jnp.float32)
    params = make_params(kp, INPUT_DIM, HIDDEN_DIM, OUTPUT_DIM, NUM_LAYERS)

    fwd = jax.jit(tsf_forward, static_argnums=2)
    out = fwd(x, params, OUTPUT_DIM)
    out = jax.block_until_ready(out)

    ref = tsf_forward_ref(x, params, OUTPUT_DIM)
    assert out.shape == (B, OUTPUT_DIM, 1), out.shape
    assert jnp.allclose(out, ref, atol=1e-4, rtol=1e-4), (out, ref)

    print("KERNEL_OK")
</pallas_src>

<mosaic_0001>
module attributes {stable_mosaic.version = 11 : i64} {
  func.func @fused_tsf_kernel(%arg0: memref<16x4xf32, #tpu.memory_space<vmem>>, %arg1: memref<4x32xf32, #tpu.memory_space<vmem>>, %arg2: memref<1x32xf32, #tpu.memory_space<vmem>>, %arg3: memref<1x32xf32, #tpu.memory_space<vmem>>, %arg4: memref<1x32xf32, #tpu.memory_space<vmem>>, %arg5: memref<16x32x32xf32, #tpu.memory_space<vmem>>, %arg6: memref<16x32x32xf32, #tpu.memory_space<vmem>>, %arg7: memref<16x1x32xf32, #tpu.memory_space<vmem>>, %arg8: memref<32x16xf32, #tpu.memory_space<vmem>>, %arg9: memref<1x16xf32, #tpu.memory_space<vmem>>, %arg10: memref<1x16xf32, #tpu.memory_space<vmem>>, %arg11: memref<1x16xf32, #tpu.memory_space<vmem>>, %arg12: memref<16x1xf32, #tpu.memory_space<vmem>>, %arg13: memref<1x1xf32, #tpu.memory_space<vmem>>, %arg14: memref<2x1xf32, #tpu.memory_space<vmem>>, %arg15: memref<16x32xf32, #tpu.memory_space<vmem>>, %arg16: memref<16x32xf32, #tpu.memory_space<vmem>>) attributes {dimension_semantics = [], scalar_prefetch = 0 : i64, scratch_operands = 2 : i64, tpu.core_type = #tpu.core_type<tc>} {
    %c0 = arith.constant 0 : index
    %c0_0 = arith.constant 0 : index
    %0 = vector.load %arg0[%c0, %c0_0] : memref<16x4xf32, #tpu.memory_space<vmem>>, vector<16x4xf32>
    %c0_1 = arith.constant 0 : index
    %c0_2 = arith.constant 0 : index
    %1 = vector.load %arg1[%c0_1, %c0_2] : memref<4x32xf32, #tpu.memory_space<vmem>>, vector<4x32xf32>
    %cst = arith.constant dense<0.000000e+00> : vector<16x32xf32>
    %2 = tpu.matmul %0, %1, %cst {dimension_numbers = #tpu.dot_dimension_numbers<[1], [0], [0], [1], [0, 0, 1, 1], [], []>} : vector<16x4xf32>, vector<4x32xf32>, vector<16x32xf32> -> vector<16x32xf32>
    %c0_3 = arith.constant 0 : index
    %c0_4 = arith.constant 0 : index
    %3 = vector.load %arg2[%c0_3, %c0_4] : memref<1x32xf32, #tpu.memory_space<vmem>>, vector<1x32xf32>
    %4 = vector.broadcast %3 : vector<1x32xf32> to vector<16x32xf32>
    %5 = arith.addf %2, %4 : vector<16x32xf32>
    %c0_5 = arith.constant 0 : index
    %c0_6 = arith.constant 0 : index
    %6 = vector.load %arg3[%c0_5, %c0_6] : memref<1x32xf32, #tpu.memory_space<vmem>>, vector<1x32xf32>
    %c0_7 = arith.constant 0 : index
    %c0_8 = arith.constant 0 : index
    %7 = vector.load %arg4[%c0_7, %c0_8] : memref<1x32xf32, #tpu.memory_space<vmem>>, vector<1x32xf32>
    %cst_9 = arith.constant dense<0.000000e+00> : vector<16xf32>
    %8 = vector.multi_reduction <add>, %5, %cst_9 [1] : vector<16x32xf32> to vector<16xf32>
    %9 = vector.shape_cast %8 : vector<16xf32> to vector<16x1xf32>
    %cst_10 = arith.constant 3.200000e+01 : f32
    %10 = vector.broadcast %cst_10 : f32 to vector<16x1xf32>
    %11 = arith.divf %9, %10 : vector<16x1xf32>
    %12 = vector.broadcast %11 : vector<16x1xf32> to vector<16x32xf32>
    %13 = arith.subf %5, %12 : vector<16x32xf32>
    %14 = arith.mulf %13, %13 : vector<16x32xf32>
    %cst_11 = arith.constant dense<0.000000e+00> : vector<16xf32>
    %15 = vector.multi_reduction <add>, %14, %cst_11 [1] : vector<16x32xf32> to vector<16xf32>
    %16 = vector.shape_cast %15 : vector<16xf32> to vector<16x1xf32>
    %cst_12 = arith.constant 3.200000e+01 : f32
    %17 = vector.broadcast %cst_12 : f32 to vector<16x1xf32>
    %18 = arith.divf %16, %17 : vector<16x1xf32>
    %19 = vector.broadcast %11 : vector<16x1xf32> to vector<16x32xf32>
    %20 = arith.subf %5, %19 : vector<16x32xf32>
    %cst_13 = arith.constant 9.99999974E-6 : f32
    %21 = vector.broadcast %cst_13 : f32 to vector<16x1xf32>
    %22 = arith.addf %18, %21 : vector<16x1xf32>
    %23 = math.rsqrt %22 : vector<16x1xf32>
    %24 = vector.broadcast %23 : vector<16x1xf32> to vector<16x32xf32>
    %25 = arith.mulf %20, %24 : vector<16x32xf32>
    %26 = vector.broadcast %6 : vector<1x32xf32> to vector<16x32xf32>
    %27 = arith.mulf %25, %26 : vector<16x32xf32>
    %28 = vector.broadcast %7 : vector<1x32xf32> to vector<16x32xf32>
    %29 = arith.addf %27, %28 : vector<16x32xf32>
    %cst_14 = arith.constant 0.000000e+00 : f32
    %30 = vector.broadcast %cst_14 : f32 to vector<16x32xf32>
    %31 = arith.maximumf %29, %30 : vector<16x32xf32>
    %c0_15 = arith.constant 0 : index
    %c0_16 = arith.constant 0 : index
    %c0_17 = arith.constant 0 : index
    %32 = vector.load %arg5[%c0_15, %c0_16, %c0_17] : memref<16x32x32xf32, #tpu.memory_space<vmem>>, vector<1x32x32xf32>
    %33 = vector.shape_cast %32 : vector<1x32x32xf32> to vector<32x32xf32>
    %cst_18 = arith.constant dense<0.000000e+00> : vector<16x32xf32>
    %34 = tpu.matmul %31, %33, %cst_18 {dimension_numbers = #tpu.dot_dimension_numbers<[1], [0], [0], [1], [0, 0, 1, 1], [], []>} : vector<16x32xf32>, vector<32x32xf32>, vector<16x32xf32> -> vector<16x32xf32>
    %c0_19 = arith.constant 0 : index
    %c0_20 = arith.constant 0 : index
    %c0_21 = arith.constant 0 : index
    %35 = vector.load %arg7[%c0_19, %c0_20, %c0_21] : memref<16x1x32xf32, #tpu.memory_space<vmem>>, vector<1x1x32xf32>
    %36 = vector.shape_cast %35 : vector<1x1x32xf32> to vector<1x32xf32>
    %37 = vector.broadcast %36 : vector<1x32xf32> to vector<16x32xf32>
    %38 = arith.addf %34, %37 : vector<16x32xf32>
    %c0_22 = arith.constant 0 : index
    %c0_23 = arith.constant 0 : index
    %c0_24 = arith.constant 0 : index
    %39 = vector.load %arg6[%c0_22, %c0_23, %c0_24] : memref<16x32x32xf32, #tpu.memory_space<vmem>>, vector<1x32x32xf32>
    %40 = vector.shape_cast %39 : vector<1x32x32xf32> to vector<32x32xf32>
    %c1 = arith.constant 1 : index
    %c0_25 = arith.constant 0 : index
    %c0_26 = arith.constant 0 : index
    %41 = vector.load %arg5[%c1, %c0_25, %c0_26] : memref<16x32x32xf32, #tpu.memory_space<vmem>>, vector<1x32x32xf32>
    %42 = vector.shape_cast %41 : vector<1x32x32xf32> to vector<32x32xf32>
    %cst_27 = arith.constant dense<0.000000e+00> : vector<16x32xf32>
    %43 = tpu.matmul %31, %42, %cst_27 {dimension_numbers = #tpu.dot_dimension_numbers<[1], [0], [0], [1], [0, 0, 1, 1], [], []>} : vector<16x32xf32>, vector<32x32xf32>, vector<16x32xf32> -> vector<16x32xf32>
    %c1_28 = arith.constant 1 : index
    %c0_29 = arith.constant 0 : index
    %c0_30 = arith.constant 0 : index
    %44 = vector.load %arg7[%c1_28, %c0_29, %c0_30] : memref<16x1x32xf32, #tpu.memory_space<vmem>>, vector<1x1x32xf32>
    %45 = vector.shape_cast %44 : vector<1x1x32xf32> to vector<1x32xf32>
    %46 = vector.broadcast %45 : vector<1x32xf32> to vector<16x32xf32>
    %47 = arith.addf %43, %46 : vector<16x32xf32>
    %c1_31 = arith.constant 1 : index
    %c0_32 = arith.constant 0 : index
    %c0_33 = arith.constant 0 : index
    %48 = vector.load %arg6[%c1_31, %c0_32, %c0_33] : memref<16x32x32xf32, #tpu.memory_space<vmem>>, vector<1x32x32xf32>
    %49 = vector.shape_cast %48 : vector<1x32x32xf32> to vector<32x32xf32>
    %c2 = arith.constant 2 : index
    %c0_34 = arith.constant 0 : index
    %c0_35 = arith.constant 0 : index
    %50 = vector.load %arg5[%c2, %c0_34, %c0_35] : memref<16x32x32xf32, #tpu.memory_space<vmem>>, vector<1x32x32xf32>
    %51 = vector.shape_cast %50 : vector<1x32x32xf32> to vector<32x32xf32>
    %cst_36 = arith.constant dense<0.000000e+00> : vector<16x32xf32>
    %52 = tpu.matmul %31, %51, %cst_36 {dimension_numbers = #tpu.dot_dimension_numbers<[1], [0], [0], [1], [0, 0, 1, 1], [], []>} : vector<16x32xf32>, vector<32x32xf32>, vector<16x32xf32> -> vector<16x32xf32>
    %c2_37 = arith.constant 2 : index
    %c0_38 = arith.constant 0 : index
    %c0_39 = arith.constant 0 : index
    %53 = vector.load %arg7[%c2_37, %c0_38, %c0_39] : memref<16x1x32xf32, #tpu.memory_space<vmem>>, vector<1x1x32xf32>
    %54 = vector.shape_cast %53 : vector<1x1x32xf32> to vector<1x32xf32>
    %55 = vector.broadcast %54 : vector<1x32xf32> to vector<16x32xf32>
    %56 = arith.addf %52, %55 : vector<16x32xf32>
    %c2_40 = arith.constant 2 : index
    %c0_41 = arith.constant 0 : index
    %c0_42 = arith.constant 0 : index
    %57 = vector.load %arg6[%c2_40, %c0_41, %c0_42] : memref<16x32x32xf32, #tpu.memory_space<vmem>>, vector<1x32x32xf32>
    %58 = vector.shape_cast %57 : vector<1x32x32xf32> to vector<32x32xf32>
    %c3 = arith.constant 3 : index
    %c0_43 = arith.constant 0 : index
    %c0_44 = arith.constant 0 : index
    %59 = vector.load %arg5[%c3, %c0_43, %c0_44] : memref<16x32x32xf32, #tpu.memory_space<vmem>>, vector<1x32x32xf32>
    %60 = vector.shape_cast %59 : vector<1x32x32xf32> to vector<32x32xf32>
    %cst_45 = arith.constant dense<0.000000e+00> : vector<16x32xf32>
    %61 = tpu.matmul %31, %60, %cst_45 {dimension_numbers = #tpu.dot_dimension_numbers<[1], [0], [0], [1], [0, 0, 1, 1], [], []>} : vector<16x32xf32>, vector<32x32xf32>, vector<16x32xf32> -> vector<16x32xf32>
    %c3_46 = arith.constant 3 : index
    %c0_47 = arith.constant 0 : index
    %c0_48 = arith.constant 0 : index
    %62 = vector.load %arg7[%c3_46, %c0_47, %c0_48] : memref<16x1x32xf32, #tpu.memory_space<vmem>>, vector<1x1x32xf32>
    %63 = vector.shape_cast %62 : vector<1x1x32xf32> to vector<1x32xf32>
    %64 = vector.broadcast %63 : vector<1x32xf32> to vector<16x32xf32>
    %65 = arith.addf %61, %64 : vector<16x32xf32>
    %c3_49 = arith.constant 3 : index
    %c0_50 = arith.constant 0 : index
    %c0_51 = arith.constant 0 : index
    %66 = vector.load %arg6[%c3_49, %c0_50, %c0_51] : memref<16x32x32xf32, #tpu.memory_space<vmem>>, vector<1x32x32xf32>
    %67 = vector.shape_cast %66 : vector<1x32x32xf32> to vector<32x32xf32>
    %cst_52 = arith.constant 0.000000e+00 : f32
    %68 = vector.broadcast %cst_52 : f32 to vector<2x32xf32>
    %cst_53 = arith.constant 0.000000e+00 : f32
    %69 = vector.broadcast %cst_53 : f32 to vector<2x32xf32>
    %70 = vector.extract_strided_slice %38 {offsets = [0, 0], sizes = [2, 32], strides = [1, 1]} : vector<16x32xf32> to vector<2x32xf32>
    %cst_54 = arith.constant dense<0.000000e+00> : vector<2x32xf32>
    %71 = tpu.matmul %68, %40, %cst_54 {dimension_numbers = #tpu.dot_dimension_numbers<[1], [0], [0], [1], [0, 0, 1, 1], [], []>} : vector<2x32xf32>, vector<32x32xf32>, vector<2x32xf32> -> vector<2x32xf32>
    %72 = arith.addf %70, %71 : vector<2x32xf32>
    %73 = arith.negf %72 : vector<2x32xf32>
    %74 = math.exp %73 : vector<2x32xf32>
    %cst_55 = arith.constant 1.000000e+00 : f32
    %75 = vector.broadcast %cst_55 : f32 to vector<2x32xf32>
    %76 = arith.addf %75, %74 : vector<2x32xf32>
    %77 = arith.divf %75, %76 : vector<2x32xf32>
    %78 = vector.extract_strided_slice %47 {offsets = [0, 0], sizes = [2, 32], strides = [1, 1]} : vector<16x32xf32> to vector<2x32xf32>
    %cst_56 = arith.constant dense<0.000000e+00> : vector<2x32xf32>
    %79 = tpu.matmul %68, %49, %cst_56 {dimension_numbers = #tpu.dot_dimension_numbers<[1], [0], [0], [1], [0, 0, 1, 1], [], []>} : vector<2x32xf32>, vector<32x32xf32>, vector<2x32xf32> -> vector<2x32xf32>
    %80 = arith.addf %78, %79 : vector<2x32xf32>
    %81 = arith.negf %80 : vector<2x32xf32>
    %82 = math.exp %81 : vector<2x32xf32>
    %cst_57 = arith.constant 1.000000e+00 : f32
    %83 = vector.broadcast %cst_57 : f32 to vector<2x32xf32>
    %84 = arith.addf %83, %82 : vector<2x32xf32>
    %85 = arith.divf %83, %84 : vector<2x32xf32>
    %86 = vector.extract_strided_slice %56 {offsets = [0, 0], sizes = [2, 32], strides = [1, 1]} : vector<16x32xf32> to vector<2x32xf32>
    %cst_58 = arith.constant dense<0.000000e+00> : vector<2x32xf32>
    %87 = tpu.matmul %68, %58, %cst_58 {dimension_numbers = #tpu.dot_dimension_numbers<[1], [0], [0], [1], [0, 0, 1, 1], [], []>} : vector<2x32xf32>, vector<32x32xf32>, vector<2x32xf32> -> vector<2x32xf32>
    %88 = arith.addf %86, %87 : vector<2x32xf32>
    %89 = math.tanh %88 : vector<2x32xf32>
    %90 = vector.extract_strided_slice %65 {offsets = [0, 0], sizes = [2, 32], strides = [1, 1]} : vector<16x32xf32> to vector<2x32xf32>
    %cst_59 = arith.constant dense<0.000000e+00> : vector<2x32xf32>
    %91 = tpu.matmul %68, %67, %cst_59 {dimension_numbers = #tpu.dot_dimension_numbers<[1], [0], [0], [1], [0, 0, 1, 1], [], []>} : vector<2x32xf32>, vector<32x32xf32>, vector<2x32xf32> -> vector<2x32xf32>
    %92 = arith.addf %90, %91 : vector<2x32xf32>
    %93 = arith.negf %92 : vector<2x32xf32>
    %94 = math.exp %93 : vector<2x32xf32>
    %cst_60 = arith.constant 1.000000e+00 : f32
    %95 = vector.broadcast %cst_60 : f32 to vector<2x32xf32>
    %96 = arith.addf %95, %94 : vector<2x32xf32>
    %97 = arith.divf %95, %96 : vector<2x32xf32>
    %98 = arith.mulf %85, %69 : vector<2x32xf32>
    %99 = arith.mulf %77, %89 : vector<2x32xf32>
    %100 = arith.addf %98, %99 : vector<2x32xf32>
    %101 = math.tanh %100 : vector<2x32xf32>
    %102 = arith.mulf %97, %101 : vector<2x32xf32>
    %c0_61 = arith.constant 0 : index
    %c0_62 = arith.constant 0 : index
    %103 = vector.load %arg15[%c0_61, %c0_62] : memref<16x32xf32, #tpu.memory_space<vmem>>, vector<2x32xf32>
    tpu.vector_store %arg15[%c0_61, %c0_62], %102 {strides = array<i32>} : memref<16x32xf32, #tpu.memory_space<vmem>>, vector<2x32xf32>,
    %104 = vector.extract_strided_slice %38 {offsets = [2, 0], sizes = [2, 32], strides = [1, 1]} : vector<16x32xf32> to vector<2x32xf32>
    %cst_63 = arith.constant dense<0.000000e+00> : vector<2x32xf32>
    %105 = tpu.matmul %102, %40, %cst_63 {dimension_numbers = #tpu.dot_dimension_numbers<[1], [0], [0], [1], [0, 0, 1, 1], [], []>} : vector<2x32xf32>, vector<32x32xf32>, vector<2x32xf32> -> vector<2x32xf32>
    %106 = arith.addf %104, %105 : vector<2x32xf32>
    %107 = arith.negf %106 : vector<2x32xf32>
    %108 = math.exp %107 : vector<2x32xf32>
    %cst_64 = arith.constant 1.000000e+00 : f32
    %109 = vector.broadcast %cst_64 : f32 to vector<2x32xf32>
    %110 = arith.addf %109, %108 : vector<2x32xf32>
    %111 = arith.divf %109, %110 : vector<2x32xf32>
    %112 = vector.extract_strided_slice %47 {offsets = [2, 0], sizes = [2, 32], strides = [1, 1]} : vector<16x32xf32> to vector<2x32xf32>
    %cst_65 = arith.constant dense<0.000000e+00> : vector<2x32xf32>
    %113 = tpu.matmul %102, %49, %cst_65 {dimension_numbers = #tpu.dot_dimension_numbers<[1], [0], [0], [1], [0, 0, 1, 1], [], []>} : vector<2x32xf32>, vector<32x32xf32>, vector<2x32xf32> -> vector<2x32xf32>
    %114 = arith.addf %112, %113 : vector<2x32xf32>
    %115 = arith.negf %114 : vector<2x32xf32>
    %116 = math.exp %115 : vector<2x32xf32>
    %cst_66 = arith.constant 1.000000e+00 : f32
    %117 = vector.broadcast %cst_66 : f32 to vector<2x32xf32>
    %118 = arith.addf %117, %116 : vector<2x32xf32>
    %119 = arith.divf %117, %118 : vector<2x32xf32>
    %120 = vector.extract_strided_slice %56 {offsets = [2, 0], sizes = [2, 32], strides = [1, 1]} : vector<16x32xf32> to vector<2x32xf32>
    %cst_67 = arith.constant dense<0.000000e+00> : vector<2x32xf32>
    %121 = tpu.matmul %102, %58, %cst_67 {dimension_numbers = #tpu.dot_dimension_numbers<[1], [0], [0], [1], [0, 0, 1, 1], [], []>} : vector<2x32xf32>, vector<32x32xf32>, vector<2x32xf32> -> vector<2x32xf32>
    %122 = arith.addf %120, %121 : vector<2x32xf32>
    %123 = math.tanh %122 : vector<2x32xf32>
    %124 = vector.extract_strided_slice %65 {offsets = [2, 0], sizes = [2, 32], strides = [1, 1]} : vector<16x32xf32> to vector<2x32xf32>
    %cst_68 = arith.constant dense<0.000000e+00> : vector<2x32xf32>
    %125 = tpu.matmul %102, %67, %cst_68 {dimension_numbers = #tpu.dot_dimension_numbers<[1], [0], [0], [1], [0, 0, 1, 1], [], []>} : vector<2x32xf32>, vector<32x32xf32>, vector<2x32xf32> -> vector<2x32xf32>
    %126 = arith.addf %124, %125 : vector<2x32xf32>
    %127 = arith.negf %126 : vector<2x32xf32>
    %128 = math.exp %127 : vector<2x32xf32>
    %cst_69 = arith.constant 1.000000e+00 : f32
    %129 = vector.broadcast %cst_69 : f32 to vector<2x32xf32>
    %130 = arith.addf %129, %128 : vector<2x32xf32>
    %131 = arith.divf %129, %130 : vector<2x32xf32>
    %132 = arith.mulf %119, %100 : vector<2x32xf32>
    %133 = arith.mulf %111, %123 : vector<2x32xf32>
    %134 = arith.addf %132, %133 : vector<2x32xf32>
    %135 = math.tanh %134 : vector<2x32xf32>
    %136 = arith.mulf %131, %135 : vector<2x32xf32>
    %c2_70 = arith.constant 2 : index
    %c0_71 = arith.constant 0 : index
    %137 = vector.load %arg15[%c2_70, %c0_71] : memref<16x32xf32, #tpu.memory_space<vmem>>, vector<2x32xf32>
    tpu.vector_store %arg15[%c2_70, %c0_71], %136 {strides = array<i32>} : memref<16x32xf32, #tpu.memory_space<vmem>>, vector<2x32xf32>,
    %138 = vector.extract_strided_slice %38 {offsets = [4, 0], sizes = [2, 32], strides = [1, 1]} : vector<16x32xf32> to vector<2x32xf32>
    %cst_72 = arith.constant dense<0.000000e+00> : vector<2x32xf32>
    %139 = tpu.matmul %136, %40, %cst_72 {dimension_numbers = #tpu.dot_dimension_numbers<[1], [0], [0], [1], [0, 0, 1, 1], [], []>} : vector<2x32xf32>, vector<32x32xf32>, vector<2x32xf32> -> vector<2x32xf32>
    %140 = arith.addf %138, %139 : vector<2x32xf32>
    %141 = arith.negf %140 : vector<2x32xf32>
    %142 = math.exp %141 : vector<2x32xf32>
    %cst_73 = arith.constant 1.000000e+00 : f32
    %143 = vector.broadcast %cst_73 : f32 to vector<2x32xf32>
    %144 = arith.addf %143, %142 : vector<2x32xf32>
    %145 = arith.divf %143, %144 : vector<2x32xf32>
    %146 = vector.extract_strided_slice %47 {offsets = [4, 0], sizes = [2, 32], strides = [1, 1]} : vector<16x32xf32> to vector<2x32xf32>
    %cst_74 = arith.constant dense<0.000000e+00> : vector<2x32xf32>
    %147 = tpu.matmul %136, %49, %cst_74 {dimension_numbers = #tpu.dot_dimension_numbers<[1], [0], [0], [1], [0, 0, 1, 1], [], []>} : vector<2x32xf32>, vector<32x32xf32>, vector<2x32xf32> -> vector<2x32xf32>
    %148 = arith.addf %146, %147 : vector<2x32xf32>
    %149 = arith.negf %148 : vector<2x32xf32>
    %150 = math.exp %149 : vector<2x32xf32>
    %cst_75 = arith.constant 1.000000e+00 : f32
    %151 = vector.broadcast %cst_75 : f32 to vector<2x32xf32>
    %152 = arith.addf %151, %150 : vector<2x32xf32>
    %153 = arith.divf %151, %152 : vector<2x32xf32>
    %154 = vector.extract_strided_slice %56 {offsets = [4, 0], sizes = [2, 32], strides = [1, 1]} : vector<16x32xf32> to vector<2x32xf32>
    %cst_76 = arith.constant dense<0.000000e+00> : vector<2x32xf32>
    %155 = tpu.matmul %136, %58, %cst_76 {dimension_numbers = #tpu.dot_dimension_numbers<[1], [0], [0], [1], [0, 0, 1, 1], [], []>} : vector<2x32xf32>, vector<32x32xf32>, vector<2x32xf32> -> vector<2x32xf32>
    %156 = arith.addf %154, %155 : vector<2x32xf32>
    %157 = math.tanh %156 : vector<2x32xf32>
    %158 = vector.extract_strided_slice %65 {offsets = [4, 0], sizes = [2, 32], strides = [1, 1]} : vector<16x32xf32> to vector<2x32xf32>
    %cst_77 = arith.constant dense<0.000000e+00> : vector<2x32xf32>
    %159 = tpu.matmul %136, %67, %cst_77 {dimension_numbers = #tpu.dot_dimension_numbers<[1], [0], [0], [1], [0, 0, 1, 1], [], []>} : vector<2x32xf32>, vector<32x32xf32>, vector<2x32xf32> -> vector<2x32xf32>
    %160 = arith.addf %158, %159 : vector<2x32xf32>
    %161 = arith.negf %160 : vector<2x32xf32>
    %162 = math.exp %161 : vector<2x32xf32>
    %cst_78 = arith.constant 1.000000e+00 : f32
    %163 = vector.broadcast %cst_78 : f32 to vector<2x32xf32>
    %164 = arith.addf %163, %162 : vector<2x32xf32>
    %165 = arith.divf %163, %164 : vector<2x32xf32>
    %166 = arith.mulf %153, %134 : vector<2x32xf32>
    %167 = arith.mulf %145, %157 : vector<2x32xf32>
    %168 = arith.addf %166, %167 : vector<2x32xf32>
    %169 = math.tanh %168 : vector<2x32xf32>
    %170 = arith.mulf %165, %169 : vector<2x32xf32>
    %c4 = arith.constant 4 : index
    %c0_79 = arith.constant 0 : index
    %171 = vector.load %arg15[%c4, %c0_79] : memref<16x32xf32, #tpu.memory_space<vmem>>, vector<2x32xf32>
    tpu.vector_store %arg15[%c4, %c0_79], %170 {strides = array<i32>} : memref<16x32xf32, #tpu.memory_space<vmem>>, vector<2x32xf32>,
    %172 = vector.extract_strided_slice %38 {offsets = [6, 0], sizes = [2, 32], strides = [1, 1]} : vector<16x32xf32> to vector<2x32xf32>
    %cst_80 = arith.constant dense<0.000000e+00> : vector<2x32xf32>
    %173 = tpu.matmul %170, %40, %cst_80 {dimension_numbers = #tpu.dot_dimension_numbers<[1], [0], [0], [1], [0, 0, 1, 1], [], []>} : vector<2x32xf32>, vector<32x32xf32>, vector<2x32xf32> -> vector<2x32xf32>
    %174 = arith.addf %172, %173 : vector<2x32xf32>
    %175 = arith.negf %174 : vector<2x32xf32>
    %176 = math.exp %175 : vector<2x32xf32>
    %cst_81 = arith.constant 1.000000e+00 : f32
    %177 = vector.broadcast %cst_81 : f32 to vector<2x32xf32>
    %178 = arith.addf %177, %176 : vector<2x32xf32>
    %179 = arith.divf %177, %178 : vector<2x32xf32>
    %180 = vector.extract_strided_slice %47 {offsets = [6, 0], sizes = [2, 32], strides = [1, 1]} : vector<16x32xf32> to vector<2x32xf32>
    %cst_82 = arith.constant dense<0.000000e+00> : vector<2x32xf32>
    %181 = tpu.matmul %170, %49, %cst_82 {dimension_numbers = #tpu.dot_dimension_numbers<[1], [0], [0], [1], [0, 0, 1, 1], [], []>} : vector<2x32xf32>, vector<32x32xf32>, vector<2x32xf32> -> vector<2x32xf32>
    %182 = arith.addf %180, %181 : vector<2x32xf32>
    %183 = arith.negf %182 : vector<2x32xf32>
    %184 = math.exp %183 : vector<2x32xf32>
    %cst_83 = arith.constant 1.000000e+00 : f32
    %185 = vector.broadcast %cst_83 : f32 to vector<2x32xf32>
    %186 = arith.addf %185, %184 : vector<2x32xf32>
    %187 = arith.divf %185, %186 : vector<2x32xf32>
    %188 = vector.extract_strided_slice %56 {offsets = [6, 0], sizes = [2, 32], strides = [1, 1]} : vector<16x32xf32> to vector<2x32xf32>
    %cst_84 = arith.constant dense<0.000000e+00> : vector<2x32xf32>
    %189 = tpu.matmul %170, %58, %cst_84 {dimension_numbers = #tpu.dot_dimension_numbers<[1], [0], [0], [1], [0, 0, 1, 1], [], []>} : vector<2x32xf32>, vector<32x32xf32>, vector<2x32xf32> -> vector<2x32xf32>
    %190 = arith.addf %188, %189 : vector<2x32xf32>
    %191 = math.tanh %190 : vector<2x32xf32>
    %192 = vector.extract_strided_slice %65 {offsets = [6, 0], sizes = [2, 32], strides = [1, 1]} : vector<16x32xf32> to vector<2x32xf32>
    %cst_85 = arith.constant dense<0.000000e+00> : vector<2x32xf32>
    %193 = tpu.matmul %170, %67, %cst_85 {dimension_numbers = #tpu.dot_dimension_numbers<[1], [0], [0], [1], [0, 0, 1, 1], [], []>} : vector<2x32xf32>, vector<32x32xf32>, vector<2x32xf32> -> vector<2x32xf32>
    %194 = arith.addf %192, %193 : vector<2x32xf32>
    %195 = arith.negf %194 : vector<2x32xf32>
    %196 = math.exp %195 : vector<2x32xf32>
    %cst_86 = arith.constant 1.000000e+00 : f32
    %197 = vector.broadcast %cst_86 : f32 to vector<2x32xf32>
    %198 = arith.addf %197, %196 : vector<2x32xf32>
    %199 = arith.divf %197, %198 : vector<2x32xf32>
    %200 = arith.mulf %187, %168 : vector<2x32xf32>
    %201 = arith.mulf %179, %191 : vector<2x32xf32>
    %202 = arith.addf %200, %201 : vector<2x32xf32>
    %203 = math.tanh %202 : vector<2x32xf32>
    %204 = arith.mulf %199, %203 : vector<2x32xf32>
    %c6 = arith.constant 6 : index
    %c0_87 = arith.constant 0 : index
    %205 = vector.load %arg15[%c6, %c0_87] : memref<16x32xf32, #tpu.memory_space<vmem>>, vector<2x32xf32>
    tpu.vector_store %arg15[%c6, %c0_87], %204 {strides = array<i32>} : memref<16x32xf32, #tpu.memory_space<vmem>>, vector<2x32xf32>,
    %206 = vector.extract_strided_slice %38 {offsets = [8, 0], sizes = [2, 32], strides = [1, 1]} : vector<16x32xf32> to vector<2x32xf32>
    %cst_88 = arith.constant dense<0.000000e+00> : vector<2x32xf32>
    %207 = tpu.matmul %204, %40, %cst_88 {dimension_numbers = #tpu.dot_dimension_numbers<[1], [0], [0], [1], [0, 0, 1, 1], [], []>} : vector<2x32xf32>, vector<32x32xf32>, vector<2x32xf32> -> vector<2x32xf32>
    %208 = arith.addf %206, %207 : vector<2x32xf32>
    %209 = arith.negf %208 : vector<2x32xf32>
    %210 = math.exp %209 : vector<2x32xf32>
    %cst_89 = arith.constant 1.000000e+00 : f32
    %211 = vector.broadcast %cst_89 : f32 to vector<2x32xf32>
    %212 = arith.addf %211, %210 : vector<2x32xf32>
    %213 = arith.divf %211, %212 : vector<2x32xf32>
    %214 = vector.extract_strided_slice %47 {offsets = [8, 0], sizes = [2, 32], strides = [1, 1]} : vector<16x32xf32> to vector<2x32xf32>
    %cst_90 = arith.constant dense<0.000000e+00> : vector<2x32xf32>
    %215 = tpu.matmul %204, %49, %cst_90 {dimension_numbers = #tpu.dot_dimension_numbers<[1], [0], [0], [1], [0, 0, 1, 1], [], []>} : vector<2x32xf32>, vector<32x32xf32>, vector<2x32xf32> -> vector<2x32xf32>
    %216 = arith.addf %214, %215 : vector<2x32xf32>
    %217 = arith.negf %216 : vector<2x32xf32>
    %218 = math.exp %217 : vector<2x32xf32>
    %cst_91 = arith.constant 1.000000e+00 : f32
    %219 = vector.broadcast %cst_91 : f32 to vector<2x32xf32>
    %220 = arith.addf %219, %218 : vector<2x32xf32>
    %221 = arith.divf %219, %220 : vector<2x32xf32>
    %222 = vector.extract_strided_slice %56 {offsets = [8, 0], sizes = [2, 32], strides = [1, 1]} : vector<16x32xf32> to vector<2x32xf32>
    %cst_92 = arith.constant dense<0.000000e+00> : vector<2x32xf32>
    %223 = tpu.matmul %204, %58, %cst_92 {dimension_numbers = #tpu.dot_dimension_numbers<[1], [0], [0], [1], [0, 0, 1, 1], [], []>} : vector<2x32xf32>, vector<32x32xf32>, vector<2x32xf32> -> vector<2x32xf32>
    %224 = arith.addf %222, %223 : vector<2x32xf32>
    %225 = math.tanh %224 : vector<2x32xf32>
    %226 = vector.extract_strided_slice %65 {offsets = [8, 0], sizes = [2, 32], strides = [1, 1]} : vector<16x32xf32> to vector<2x32xf32>
    %cst_93 = arith.constant dense<0.000000e+00> : vector<2x32xf32>
    %227 = tpu.matmul %204, %67, %cst_93 {dimension_numbers = #tpu.dot_dimension_numbers<[1], [0], [0], [1], [0, 0, 1, 1], [], []>} : vector<2x32xf32>, vector<32x32xf32>, vector<2x32xf32> -> vector<2x32xf32>
    %228 = arith.addf %226, %227 : vector<2x32xf32>
    %229 = arith.negf %228 : vector<2x32xf32>
    %230 = math.exp %229 : vector<2x32xf32>
    %cst_94 = arith.constant 1.000000e+00 : f32
    %231 = vector.broadcast %cst_94 : f32 to vector<2x32xf32>
    %232 = arith.addf %231, %230 : vector<2x32xf32>
    %233 = arith.divf %231, %232 : vector<2x32xf32>
    %234 = arith.mulf %221, %202 : vector<2x32xf32>
    %235 = arith.mulf %213, %225 : vector<2x32xf32>
    %236 = arith.addf %234, %235 : vector<2x32xf32>
    %237 = math.tanh %236 : vector<2x32xf32>
    %238 = arith.mulf %233, %237 : vector<2x32xf32>
    %c8 = arith.constant 8 : index
    %c0_95 = arith.constant 0 : index
    %239 = vector.load %arg15[%c8, %c0_95] : memref<16x32xf32, #tpu.memory_space<vmem>>, vector<2x32xf32>
    tpu.vector_store %arg15[%c8, %c0_95], %238 {strides = array<i32>} : memref<16x32xf32, #tpu.memory_space<vmem>>, vector<2x32xf32>,
    %240 = vector.extract_strided_slice %38 {offsets = [10, 0], sizes = [2, 32], strides = [1, 1]} : vector<16x32xf32> to vector<2x32xf32>
    %cst_96 = arith.constant dense<0.000000e+00> : vector<2x32xf32>
    %241 = tpu.matmul %238, %40, %cst_96 {dimension_numbers = #tpu.dot_dimension_numbers<[1], [0], [0], [1], [0, 0, 1, 1], [], []>} : vector<2x32xf32>, vector<32x32xf32>, vector<2x32xf32> -> vector<2x32xf32>
    %242 = arith.addf %240, %241 : vector<2x32xf32>
    %243 = arith.negf %242 : vector<2x32xf32>
    %244 = math.exp %243 : vector<2x32xf32>
    %cst_97 = arith.constant 1.000000e+00 : f32
    %245 = vector.broadcast %cst_97 : f32 to vector<2x32xf32>
    %246 = arith.addf %245, %244 : vector<2x32xf32>
    %247 = arith.divf %245, %246 : vector<2x32xf32>
    %248 = vector.extract_strided_slice %47 {offsets = [10, 0], sizes = [2, 32], strides = [1, 1]} : vector<16x32xf32> to vector<2x32xf32>
    %cst_98 = arith.constant dense<0.000000e+00> : vector<2x32xf32>
    %249 = tpu.matmul %238, %49, %cst_98 {dimension_numbers = #tpu.dot_dimension_numbers<[1], [0], [0], [1], [0, 0, 1, 1], [], []>} : vector<2x32xf32>, vector<32x32xf32>, vector<2x32xf32> -> vector<2x32xf32>
    %250 = arith.addf %248, %249 : vector<2x32xf32>
    %251 = arith.negf %250 : vector<2x32xf32>
    %252 = math.exp %251 : vector<2x32xf32>
    %cst_99 = arith.constant 1.000000e+00 : f32
    %253 = vector.broadcast %cst_99 : f32 to vector<2x32xf32>
    %254 = arith.addf %253, %252 : vector<2x32xf32>
    %255 = arith.divf %253, %254 : vector<2x32xf32>
    %256 = vector.extract_strided_slice %56 {offsets = [10, 0], sizes = [2, 32], strides = [1, 1]} : vector<16x32xf32> to vector<2x32xf32>
    %cst_100 = arith.constant dense<0.000000e+00> : vector<2x32xf32>
    %257 = tpu.matmul %238, %58, %cst_100 {dimension_numbers = #tpu.dot_dimension_numbers<[1], [0], [0], [1], [0, 0, 1, 1], [], []>} : vector<2x32xf32>, vector<32x32xf32>, vector<2x32xf32> -> vector<2x32xf32>
    %258 = arith.addf %256, %257 : vector<2x32xf32>
    %259 = math.tanh %258 : vector<2x32xf32>
    %260 = vector.extract_strided_slice %65 {offsets = [10, 0], sizes = [2, 32], strides = [1, 1]} : vector<16x32xf32> to vector<2x32xf32>
    %cst_101 = arith.constant dense<0.000000e+00> : vector<2x32xf32>
    %261 = tpu.matmul %238, %67, %cst_101 {dimension_numbers = #tpu.dot_dimension_numbers<[1], [0], [0], [1], [0, 0, 1, 1], [], []>} : vector<2x32xf32>, vector<32x32xf32>, vector<2x32xf32> -> vector<2x32xf32>
    %262 = arith.addf %260, %261 : vector<2x32xf32>
    %263 = arith.negf %262 : vector<2x32xf32>
    %264 = math.exp %263 : vector<2x32xf32>
    %cst_102 = arith.constant 1.000000e+00 : f32
    %265 = vector.broadcast %cst_102 : f32 to vector<2x32xf32>
    %266 = arith.addf %265, %264 : vector<2x32xf32>
    %267 = arith.divf %265, %266 : vector<2x32xf32>
    %268 = arith.mulf %255, %236 : vector<2x32xf32>
    %269 = arith.mulf %247, %259 : vector<2x32xf32>
    %270 = arith.addf %268, %269 : vector<2x32xf32>
    %271 = math.tanh %270 : vector<2x32xf32>
    %272 = arith.mulf %267, %271 : vector<2x32xf32>
    %c10 = arith.constant 10 : index
    %c0_103 = arith.constant 0 : index
    %273 = vector.load %arg15[%c10, %c0_103] : memref<16x32xf32, #tpu.memory_space<vmem>>, vector<2x32xf32>
    tpu.vector_store %arg15[%c10, %c0_103], %272 {strides = array<i32>} : memref<16x32xf32, #tpu.memory_space<vmem>>, vector<2x32xf32>,
    %274 = vector.extract_strided_slice %38 {offsets = [12, 0], sizes = [2, 32], strides = [1, 1]} : vector<16x32xf32> to vector<2x32xf32>
    %cst_104 = arith.constant dense<0.000000e+00> : vector<2x32xf32>
    %275 = tpu.matmul %272, %40, %cst_104 {dimension_numbers = #tpu.dot_dimension_numbers<[1], [0], [0], [1], [0, 0, 1, 1], [], []>} : vector<2x32xf32>, vector<32x32xf32>, vector<2x32xf32> -> vector<2x32xf32>
    %276 = arith.addf %274, %275 : vector<2x32xf32>
    %277 = arith.negf %276 : vector<2x32xf32>
    %278 = math.exp %277 : vector<2x32xf32>
    %cst_105 = arith.constant 1.000000e+00 : f32
    %279 = vector.broadcast %cst_105 : f32 to vector<2x32xf32>
    %280 = arith.addf %279, %278 : vector<2x32xf32>
    %281 = arith.divf %279, %280 : vector<2x32xf32>
    %282 = vector.extract_strided_slice %47 {offsets = [12, 0], sizes = [2, 32], strides = [1, 1]} : vector<16x32xf32> to vector<2x32xf32>
    %cst_106 = arith.constant dense<0.000000e+00> : vector<2x32xf32>
    %283 = tpu.matmul %272, %49, %cst_106 {dimension_numbers = #tpu.dot_dimension_numbers<[1], [0], [0], [1], [0, 0, 1, 1], [], []>} : vector<2x32xf32>, vector<32x32xf32>, vector<2x32xf32> -> vector<2x32xf32>
    %284 = arith.addf %282, %283 : vector<2x32xf32>
    %285 = arith.negf %284 : vector<2x32xf32>
    %286 = math.exp %285 : vector<2x32xf32>
    %cst_107 = arith.constant 1.000000e+00 : f32
    %287 = vector.broadcast %cst_107 : f32 to vector<2x32xf32>
    %288 = arith.addf %287, %286 : vector<2x32xf32>
    %289 = arith.divf %287, %288 : vector<2x32xf32>
    %290 = vector.extract_strided_slice %56 {offsets = [12, 0], sizes = [2, 32], strides = [1, 1]} : vector<16x32xf32> to vector<2x32xf32>
    %cst_108 = arith.constant dense<0.000000e+00> : vector<2x32xf32>
    %291 = tpu.matmul %272, %58, %cst_108 {dimension_numbers = #tpu.dot_dimension_numbers<[1], [0], [0], [1], [0, 0, 1, 1], [], []>} : vector<2x32xf32>, vector<32x32xf32>, vector<2x32xf32> -> vector<2x32xf32>
    %292 = arith.addf %290, %291 : vector<2x32xf32>
    %293 = math.tanh %292 : vector<2x32xf32>
    %294 = vector.extract_strided_slice %65 {offsets = [12, 0], sizes = [2, 32], strides = [1, 1]} : vector<16x32xf32> to vector<2x32xf32>
    %cst_109 = arith.constant dense<0.000000e+00> : vector<2x32xf32>
    %295 = tpu.matmul %272, %67, %cst_109 {dimension_numbers = #tpu.dot_dimension_numbers<[1], [0], [0], [1], [0, 0, 1, 1], [], []>} : vector<2x32xf32>, vector<32x32xf32>, vector<2x32xf32> -> vector<2x32xf32>
    %296 = arith.addf %294, %295 : vector<2x32xf32>
    %297 = arith.negf %296 : vector<2x32xf32>
    %298 = math.exp %297 : vector<2x32xf32>
    %cst_110 = arith.constant 1.000000e+00 : f32
    %299 = vector.broadcast %cst_110 : f32 to vector<2x32xf32>
    %300 = arith.addf %299, %298 : vector<2x32xf32>
    %301 = arith.divf %299, %300 : vector<2x32xf32>
    %302 = arith.mulf %289, %270 : vector<2x32xf32>
    %303 = arith.mulf %281, %293 : vector<2x32xf32>
    %304 = arith.addf %302, %303 : vector<2x32xf32>
    %305 = math.tanh %304 : vector<2x32xf32>
    %306 = arith.mulf %301, %305 : vector<2x32xf32>
    %c12 = arith.constant 12 : index
    %c0_111 = arith.constant 0 : index
    %307 = vector.load %arg15[%c12, %c0_111] : memref<16x32xf32, #tpu.memory_space<vmem>>, vector<2x32xf32>
    tpu.vector_store %arg15[%c12, %c0_111], %306 {strides = array<i32>} : memref<16x32xf32, #tpu.memory_space<vmem>>, vector<2x32xf32>,
    %308 = vector.extract_strided_slice %38 {offsets = [14, 0], sizes = [2, 32], strides = [1, 1]} : vector<16x32xf32> to vector<2x32xf32>
    %cst_112 = arith.constant dense<0.000000e+00> : vector<2x32xf32>
    %309 = tpu.matmul %306, %40, %cst_112 {dimension_numbers = #tpu.dot_dimension_numbers<[1], [0], [0], [1], [0, 0, 1, 1], [], []>} : vector<2x32xf32>, vector<32x32xf32>, vector<2x32xf32> -> vector<2x32xf32>
    %310 = arith.addf %308, %309 : vector<2x32xf32>
    %311 = arith.negf %310 : vector<2x32xf32>
    %312 = math.exp %311 : vector<2x32xf32>
    %cst_113 = arith.constant 1.000000e+00 : f32
    %313 = vector.broadcast %cst_113 : f32 to vector<2x32xf32>
    %314 = arith.addf %313, %312 : vector<2x32xf32>
    %315 = arith.divf %313, %314 : vector<2x32xf32>
    %316 = vector.extract_strided_slice %47 {offsets = [14, 0], sizes = [2, 32], strides = [1, 1]} : vector<16x32xf32> to vector<2x32xf32>
    %cst_114 = arith.constant dense<0.000000e+00> : vector<2x32xf32>
    %317 = tpu.matmul %306, %49, %cst_114 {dimension_numbers = #tpu.dot_dimension_numbers<[1], [0], [0], [1], [0, 0, 1, 1], [], []>} : vector<2x32xf32>, vector<32x32xf32>, vector<2x32xf32> -> vector<2x32xf32>
    %318 = arith.addf %316, %317 : vector<2x32xf32>
    %319 = arith.negf %318 : vector<2x32xf32>
    %320 = math.exp %319 : vector<2x32xf32>
    %cst_115 = arith.constant 1.000000e+00 : f32
    %321 = vector.broadcast %cst_115 : f32 to vector<2x32xf32>
    %322 = arith.addf %321, %320 : vector<2x32xf32>
    %323 = arith.divf %321, %322 : vector<2x32xf32>
    %324 = vector.extract_strided_slice %56 {offsets = [14, 0], sizes = [2, 32], strides = [1, 1]} : vector<16x32xf32> to vector<2x32xf32>
    %cst_116 = arith.constant dense<0.000000e+00> : vector<2x32xf32>
    %325 = tpu.matmul %306, %58, %cst_116 {dimension_numbers = #tpu.dot_dimension_numbers<[1], [0], [0], [1], [0, 0, 1, 1], [], []>} : vector<2x32xf32>, vector<32x32xf32>, vector<2x32xf32> -> vector<2x32xf32>
    %326 = arith.addf %324, %325 : vector<2x32xf32>
    %327 = math.tanh %326 : vector<2x32xf32>
    %328 = vector.extract_strided_slice %65 {offsets = [14, 0], sizes = [2, 32], strides = [1, 1]} : vector<16x32xf32> to vector<2x32xf32>
    %cst_117 = arith.constant dense<0.000000e+00> : vector<2x32xf32>
    %329 = tpu.matmul %306, %67, %cst_117 {dimension_numbers = #tpu.dot_dimension_numbers<[1], [0], [0], [1], [0, 0, 1, 1], [], []>} : vector<2x32xf32>, vector<32x32xf32>, vector<2x32xf32> -> vector<2x32xf32>
    %330 = arith.addf %328, %329 : vector<2x32xf32>
    %331 = arith.negf %330 : vector<2x32xf32>
    %332 = math.exp %331 : vector<2x32xf32>
    %cst_118 = arith.constant 1.000000e+00 : f32
    %333 = vector.broadcast %cst_118 : f32 to vector<2x32xf32>
    %334 = arith.addf %333, %332 : vector<2x32xf32>
    %335 = arith.divf %333, %334 : vector<2x32xf32>
    %336 = arith.mulf %323, %304 : vector<2x32xf32>
    %337 = arith.mulf %315, %327 : vector<2x32xf32>
    %338 = arith.addf %336, %337 : vector<2x32xf32>
    %339 = math.tanh %338 : vector<2x32xf32>
    %340 = arith.mulf %335, %339 : vector<2x32xf32>
    %c14 = arith.constant 14 : index
    %c0_119 = arith.constant 0 : index
    %341 = vector.load %arg15[%c14, %c0_119] : memref<16x32xf32, #tpu.memory_space<vmem>>, vector<2x32xf32>
    tpu.vector_store %arg15[%c14, %c0_119], %340 {strides = array<i32>} : memref<16x32xf32, #tpu.memory_space<vmem>>, vector<2x32xf32>,
    %c0_120 = arith.constant 0 : index
    %c0_121 = arith.constant 0 : index
    %342 = vector.load %arg15[%c0_120, %c0_121] : memref<16x32xf32, #tpu.memory_space<vmem>>, vector<16x32xf32>
    %c4_122 = arith.constant 4 : index
    %c0_123 = arith.constant 0 : index
    %c0_124 = arith.constant 0 : index
    %343 = vector.load %arg5[%c4_122, %c0_123, %c0_124] : memref<16x32x32xf32, #tpu.memory_space<vmem>>, vector<1x32x32xf32>
    %344 = vector.shape_cast %343 : vector<1x32x32xf32> to vector<32x32xf32>
    %cst_125 = arith.constant dense<0.000000e+00> : vector<16x32xf32>
    %345 = tpu.matmul %342, %344, %cst_125 {dimension_numbers = #tpu.dot_dimension_numbers<[1], [0], [0], [1], [0, 0, 1, 1], [], []>} : vector<16x32xf32>, vector<32x32xf32>, vector<16x32xf32> -> vector<16x32xf32>
    %c4_126 = arith.constant 4 : index
    %c0_127 = arith.constant 0 : index
    %c0_128 = arith.constant 0 : index
    %346 = vector.load %arg7[%c4_126, %c0_127, %c0_128] : memref<16x1x32xf32, #tpu.memory_space<vmem>>, vector<1x1x32xf32>
    %347 = vector.shape_cast %346 : vector<1x1x32xf32> to vector<1x32xf32>
    %348 = vector.broadcast %347 : vector<1x32xf32> to vector<16x32xf32>
    %349 = arith.addf %345, %348 : vector<16x32xf32>
    %c4_129 = arith.constant 4 : index
    %c0_130 = arith.constant 0 : index
    %c0_131 = arith.constant 0 : index
    %350 = vector.load %arg6[%c4_129, %c0_130, %c0_131] : memref<16x32x32xf32, #tpu.memory_space<vmem>>, vector<1x32x32xf32>
    %351 = vector.shape_cast %350 : vector<1x32x32xf32> to vector<32x32xf32>
    %c5 = arith.constant 5 : index
    %c0_132 = arith.constant 0 : index
    %c0_133 = arith.constant 0 : index
    %352 = vector.load %arg5[%c5, %c0_132, %c0_133] : memref<16x32x32xf32, #tpu.memory_space<vmem>>, vector<1x32x32xf32>
    %353 = vector.shape_cast %352 : vector<1x32x32xf32> to vector<32x32xf32>
    %cst_134 = arith.constant dense<0.000000e+00> : vector<16x32xf32>
    %354 = tpu.matmul %342, %353, %cst_134 {dimension_numbers = #tpu.dot_dimension_numbers<[1], [0], [0], [1], [0, 0, 1, 1], [], []>} : vector<16x32xf32>, vector<32x32xf32>, vector<16x32xf32> -> vector<16x32xf32>
    %c5_135 = arith.constant 5 : index
    %c0_136 = arith.constant 0 : index
    %c0_137 = arith.constant 0 : index
    %355 = vector.load %arg7[%c5_135, %c0_136, %c0_137] : memref<16x1x32xf32, #tpu.memory_space<vmem>>, vector<1x1x32xf32>
    %356 = vector.shape_cast %355 : vector<1x1x32xf32> to vector<1x32xf32>
    %357 = vector.broadcast %356 : vector<1x32xf32> to vector<16x32xf32>
    %358 = arith.addf %354, %357 : vector<16x32xf32>
    %c5_138 = arith.constant 5 : index
    %c0_139 = arith.constant 0 : index
    %c0_140 = arith.constant 0 : index
    %359 = vector.load %arg6[%c5_138, %c0_139, %c0_140] : memref<16x32x32xf32, #tpu.memory_space<vmem>>, vector<1x32x32xf32>
    %360 = vector.shape_cast %359 : vector<1x32x32xf32> to vector<32x32xf32>
    %c6_141 = arith.constant 6 : index
    %c0_142 = arith.constant 0 : index
    %c0_143 = arith.constant 0 : index
    %361 = vector.load %arg5[%c6_141, %c0_142, %c0_143] : memref<16x32x32xf32, #tpu.memory_space<vmem>>, vector<1x32x32xf32>
    %362 = vector.shape_cast %361 : vector<1x32x32xf32> to vector<32x32xf32>
    %cst_144 = arith.constant dense<0.000000e+00> : vector<16x32xf32>
    %363 = tpu.matmul %342, %362, %cst_144 {dimension_numbers = #tpu.dot_dimension_numbers<[1], [0], [0], [1], [0, 0, 1, 1], [], []>} : vector<16x32xf32>, vector<32x32xf32>, vector<16x32xf32> -> vector<16x32xf32>
    %c6_145 = arith.constant 6 : index
    %c0_146 = arith.constant 0 : index
    %c0_147 = arith.constant 0 : index
    %364 = vector.load %arg7[%c6_145, %c0_146, %c0_147] : memref<16x1x32xf32, #tpu.memory_space<vmem>>, vector<1x1x32xf32>
    %365 = vector.shape_cast %364 : vector<1x1x32xf32> to vector<1x32xf32>
    %366 = vector.broadcast %365 : vector<1x32xf32> to vector<16x32xf32>
    %367 = arith.addf %363, %366 : vector<16x32xf32>
    %c6_148 = arith.constant 6 : index
    %c0_149 = arith.constant 0 : index
    %c0_150 = arith.constant 0 : index
    %368 = vector.load %arg6[%c6_148, %c0_149, %c0_150] : memref<16x32x32xf32, #tpu.memory_space<vmem>>, vector<1x32x32xf32>
    %369 = vector.shape_cast %368 : vector<1x32x32xf32> to vector<32x32xf32>
    %c7 = arith.constant 7 : index
    %c0_151 = arith.constant 0 : index
    %c0_152 = arith.constant 0 : index
    %370 = vector.load %arg5[%c7, %c0_151, %c0_152] : memref<16x32x32xf32, #tpu.memory_space<vmem>>, vector<1x32x32xf32>
    %371 = vector.shape_cast %370 : vector<1x32x32xf32> to vector<32x32xf32>
    %cst_153 = arith.constant dense<0.000000e+00> : vector<16x32xf32>
    %372 = tpu.matmul %342, %371, %cst_153 {dimension_numbers = #tpu.dot_dimension_numbers<[1], [0], [0], [1], [0, 0, 1, 1], [], []>} : vector<16x32xf32>, vector<32x32xf32>, vector<16x32xf32> -> vector<16x32xf32>
    %c7_154 = arith.constant 7 : index
    %c0_155 = arith.constant 0 : index
    %c0_156 = arith.constant 0 : index
    %373 = vector.load %arg7[%c7_154, %c0_155, %c0_156] : memref<16x1x32xf32, #tpu.memory_space<vmem>>, vector<1x1x32xf32>
    %374 = vector.shape_cast %373 : vector<1x1x32xf32> to vector<1x32xf32>
    %375 = vector.broadcast %374 : vector<1x32xf32> to vector<16x32xf32>
    %376 = arith.addf %372, %375 : vector<16x32xf32>
    %c7_157 = arith.constant 7 : index
    %c0_158 = arith.constant 0 : index
    %c0_159 = arith.constant 0 : index
    %377 = vector.load %arg6[%c7_157, %c0_158, %c0_159] : memref<16x32x32xf32, #tpu.memory_space<vmem>>, vector<1x32x32xf32>
    %378 = vector.shape_cast %377 : vector<1x32x32xf32> to vector<32x32xf32>
    %cst_160 = arith.constant 0.000000e+00 : f32
    %379 = vector.broadcast %cst_160 : f32 to vector<2x32xf32>
    %cst_161 = arith.constant 0.000000e+00 : f32
    %380 = vector.broadcast %cst_161 : f32 to vector<2x32xf32>
    %381 = vector.extract_strided_slice %349 {offsets = [0, 0], sizes = [2, 32], strides = [1, 1]} : vector<16x32xf32> to vector<2x32xf32>
    %cst_162 = arith.constant dense<0.000000e+00> : vector<2x32xf32>
    %382 = tpu.matmul %379, %351, %cst_162 {dimension_numbers = #tpu.dot_dimension_numbers<[1], [0], [0], [1], [0, 0, 1, 1], [], []>} : vector<2x32xf32>, vector<32x32xf32>, vector<2x32xf32> -> vector<2x32xf32>
    %383 = arith.addf %381, %382 : vector<2x32xf32>
    %384 = arith.negf %383 : vector<2x32xf32>
    %385 = math.exp %384 : vector<2x32xf32>
    %cst_163 = arith.constant 1.000000e+00 : f32
    %386 = vector.broadcast %cst_163 : f32 to vector<2x32xf32>
    %387 = arith.addf %386, %385 : vector<2x32xf32>
    %388 = arith.divf %386, %387 : vector<2x32xf32>
    %389 = vector.extract_strided_slice %358 {offsets = [0, 0], sizes = [2, 32], strides = [1, 1]} : vector<16x32xf32> to vector<2x32xf32>
    %cst_164 = arith.constant dense<0.000000e+00> : vector<2x32xf32>
    %390 = tpu.matmul %379, %360, %cst_164 {dimension_numbers = #tpu.dot_dimension_numbers<[1], [0], [0], [1], [0, 0, 1, 1], [], []>} : vector<2x32xf32>, vector<32x32xf32>, vector<2x32xf32> -> vector<2x32xf32>
    %391 = arith.addf %389, %390 : vector<2x32xf32>
    %392 = arith.negf %391 : vector<2x32xf32>
    %393 = math.exp %392 : vector<2x32xf32>
    %cst_165 = arith.constant 1.000000e+00 : f32
    %394 = vector.broadcast %cst_165 : f32 to vector<2x32xf32>
    %395 = arith.addf %394, %393 : vector<2x32xf32>
    %396 = arith.divf %394, %395 : vector<2x32xf32>
    %397 = vector.extract_strided_slice %367 {offsets = [0, 0], sizes = [2, 32], strides = [1, 1]} : vector<16x32xf32> to vector<2x32xf32>
    %cst_166 = arith.constant dense<0.000000e+00> : vector<2x32xf32>
    %398 = tpu.matmul %379, %369, %cst_166 {dimension_numbers = #tpu.dot_dimension_numbers<[1], [0], [0], [1], [0, 0, 1, 1], [], []>} : vector<2x32xf32>, vector<32x32xf32>, vector<2x32xf32> -> vector<2x32xf32>
    %399 = arith.addf %397, %398 : vector<2x32xf32>
    %400 = math.tanh %399 : vector<2x32xf32>
    %401 = vector.extract_strided_slice %376 {offsets = [0, 0], sizes = [2, 32], strides = [1, 1]} : vector<16x32xf32> to vector<2x32xf32>
    %cst_167 = arith.constant dense<0.000000e+00> : vector<2x32xf32>
    %402 = tpu.matmul %379, %378, %cst_167 {dimension_numbers = #tpu.dot_dimension_numbers<[1], [0], [0], [1], [0, 0, 1, 1], [], []>} : vector<2x32xf32>, vector<32x32xf32>, vector<2x32xf32> -> vector<2x32xf32>
    %403 = arith.addf %401, %402 : vector<2x32xf32>
    %404 = arith.negf %403 : vector<2x32xf32>
    %405 = math.exp %404 : vector<2x32xf32>
    %cst_168 = arith.constant 1.000000e+00 : f32
    %406 = vector.broadcast %cst_168 : f32 to vector<2x32xf32>
    %407 = arith.addf %406, %405 : vector<2x32xf32>
    %408 = arith.divf %406, %407 : vector<2x32xf32>
    %409 = arith.mulf %396, %380 : vector<2x32xf32>
    %410 = arith.mulf %388, %400 : vector<2x32xf32>
    %411 = arith.addf %409, %410 : vector<2x32xf32>
    %412 = math.tanh %411 : vector<2x32xf32>
    %413 = arith.mulf %408, %412 : vector<2x32xf32>
    %c0_169 = arith.constant 0 : index
    %c0_170 = arith.constant 0 : index
    %414 = vector.load %arg16[%c0_169, %c0_170] : memref<16x32xf32, #tpu.memory_space<vmem>>, vector<2x32xf32>
    tpu.vector_store %arg16[%c0_169, %c0_170], %413 {strides = array<i32>} : memref<16x32xf32, #tpu.memory_space<vmem>>, vector<2x32xf32>,
    %415 = vector.extract_strided_slice %349 {offsets = [2, 0], sizes = [2, 32], strides = [1, 1]} : vector<16x32xf32> to vector<2x32xf32>
    %cst_171 = arith.constant dense<0.000000e+00> : vector<2x32xf32>
    %416 = tpu.matmul %413, %351, %cst_171 {dimension_numbers = #tpu.dot_dimension_numbers<[1], [0], [0], [1], [0, 0, 1, 1], [], []>} : vector<2x32xf32>, vector<32x32xf32>, vector<2x32xf32> -> vector<2x32xf32>
    %417 = arith.addf %415, %416 : vector<2x32xf32>
    %418 = arith.negf %417 : vector<2x32xf32>
    %419 = math.exp %418 : vector<2x32xf32>
    %cst_172 = arith.constant 1.000000e+00 : f32
    %420 = vector.broadcast %cst_172 : f32 to vector<2x32xf32>
    %421 = arith.addf %420, %419 : vector<2x32xf32>
    %422 = arith.divf %420, %421 : vector<2x32xf32>
    %423 = vector.extract_strided_slice %358 {offsets = [2, 0], sizes = [2, 32], strides = [1, 1]} : vector<16x32xf32> to vector<2x32xf32>
    %cst_173 = arith.constant dense<0.000000e+00> : vector<2x32xf32>
    %424 = tpu.matmul %413, %360, %cst_173 {dimension_numbers = #tpu.dot_dimension_numbers<[1], [0], [0], [1], [0, 0, 1, 1], [], []>} : vector<2x32xf32>, vector<32x32xf32>, vector<2x32xf32> -> vector<2x32xf32>
    %425 = arith.addf %423, %424 : vector<2x32xf32>
    %426 = arith.negf %425 : vector<2x32xf32>
    %427 = math.exp %426 : vector<2x32xf32>
    %cst_174 = arith.constant 1.000000e+00 : f32
    %428 = vector.broadcast %cst_174 : f32 to vector<2x32xf32>
    %429 = arith.addf %428, %427 : vector<2x32xf32>
    %430 = arith.divf %428, %429 : vector<2x32xf32>
    %431 = vector.extract_strided_slice %367 {offsets = [2, 0], sizes = [2, 32], strides = [1, 1]} : vector<16x32xf32> to vector<2x32xf32>
    %cst_175 = arith.constant dense<0.000000e+00> : vector<2x32xf32>
    %432 = tpu.matmul %413, %369, %cst_175 {dimension_numbers = #tpu.dot_dimension_numbers<[1], [0], [0], [1], [0, 0, 1, 1], [], []>} : vector<2x32xf32>, vector<32x32xf32>, vector<2x32xf32> -> vector<2x32xf32>
    %433 = arith.addf %431, %432 : vector<2x32xf32>
    %434 = math.tanh %433 : vector<2x32xf32>
    %435 = vector.extract_strided_slice %376 {offsets = [2, 0], sizes = [2, 32], strides = [1, 1]} : vector<16x32xf32> to vector<2x32xf32>
    %cst_176 = arith.constant dense<0.000000e+00> : vector<2x32xf32>
    %436 = tpu.matmul %413, %378, %cst_176 {dimension_numbers = #tpu.dot_dimension_numbers<[1], [0], [0], [1], [0, 0, 1, 1], [], []>} : vector<2x32xf32>, vector<32x32xf32>, vector<2x32xf32> -> vector<2x32xf32>
    %437 = arith.addf %435, %436 : vector<2x32xf32>
    %438 = arith.negf %437 : vector<2x32xf32>
    %439 = math.exp %438 : vector<2x32xf32>
    %cst_177 = arith.constant 1.000000e+00 : f32
    %440 = vector.broadcast %cst_177 : f32 to vector<2x32xf32>
    %441 = arith.addf %440, %439 : vector<2x32xf32>
    %442 = arith.divf %440, %441 : vector<2x32xf32>
    %443 = arith.mulf %430, %411 : vector<2x32xf32>
    %444 = arith.mulf %422, %434 : vector<2x32xf32>
    %445 = arith.addf %443, %444 : vector<2x32xf32>
    %446 = math.tanh %445 : vector<2x32xf32>
    %447 = arith.mulf %442, %446 : vector<2x32xf32>
    %c2_178 = arith.constant 2 : index
    %c0_179 = arith.constant 0 : index
    %448 = vector.load %arg16[%c2_178, %c0_179] : memref<16x32xf32, #tpu.memory_space<vmem>>, vector<2x32xf32>
    tpu.vector_store %arg16[%c2_178, %c0_179], %447 {strides = array<i32>} : memref<16x32xf32, #tpu.memory_space<vmem>>, vector<2x32xf32>,
    %449 = vector.extract_strided_slice %349 {offsets = [4, 0], sizes = [2, 32], strides = [1, 1]} : vector<16x32xf32> to vector<2x32xf32>
    %cst_180 = arith.constant dense<0.000000e+00> : vector<2x32xf32>
    %450 = tpu.matmul %447, %351, %cst_180 {dimension_numbers = #tpu.dot_dimension_numbers<[1], [0], [0], [1], [0, 0, 1, 1], [], []>} : vector<2x32xf32>, vector<32x32xf32>, vector<2x32xf32> -> vector<2x32xf32>
    %451 = arith.addf %449, %450 : vector<2x32xf32>
    %452 = arith.negf %451 : vector<2x32xf32>
    %453 = math.exp %452 : vector<2x32xf32>
    %cst_181 = arith.constant 1.000000e+00 : f32
    %454 = vector.broadcast %cst_181 : f32 to vector<2x32xf32>
    %455 = arith.addf %454, %453 : vector<2x32xf32>
    %456 = arith.divf %454, %455 : vector<2x32xf32>
    %457 = vector.extract_strided_slice %358 {offsets = [4, 0], sizes = [2, 32], strides = [1, 1]} : vector<16x32xf32> to vector<2x32xf32>
    %cst_182 = arith.constant dense<0.000000e+00> : vector<2x32xf32>
    %458 = tpu.matmul %447, %360, %cst_182 {dimension_numbers = #tpu.dot_dimension_numbers<[1], [0], [0], [1], [0, 0, 1, 1], [], []>} : vector<2x32xf32>, vector<32x32xf32>, vector<2x32xf32> -> vector<2x32xf32>
    %459 = arith.addf %457, %458 : vector<2x32xf32>
    %460 = arith.negf %459 : vector<2x32xf32>
    %461 = math.exp %460 : vector<2x32xf32>
    %cst_183 = arith.constant 1.000000e+00 : f32
    %462 = vector.broadcast %cst_183 : f32 to vector<2x32xf32>
    %463 = arith.addf %462, %461 : vector<2x32xf32>
    %464 = arith.divf %462, %463 : vector<2x32xf32>
    %465 = vector.extract_strided_slice %367 {offsets = [4, 0], sizes = [2, 32], strides = [1, 1]} : vector<16x32xf32> to vector<2x32xf32>
    %cst_184 = arith.constant dense<0.000000e+00> : vector<2x32xf32>
    %466 = tpu.matmul %447, %369, %cst_184 {dimension_numbers = #tpu.dot_dimension_numbers<[1], [0], [0], [1], [0, 0, 1, 1], [], []>} : vector<2x32xf32>, vector<32x32xf32>, vector<2x32xf32> -> vector<2x32xf32>
    %467 = arith.addf %465, %466 : vector<2x32xf32>
    %468 = math.tanh %467 : vector<2x32xf32>
    %469 = vector.extract_strided_slice %376 {offsets = [4, 0], sizes = [2, 32], strides = [1, 1]} : vector<16x32xf32> to vector<2x32xf32>
    %cst_185 = arith.constant dense<0.000000e+00> : vector<2x32xf32>
    %470 = tpu.matmul %447, %378, %cst_185 {dimension_numbers = #tpu.dot_dimension_numbers<[1], [0], [0], [1], [0, 0, 1, 1], [], []>} : vector<2x32xf32>, vector<32x32xf32>, vector<2x32xf32> -> vector<2x32xf32>
    %471 = arith.addf %469, %470 : vector<2x32xf32>
    %472 = arith.negf %471 : vector<2x32xf32>
    %473 = math.exp %472 : vector<2x32xf32>
    %cst_186 = arith.constant 1.000000e+00 : f32
    %474 = vector.broadcast %cst_186 : f32 to vector<2x32xf32>
    %475 = arith.addf %474, %473 : vector<2x32xf32>
    %476 = arith.divf %474, %475 : vector<2x32xf32>
    %477 = arith.mulf %464, %445 : vector<2x32xf32>
    %478 = arith.mulf %456, %468 : vector<2x32xf32>
    %479 = arith.addf %477, %478 : vector<2x32xf32>
    %480 = math.tanh %479 : vector<2x32xf32>
    %481 = arith.mulf %476, %480 : vector<2x32xf32>
    %c4_187 = arith.constant 4 : index
    %c0_188 = arith.constant 0 : index
    %482 = vector.load %arg16[%c4_187, %c0_188] : memref<16x32xf32, #tpu.memory_space<vmem>>, vector<2x32xf32>
    tpu.vector_store %arg16[%c4_187, %c0_188], %481 {strides = array<i32>} : memref<16x32xf32, #tpu.memory_space<vmem>>, vector<2x32xf32>,
    %483 = vector.extract_strided_slice %349 {offsets = [6, 0], sizes = [2, 32], strides = [1, 1]} : vector<16x32xf32> to vector<2x32xf32>
    %cst_189 = arith.constant dense<0.000000e+00> : vector<2x32xf32>
    %484 = tpu.matmul %481, %351, %cst_189 {dimension_numbers = #tpu.dot_dimension_numbers<[1], [0], [0], [1], [0, 0, 1, 1], [], []>} : vector<2x32xf32>, vector<32x32xf32>, vector<2x32xf32> -> vector<2x32xf32>
    %485 = arith.addf %483, %484 : vector<2x32xf32>
    %486 = arith.negf %485 : vector<2x32xf32>
    %487 = math.exp %486 : vector<2x32xf32>
    %cst_190 = arith.constant 1.000000e+00 : f32
    %488 = vector.broadcast %cst_190 : f32 to vector<2x32xf32>
    %489 = arith.addf %488, %487 : vector<2x32xf32>
    %490 = arith.divf %488, %489 : vector<2x32xf32>
    %491 = vector.extract_strided_slice %358 {offsets = [6, 0], sizes = [2, 32], strides = [1, 1]} : vector<16x32xf32> to vector<2x32xf32>
    %cst_191 = arith.constant dense<0.000000e+00> : vector<2x32xf32>
    %492 = tpu.matmul %481, %360, %cst_191 {dimension_numbers = #tpu.dot_dimension_numbers<[1], [0], [0], [1], [0, 0, 1, 1], [], []>} : vector<2x32xf32>, vector<32x32xf32>, vector<2x32xf32> -> vector<2x32xf32>
    %493 = arith.addf %491, %492 : vector<2x32xf32>
    %494 = arith.negf %493 : vector<2x32xf32>
    %495 = math.exp %494 : vector<2x32xf32>
    %cst_192 = arith.constant 1.000000e+00 : f32
    %496 = vector.broadcast %cst_192 : f32 to vector<2x32xf32>
    %497 = arith.addf %496, %495 : vector<2x32xf32>
    %498 = arith.divf %496, %497 : vector<2x32xf32>
    %499 = vector.extract_strided_slice %367 {offsets = [6, 0], sizes = [2, 32], strides = [1, 1]} : vector<16x32xf32> to vector<2x32xf32>
    %cst_193 = arith.constant dense<0.000000e+00> : vector<2x32xf32>
    %500 = tpu.matmul %481, %369, %cst_193 {dimension_numbers = #tpu.dot_dimension_numbers<[1], [0], [0], [1], [0, 0, 1, 1], [], []>} : vector<2x32xf32>, vector<32x32xf32>, vector<2x32xf32> -> vector<2x32xf32>
    %501 = arith.addf %499, %500 : vector<2x32xf32>
    %502 = math.tanh %501 : vector<2x32xf32>
    %503 = vector.extract_strided_slice %376 {offsets = [6, 0], sizes = [2, 32], strides = [1, 1]} : vector<16x32xf32> to vector<2x32xf32>
    %cst_194 = arith.constant dense<0.000000e+00> : vector<2x32xf32>
    %504 = tpu.matmul %481, %378, %cst_194 {dimension_numbers = #tpu.dot_dimension_numbers<[1], [0], [0], [1], [0, 0, 1, 1], [], []>} : vector<2x32xf32>, vector<32x32xf32>, vector<2x32xf32> -> vector<2x32xf32>
    %505 = arith.addf %503, %504 : vector<2x32xf32>
    %506 = arith.negf %505 : vector<2x32xf32>
    %507 = math.exp %506 : vector<2x32xf32>
    %cst_195 = arith.constant 1.000000e+00 : f32
    %508 = vector.broadcast %cst_195 : f32 to vector<2x32xf32>
    %509 = arith.addf %508, %507 : vector<2x32xf32>
    %510 = arith.divf %508, %509 : vector<2x32xf32>
    %511 = arith.mulf %498, %479 : vector<2x32xf32>
    %512 = arith.mulf %490, %502 : vector<2x32xf32>
    %513 = arith.addf %511, %512 : vector<2x32xf32>
    %514 = math.tanh %513 : vector<2x32xf32>
    %515 = arith.mulf %510, %514 : vector<2x32xf32>
    %c6_196 = arith.constant 6 : index
    %c0_197 = arith.constant 0 : index
    %516 = vector.load %arg16[%c6_196, %c0_197] : memref<16x32xf32, #tpu.memory_space<vmem>>, vector<2x32xf32>
    tpu.vector_store %arg16[%c6_196, %c0_197], %515 {strides = array<i32>} : memref<16x32xf32, #tpu.memory_space<vmem>>, vector<2x32xf32>,
    %517 = vector.extract_strided_slice %349 {offsets = [8, 0], sizes = [2, 32], strides = [1, 1]} : vector<16x32xf32> to vector<2x32xf32>
    %cst_198 = arith.constant dense<0.000000e+00> : vector<2x32xf32>
    %518 = tpu.matmul %515, %351, %cst_198 {dimension_numbers = #tpu.dot_dimension_numbers<[1], [0], [0], [1], [0, 0, 1, 1], [], []>} : vector<2x32xf32>, vector<32x32xf32>, vector<2x32xf32> -> vector<2x32xf32>
    %519 = arith.addf %517, %518 : vector<2x32xf32>
    %520 = arith.negf %519 : vector<2x32xf32>
    %521 = math.exp %520 : vector<2x32xf32>
    %cst_199 = arith.constant 1.000000e+00 : f32
    %522 = vector.broadcast %cst_199 : f32 to vector<2x32xf32>
    %523 = arith.addf %522, %521 : vector<2x32xf32>
    %524 = arith.divf %522, %523 : vector<2x32xf32>
    %525 = vector.extract_strided_slice %358 {offsets = [8, 0], sizes = [2, 32], strides = [1, 1]} : vector<16x32xf32> to vector<2x32xf32>
    %cst_200 = arith.constant dense<0.000000e+00> : vector<2x32xf32>
    %526 = tpu.matmul %515, %360, %cst_200 {dimension_numbers = #tpu.dot_dimension_numbers<[1], [0], [0], [1], [0, 0, 1, 1], [], []>} : vector<2x32xf32>, vector<32x32xf32>, vector<2x32xf32> -> vector<2x32xf32>
    %527 = arith.addf %525, %526 : vector<2x32xf32>
    %528 = arith.negf %527 : vector<2x32xf32>
    %529 = math.exp %528 : vector<2x32xf32>
    %cst_201 = arith.constant 1.000000e+00 : f32
    %530 = vector.broadcast %cst_201 : f32 to vector<2x32xf32>
    %531 = arith.addf %530, %529 : vector<2x32xf32>
    %532 = arith.divf %530, %531 : vector<2x32xf32>
    %533 = vector.extract_strided_slice %367 {offsets = [8, 0], sizes = [2, 32], strides = [1, 1]} : vector<16x32xf32> to vector<2x32xf32>
    %cst_202 = arith.constant dense<0.000000e+00> : vector<2x32xf32>
    %534 = tpu.matmul %515, %369, %cst_202 {dimension_numbers = #tpu.dot_dimension_numbers<[1], [0], [0], [1], [0, 0, 1, 1], [], []>} : vector<2x32xf32>, vector<32x32xf32>, vector<2x32xf32> -> vector<2x32xf32>
    %535 = arith.addf %533, %534 : vector<2x32xf32>
    %536 = math.tanh %535 : vector<2x32xf32>
    %537 = vector.extract_strided_slice %376 {offsets = [8, 0], sizes = [2, 32], strides = [1, 1]} : vector<16x32xf32> to vector<2x32xf32>
    %cst_203 = arith.constant dense<0.000000e+00> : vector<2x32xf32>
    %538 = tpu.matmul %515, %378, %cst_203 {dimension_numbers = #tpu.dot_dimension_numbers<[1], [0], [0], [1], [0, 0, 1, 1], [], []>} : vector<2x32xf32>, vector<32x32xf32>, vector<2x32xf32> -> vector<2x32xf32>
    %539 = arith.addf %537, %538 : vector<2x32xf32>
    %540 = arith.negf %539 : vector<2x32xf32>
    %541 = math.exp %540 : vector<2x32xf32>
    %cst_204 = arith.constant 1.000000e+00 : f32
    %542 = vector.broadcast %cst_204 : f32 to vector<2x32xf32>
    %543 = arith.addf %542, %541 : vector<2x32xf32>
    %544 = arith.divf %542, %543 : vector<2x32xf32>
    %545 = arith.mulf %532, %513 : vector<2x32xf32>
    %546 = arith.mulf %524, %536 : vector<2x32xf32>
    %547 = arith.addf %545, %546 : vector<2x32xf32>
    %548 = math.tanh %547 : vector<2x32xf32>
    %549 = arith.mulf %544, %548 : vector<2x32xf32>
    %c8_205 = arith.constant 8 : index
    %c0_206 = arith.constant 0 : index
    %550 = vector.load %arg16[%c8_205, %c0_206] : memref<16x32xf32, #tpu.memory_space<vmem>>, vector<2x32xf32>
    tpu.vector_store %arg16[%c8_205, %c0_206], %549 {strides = array<i32>} : memref<16x32xf32, #tpu.memory_space<vmem>>, vector<2x32xf32>,
    %551 = vector.extract_strided_slice %349 {offsets = [10, 0], sizes = [2, 32], strides = [1, 1]} : vector<16x32xf32> to vector<2x32xf32>
    %cst_207 = arith.constant dense<0.000000e+00> : vector<2x32xf32>
    %552 = tpu.matmul %549, %351, %cst_207 {dimension_numbers = #tpu.dot_dimension_numbers<[1], [0], [0], [1], [0, 0, 1, 1], [], []>} : vector<2x32xf32>, vector<32x32xf32>, vector<2x32xf32> -> vector<2x32xf32>
    %553 = arith.addf %551, %552 : vector<2x32xf32>
    %554 = arith.negf %553 : vector<2x32xf32>
    %555 = math.exp %554 : vector<2x32xf32>
    %cst_208 = arith.constant 1.000000e+00 : f32
    %556 = vector.broadcast %cst_208 : f32 to vector<2x32xf32>
    %557 = arith.addf %556, %555 : vector<2x32xf32>
    %558 = arith.divf %556, %557 : vector<2x32xf32>
    %559 = vector.extract_strided_slice %358 {offsets = [10, 0], sizes = [2, 32], strides = [1, 1]} : vector<16x32xf32> to vector<2x32xf32>
    %cst_209 = arith.constant dense<0.000000e+00> : vector<2x32xf32>
    %560 = tpu.matmul %549, %360, %cst_209 {dimension_numbers = #tpu.dot_dimension_numbers<[1], [0], [0], [1], [0, 0, 1, 1], [], []>} : vector<2x32xf32>, vector<32x32xf32>, vector<2x32xf32> -> vector<2x32xf32>
    %561 = arith.addf %559, %560 : vector<2x32xf32>
    %562 = arith.negf %561 : vector<2x32xf32>
    %563 = math.exp %562 : vector<2x32xf32>
    %cst_210 = arith.constant 1.000000e+00 : f32
    %564 = vector.broadcast %cst_210 : f32 to vector<2x32xf32>
    %565 = arith.addf %564, %563 : vector<2x32xf32>
    %566 = arith.divf %564, %565 : vector<2x32xf32>
    %567 = vector.extract_strided_slice %367 {offsets = [10, 0], sizes = [2, 32], strides = [1, 1]} : vector<16x32xf32> to vector<2x32xf32>
    %cst_211 = arith.constant dense<0.000000e+00> : vector<2x32xf32>
    %568 = tpu.matmul %549, %369, %cst_211 {dimension_numbers = #tpu.dot_dimension_numbers<[1], [0], [0], [1], [0, 0, 1, 1], [], []>} : vector<2x32xf32>, vector<32x32xf32>, vector<2x32xf32> -> vector<2x32xf32>
    %569 = arith.addf %567, %568 : vector<2x32xf32>
    %570 = math.tanh %569 : vector<2x32xf32>
    %571 = vector.extract_strided_slice %376 {offsets = [10, 0], sizes = [2, 32], strides = [1, 1]} : vector<16x32xf32> to vector<2x32xf32>
    %cst_212 = arith.constant dense<0.000000e+00> : vector<2x32xf32>
    %572 = tpu.matmul %549, %378, %cst_212 {dimension_numbers = #tpu.dot_dimension_numbers<[1], [0], [0], [1], [0, 0, 1, 1], [], []>} : vector<2x32xf32>, vector<32x32xf32>, vector<2x32xf32> -> vector<2x32xf32>
    %573 = arith.addf %571, %572 : vector<2x32xf32>
    %574 = arith.negf %573 : vector<2x32xf32>
    %575 = math.exp %574 : vector<2x32xf32>
    %cst_213 = arith.constant 1.000000e+00 : f32
    %576 = vector.broadcast %cst_213 : f32 to vector<2x32xf32>
    %577 = arith.addf %576, %575 : vector<2x32xf32>
    %578 = arith.divf %576, %577 : vector<2x32xf32>
    %579 = arith.mulf %566, %547 : vector<2x32xf32>
    %580 = arith.mulf %558, %570 : vector<2x32xf32>
    %581 = arith.addf %579, %580 : vector<2x32xf32>
    %582 = math.tanh %581 : vector<2x32xf32>
    %583 = arith.mulf %578, %582 : vector<2x32xf32>
    %c10_214 = arith.constant 10 : index
    %c0_215 = arith.constant 0 : index
    %584 = vector.load %arg16[%c10_214, %c0_215] : memref<16x32xf32, #tpu.memory_space<vmem>>, vector<2x32xf32>
    tpu.vector_store %arg16[%c10_214, %c0_215], %583 {strides = array<i32>} : memref<16x32xf32, #tpu.memory_space<vmem>>, vector<2x32xf32>,
    %585 = vector.extract_strided_slice %349 {offsets = [12, 0], sizes = [2, 32], strides = [1, 1]} : vector<16x32xf32> to vector<2x32xf32>
    %cst_216 = arith.constant dense<0.000000e+00> : vector<2x32xf32>
    %586 = tpu.matmul %583, %351, %cst_216 {dimension_numbers = #tpu.dot_dimension_numbers<[1], [0], [0], [1], [0, 0, 1, 1], [], []>} : vector<2x32xf32>, vector<32x32xf32>, vector<2x32xf32> -> vector<2x32xf32>
    %587 = arith.addf %585, %586 : vector<2x32xf32>
    %588 = arith.negf %587 : vector<2x32xf32>
    %589 = math.exp %588 : vector<2x32xf32>
    %cst_217 = arith.constant 1.000000e+00 : f32
    %590 = vector.broadcast %cst_217 : f32 to vector<2x32xf32>
    %591 = arith.addf %590, %589 : vector<2x32xf32>
    %592 = arith.divf %590, %591 : vector<2x32xf32>
    %593 = vector.extract_strided_slice %358 {offsets = [12, 0], sizes = [2, 32], strides = [1, 1]} : vector<16x32xf32> to vector<2x32xf32>
    %cst_218 = arith.constant dense<0.000000e+00> : vector<2x32xf32>
    %594 = tpu.matmul %583, %360, %cst_218 {dimension_numbers = #tpu.dot_dimension_numbers<[1], [0], [0], [1], [0, 0, 1, 1], [], []>} : vector<2x32xf32>, vector<32x32xf32>, vector<2x32xf32> -> vector<2x32xf32>
    %595 = arith.addf %593, %594 : vector<2x32xf32>
    %596 = arith.negf %595 : vector<2x32xf32>
    %597 = math.exp %596 : vector<2x32xf32>
    %cst_219 = arith.constant 1.000000e+00 : f32
    %598 = vector.broadcast %cst_219 : f32 to vector<2x32xf32>
    %599 = arith.addf %598, %597 : vector<2x32xf32>
    %600 = arith.divf %598, %599 : vector<2x32xf32>
    %601 = vector.extract_strided_slice %367 {offsets = [12, 0], sizes = [2, 32], strides = [1, 1]} : vector<16x32xf32> to vector<2x32xf32>
    %cst_220 = arith.constant dense<0.000000e+00> : vector<2x32xf32>
    %602 = tpu.matmul %583, %369, %cst_220 {dimension_numbers = #tpu.dot_dimension_numbers<[1], [0], [0], [1], [0, 0, 1, 1], [], []>} : vector<2x32xf32>, vector<32x32xf32>, vector<2x32xf32> -> vector<2x32xf32>
    %603 = arith.addf %601, %602 : vector<2x32xf32>
    %604 = math.tanh %603 : vector<2x32xf32>
    %605 = vector.extract_strided_slice %376 {offsets = [12, 0], sizes = [2, 32], strides = [1, 1]} : vector<16x32xf32> to vector<2x32xf32>
    %cst_221 = arith.constant dense<0.000000e+00> : vector<2x32xf32>
    %606 = tpu.matmul %583, %378, %cst_221 {dimension_numbers = #tpu.dot_dimension_numbers<[1], [0], [0], [1], [0, 0, 1, 1], [], []>} : vector<2x32xf32>, vector<32x32xf32>, vector<2x32xf32> -> vector<2x32xf32>
    %607 = arith.addf %605, %606 : vector<2x32xf32>
    %608 = arith.negf %607 : vector<2x32xf32>
    %609 = math.exp %608 : vector<2x32xf32>
    %cst_222 = arith.constant 1.000000e+00 : f32
    %610 = vector.broadcast %cst_222 : f32 to vector<2x32xf32>
    %611 = arith.addf %610, %609 : vector<2x32xf32>
    %612 = arith.divf %610, %611 : vector<2x32xf32>
    %613 = arith.mulf %600, %581 : vector<2x32xf32>
    %614 = arith.mulf %592, %604 : vector<2x32xf32>
    %615 = arith.addf %613, %614 : vector<2x32xf32>
    %616 = math.tanh %615 : vector<2x32xf32>
    %617 = arith.mulf %612, %616 : vector<2x32xf32>
    %c12_223 = arith.constant 12 : index
    %c0_224 = arith.constant 0 : index
    %618 = vector.load %arg16[%c12_223, %c0_224] : memref<16x32xf32, #tpu.memory_space<vmem>>, vector<2x32xf32>
    tpu.vector_store %arg16[%c12_223, %c0_224], %617 {strides = array<i32>} : memref<16x32xf32, #tpu.memory_space<vmem>>, vector<2x32xf32>,
    %619 = vector.extract_strided_slice %349 {offsets = [14, 0], sizes = [2, 32], strides = [1, 1]} : vector<16x32xf32> to vector<2x32xf32>
    %cst_225 = arith.constant dense<0.000000e+00> : vector<2x32xf32>
    %620 = tpu.matmul %617, %351, %cst_225 {dimension_numbers = #tpu.dot_dimension_numbers<[1], [0], [0], [1], [0, 0, 1, 1], [], []>} : vector<2x32xf32>, vector<32x32xf32>, vector<2x32xf32> -> vector<2x32xf32>
    %621 = arith.addf %619, %620 : vector<2x32xf32>
    %622 = arith.negf %621 : vector<2x32xf32>
    %623 = math.exp %622 : vector<2x32xf32>
    %cst_226 = arith.constant 1.000000e+00 : f32
    %624 = vector.broadcast %cst_226 : f32 to vector<2x32xf32>
    %625 = arith.addf %624, %623 : vector<2x32xf32>
    %626 = arith.divf %624, %625 : vector<2x32xf32>
    %627 = vector.extract_strided_slice %358 {offsets = [14, 0], sizes = [2, 32], strides = [1, 1]} : vector<16x32xf32> to vector<2x32xf32>
    %cst_227 = arith.constant dense<0.000000e+00> : vector<2x32xf32>
    %628 = tpu.matmul %617, %360, %cst_227 {dimension_numbers = #tpu.dot_dimension_numbers<[1], [0], [0], [1], [0, 0, 1, 1], [], []>} : vector<2x32xf32>, vector<32x32xf32>, vector<2x32xf32> -> vector<2x32xf32>
    %629 = arith.addf %627, %628 : vector<2x32xf32>
    %630 = arith.negf %629 : vector<2x32xf32>
    %631 = math.exp %630 : vector<2x32xf32>
    %cst_228 = arith.constant 1.000000e+00 : f32
    %632 = vector.broadcast %cst_228 : f32 to vector<2x32xf32>
    %633 = arith.addf %632, %631 : vector<2x32xf32>
    %634 = arith.divf %632, %633 : vector<2x32xf32>
    %635 = vector.extract_strided_slice %367 {offsets = [14, 0], sizes = [2, 32], strides = [1, 1]} : vector<16x32xf32> to vector<2x32xf32>
    %cst_229 = arith.constant dense<0.000000e+00> : vector<2x32xf32>
    %636 = tpu.matmul %617, %369, %cst_229 {dimension_numbers = #tpu.dot_dimension_numbers<[1], [0], [0], [1], [0, 0, 1, 1], [], []>} : vector<2x32xf32>, vector<32x32xf32>, vector<2x32xf32> -> vector<2x32xf32>
    %637 = arith.addf %635, %636 : vector<2x32xf32>
    %638 = math.tanh %637 : vector<2x32xf32>
    %639 = vector.extract_strided_slice %376 {offsets = [14, 0], sizes = [2, 32], strides = [1, 1]} : vector<16x32xf32> to vector<2x32xf32>
    %cst_230 = arith.constant dense<0.000000e+00> : vector<2x32xf32>
    %640 = tpu.matmul %617, %378, %cst_230 {dimension_numbers = #tpu.dot_dimension_numbers<[1], [0], [0], [1], [0, 0, 1, 1], [], []>} : vector<2x32xf32>, vector<32x32xf32>, vector<2x32xf32> -> vector<2x32xf32>
    %641 = arith.addf %639, %640 : vector<2x32xf32>
    %642 = arith.negf %641 : vector<2x32xf32>
    %643 = math.exp %642 : vector<2x32xf32>
    %cst_231 = arith.constant 1.000000e+00 : f32
    %644 = vector.broadcast %cst_231 : f32 to vector<2x32xf32>
    %645 = arith.addf %644, %643 : vector<2x32xf32>
    %646 = arith.divf %644, %645 : vector<2x32xf32>
    %647 = arith.mulf %634, %615 : vector<2x32xf32>
    %648 = arith.mulf %626, %638 : vector<2x32xf32>
    %649 = arith.addf %647, %648 : vector<2x32xf32>
    %650 = math.tanh %649 : vector<2x32xf32>
    %651 = arith.mulf %646, %650 : vector<2x32xf32>
    %c14_232 = arith.constant 14 : index
    %c0_233 = arith.constant 0 : index
    %652 = vector.load %arg16[%c14_232, %c0_233] : memref<16x32xf32, #tpu.memory_space<vmem>>, vector<2x32xf32>
    tpu.vector_store %arg16[%c14_232, %c0_233], %651 {strides = array<i32>} : memref<16x32xf32, #tpu.memory_space<vmem>>, vector<2x32xf32>,
    %c0_234 = arith.constant 0 : index
    %c0_235 = arith.constant 0 : index
    %653 = vector.load %arg16[%c0_234, %c0_235] : memref<16x32xf32, #tpu.memory_space<vmem>>, vector<16x32xf32>
    %c8_236 = arith.constant 8 : index
    %c0_237 = arith.constant 0 : index
    %c0_238 = arith.constant 0 : index
    %654 = vector.load %arg5[%c8_236, %c0_237, %c0_238] : memref<16x32x32xf32, #tpu.memory_space<vmem>>, vector<1x32x32xf32>
    %655 = vector.shape_cast %654 : vector<1x32x32xf32> to vector<32x32xf32>
    %cst_239 = arith.constant dense<0.000000e+00> : vector<16x32xf32>
    %656 = tpu.matmul %653, %655, %cst_239 {dimension_numbers = #tpu.dot_dimension_numbers<[1], [0], [0], [1], [0, 0, 1, 1], [], []>} : vector<16x32xf32>, vector<32x32xf32>, vector<16x32xf32> -> vector<16x32xf32>
    %c8_240 = arith.constant 8 : index
    %c0_241 = arith.constant 0 : index
    %c0_242 = arith.constant 0 : index
    %657 = vector.load %arg7[%c8_240, %c0_241, %c0_242] : memref<16x1x32xf32, #tpu.memory_space<vmem>>, vector<1x1x32xf32>
    %658 = vector.shape_cast %657 : vector<1x1x32xf32> to vector<1x32xf32>
    %659 = vector.broadcast %658 : vector<1x32xf32> to vector<16x32xf32>
    %660 = arith.addf %656, %659 : vector<16x32xf32>
    %c8_243 = arith.constant 8 : index
    %c0_244 = arith.constant 0 : index
    %c0_245 = arith.constant 0 : index
    %661 = vector.load %arg6[%c8_243, %c0_244, %c0_245] : memref<16x32x32xf32, #tpu.memory_space<vmem>>, vector<1x32x32xf32>
    %662 = vector.shape_cast %661 : vector<1x32x32xf32> to vector<32x32xf32>
    %c9 = arith.constant 9 : index
    %c0_246 = arith.constant 0 : index
    %c0_247 = arith.constant 0 : index
    %663 = vector.load %arg5[%c9, %c0_246, %c0_247] : memref<16x32x32xf32, #tpu.memory_space<vmem>>, vector<1x32x32xf32>
    %664 = vector.shape_cast %663 : vector<1x32x32xf32> to vector<32x32xf32>
    %cst_248 = arith.constant dense<0.000000e+00> : vector<16x32xf32>
    %665 = tpu.matmul %653, %664, %cst_248 {dimension_numbers = #tpu.dot_dimension_numbers<[1], [0], [0], [1], [0, 0, 1, 1], [], []>} : vector<16x32xf32>, vector<32x32xf32>, vector<16x32xf32> -> vector<16x32xf32>
    %c9_249 = arith.constant 9 : index
    %c0_250 = arith.constant 0 : index
    %c0_251 = arith.constant 0 : index
    %666 = vector.load %arg7[%c9_249, %c0_250, %c0_251] : memref<16x1x32xf32, #tpu.memory_space<vmem>>, vector<1x1x32xf32>
    %667 = vector.shape_cast %666 : vector<1x1x32xf32> to vector<1x32xf32>
    %668 = vector.broadcast %667 : vector<1x32xf32> to vector<16x32xf32>
    %669 = arith.addf %665, %668 : vector<16x32xf32>
    %c9_252 = arith.constant 9 : index
    %c0_253 = arith.constant 0 : index
    %c0_254 = arith.constant 0 : index
    %670 = vector.load %arg6[%c9_252, %c0_253, %c0_254] : memref<16x32x32xf32, #tpu.memory_space<vmem>>, vector<1x32x32xf32>
    %671 = vector.shape_cast %670 : vector<1x32x32xf32> to vector<32x32xf32>
    %c10_255 = arith.constant 10 : index
    %c0_256 = arith.constant 0 : index
    %c0_257 = arith.constant 0 : index
    %672 = vector.load %arg5[%c10_255, %c0_256, %c0_257] : memref<16x32x32xf32, #tpu.memory_space<vmem>>, vector<1x32x32xf32>
    %673 = vector.shape_cast %672 : vector<1x32x32xf32> to vector<32x32xf32>
    %cst_258 = arith.constant dense<0.000000e+00> : vector<16x32xf32>
    %674 = tpu.matmul %653, %673, %cst_258 {dimension_numbers = #tpu.dot_dimension_numbers<[1], [0], [0], [1], [0, 0, 1, 1], [], []>} : vector<16x32xf32>, vector<32x32xf32>, vector<16x32xf32> -> vector<16x32xf32>
    %c10_259 = arith.constant 10 : index
    %c0_260 = arith.constant 0 : index
    %c0_261 = arith.constant 0 : index
    %675 = vector.load %arg7[%c10_259, %c0_260, %c0_261] : memref<16x1x32xf32, #tpu.memory_space<vmem>>, vector<1x1x32xf32>
    %676 = vector.shape_cast %675 : vector<1x1x32xf32> to vector<1x32xf32>
    %677 = vector.broadcast %676 : vector<1x32xf32> to vector<16x32xf32>
    %678 = arith.addf %674, %677 : vector<16x32xf32>
    %c10_262 = arith.constant 10 : index
    %c0_263 = arith.constant 0 : index
    %c0_264 = arith.constant 0 : index
    %679 = vector.load %arg6[%c10_262, %c0_263, %c0_264] : memref<16x32x32xf32, #tpu.memory_space<vmem>>, vector<1x32x32xf32>
    %680 = vector.shape_cast %679 : vector<1x32x32xf32> to vector<32x32xf32>
    %c11 = arith.constant 11 : index
    %c0_265 = arith.constant 0 : index
    %c0_266 = arith.constant 0 : index
    %681 = vector.load %arg5[%c11, %c0_265, %c0_266] : memref<16x32x32xf32, #tpu.memory_space<vmem>>, vector<1x32x32xf32>
    %682 = vector.shape_cast %681 : vector<1x32x32xf32> to vector<32x32xf32>
    %cst_267 = arith.constant dense<0.000000e+00> : vector<16x32xf32>
    %683 = tpu.matmul %653, %682, %cst_267 {dimension_numbers = #tpu.dot_dimension_numbers<[1], [0], [0], [1], [0, 0, 1, 1], [], []>} : vector<16x32xf32>, vector<32x32xf32>, vector<16x32xf32> -> vector<16x32xf32>
    %c11_268 = arith.constant 11 : index
    %c0_269 = arith.constant 0 : index
    %c0_270 = arith.constant 0 : index
    %684 = vector.load %arg7[%c11_268, %c0_269, %c0_270] : memref<16x1x32xf32, #tpu.memory_space<vmem>>, vector<1x1x32xf32>
    %685 = vector.shape_cast %684 : vector<1x1x32xf32> to vector<1x32xf32>
    %686 = vector.broadcast %685 : vector<1x32xf32> to vector<16x32xf32>
    %687 = arith.addf %683, %686 : vector<16x32xf32>
    %c11_271 = arith.constant 11 : index
    %c0_272 = arith.constant 0 : index
    %c0_273 = arith.constant 0 : index
    %688 = vector.load %arg6[%c11_271, %c0_272, %c0_273] : memref<16x32x32xf32, #tpu.memory_space<vmem>>, vector<1x32x32xf32>
    %689 = vector.shape_cast %688 : vector<1x32x32xf32> to vector<32x32xf32>
    %cst_274 = arith.constant 0.000000e+00 : f32
    %690 = vector.broadcast %cst_274 : f32 to vector<2x32xf32>
    %cst_275 = arith.constant 0.000000e+00 : f32
    %691 = vector.broadcast %cst_275 : f32 to vector<2x32xf32>
    %692 = vector.extract_strided_slice %660 {offsets = [0, 0], sizes = [2, 32], strides = [1, 1]} : vector<16x32xf32> to vector<2x32xf32>
    %cst_276 = arith.constant dense<0.000000e+00> : vector<2x32xf32>
    %693 = tpu.matmul %690, %662, %cst_276 {dimension_numbers = #tpu.dot_dimension_numbers<[1], [0], [0], [1], [0, 0, 1, 1], [], []>} : vector<2x32xf32>, vector<32x32xf32>, vector<2x32xf32> -> vector<2x32xf32>
    %694 = arith.addf %692, %693 : vector<2x32xf32>
    %695 = arith.negf %694 : vector<2x32xf32>
    %696 = math.exp %695 : vector<2x32xf32>
    %cst_277 = arith.constant 1.000000e+00 : f32
    %697 = vector.broadcast %cst_277 : f32 to vector<2x32xf32>
    %698 = arith.addf %697, %696 : vector<2x32xf32>
    %699 = arith.divf %697, %698 : vector<2x32xf32>
    %700 = vector.extract_strided_slice %669 {offsets = [0, 0], sizes = [2, 32], strides = [1, 1]} : vector<16x32xf32> to vector<2x32xf32>
    %cst_278 = arith.constant dense<0.000000e+00> : vector<2x32xf32>
    %701 = tpu.matmul %690, %671, %cst_278 {dimension_numbers = #tpu.dot_dimension_numbers<[1], [0], [0], [1], [0, 0, 1, 1], [], []>} : vector<2x32xf32>, vector<32x32xf32>, vector<2x32xf32> -> vector<2x32xf32>
    %702 = arith.addf %700, %701 : vector<2x32xf32>
    %703 = arith.negf %702 : vector<2x32xf32>
    %704 = math.exp %703 : vector<2x32xf32>
    %cst_279 = arith.constant 1.000000e+00 : f32
    %705 = vector.broadcast %cst_279 : f32 to vector<2x32xf32>
    %706 = arith.addf %705, %704 : vector<2x32xf32>
    %707 = arith.divf %705, %706 : vector<2x32xf32>
    %708 = vector.extract_strided_slice %678 {offsets = [0, 0], sizes = [2, 32], strides = [1, 1]} : vector<16x32xf32> to vector<2x32xf32>
    %cst_280 = arith.constant dense<0.000000e+00> : vector<2x32xf32>
    %709 = tpu.matmul %690, %680, %cst_280 {dimension_numbers = #tpu.dot_dimension_numbers<[1], [0], [0], [1], [0, 0, 1, 1], [], []>} : vector<2x32xf32>, vector<32x32xf32>, vector<2x32xf32> -> vector<2x32xf32>
    %710 = arith.addf %708, %709 : vector<2x32xf32>
    %711 = math.tanh %710 : vector<2x32xf32>
    %712 = vector.extract_strided_slice %687 {offsets = [0, 0], sizes = [2, 32], strides = [1, 1]} : vector<16x32xf32> to vector<2x32xf32>
    %cst_281 = arith.constant dense<0.000000e+00> : vector<2x32xf32>
    %713 = tpu.matmul %690, %689, %cst_281 {dimension_numbers = #tpu.dot_dimension_numbers<[1], [0], [0], [1], [0, 0, 1, 1], [], []>} : vector<2x32xf32>, vector<32x32xf32>, vector<2x32xf32> -> vector<2x32xf32>
    %714 = arith.addf %712, %713 : vector<2x32xf32>
    %715 = arith.negf %714 : vector<2x32xf32>
    %716 = math.exp %715 : vector<2x32xf32>
    %cst_282 = arith.constant 1.000000e+00 : f32
    %717 = vector.broadcast %cst_282 : f32 to vector<2x32xf32>
    %718 = arith.addf %717, %716 : vector<2x32xf32>
    %719 = arith.divf %717, %718 : vector<2x32xf32>
    %720 = arith.mulf %707, %691 : vector<2x32xf32>
    %721 = arith.mulf %699, %711 : vector<2x32xf32>
    %722 = arith.addf %720, %721 : vector<2x32xf32>
    %723 = math.tanh %722 : vector<2x32xf32>
    %724 = arith.mulf %719, %723 : vector<2x32xf32>
    %c0_283 = arith.constant 0 : index
    %c0_284 = arith.constant 0 : index
    %725 = vector.load %arg15[%c0_283, %c0_284] : memref<16x32xf32, #tpu.memory_space<vmem>>, vector<2x32xf32>
    tpu.vector_store %arg15[%c0_283, %c0_284], %724 {strides = array<i32>} : memref<16x32xf32, #tpu.memory_space<vmem>>, vector<2x32xf32>,
    %726 = vector.extract_strided_slice %660 {offsets = [2, 0], sizes = [2, 32], strides = [1, 1]} : vector<16x32xf32> to vector<2x32xf32>
    %cst_285 = arith.constant dense<0.000000e+00> : vector<2x32xf32>
    %727 = tpu.matmul %724, %662, %cst_285 {dimension_numbers = #tpu.dot_dimension_numbers<[1], [0], [0], [1], [0, 0, 1, 1], [], []>} : vector<2x32xf32>, vector<32x32xf32>, vector<2x32xf32> -> vector<2x32xf32>
    %728 = arith.addf %726, %727 : vector<2x32xf32>
    %729 = arith.negf %728 : vector<2x32xf32>
    %730 = math.exp %729 : vector<2x32xf32>
    %cst_286 = arith.constant 1.000000e+00 : f32
    %731 = vector.broadcast %cst_286 : f32 to vector<2x32xf32>
    %732 = arith.addf %731, %730 : vector<2x32xf32>
    %733 = arith.divf %731, %732 : vector<2x32xf32>
    %734 = vector.extract_strided_slice %669 {offsets = [2, 0], sizes = [2, 32], strides = [1, 1]} : vector<16x32xf32> to vector<2x32xf32>
    %cst_287 = arith.constant dense<0.000000e+00> : vector<2x32xf32>
    %735 = tpu.matmul %724, %671, %cst_287 {dimension_numbers = #tpu.dot_dimension_numbers<[1], [0], [0], [1], [0, 0, 1, 1], [], []>} : vector<2x32xf32>, vector<32x32xf32>, vector<2x32xf32> -> vector<2x32xf32>
    %736 = arith.addf %734, %735 : vector<2x32xf32>
    %737 = arith.negf %736 : vector<2x32xf32>
    %738 = math.exp %737 : vector<2x32xf32>
    %cst_288 = arith.constant 1.000000e+00 : f32
    %739 = vector.broadcast %cst_288 : f32 to vector<2x32xf32>
    %740 = arith.addf %739, %738 : vector<2x32xf32>
    %741 = arith.divf %739, %740 : vector<2x32xf32>
    %742 = vector.extract_strided_slice %678 {offsets = [2, 0], sizes = [2, 32], strides = [1, 1]} : vector<16x32xf32> to vector<2x32xf32>
    %cst_289 = arith.constant dense<0.000000e+00> : vector<2x32xf32>
    %743 = tpu.matmul %724, %680, %cst_289 {dimension_numbers = #tpu.dot_dimension_numbers<[1], [0], [0], [1], [0, 0, 1, 1], [], []>} : vector<2x32xf32>, vector<32x32xf32>, vector<2x32xf32> -> vector<2x32xf32>
    %744 = arith.addf %742, %743 : vector<2x32xf32>
    %745 = math.tanh %744 : vector<2x32xf32>
    %746 = vector.extract_strided_slice %687 {offsets = [2, 0], sizes = [2, 32], strides = [1, 1]} : vector<16x32xf32> to vector<2x32xf32>
    %cst_290 = arith.constant dense<0.000000e+00> : vector<2x32xf32>
    %747 = tpu.matmul %724, %689, %cst_290 {dimension_numbers = #tpu.dot_dimension_numbers<[1], [0], [0], [1], [0, 0, 1, 1], [], []>} : vector<2x32xf32>, vector<32x32xf32>, vector<2x32xf32> -> vector<2x32xf32>
    %748 = arith.addf %746, %747 : vector<2x32xf32>
    %749 = arith.negf %748 : vector<2x32xf32>
    %750 = math.exp %749 : vector<2x32xf32>
    %cst_291 = arith.constant 1.000000e+00 : f32
    %751 = vector.broadcast %cst_291 : f32 to vector<2x32xf32>
    %752 = arith.addf %751, %750 : vector<2x32xf32>
    %753 = arith.divf %751, %752 : vector<2x32xf32>
    %754 = arith.mulf %741, %722 : vector<2x32xf32>
    %755 = arith.mulf %733, %745 : vector<2x32xf32>
    %756 = arith.addf %754, %755 : vector<2x32xf32>
    %757 = math.tanh %756 : vector<2x32xf32>
    %758 = arith.mulf %753, %757 : vector<2x32xf32>
    %c2_292 = arith.constant 2 : index
    %c0_293 = arith.constant 0 : index
    %759 = vector.load %arg15[%c2_292, %c0_293] : memref<16x32xf32, #tpu.memory_space<vmem>>, vector<2x32xf32>
    tpu.vector_store %arg15[%c2_292, %c0_293], %758 {strides = array<i32>} : memref<16x32xf32, #tpu.memory_space<vmem>>, vector<2x32xf32>,
    %760 = vector.extract_strided_slice %660 {offsets = [4, 0], sizes = [2, 32], strides = [1, 1]} : vector<16x32xf32> to vector<2x32xf32>
    %cst_294 = arith.constant dense<0.000000e+00> : vector<2x32xf32>
    %761 = tpu.matmul %758, %662, %cst_294 {dimension_numbers = #tpu.dot_dimension_numbers<[1], [0], [0], [1], [0, 0, 1, 1], [], []>} : vector<2x32xf32>, vector<32x32xf32>, vector<2x32xf32> -> vector<2x32xf32>
    %762 = arith.addf %760, %761 : vector<2x32xf32>
    %763 = arith.negf %762 : vector<2x32xf32>
    %764 = math.exp %763 : vector<2x32xf32>
    %cst_295 = arith.constant 1.000000e+00 : f32
    %765 = vector.broadcast %cst_295 : f32 to vector<2x32xf32>
    %766 = arith.addf %765, %764 : vector<2x32xf32>
    %767 = arith.divf %765, %766 : vector<2x32xf32>
    %768 = vector.extract_strided_slice %669 {offsets = [4, 0], sizes = [2, 32], strides = [1, 1]} : vector<16x32xf32> to vector<2x32xf32>
    %cst_296 = arith.constant dense<0.000000e+00> : vector<2x32xf32>
    %769 = tpu.matmul %758, %671, %cst_296 {dimension_numbers = #tpu.dot_dimension_numbers<[1], [0], [0], [1], [0, 0, 1, 1], [], []>} : vector<2x32xf32>, vector<32x32xf32>, vector<2x32xf32> -> vector<2x32xf32>
    %770 = arith.addf %768, %769 : vector<2x32xf32>
    %771 = arith.negf %770 : vector<2x32xf32>
    %772 = math.exp %771 : vector<2x32xf32>
    %cst_297 = arith.constant 1.000000e+00 : f32
    %773 = vector.broadcast %cst_297 : f32 to vector<2x32xf32>
    %774 = arith.addf %773, %772 : vector<2x32xf32>
    %775 = arith.divf %773, %774 : vector<2x32xf32>
    %776 = vector.extract_strided_slice %678 {offsets = [4, 0], sizes = [2, 32], strides = [1, 1]} : vector<16x32xf32> to vector<2x32xf32>
    %cst_298 = arith.constant dense<0.000000e+00> : vector<2x32xf32>
    %777 = tpu.matmul %758, %680, %cst_298 {dimension_numbers = #tpu.dot_dimension_numbers<[1], [0], [0], [1], [0, 0, 1, 1], [], []>} : vector<2x32xf32>, vector<32x32xf32>, vector<2x32xf32> -> vector<2x32xf32>
    %778 = arith.addf %776, %777 : vector<2x32xf32>
    %779 = math.tanh %778 : vector<2x32xf32>
    %780 = vector.extract_strided_slice %687 {offsets = [4, 0], sizes = [2, 32], strides = [1, 1]} : vector<16x32xf32> to vector<2x32xf32>
    %cst_299 = arith.constant dense<0.000000e+00> : vector<2x32xf32>
    %781 = tpu.matmul %758, %689, %cst_299 {dimension_numbers = #tpu.dot_dimension_numbers<[1], [0], [0], [1], [0, 0, 1, 1], [], []>} : vector<2x32xf32>, vector<32x32xf32>, vector<2x32xf32> -> vector<2x32xf32>
    %782 = arith.addf %780, %781 : vector<2x32xf32>
    %783 = arith.negf %782 : vector<2x32xf32>
    %784 = math.exp %783 : vector<2x32xf32>
    %cst_300 = arith.constant 1.000000e+00 : f32
    %785 = vector.broadcast %cst_300 : f32 to vector<2x32xf32>
    %786 = arith.addf %785, %784 : vector<2x32xf32>
    %787 = arith.divf %785, %786 : vector<2x32xf32>
    %788 = arith.mulf %775, %756 : vector<2x32xf32>
    %789 = arith.mulf %767, %779 : vector<2x32xf32>
    %790 = arith.addf %788, %789 : vector<2x32xf32>
    %791 = math.tanh %790 : vector<2x32xf32>
    %792 = arith.mulf %787, %791 : vector<2x32xf32>
    %c4_301 = arith.constant 4 : index
    %c0_302 = arith.constant 0 : index
    %793 = vector.load %arg15[%c4_301, %c0_302] : memref<16x32xf32, #tpu.memory_space<vmem>>, vector<2x32xf32>
    tpu.vector_store %arg15[%c4_301, %c0_302], %792 {strides = array<i32>} : memref<16x32xf32, #tpu.memory_space<vmem>>, vector<2x32xf32>,
    %794 = vector.extract_strided_slice %660 {offsets = [6, 0], sizes = [2, 32], strides = [1, 1]} : vector<16x32xf32> to vector<2x32xf32>
    %cst_303 = arith.constant dense<0.000000e+00> : vector<2x32xf32>
    %795 = tpu.matmul %792, %662, %cst_303 {dimension_numbers = #tpu.dot_dimension_numbers<[1], [0], [0], [1], [0, 0, 1, 1], [], []>} : vector<2x32xf32>, vector<32x32xf32>, vector<2x32xf32> -> vector<2x32xf32>
    %796 = arith.addf %794, %795 : vector<2x32xf32>
    %797 = arith.negf %796 : vector<2x32xf32>
    %798 = math.exp %797 : vector<2x32xf32>
    %cst_304 = arith.constant 1.000000e+00 : f32
    %799 = vector.broadcast %cst_304 : f32 to vector<2x32xf32>
    %800 = arith.addf %799, %798 : vector<2x32xf32>
    %801 = arith.divf %799, %800 : vector<2x32xf32>
    %802 = vector.extract_strided_slice %669 {offsets = [6, 0], sizes = [2, 32], strides = [1, 1]} : vector<16x32xf32> to vector<2x32xf32>
    %cst_305 = arith.constant dense<0.000000e+00> : vector<2x32xf32>
    %803 = tpu.matmul %792, %671, %cst_305 {dimension_numbers = #tpu.dot_dimension_numbers<[1], [0], [0], [1], [0, 0, 1, 1], [], []>} : vector<2x32xf32>, vector<32x32xf32>, vector<2x32xf32> -> vector<2x32xf32>
    %804 = arith.addf %802, %803 : vector<2x32xf32>
    %805 = arith.negf %804 : vector<2x32xf32>
    %806 = math.exp %805 : vector<2x32xf32>
    %cst_306 = arith.constant 1.000000e+00 : f32
    %807 = vector.broadcast %cst_306 : f32 to vector<2x32xf32>
    %808 = arith.addf %807, %806 : vector<2x32xf32>
    %809 = arith.divf %807, %808 : vector<2x32xf32>
    %810 = vector.extract_strided_slice %678 {offsets = [6, 0], sizes = [2, 32], strides = [1, 1]} : vector<16x32xf32> to vector<2x32xf32>
    %cst_307 = arith.constant dense<0.000000e+00> : vector<2x32xf32>
    %811 = tpu.matmul %792, %680, %cst_307 {dimension_numbers = #tpu.dot_dimension_numbers<[1], [0], [0], [1], [0, 0, 1, 1], [], []>} : vector<2x32xf32>, vector<32x32xf32>, vector<2x32xf32> -> vector<2x32xf32>
    %812 = arith.addf %810, %811 : vector<2x32xf32>
    %813 = math.tanh %812 : vector<2x32xf32>
    %814 = vector.extract_strided_slice %687 {offsets = [6, 0], sizes = [2, 32], strides = [1, 1]} : vector<16x32xf32> to vector<2x32xf32>
    %cst_308 = arith.constant dense<0.000000e+00> : vector<2x32xf32>
    %815 = tpu.matmul %792, %689, %cst_308 {dimension_numbers = #tpu.dot_dimension_numbers<[1], [0], [0], [1], [0, 0, 1, 1], [], []>} : vector<2x32xf32>, vector<32x32xf32>, vector<2x32xf32> -> vector<2x32xf32>
    %816 = arith.addf %814, %815 : vector<2x32xf32>
    %817 = arith.negf %816 : vector<2x32xf32>
    %818 = math.exp %817 : vector<2x32xf32>
    %cst_309 = arith.constant 1.000000e+00 : f32
    %819 = vector.broadcast %cst_309 : f32 to vector<2x32xf32>
    %820 = arith.addf %819, %818 : vector<2x32xf32>
    %821 = arith.divf %819, %820 : vector<2x32xf32>
    %822 = arith.mulf %809, %790 : vector<2x32xf32>
    %823 = arith.mulf %801, %813 : vector<2x32xf32>
    %824 = arith.addf %822, %823 : vector<2x32xf32>
    %825 = math.tanh %824 : vector<2x32xf32>
    %826 = arith.mulf %821, %825 : vector<2x32xf32>
    %c6_310 = arith.constant 6 : index
    %c0_311 = arith.constant 0 : index
    %827 = vector.load %arg15[%c6_310, %c0_311] : memref<16x32xf32, #tpu.memory_space<vmem>>, vector<2x32xf32>
    tpu.vector_store %arg15[%c6_310, %c0_311], %826 {strides = array<i32>} : memref<16x32xf32, #tpu.memory_space<vmem>>, vector<2x32xf32>,
    %828 = vector.extract_strided_slice %660 {offsets = [8, 0], sizes = [2, 32], strides = [1, 1]} : vector<16x32xf32> to vector<2x32xf32>
    %cst_312 = arith.constant dense<0.000000e+00> : vector<2x32xf32>
    %829 = tpu.matmul %826, %662, %cst_312 {dimension_numbers = #tpu.dot_dimension_numbers<[1], [0], [0], [1], [0, 0, 1, 1], [], []>} : vector<2x32xf32>, vector<32x32xf32>, vector<2x32xf32> -> vector<2x32xf32>
    %830 = arith.addf %828, %829 : vector<2x32xf32>
    %831 = arith.negf %830 : vector<2x32xf32>
    %832 = math.exp %831 : vector<2x32xf32>
    %cst_313 = arith.constant 1.000000e+00 : f32
    %833 = vector.broadcast %cst_313 : f32 to vector<2x32xf32>
    %834 = arith.addf %833, %832 : vector<2x32xf32>
    %835 = arith.divf %833, %834 : vector<2x32xf32>
    %836 = vector.extract_strided_slice %669 {offsets = [8, 0], sizes = [2, 32], strides = [1, 1]} : vector<16x32xf32> to vector<2x32xf32>
    %cst_314 = arith.constant dense<0.000000e+00> : vector<2x32xf32>
    %837 = tpu.matmul %826, %671, %cst_314 {dimension_numbers = #tpu.dot_dimension_numbers<[1], [0], [0], [1], [0, 0, 1, 1], [], []>} : vector<2x32xf32>, vector<32x32xf32>, vector<2x32xf32> -> vector<2x32xf32>
    %838 = arith.addf %836, %837 : vector<2x32xf32>
    %839 = arith.negf %838 : vector<2x32xf32>
    %840 = math.exp %839 : vector<2x32xf32>
    %cst_315 = arith.constant 1.000000e+00 : f32
    %841 = vector.broadcast %cst_315 : f32 to vector<2x32xf32>
    %842 = arith.addf %841, %840 : vector<2x32xf32>
    %843 = arith.divf %841, %842 : vector<2x32xf32>
    %844 = vector.extract_strided_slice %678 {offsets = [8, 0], sizes = [2, 32], strides = [1, 1]} : vector<16x32xf32> to vector<2x32xf32>
    %cst_316 = arith.constant dense<0.000000e+00> : vector<2x32xf32>
    %845 = tpu.matmul %826, %680, %cst_316 {dimension_numbers = #tpu.dot_dimension_numbers<[1], [0], [0], [1], [0, 0, 1, 1], [], []>} : vector<2x32xf32>, vector<32x32xf32>, vector<2x32xf32> -> vector<2x32xf32>
    %846 = arith.addf %844, %845 : vector<2x32xf32>
    %847 = math.tanh %846 : vector<2x32xf32>
    %848 = vector.extract_strided_slice %687 {offsets = [8, 0], sizes = [2, 32], strides = [1, 1]} : vector<16x32xf32> to vector<2x32xf32>
    %cst_317 = arith.constant dense<0.000000e+00> : vector<2x32xf32>
    %849 = tpu.matmul %826, %689, %cst_317 {dimension_numbers = #tpu.dot_dimension_numbers<[1], [0], [0], [1], [0, 0, 1, 1], [], []>} : vector<2x32xf32>, vector<32x32xf32>, vector<2x32xf32> -> vector<2x32xf32>
    %850 = arith.addf %848, %849 : vector<2x32xf32>
    %851 = arith.negf %850 : vector<2x32xf32>
    %852 = math.exp %851 : vector<2x32xf32>
    %cst_318 = arith.constant 1.000000e+00 : f32
    %853 = vector.broadcast %cst_318 : f32 to vector<2x32xf32>
    %854 = arith.addf %853, %852 : vector<2x32xf32>
    %855 = arith.divf %853, %854 : vector<2x32xf32>
    %856 = arith.mulf %843, %824 : vector<2x32xf32>
    %857 = arith.mulf %835, %847 : vector<2x32xf32>
    %858 = arith.addf %856, %857 : vector<2x32xf32>
    %859 = math.tanh %858 : vector<2x32xf32>
    %860 = arith.mulf %855, %859 : vector<2x32xf32>
    %c8_319 = arith.constant 8 : index
    %c0_320 = arith.constant 0 : index
    %861 = vector.load %arg15[%c8_319, %c0_320] : memref<16x32xf32, #tpu.memory_space<vmem>>, vector<2x32xf32>
    tpu.vector_store %arg15[%c8_319, %c0_320], %860 {strides = array<i32>} : memref<16x32xf32, #tpu.memory_space<vmem>>, vector<2x32xf32>,
    %862 = vector.extract_strided_slice %660 {offsets = [10, 0], sizes = [2, 32], strides = [1, 1]} : vector<16x32xf32> to vector<2x32xf32>
    %cst_321 = arith.constant dense<0.000000e+00> : vector<2x32xf32>
    %863 = tpu.matmul %860, %662, %cst_321 {dimension_numbers = #tpu.dot_dimension_numbers<[1], [0], [0], [1], [0, 0, 1, 1], [], []>} : vector<2x32xf32>, vector<32x32xf32>, vector<2x32xf32> -> vector<2x32xf32>
    %864 = arith.addf %862, %863 : vector<2x32xf32>
    %865 = arith.negf %864 : vector<2x32xf32>
    %866 = math.exp %865 : vector<2x32xf32>
    %cst_322 = arith.constant 1.000000e+00 : f32
    %867 = vector.broadcast %cst_322 : f32 to vector<2x32xf32>
    %868 = arith.addf %867, %866 : vector<2x32xf32>
    %869 = arith.divf %867, %868 : vector<2x32xf32>
    %870 = vector.extract_strided_slice %669 {offsets = [10, 0], sizes = [2, 32], strides = [1, 1]} : vector<16x32xf32> to vector<2x32xf32>
    %cst_323 = arith.constant dense<0.000000e+00> : vector<2x32xf32>
    %871 = tpu.matmul %860, %671, %cst_323 {dimension_numbers = #tpu.dot_dimension_numbers<[1], [0], [0], [1], [0, 0, 1, 1], [], []>} : vector<2x32xf32>, vector<32x32xf32>, vector<2x32xf32> -> vector<2x32xf32>
    %872 = arith.addf %870, %871 : vector<2x32xf32>
    %873 = arith.negf %872 : vector<2x32xf32>
    %874 = math.exp %873 : vector<2x32xf32>
    %cst_324 = arith.constant 1.000000e+00 : f32
    %875 = vector.broadcast %cst_324 : f32 to vector<2x32xf32>
    %876 = arith.addf %875, %874 : vector<2x32xf32>
    %877 = arith.divf %875, %876 : vector<2x32xf32>
    %878 = vector.extract_strided_slice %678 {offsets = [10, 0], sizes = [2, 32], strides = [1, 1]} : vector<16x32xf32> to vector<2x32xf32>
    %cst_325 = arith.constant dense<0.000000e+00> : vector<2x32xf32>
    %879 = tpu.matmul %860, %680, %cst_325 {dimension_numbers = #tpu.dot_dimension_numbers<[1], [0], [0], [1], [0, 0, 1, 1], [], []>} : vector<2x32xf32>, vector<32x32xf32>, vector<2x32xf32> -> vector<2x32xf32>
    %880 = arith.addf %878, %879 : vector<2x32xf32>
    %881 = math.tanh %880 : vector<2x32xf32>
    %882 = vector.extract_strided_slice %687 {offsets = [10, 0], sizes = [2, 32], strides = [1, 1]} : vector<16x32xf32> to vector<2x32xf32>
    %cst_326 = arith.constant dense<0.000000e+00> : vector<2x32xf32>
    %883 = tpu.matmul %860, %689, %cst_326 {dimension_numbers = #tpu.dot_dimension_numbers<[1], [0], [0], [1], [0, 0, 1, 1], [], []>} : vector<2x32xf32>, vector<32x32xf32>, vector<2x32xf32> -> vector<2x32xf32>
    %884 = arith.addf %882, %883 : vector<2x32xf32>
    %885 = arith.negf %884 : vector<2x32xf32>
    %886 = math.exp %885 : vector<2x32xf32>
    %cst_327 = arith.constant 1.000000e+00 : f32
    %887 = vector.broadcast %cst_327 : f32 to vector<2x32xf32>
    %888 = arith.addf %887, %886 : vector<2x32xf32>
    %889 = arith.divf %887, %888 : vector<2x32xf32>
    %890 = arith.mulf %877, %858 : vector<2x32xf32>
    %891 = arith.mulf %869, %881 : vector<2x32xf32>
    %892 = arith.addf %890, %891 : vector<2x32xf32>
    %893 = math.tanh %892 : vector<2x32xf32>
    %894 = arith.mulf %889, %893 : vector<2x32xf32>
    %c10_328 = arith.constant 10 : index
    %c0_329 = arith.constant 0 : index
    %895 = vector.load %arg15[%c10_328, %c0_329] : memref<16x32xf32, #tpu.memory_space<vmem>>, vector<2x32xf32>
    tpu.vector_store %arg15[%c10_328, %c0_329], %894 {strides = array<i32>} : memref<16x32xf32, #tpu.memory_space<vmem>>, vector<2x32xf32>,
    %896 = vector.extract_strided_slice %660 {offsets = [12, 0], sizes = [2, 32], strides = [1, 1]} : vector<16x32xf32> to vector<2x32xf32>
    %cst_330 = arith.constant dense<0.000000e+00> : vector<2x32xf32>
    %897 = tpu.matmul %894, %662, %cst_330 {dimension_numbers = #tpu.dot_dimension_numbers<[1], [0], [0], [1], [0, 0, 1, 1], [], []>} : vector<2x32xf32>, vector<32x32xf32>, vector<2x32xf32> -> vector<2x32xf32>
    %898 = arith.addf %896, %897 : vector<2x32xf32>
    %899 = arith.negf %898 : vector<2x32xf32>
    %900 = math.exp %899 : vector<2x32xf32>
    %cst_331 = arith.constant 1.000000e+00 : f32
    %901 = vector.broadcast %cst_331 : f32 to vector<2x32xf32>
    %902 = arith.addf %901, %900 : vector<2x32xf32>
    %903 = arith.divf %901, %902 : vector<2x32xf32>
    %904 = vector.extract_strided_slice %669 {offsets = [12, 0], sizes = [2, 32], strides = [1, 1]} : vector<16x32xf32> to vector<2x32xf32>
    %cst_332 = arith.constant dense<0.000000e+00> : vector<2x32xf32>
    %905 = tpu.matmul %894, %671, %cst_332 {dimension_numbers = #tpu.dot_dimension_numbers<[1], [0], [0], [1], [0, 0, 1, 1], [], []>} : vector<2x32xf32>, vector<32x32xf32>, vector<2x32xf32> -> vector<2x32xf32>
    %906 = arith.addf %904, %905 : vector<2x32xf32>
    %907 = arith.negf %906 : vector<2x32xf32>
    %908 = math.exp %907 : vector<2x32xf32>
    %cst_333 = arith.constant 1.000000e+00 : f32
    %909 = vector.broadcast %cst_333 : f32 to vector<2x32xf32>
    %910 = arith.addf %909, %908 : vector<2x32xf32>
    %911 = arith.divf %909, %910 : vector<2x32xf32>
    %912 = vector.extract_strided_slice %678 {offsets = [12, 0], sizes = [2, 32], strides = [1, 1]} : vector<16x32xf32> to vector<2x32xf32>
    %cst_334 = arith.constant dense<0.000000e+00> : vector<2x32xf32>
    %913 = tpu.matmul %894, %680, %cst_334 {dimension_numbers = #tpu.dot_dimension_numbers<[1], [0], [0], [1], [0, 0, 1, 1], [], []>} : vector<2x32xf32>, vector<32x32xf32>, vector<2x32xf32> -> vector<2x32xf32>
    %914 = arith.addf %912, %913 : vector<2x32xf32>
    %915 = math.tanh %914 : vector<2x32xf32>
    %916 = vector.extract_strided_slice %687 {offsets = [12, 0], sizes = [2, 32], strides = [1, 1]} : vector<16x32xf32> to vector<2x32xf32>
    %cst_335 = arith.constant dense<0.000000e+00> : vector<2x32xf32>
    %917 = tpu.matmul %894, %689, %cst_335 {dimension_numbers = #tpu.dot_dimension_numbers<[1], [0], [0], [1], [0, 0, 1, 1], [], []>} : vector<2x32xf32>, vector<32x32xf32>, vector<2x32xf32> -> vector<2x32xf32>
    %918 = arith.addf %916, %917 : vector<2x32xf32>
    %919 = arith.negf %918 : vector<2x32xf32>
    %920 = math.exp %919 : vector<2x32xf32>
    %cst_336 = arith.constant 1.000000e+00 : f32
    %921 = vector.broadcast %cst_336 : f32 to vector<2x32xf32>
    %922 = arith.addf %921, %920 : vector<2x32xf32>
    %923 = arith.divf %921, %922 : vector<2x32xf32>
    %924 = arith.mulf %911, %892 : vector<2x32xf32>
    %925 = arith.mulf %903, %915 : vector<2x32xf32>
    %926 = arith.addf %924, %925 : vector<2x32xf32>
    %927 = math.tanh %926 : vector<2x32xf32>
    %928 = arith.mulf %923, %927 : vector<2x32xf32>
    %c12_337 = arith.constant 12 : index
    %c0_338 = arith.constant 0 : index
    %929 = vector.load %arg15[%c12_337, %c0_338] : memref<16x32xf32, #tpu.memory_space<vmem>>, vector<2x32xf32>
    tpu.vector_store %arg15[%c12_337, %c0_338], %928 {strides = array<i32>} : memref<16x32xf32, #tpu.memory_space<vmem>>, vector<2x32xf32>,
    %930 = vector.extract_strided_slice %660 {offsets = [14, 0], sizes = [2, 32], strides = [1, 1]} : vector<16x32xf32> to vector<2x32xf32>
    %cst_339 = arith.constant dense<0.000000e+00> : vector<2x32xf32>
    %931 = tpu.matmul %928, %662, %cst_339 {dimension_numbers = #tpu.dot_dimension_numbers<[1], [0], [0], [1], [0, 0, 1, 1], [], []>} : vector<2x32xf32>, vector<32x32xf32>, vector<2x32xf32> -> vector<2x32xf32>
    %932 = arith.addf %930, %931 : vector<2x32xf32>
    %933 = arith.negf %932 : vector<2x32xf32>
    %934 = math.exp %933 : vector<2x32xf32>
    %cst_340 = arith.constant 1.000000e+00 : f32
    %935 = vector.broadcast %cst_340 : f32 to vector<2x32xf32>
    %936 = arith.addf %935, %934 : vector<2x32xf32>
    %937 = arith.divf %935, %936 : vector<2x32xf32>
    %938 = vector.extract_strided_slice %669 {offsets = [14, 0], sizes = [2, 32], strides = [1, 1]} : vector<16x32xf32> to vector<2x32xf32>
    %cst_341 = arith.constant dense<0.000000e+00> : vector<2x32xf32>
    %939 = tpu.matmul %928, %671, %cst_341 {dimension_numbers = #tpu.dot_dimension_numbers<[1], [0], [0], [1], [0, 0, 1, 1], [], []>} : vector<2x32xf32>, vector<32x32xf32>, vector<2x32xf32> -> vector<2x32xf32>
    %940 = arith.addf %938, %939 : vector<2x32xf32>
    %941 = arith.negf %940 : vector<2x32xf32>
    %942 = math.exp %941 : vector<2x32xf32>
    %cst_342 = arith.constant 1.000000e+00 : f32
    %943 = vector.broadcast %cst_342 : f32 to vector<2x32xf32>
    %944 = arith.addf %943, %942 : vector<2x32xf32>
    %945 = arith.divf %943, %944 : vector<2x32xf32>
    %946 = vector.extract_strided_slice %678 {offsets = [14, 0], sizes = [2, 32], strides = [1, 1]} : vector<16x32xf32> to vector<2x32xf32>
    %cst_343 = arith.constant dense<0.000000e+00> : vector<2x32xf32>
    %947 = tpu.matmul %928, %680, %cst_343 {dimension_numbers = #tpu.dot_dimension_numbers<[1], [0], [0], [1], [0, 0, 1, 1], [], []>} : vector<2x32xf32>, vector<32x32xf32>, vector<2x32xf32> -> vector<2x32xf32>
    %948 = arith.addf %946, %947 : vector<2x32xf32>
    %949 = math.tanh %948 : vector<2x32xf32>
    %950 = vector.extract_strided_slice %687 {offsets = [14, 0], sizes = [2, 32], strides = [1, 1]} : vector<16x32xf32> to vector<2x32xf32>
    %cst_344 = arith.constant dense<0.000000e+00> : vector<2x32xf32>
    %951 = tpu.matmul %928, %689, %cst_344 {dimension_numbers = #tpu.dot_dimension_numbers<[1], [0], [0], [1], [0, 0, 1, 1], [], []>} : vector<2x32xf32>, vector<32x32xf32>, vector<2x32xf32> -> vector<2x32xf32>
    %952 = arith.addf %950, %951 : vector<2x32xf32>
    %953 = arith.negf %952 : vector<2x32xf32>
    %954 = math.exp %953 : vector<2x32xf32>
    %cst_345 = arith.constant 1.000000e+00 : f32
    %955 = vector.broadcast %cst_345 : f32 to vector<2x32xf32>
    %956 = arith.addf %955, %954 : vector<2x32xf32>
    %957 = arith.divf %955, %956 : vector<2x32xf32>
    %958 = arith.mulf %945, %926 : vector<2x32xf32>
    %959 = arith.mulf %937, %949 : vector<2x32xf32>
    %960 = arith.addf %958, %959 : vector<2x32xf32>
    %961 = math.tanh %960 : vector<2x32xf32>
    %962 = arith.mulf %957, %961 : vector<2x32xf32>
    %c14_346 = arith.constant 14 : index
    %c0_347 = arith.constant 0 : index
    %963 = vector.load %arg15[%c14_346, %c0_347] : memref<16x32xf32, #tpu.memory_space<vmem>>, vector<2x32xf32>
    tpu.vector_store %arg15[%c14_346, %c0_347], %962 {strides = array<i32>} : memref<16x32xf32, #tpu.memory_space<vmem>>, vector<2x32xf32>,
    %c0_348 = arith.constant 0 : index
    %c0_349 = arith.constant 0 : index
    %964 = vector.load %arg15[%c0_348, %c0_349] : memref<16x32xf32, #tpu.memory_space<vmem>>, vector<16x32xf32>
    %c12_350 = arith.constant 12 : index
    %c0_351 = arith.constant 0 : index
    %c0_352 = arith.constant 0 : index
    %965 = vector.load %arg5[%c12_350, %c0_351, %c0_352] : memref<16x32x32xf32, #tpu.memory_space<vmem>>, vector<1x32x32xf32>
    %966 = vector.shape_cast %965 : vector<1x32x32xf32> to vector<32x32xf32>
    %cst_353 = arith.constant dense<0.000000e+00> : vector<16x32xf32>
    %967 = tpu.matmul %964, %966, %cst_353 {dimension_numbers = #tpu.dot_dimension_numbers<[1], [0], [0], [1], [0, 0, 1, 1], [], []>} : vector<16x32xf32>, vector<32x32xf32>, vector<16x32xf32> -> vector<16x32xf32>
    %c12_354 = arith.constant 12 : index
    %c0_355 = arith.constant 0 : index
    %c0_356 = arith.constant 0 : index
    %968 = vector.load %arg7[%c12_354, %c0_355, %c0_356] : memref<16x1x32xf32, #tpu.memory_space<vmem>>, vector<1x1x32xf32>
    %969 = vector.shape_cast %968 : vector<1x1x32xf32> to vector<1x32xf32>
    %970 = vector.broadcast %969 : vector<1x32xf32> to vector<16x32xf32>
    %971 = arith.addf %967, %970 : vector<16x32xf32>
    %c12_357 = arith.constant 12 : index
    %c0_358 = arith.constant 0 : index
    %c0_359 = arith.constant 0 : index
    %972 = vector.load %arg6[%c12_357, %c0_358, %c0_359] : memref<16x32x32xf32, #tpu.memory_space<vmem>>, vector<1x32x32xf32>
    %973 = vector.shape_cast %972 : vector<1x32x32xf32> to vector<32x32xf32>
    %c13 = arith.constant 13 : index
    %c0_360 = arith.constant 0 : index
    %c0_361 = arith.constant 0 : index
    %974 = vector.load %arg5[%c13, %c0_360, %c0_361] : memref<16x32x32xf32, #tpu.memory_space<vmem>>, vector<1x32x32xf32>
    %975 = vector.shape_cast %974 : vector<1x32x32xf32> to vector<32x32xf32>
    %cst_362 = arith.constant dense<0.000000e+00> : vector<16x32xf32>
    %976 = tpu.matmul %964, %975, %cst_362 {dimension_numbers = #tpu.dot_dimension_numbers<[1], [0], [0], [1], [0, 0, 1, 1], [], []>} : vector<16x32xf32>, vector<32x32xf32>, vector<16x32xf32> -> vector<16x32xf32>
    %c13_363 = arith.constant 13 : index
    %c0_364 = arith.constant 0 : index
    %c0_365 = arith.constant 0 : index
    %977 = vector.load %arg7[%c13_363, %c0_364, %c0_365] : memref<16x1x32xf32, #tpu.memory_space<vmem>>, vector<1x1x32xf32>
    %978 = vector.shape_cast %977 : vector<1x1x32xf32> to vector<1x32xf32>
    %979 = vector.broadcast %978 : vector<1x32xf32> to vector<16x32xf32>
    %980 = arith.addf %976, %979 : vector<16x32xf32>
    %c13_366 = arith.constant 13 : index
    %c0_367 = arith.constant 0 : index
    %c0_368 = arith.constant 0 : index
    %981 = vector.load %arg6[%c13_366, %c0_367, %c0_368] : memref<16x32x32xf32, #tpu.memory_space<vmem>>, vector<1x32x32xf32>
    %982 = vector.shape_cast %981 : vector<1x32x32xf32> to vector<32x32xf32>
    %c14_369 = arith.constant 14 : index
    %c0_370 = arith.constant 0 : index
    %c0_371 = arith.constant 0 : index
    %983 = vector.load %arg5[%c14_369, %c0_370, %c0_371] : memref<16x32x32xf32, #tpu.memory_space<vmem>>, vector<1x32x32xf32>
    %984 = vector.shape_cast %983 : vector<1x32x32xf32> to vector<32x32xf32>
    %cst_372 = arith.constant dense<0.000000e+00> : vector<16x32xf32>
    %985 = tpu.matmul %964, %984, %cst_372 {dimension_numbers = #tpu.dot_dimension_numbers<[1], [0], [0], [1], [0, 0, 1, 1], [], []>} : vector<16x32xf32>, vector<32x32xf32>, vector<16x32xf32> -> vector<16x32xf32>
    %c14_373 = arith.constant 14 : index
    %c0_374 = arith.constant 0 : index
    %c0_375 = arith.constant 0 : index
    %986 = vector.load %arg7[%c14_373, %c0_374, %c0_375] : memref<16x1x32xf32, #tpu.memory_space<vmem>>, vector<1x1x32xf32>
    %987 = vector.shape_cast %986 : vector<1x1x32xf32> to vector<1x32xf32>
    %988 = vector.broadcast %987 : vector<1x32xf32> to vector<16x32xf32>
    %989 = arith.addf %985, %988 : vector<16x32xf32>
    %c14_376 = arith.constant 14 : index
    %c0_377 = arith.constant 0 : index
    %c0_378 = arith.constant 0 : index
    %990 = vector.load %arg6[%c14_376, %c0_377, %c0_378] : memref<16x32x32xf32, #tpu.memory_space<vmem>>, vector<1x32x32xf32>
    %991 = vector.shape_cast %990 : vector<1x32x32xf32> to vector<32x32xf32>
    %c15 = arith.constant 15 : index
    %c0_379 = arith.constant 0 : index
    %c0_380 = arith.constant 0 : index
    %992 = vector.load %arg5[%c15, %c0_379, %c0_380] : memref<16x32x32xf32, #tpu.memory_space<vmem>>, vector<1x32x32xf32>
    %993 = vector.shape_cast %992 : vector<1x32x32xf32> to vector<32x32xf32>
    %cst_381 = arith.constant dense<0.000000e+00> : vector<16x32xf32>
    %994 = tpu.matmul %964, %993, %cst_381 {dimension_numbers = #tpu.dot_dimension_numbers<[1], [0], [0], [1], [0, 0, 1, 1], [], []>} : vector<16x32xf32>, vector<32x32xf32>, vector<16x32xf32> -> vector<16x32xf32>
    %c15_382 = arith.constant 15 : index
    %c0_383 = arith.constant 0 : index
    %c0_384 = arith.constant 0 : index
    %995 = vector.load %arg7[%c15_382, %c0_383, %c0_384] : memref<16x1x32xf32, #tpu.memory_space<vmem>>, vector<1x1x32xf32>
    %996 = vector.shape_cast %995 : vector<1x1x32xf32> to vector<1x32xf32>
    %997 = vector.broadcast %996 : vector<1x32xf32> to vector<16x32xf32>
    %998 = arith.addf %994, %997 : vector<16x32xf32>
    %c15_385 = arith.constant 15 : index
    %c0_386 = arith.constant 0 : index
    %c0_387 = arith.constant 0 : index
    %999 = vector.load %arg6[%c15_385, %c0_386, %c0_387] : memref<16x32x32xf32, #tpu.memory_space<vmem>>, vector<1x32x32xf32>
    %1000 = vector.shape_cast %999 : vector<1x32x32xf32> to vector<32x32xf32>
    %cst_388 = arith.constant 0.000000e+00 : f32
    %1001 = vector.broadcast %cst_388 : f32 to vector<2x32xf32>
    %cst_389 = arith.constant 0.000000e+00 : f32
    %1002 = vector.broadcast %cst_389 : f32 to vector<2x32xf32>
    %1003 = vector.extract_strided_slice %971 {offsets = [0, 0], sizes = [2, 32], strides = [1, 1]} : vector<16x32xf32> to vector<2x32xf32>
    %cst_390 = arith.constant dense<0.000000e+00> : vector<2x32xf32>
    %1004 = tpu.matmul %1001, %973, %cst_390 {dimension_numbers = #tpu.dot_dimension_numbers<[1], [0], [0], [1], [0, 0, 1, 1], [], []>} : vector<2x32xf32>, vector<32x32xf32>, vector<2x32xf32> -> vector<2x32xf32>
    %1005 = arith.addf %1003, %1004 : vector<2x32xf32>
    %1006 = arith.negf %1005 : vector<2x32xf32>
    %1007 = math.exp %1006 : vector<2x32xf32>
    %cst_391 = arith.constant 1.000000e+00 : f32
    %1008 = vector.broadcast %cst_391 : f32 to vector<2x32xf32>
    %1009 = arith.addf %1008, %1007 : vector<2x32xf32>
    %1010 = arith.divf %1008, %1009 : vector<2x32xf32>
    %1011 = vector.extract_strided_slice %980 {offsets = [0, 0], sizes = [2, 32], strides = [1, 1]} : vector<16x32xf32> to vector<2x32xf32>
    %cst_392 = arith.constant dense<0.000000e+00> : vector<2x32xf32>
    %1012 = tpu.matmul %1001, %982, %cst_392 {dimension_numbers = #tpu.dot_dimension_numbers<[1], [0], [0], [1], [0, 0, 1, 1], [], []>} : vector<2x32xf32>, vector<32x32xf32>, vector<2x32xf32> -> vector<2x32xf32>
    %1013 = arith.addf %1011, %1012 : vector<2x32xf32>
    %1014 = arith.negf %1013 : vector<2x32xf32>
    %1015 = math.exp %1014 : vector<2x32xf32>
    %cst_393 = arith.constant 1.000000e+00 : f32
    %1016 = vector.broadcast %cst_393 : f32 to vector<2x32xf32>
    %1017 = arith.addf %1016, %1015 : vector<2x32xf32>
    %1018 = arith.divf %1016, %1017 : vector<2x32xf32>
    %1019 = vector.extract_strided_slice %989 {offsets = [0, 0], sizes = [2, 32], strides = [1, 1]} : vector<16x32xf32> to vector<2x32xf32>
    %cst_394 = arith.constant dense<0.000000e+00> : vector<2x32xf32>
    %1020 = tpu.matmul %1001, %991, %cst_394 {dimension_numbers = #tpu.dot_dimension_numbers<[1], [0], [0], [1], [0, 0, 1, 1], [], []>} : vector<2x32xf32>, vector<32x32xf32>, vector<2x32xf32> -> vector<2x32xf32>
    %1021 = arith.addf %1019, %1020 : vector<2x32xf32>
    %1022 = math.tanh %1021 : vector<2x32xf32>
    %1023 = vector.extract_strided_slice %998 {offsets = [0, 0], sizes = [2, 32], strides = [1, 1]} : vector<16x32xf32> to vector<2x32xf32>
    %cst_395 = arith.constant dense<0.000000e+00> : vector<2x32xf32>
    %1024 = tpu.matmul %1001, %1000, %cst_395 {dimension_numbers = #tpu.dot_dimension_numbers<[1], [0], [0], [1], [0, 0, 1, 1], [], []>} : vector<2x32xf32>, vector<32x32xf32>, vector<2x32xf32> -> vector<2x32xf32>
    %1025 = arith.addf %1023, %1024 : vector<2x32xf32>
    %1026 = arith.negf %1025 : vector<2x32xf32>
    %1027 = math.exp %1026 : vector<2x32xf32>
    %cst_396 = arith.constant 1.000000e+00 : f32
    %1028 = vector.broadcast %cst_396 : f32 to vector<2x32xf32>
    %1029 = arith.addf %1028, %1027 : vector<2x32xf32>
    %1030 = arith.divf %1028, %1029 : vector<2x32xf32>
    %1031 = arith.mulf %1018, %1002 : vector<2x32xf32>
    %1032 = arith.mulf %1010, %1022 : vector<2x32xf32>
    %1033 = arith.addf %1031, %1032 : vector<2x32xf32>
    %1034 = math.tanh %1033 : vector<2x32xf32>
    %1035 = arith.mulf %1030, %1034 : vector<2x32xf32>
    %1036 = vector.extract_strided_slice %971 {offsets = [2, 0], sizes = [2, 32], strides = [1, 1]} : vector<16x32xf32> to vector<2x32xf32>
    %cst_397 = arith.constant dense<0.000000e+00> : vector<2x32xf32>
    %1037 = tpu.matmul %1035, %973, %cst_397 {dimension_numbers = #tpu.dot_dimension_numbers<[1], [0], [0], [1], [0, 0, 1, 1], [], []>} : vector<2x32xf32>, vector<32x32xf32>, vector<2x32xf32> -> vector<2x32xf32>
    %1038 = arith.addf %1036, %1037 : vector<2x32xf32>
    %1039 = arith.negf %1038 : vector<2x32xf32>
    %1040 = math.exp %1039 : vector<2x32xf32>
    %cst_398 = arith.constant 1.000000e+00 : f32
    %1041 = vector.broadcast %cst_398 : f32 to vector<2x32xf32>
    %1042 = arith.addf %1041, %1040 : vector<2x32xf32>
    %1043 = arith.divf %1041, %1042 : vector<2x32xf32>
    %1044 = vector.extract_strided_slice %980 {offsets = [2, 0], sizes = [2, 32], strides = [1, 1]} : vector<16x32xf32> to vector<2x32xf32>
    %cst_399 = arith.constant dense<0.000000e+00> : vector<2x32xf32>
    %1045 = tpu.matmul %1035, %982, %cst_399 {dimension_numbers = #tpu.dot_dimension_numbers<[1], [0], [0], [1], [0, 0, 1, 1], [], []>} : vector<2x32xf32>, vector<32x32xf32>, vector<2x32xf32> -> vector<2x32xf32>
    %1046 = arith.addf %1044, %1045 : vector<2x32xf32>
    %1047 = arith.negf %1046 : vector<2x32xf32>
    %1048 = math.exp %1047 : vector<2x32xf32>
    %cst_400 = arith.constant 1.000000e+00 : f32
    %1049 = vector.broadcast %cst_400 : f32 to vector<2x32xf32>
    %1050 = arith.addf %1049, %1048 : vector<2x32xf32>
    %1051 = arith.divf %1049, %1050 : vector<2x32xf32>
    %1052 = vector.extract_strided_slice %989 {offsets = [2, 0], sizes = [2, 32], strides = [1, 1]} : vector<16x32xf32> to vector<2x32xf32>
    %cst_401 = arith.constant dense<0.000000e+00> : vector<2x32xf32>
    %1053 = tpu.matmul %1035, %991, %cst_401 {dimension_numbers = #tpu.dot_dimension_numbers<[1], [0], [0], [1], [0, 0, 1, 1], [], []>} : vector<2x32xf32>, vector<32x32xf32>, vector<2x32xf32> -> vector<2x32xf32>
    %1054 = arith.addf %1052, %1053 : vector<2x32xf32>
    %1055 = math.tanh %1054 : vector<2x32xf32>
    %1056 = vector.extract_strided_slice %998 {offsets = [2, 0], sizes = [2, 32], strides = [1, 1]} : vector<16x32xf32> to vector<2x32xf32>
    %cst_402 = arith.constant dense<0.000000e+00> : vector<2x32xf32>
    %1057 = tpu.matmul %1035, %1000, %cst_402 {dimension_numbers = #tpu.dot_dimension_numbers<[1], [0], [0], [1], [0, 0, 1, 1], [], []>} : vector<2x32xf32>, vector<32x32xf32>, vector<2x32xf32> -> vector<2x32xf32>
    %1058 = arith.addf %1056, %1057 : vector<2x32xf32>
    %1059 = arith.negf %1058 : vector<2x32xf32>
    %1060 = math.exp %1059 : vector<2x32xf32>
    %cst_403 = arith.constant 1.000000e+00 : f32
    %1061 = vector.broadcast %cst_403 : f32 to vector<2x32xf32>
    %1062 = arith.addf %1061, %1060 : vector<2x32xf32>
    %1063 = arith.divf %1061, %1062 : vector<2x32xf32>
    %1064 = arith.mulf %1051, %1033 : vector<2x32xf32>
    %1065 = arith.mulf %1043, %1055 : vector<2x32xf32>
    %1066 = arith.addf %1064, %1065 : vector<2x32xf32>
    %1067 = math.tanh %1066 : vector<2x32xf32>
    %1068 = arith.mulf %1063, %1067 : vector<2x32xf32>
    %1069 = vector.extract_strided_slice %971 {offsets = [4, 0], sizes = [2, 32], strides = [1, 1]} : vector<16x32xf32> to vector<2x32xf32>
    %cst_404 = arith.constant dense<0.000000e+00> : vector<2x32xf32>
    %1070 = tpu.matmul %1068, %973, %cst_404 {dimension_numbers = #tpu.dot_dimension_numbers<[1], [0], [0], [1], [0, 0, 1, 1], [], []>} : vector<2x32xf32>, vector<32x32xf32>, vector<2x32xf32> -> vector<2x32xf32>
    %1071 = arith.addf %1069, %1070 : vector<2x32xf32>
    %1072 = arith.negf %1071 : vector<2x32xf32>
    %1073 = math.exp %1072 : vector<2x32xf32>
    %cst_405 = arith.constant 1.000000e+00 : f32
    %1074 = vector.broadcast %cst_405 : f32 to vector<2x32xf32>
    %1075 = arith.addf %1074, %1073 : vector<2x32xf32>
    %1076 = arith.divf %1074, %1075 : vector<2x32xf32>
    %1077 = vector.extract_strided_slice %980 {offsets = [4, 0], sizes = [2, 32], strides = [1, 1]} : vector<16x32xf32> to vector<2x32xf32>
    %cst_406 = arith.constant dense<0.000000e+00> : vector<2x32xf32>
    %1078 = tpu.matmul %1068, %982, %cst_406 {dimension_numbers = #tpu.dot_dimension_numbers<[1], [0], [0], [1], [0, 0, 1, 1], [], []>} : vector<2x32xf32>, vector<32x32xf32>, vector<2x32xf32> -> vector<2x32xf32>
    %1079 = arith.addf %1077, %1078 : vector<2x32xf32>
    %1080 = arith.negf %1079 : vector<2x32xf32>
    %1081 = math.exp %1080 : vector<2x32xf32>
    %cst_407 = arith.constant 1.000000e+00 : f32
    %1082 = vector.broadcast %cst_407 : f32 to vector<2x32xf32>
    %1083 = arith.addf %1082, %1081 : vector<2x32xf32>
    %1084 = arith.divf %1082, %1083 : vector<2x32xf32>
    %1085 = vector.extract_strided_slice %989 {offsets = [4, 0], sizes = [2, 32], strides = [1, 1]} : vector<16x32xf32> to vector<2x32xf32>
    %cst_408 = arith.constant dense<0.000000e+00> : vector<2x32xf32>
    %1086 = tpu.matmul %1068, %991, %cst_408 {dimension_numbers = #tpu.dot_dimension_numbers<[1], [0], [0], [1], [0, 0, 1, 1], [], []>} : vector<2x32xf32>, vector<32x32xf32>, vector<2x32xf32> -> vector<2x32xf32>
    %1087 = arith.addf %1085, %1086 : vector<2x32xf32>
    %1088 = math.tanh %1087 : vector<2x32xf32>
    %1089 = vector.extract_strided_slice %998 {offsets = [4, 0], sizes = [2, 32], strides = [1, 1]} : vector<16x32xf32> to vector<2x32xf32>
    %cst_409 = arith.constant dense<0.000000e+00> : vector<2x32xf32>
    %1090 = tpu.matmul %1068, %1000, %cst_409 {dimension_numbers = #tpu.dot_dimension_numbers<[1], [0], [0], [1], [0, 0, 1, 1], [], []>} : vector<2x32xf32>, vector<32x32xf32>, vector<2x32xf32> -> vector<2x32xf32>
    %1091 = arith.addf %1089, %1090 : vector<2x32xf32>
    %1092 = arith.negf %1091 : vector<2x32xf32>
    %1093 = math.exp %1092 : vector<2x32xf32>
    %cst_410 = arith.constant 1.000000e+00 : f32
    %1094 = vector.broadcast %cst_410 : f32 to vector<2x32xf32>
    %1095 = arith.addf %1094, %1093 : vector<2x32xf32>
    %1096 = arith.divf %1094, %1095 : vector<2x32xf32>
    %1097 = arith.mulf %1084, %1066 : vector<2x32xf32>
    %1098 = arith.mulf %1076, %1088 : vector<2x32xf32>
    %1099 = arith.addf %1097, %1098 : vector<2x32xf32>
    %1100 = math.tanh %1099 : vector<2x32xf32>
    %1101 = arith.mulf %1096, %1100 : vector<2x32xf32>
    %1102 = vector.extract_strided_slice %971 {offsets = [6, 0], sizes = [2, 32], strides = [1, 1]} : vector<16x32xf32> to vector<2x32xf32>
    %cst_411 = arith.constant dense<0.000000e+00> : vector<2x32xf32>
    %1103 = tpu.matmul %1101, %973, %cst_411 {dimension_numbers = #tpu.dot_dimension_numbers<[1], [0], [0], [1], [0, 0, 1, 1], [], []>} : vector<2x32xf32>, vector<32x32xf32>, vector<2x32xf32> -> vector<2x32xf32>
    %1104 = arith.addf %1102, %1103 : vector<2x32xf32>
    %1105 = arith.negf %1104 : vector<2x32xf32>
    %1106 = math.exp %1105 : vector<2x32xf32>
    %cst_412 = arith.constant 1.000000e+00 : f32
    %1107 = vector.broadcast %cst_412 : f32 to vector<2x32xf32>
    %1108 = arith.addf %1107, %1106 : vector<2x32xf32>
    %1109 = arith.divf %1107, %1108 : vector<2x32xf32>
    %1110 = vector.extract_strided_slice %980 {offsets = [6, 0], sizes = [2, 32], strides = [1, 1]} : vector<16x32xf32> to vector<2x32xf32>
    %cst_413 = arith.constant dense<0.000000e+00> : vector<2x32xf32>
    %1111 = tpu.matmul %1101, %982, %cst_413 {dimension_numbers = #tpu.dot_dimension_numbers<[1], [0], [0], [1], [0, 0, 1, 1], [], []>} : vector<2x32xf32>, vector<32x32xf32>, vector<2x32xf32> -> vector<2x32xf32>
    %1112 = arith.addf %1110, %1111 : vector<2x32xf32>
    %1113 = arith.negf %1112 : vector<2x32xf32>
    %1114 = math.exp %1113 : vector<2x32xf32>
    %cst_414 = arith.constant 1.000000e+00 : f32
    %1115 = vector.broadcast %cst_414 : f32 to vector<2x32xf32>
    %1116 = arith.addf %1115, %1114 : vector<2x32xf32>
    %1117 = arith.divf %1115, %1116 : vector<2x32xf32>
    %1118 = vector.extract_strided_slice %989 {offsets = [6, 0], sizes = [2, 32], strides = [1, 1]} : vector<16x32xf32> to vector<2x32xf32>
    %cst_415 = arith.constant dense<0.000000e+00> : vector<2x32xf32>
    %1119 = tpu.matmul %1101, %991, %cst_415 {dimension_numbers = #tpu.dot_dimension_numbers<[1], [0], [0], [1], [0, 0, 1, 1], [], []>} : vector<2x32xf32>, vector<32x32xf32>, vector<2x32xf32> -> vector<2x32xf32>
    %1120 = arith.addf %1118, %1119 : vector<2x32xf32>
    %1121 = math.tanh %1120 : vector<2x32xf32>
    %1122 = vector.extract_strided_slice %998 {offsets = [6, 0], sizes = [2, 32], strides = [1, 1]} : vector<16x32xf32> to vector<2x32xf32>
    %cst_416 = arith.constant dense<0.000000e+00> : vector<2x32xf32>
    %1123 = tpu.matmul %1101, %1000, %cst_416 {dimension_numbers = #tpu.dot_dimension_numbers<[1], [0], [0], [1], [0, 0, 1, 1], [], []>} : vector<2x32xf32>, vector<32x32xf32>, vector<2x32xf32> -> vector<2x32xf32>
    %1124 = arith.addf %1122, %1123 : vector<2x32xf32>
    %1125 = arith.negf %1124 : vector<2x32xf32>
    %1126 = math.exp %1125 : vector<2x32xf32>
    %cst_417 = arith.constant 1.000000e+00 : f32
    %1127 = vector.broadcast %cst_417 : f32 to vector<2x32xf32>
    %1128 = arith.addf %1127, %1126 : vector<2x32xf32>
    %1129 = arith.divf %1127, %1128 : vector<2x32xf32>
    %1130 = arith.mulf %1117, %1099 : vector<2x32xf32>
    %1131 = arith.mulf %1109, %1121 : vector<2x32xf32>
    %1132 = arith.addf %1130, %1131 : vector<2x32xf32>
    %1133 = math.tanh %1132 : vector<2x32xf32>
    %1134 = arith.mulf %1129, %1133 : vector<2x32xf32>
    %1135 = vector.extract_strided_slice %971 {offsets = [8, 0], sizes = [2, 32], strides = [1, 1]} : vector<16x32xf32> to vector<2x32xf32>
    %cst_418 = arith.constant dense<0.000000e+00> : vector<2x32xf32>
    %1136 = tpu.matmul %1134, %973, %cst_418 {dimension_numbers = #tpu.dot_dimension_numbers<[1], [0], [0], [1], [0, 0, 1, 1], [], []>} : vector<2x32xf32>, vector<32x32xf32>, vector<2x32xf32> -> vector<2x32xf32>
    %1137 = arith.addf %1135, %1136 : vector<2x32xf32>
    %1138 = arith.negf %1137 : vector<2x32xf32>
    %1139 = math.exp %1138 : vector<2x32xf32>
    %cst_419 = arith.constant 1.000000e+00 : f32
    %1140 = vector.broadcast %cst_419 : f32 to vector<2x32xf32>
    %1141 = arith.addf %1140, %1139 : vector<2x32xf32>
    %1142 = arith.divf %1140, %1141 : vector<2x32xf32>
    %1143 = vector.extract_strided_slice %980 {offsets = [8, 0], sizes = [2, 32], strides = [1, 1]} : vector<16x32xf32> to vector<2x32xf32>
    %cst_420 = arith.constant dense<0.000000e+00> : vector<2x32xf32>
    %1144 = tpu.matmul %1134, %982, %cst_420 {dimension_numbers = #tpu.dot_dimension_numbers<[1], [0], [0], [1], [0, 0, 1, 1], [], []>} : vector<2x32xf32>, vector<32x32xf32>, vector<2x32xf32> -> vector<2x32xf32>
    %1145 = arith.addf %1143, %1144 : vector<2x32xf32>
    %1146 = arith.negf %1145 : vector<2x32xf32>
    %1147 = math.exp %1146 : vector<2x32xf32>
    %cst_421 = arith.constant 1.000000e+00 : f32
    %1148 = vector.broadcast %cst_421 : f32 to vector<2x32xf32>
    %1149 = arith.addf %1148, %1147 : vector<2x32xf32>
    %1150 = arith.divf %1148, %1149 : vector<2x32xf32>
    %1151 = vector.extract_strided_slice %989 {offsets = [8, 0], sizes = [2, 32], strides = [1, 1]} : vector<16x32xf32> to vector<2x32xf32>
    %cst_422 = arith.constant dense<0.000000e+00> : vector<2x32xf32>
    %1152 = tpu.matmul %1134, %991, %cst_422 {dimension_numbers = #tpu.dot_dimension_numbers<[1], [0], [0], [1], [0, 0, 1, 1], [], []>} : vector<2x32xf32>, vector<32x32xf32>, vector<2x32xf32> -> vector<2x32xf32>
    %1153 = arith.addf %1151, %1152 : vector<2x32xf32>
    %1154 = math.tanh %1153 : vector<2x32xf32>
    %1155 = vector.extract_strided_slice %998 {offsets = [8, 0], sizes = [2, 32], strides = [1, 1]} : vector<16x32xf32> to vector<2x32xf32>
    %cst_423 = arith.constant dense<0.000000e+00> : vector<2x32xf32>
    %1156 = tpu.matmul %1134, %1000, %cst_423 {dimension_numbers = #tpu.dot_dimension_numbers<[1], [0], [0], [1], [0, 0, 1, 1], [], []>} : vector<2x32xf32>, vector<32x32xf32>, vector<2x32xf32> -> vector<2x32xf32>
    %1157 = arith.addf %1155, %1156 : vector<2x32xf32>
    %1158 = arith.negf %1157 : vector<2x32xf32>
    %1159 = math.exp %1158 : vector<2x32xf32>
    %cst_424 = arith.constant 1.000000e+00 : f32
    %1160 = vector.broadcast %cst_424 : f32 to vector<2x32xf32>
    %1161 = arith.addf %1160, %1159 : vector<2x32xf32>
    %1162 = arith.divf %1160, %1161 : vector<2x32xf32>
    %1163 = arith.mulf %1150, %1132 : vector<2x32xf32>
    %1164 = arith.mulf %1142, %1154 : vector<2x32xf32>
    %1165 = arith.addf %1163, %1164 : vector<2x32xf32>
    %1166 = math.tanh %1165 : vector<2x32xf32>
    %1167 = arith.mulf %1162, %1166 : vector<2x32xf32>
    %1168 = vector.extract_strided_slice %971 {offsets = [10, 0], sizes = [2, 32], strides = [1, 1]} : vector<16x32xf32> to vector<2x32xf32>
    %cst_425 = arith.constant dense<0.000000e+00> : vector<2x32xf32>
    %1169 = tpu.matmul %1167, %973, %cst_425 {dimension_numbers = #tpu.dot_dimension_numbers<[1], [0], [0], [1], [0, 0, 1, 1], [], []>} : vector<2x32xf32>, vector<32x32xf32>, vector<2x32xf32> -> vector<2x32xf32>
    %1170 = arith.addf %1168, %1169 : vector<2x32xf32>
    %1171 = arith.negf %1170 : vector<2x32xf32>
    %1172 = math.exp %1171 : vector<2x32xf32>
    %cst_426 = arith.constant 1.000000e+00 : f32
    %1173 = vector.broadcast %cst_426 : f32 to vector<2x32xf32>
    %1174 = arith.addf %1173, %1172 : vector<2x32xf32>
    %1175 = arith.divf %1173, %1174 : vector<2x32xf32>
    %1176 = vector.extract_strided_slice %980 {offsets = [10, 0], sizes = [2, 32], strides = [1, 1]} : vector<16x32xf32> to vector<2x32xf32>
    %cst_427 = arith.constant dense<0.000000e+00> : vector<2x32xf32>
    %1177 = tpu.matmul %1167, %982, %cst_427 {dimension_numbers = #tpu.dot_dimension_numbers<[1], [0], [0], [1], [0, 0, 1, 1], [], []>} : vector<2x32xf32>, vector<32x32xf32>, vector<2x32xf32> -> vector<2x32xf32>
    %1178 = arith.addf %1176, %1177 : vector<2x32xf32>
    %1179 = arith.negf %1178 : vector<2x32xf32>
    %1180 = math.exp %1179 : vector<2x32xf32>
    %cst_428 = arith.constant 1.000000e+00 : f32
    %1181 = vector.broadcast %cst_428 : f32 to vector<2x32xf32>
    %1182 = arith.addf %1181, %1180 : vector<2x32xf32>
    %1183 = arith.divf %1181, %1182 : vector<2x32xf32>
    %1184 = vector.extract_strided_slice %989 {offsets = [10, 0], sizes = [2, 32], strides = [1, 1]} : vector<16x32xf32> to vector<2x32xf32>
    %cst_429 = arith.constant dense<0.000000e+00> : vector<2x32xf32>
    %1185 = tpu.matmul %1167, %991, %cst_429 {dimension_numbers = #tpu.dot_dimension_numbers<[1], [0], [0], [1], [0, 0, 1, 1], [], []>} : vector<2x32xf32>, vector<32x32xf32>, vector<2x32xf32> -> vector<2x32xf32>
    %1186 = arith.addf %1184, %1185 : vector<2x32xf32>
    %1187 = math.tanh %1186 : vector<2x32xf32>
    %1188 = vector.extract_strided_slice %998 {offsets = [10, 0], sizes = [2, 32], strides = [1, 1]} : vector<16x32xf32> to vector<2x32xf32>
    %cst_430 = arith.constant dense<0.000000e+00> : vector<2x32xf32>
    %1189 = tpu.matmul %1167, %1000, %cst_430 {dimension_numbers = #tpu.dot_dimension_numbers<[1], [0], [0], [1], [0, 0, 1, 1], [], []>} : vector<2x32xf32>, vector<32x32xf32>, vector<2x32xf32> -> vector<2x32xf32>
    %1190 = arith.addf %1188, %1189 : vector<2x32xf32>
    %1191 = arith.negf %1190 : vector<2x32xf32>
    %1192 = math.exp %1191 : vector<2x32xf32>
    %cst_431 = arith.constant 1.000000e+00 : f32
    %1193 = vector.broadcast %cst_431 : f32 to vector<2x32xf32>
    %1194 = arith.addf %1193, %1192 : vector<2x32xf32>
    %1195 = arith.divf %1193, %1194 : vector<2x32xf32>
    %1196 = arith.mulf %1183, %1165 : vector<2x32xf32>
    %1197 = arith.mulf %1175, %1187 : vector<2x32xf32>
    %1198 = arith.addf %1196, %1197 : vector<2x32xf32>
    %1199 = math.tanh %1198 : vector<2x32xf32>
    %1200 = arith.mulf %1195, %1199 : vector<2x32xf32>
    %1201 = vector.extract_strided_slice %971 {offsets = [12, 0], sizes = [2, 32], strides = [1, 1]} : vector<16x32xf32> to vector<2x32xf32>
    %cst_432 = arith.constant dense<0.000000e+00> : vector<2x32xf32>
    %1202 = tpu.matmul %1200, %973, %cst_432 {dimension_numbers = #tpu.dot_dimension_numbers<[1], [0], [0], [1], [0, 0, 1, 1], [], []>} : vector<2x32xf32>, vector<32x32xf32>, vector<2x32xf32> -> vector<2x32xf32>
    %1203 = arith.addf %1201, %1202 : vector<2x32xf32>
    %1204 = arith.negf %1203 : vector<2x32xf32>
    %1205 = math.exp %1204 : vector<2x32xf32>
    %cst_433 = arith.constant 1.000000e+00 : f32
    %1206 = vector.broadcast %cst_433 : f32 to vector<2x32xf32>
    %1207 = arith.addf %1206, %1205 : vector<2x32xf32>
    %1208 = arith.divf %1206, %1207 : vector<2x32xf32>
    %1209 = vector.extract_strided_slice %980 {offsets = [12, 0], sizes = [2, 32], strides = [1, 1]} : vector<16x32xf32> to vector<2x32xf32>
    %cst_434 = arith.constant dense<0.000000e+00> : vector<2x32xf32>
    %1210 = tpu.matmul %1200, %982, %cst_434 {dimension_numbers = #tpu.dot_dimension_numbers<[1], [0], [0], [1], [0, 0, 1, 1], [], []>} : vector<2x32xf32>, vector<32x32xf32>, vector<2x32xf32> -> vector<2x32xf32>
    %1211 = arith.addf %1209, %1210 : vector<2x32xf32>
    %1212 = arith.negf %1211 : vector<2x32xf32>
    %1213 = math.exp %1212 : vector<2x32xf32>
    %cst_435 = arith.constant 1.000000e+00 : f32
    %1214 = vector.broadcast %cst_435 : f32 to vector<2x32xf32>
    %1215 = arith.addf %1214, %1213 : vector<2x32xf32>
    %1216 = arith.divf %1214, %1215 : vector<2x32xf32>
    %1217 = vector.extract_strided_slice %989 {offsets = [12, 0], sizes = [2, 32], strides = [1, 1]} : vector<16x32xf32> to vector<2x32xf32>
    %cst_436 = arith.constant dense<0.000000e+00> : vector<2x32xf32>
    %1218 = tpu.matmul %1200, %991, %cst_436 {dimension_numbers = #tpu.dot_dimension_numbers<[1], [0], [0], [1], [0, 0, 1, 1], [], []>} : vector<2x32xf32>, vector<32x32xf32>, vector<2x32xf32> -> vector<2x32xf32>
    %1219 = arith.addf %1217, %1218 : vector<2x32xf32>
    %1220 = math.tanh %1219 : vector<2x32xf32>
    %1221 = vector.extract_strided_slice %998 {offsets = [12, 0], sizes = [2, 32], strides = [1, 1]} : vector<16x32xf32> to vector<2x32xf32>
    %cst_437 = arith.constant dense<0.000000e+00> : vector<2x32xf32>
    %1222 = tpu.matmul %1200, %1000, %cst_437 {dimension_numbers = #tpu.dot_dimension_numbers<[1], [0], [0], [1], [0, 0, 1, 1], [], []>} : vector<2x32xf32>, vector<32x32xf32>, vector<2x32xf32> -> vector<2x32xf32>
    %1223 = arith.addf %1221, %1222 : vector<2x32xf32>
    %1224 = arith.negf %1223 : vector<2x32xf32>
    %1225 = math.exp %1224 : vector<2x32xf32>
    %cst_438 = arith.constant 1.000000e+00 : f32
    %1226 = vector.broadcast %cst_438 : f32 to vector<2x32xf32>
    %1227 = arith.addf %1226, %1225 : vector<2x32xf32>
    %1228 = arith.divf %1226, %1227 : vector<2x32xf32>
    %1229 = arith.mulf %1216, %1198 : vector<2x32xf32>
    %1230 = arith.mulf %1208, %1220 : vector<2x32xf32>
    %1231 = arith.addf %1229, %1230 : vector<2x32xf32>
    %1232 = math.tanh %1231 : vector<2x32xf32>
    %1233 = arith.mulf %1228, %1232 : vector<2x32xf32>
    %1234 = vector.extract_strided_slice %971 {offsets = [14, 0], sizes = [2, 32], strides = [1, 1]} : vector<16x32xf32> to vector<2x32xf32>
    %cst_439 = arith.constant dense<0.000000e+00> : vector<2x32xf32>
    %1235 = tpu.matmul %1233, %973, %cst_439 {dimension_numbers = #tpu.dot_dimension_numbers<[1], [0], [0], [1], [0, 0, 1, 1], [], []>} : vector<2x32xf32>, vector<32x32xf32>, vector<2x32xf32> -> vector<2x32xf32>
    %1236 = arith.addf %1234, %1235 : vector<2x32xf32>
    %1237 = arith.negf %1236 : vector<2x32xf32>
    %1238 = math.exp %1237 : vector<2x32xf32>
    %cst_440 = arith.constant 1.000000e+00 : f32
    %1239 = vector.broadcast %cst_440 : f32 to vector<2x32xf32>
    %1240 = arith.addf %1239, %1238 : vector<2x32xf32>
    %1241 = arith.divf %1239, %1240 : vector<2x32xf32>
    %1242 = vector.extract_strided_slice %980 {offsets = [14, 0], sizes = [2, 32], strides = [1, 1]} : vector<16x32xf32> to vector<2x32xf32>
    %cst_441 = arith.constant dense<0.000000e+00> : vector<2x32xf32>
    %1243 = tpu.matmul %1233, %982, %cst_441 {dimension_numbers = #tpu.dot_dimension_numbers<[1], [0], [0], [1], [0, 0, 1, 1], [], []>} : vector<2x32xf32>, vector<32x32xf32>, vector<2x32xf32> -> vector<2x32xf32>
    %1244 = arith.addf %1242, %1243 : vector<2x32xf32>
    %1245 = arith.negf %1244 : vector<2x32xf32>
    %1246 = math.exp %1245 : vector<2x32xf32>
    %cst_442 = arith.constant 1.000000e+00 : f32
    %1247 = vector.broadcast %cst_442 : f32 to vector<2x32xf32>
    %1248 = arith.addf %1247, %1246 : vector<2x32xf32>
    %1249 = arith.divf %1247, %1248 : vector<2x32xf32>
    %1250 = vector.extract_strided_slice %989 {offsets = [14, 0], sizes = [2, 32], strides = [1, 1]} : vector<16x32xf32> to vector<2x32xf32>
    %cst_443 = arith.constant dense<0.000000e+00> : vector<2x32xf32>
    %1251 = tpu.matmul %1233, %991, %cst_443 {dimension_numbers = #tpu.dot_dimension_numbers<[1], [0], [0], [1], [0, 0, 1, 1], [], []>} : vector<2x32xf32>, vector<32x32xf32>, vector<2x32xf32> -> vector<2x32xf32>
    %1252 = arith.addf %1250, %1251 : vector<2x32xf32>
    %1253 = math.tanh %1252 : vector<2x32xf32>
    %1254 = vector.extract_strided_slice %998 {offsets = [14, 0], sizes = [2, 32], strides = [1, 1]} : vector<16x32xf32> to vector<2x32xf32>
    %cst_444 = arith.constant dense<0.000000e+00> : vector<2x32xf32>
    %1255 = tpu.matmul %1233, %1000, %cst_444 {dimension_numbers = #tpu.dot_dimension_numbers<[1], [0], [0], [1], [0, 0, 1, 1], [], []>} : vector<2x32xf32>, vector<32x32xf32>, vector<2x32xf32> -> vector<2x32xf32>
    %1256 = arith.addf %1254, %1255 : vector<2x32xf32>
    %1257 = arith.negf %1256 : vector<2x32xf32>
    %1258 = math.exp %1257 : vector<2x32xf32>
    %cst_445 = arith.constant 1.000000e+00 : f32
    %1259 = vector.broadcast %cst_445 : f32 to vector<2x32xf32>
    %1260 = arith.addf %1259, %1258 : vector<2x32xf32>
    %1261 = arith.divf %1259, %1260 : vector<2x32xf32>
    %1262 = arith.mulf %1249, %1231 : vector<2x32xf32>
    %1263 = arith.mulf %1241, %1253 : vector<2x32xf32>
    %1264 = arith.addf %1262, %1263 : vector<2x32xf32>
    %1265 = math.tanh %1264 : vector<2x32xf32>
    %1266 = arith.mulf %1261, %1265 : vector<2x32xf32>
    %c0_446 = arith.constant 0 : index
    %c0_447 = arith.constant 0 : index
    %1267 = vector.load %arg8[%c0_446, %c0_447] : memref<32x16xf32, #tpu.memory_space<vmem>>, vector<32x16xf32>
    %cst_448 = arith.constant dense<0.000000e+00> : vector<2x16xf32>
    %1268 = tpu.matmul %1266, %1267, %cst_448 {dimension_numbers = #tpu.dot_dimension_numbers<[1], [0], [0], [1], [0, 0, 1, 1], [], []>} : vector<2x32xf32>, vector<32x16xf32>, vector<2x16xf32> -> vector<2x16xf32>
    %c0_449 = arith.constant 0 : index
    %c0_450 = arith.constant 0 : index
    %1269 = vector.load %arg9[%c0_449, %c0_450] : memref<1x16xf32, #tpu.memory_space<vmem>>, vector<1x16xf32>
    %1270 = vector.broadcast %1269 : vector<1x16xf32> to vector<2x16xf32>
    %1271 = arith.addf %1268, %1270 : vector<2x16xf32>
    %c0_451 = arith.constant 0 : index
    %c0_452 = arith.constant 0 : index
    %1272 = vector.load %arg10[%c0_451, %c0_452] : memref<1x16xf32, #tpu.memory_space<vmem>>, vector<1x16xf32>
    %c0_453 = arith.constant 0 : index
    %c0_454 = arith.constant 0 : index
    %1273 = vector.load %arg11[%c0_453, %c0_454] : memref<1x16xf32, #tpu.memory_space<vmem>>, vector<1x16xf32>
    %cst_455 = arith.constant dense<0.000000e+00> : vector<2xf32>
    %1274 = vector.multi_reduction <add>, %1271, %cst_455 [1] : vector<2x16xf32> to vector<2xf32>
    %1275 = vector.shape_cast %1274 : vector<2xf32> to vector<2x1xf32>
    %cst_456 = arith.constant 1.600000e+01 : f32
    %1276 = vector.broadcast %cst_456 : f32 to vector<2x1xf32>
    %1277 = arith.divf %1275, %1276 : vector<2x1xf32>
    %1278 = vector.broadcast %1277 : vector<2x1xf32> to vector<2x16xf32>
    %1279 = arith.subf %1271, %1278 : vector<2x16xf32>
    %1280 = arith.mulf %1279, %1279 : vector<2x16xf32>
    %cst_457 = arith.constant dense<0.000000e+00> : vector<2xf32>
    %1281 = vector.multi_reduction <add>, %1280, %cst_457 [1] : vector<2x16xf32> to vector<2xf32>
    %1282 = vector.shape_cast %1281 : vector<2xf32> to vector<2x1xf32>
    %cst_458 = arith.constant 1.600000e+01 : f32
    %1283 = vector.broadcast %cst_458 : f32 to vector<2x1xf32>
    %1284 = arith.divf %1282, %1283 : vector<2x1xf32>
    %1285 = vector.broadcast %1277 : vector<2x1xf32> to vector<2x16xf32>
    %1286 = arith.subf %1271, %1285 : vector<2x16xf32>
    %cst_459 = arith.constant 9.99999974E-6 : f32
    %1287 = vector.broadcast %cst_459 : f32 to vector<2x1xf32>
    %1288 = arith.addf %1284, %1287 : vector<2x1xf32>
    %1289 = math.rsqrt %1288 : vector<2x1xf32>
    %1290 = vector.broadcast %1289 : vector<2x1xf32> to vector<2x16xf32>
    %1291 = arith.mulf %1286, %1290 : vector<2x16xf32>
    %1292 = vector.broadcast %1272 : vector<1x16xf32> to vector<2x16xf32>
    %1293 = arith.mulf %1291, %1292 : vector<2x16xf32>
    %1294 = vector.broadcast %1273 : vector<1x16xf32> to vector<2x16xf32>
    %1295 = arith.addf %1293, %1294 : vector<2x16xf32>
    %cst_460 = arith.constant 0.000000e+00 : f32
    %1296 = vector.broadcast %cst_460 : f32 to vector<2x16xf32>
    %1297 = arith.maximumf %1295, %1296 : vector<2x16xf32>
    %c0_461 = arith.constant 0 : index
    %c0_462 = arith.constant 0 : index
    %1298 = vector.load %arg12[%c0_461, %c0_462] : memref<16x1xf32, #tpu.memory_space<vmem>>, vector<16x1xf32>
    %cst_463 = arith.constant dense<0.000000e+00> : vector<2x1xf32>
    %1299 = tpu.matmul %1297, %1298, %cst_463 {dimension_numbers = #tpu.dot_dimension_numbers<[1], [0], [0], [1], [0, 0, 1, 1], [], []>} : vector<2x16xf32>, vector<16x1xf32>, vector<2x1xf32> -> vector<2x1xf32>
    %c0_464 = arith.constant 0 : index
    %c0_465 = arith.constant 0 : index
    %1300 = vector.load %arg13[%c0_464, %c0_465] : memref<1x1xf32, #tpu.memory_space<vmem>>, vector<1x1xf32>
    %1301 = vector.broadcast %1300 : vector<1x1xf32> to vector<2x1xf32>
    %1302 = arith.addf %1299, %1301 : vector<2x1xf32>
    %c0_466 = arith.constant 0 : index
    %c0_467 = arith.constant 0 : index
    %1303 = vector.load %arg14[%c0_466, %c0_467] : memref<2x1xf32, #tpu.memory_space<vmem>>, vector<2x1xf32>
    tpu.vector_store %arg14[%c0_466, %c0_467], %1302 {strides = array<i32>} : memref<2x1xf32, #tpu.memory_space<vmem>>, vector<2x1xf32>,
    return
  }
}

</mosaic_0001>

<bundles_post_ra>
// kernel: tsf_forward.1
= control target key start
LH: loop header
LB: loop body
LE: loop exit
PB: predicated region body
PF: predicated region fallthrough
CT: control target
= control target key end

     0   :  { %vm66_vm0 = vcmask 1043456   ;;  %vm59_vm1 = vcmask 31744   ;;  %vm147_vm2 = vcmask 261120   ;;  %v15618_v56 = vmov 0.0   ;;  %s18331_s1 = inlined_call_operand.vmem [shape: f32[4,32], index: 1, kind: input, shape index: {}]   ;;  %s18332_s0 = inlined_call_operand.vmem [shape: f32[16,4], index: 0, kind: input, shape index: {}]   ;;  %s18333_s2 = inlined_call_operand.vmem [shape: f32[1,32], index: 2, kind: input, shape index: {}]   ;;  %s18334_s5 = inlined_call_operand.vmem [shape: f32[16,32,32], index: 5, kind: input, shape index: {}]   ;;  %s18335_s3 = inlined_call_operand.vmem [shape: f32[1,32], index: 3, kind: input, shape index: {}]   ;;  %s18336_s4 = inlined_call_operand.vmem [shape: f32[1,32], index: 4, kind: input, shape index: {}]   ;;  %s18337_s6 = inlined_call_operand.vmem [shape: f32[16,32,32], index: 6, kind: input, shape index: {}]   ;;  %s18338_s7 = inlined_call_operand.vmem [shape: f32[16,1,32], index: 7, kind: input, shape index: {}]   ;;  %s18339_s8 = inlined_call_operand.vmem [shape: f32[32,16], index: 8, kind: input, shape index: {}]   ;;  %s18340_s9 = inlined_call_operand.vmem [shape: f32[1,16], index: 9, kind: input, shape index: {}]   ;;  %s18341_s12 = inlined_call_operand.vmem [shape: f32[16,1], index: 12, kind: input, shape index: {}]   ;;  %s18342_s13 = inlined_call_operand.<no memory space> [shape: f32[1,1], index: 13, kind: input, shape index: {}]   ;;  %s18343_s10 = inlined_call_operand.vmem [shape: f32[1,16], index: 10, kind: input, shape index: {}]   ;;  %s18344_s11 = inlined_call_operand.vmem [shape: f32[1,16], index: 11, kind: input, shape index: {}]   ;;  %s18345_s14 = inlined_call_operand.vmem [shape: f32[2,1], index: 14, kind: output, shape index: {}]  }
   0x1   :  { %v51_v0 = vld [vmem:[%s18331_s1] sm:$0xf]  ;;  %v50_v2 = vld [vmem:[%s18332_s0 + $0x8] sm:$0xff]  ;;  %v196_v20 = vld [vmem:[%s18334_s5 + $0x18] sm:$0xff]  ;;  %vm15619_vm3 = vmmov 0   ;;  %vm879_vm4 = vcmask 254976  }
   0x2   :  { %v49_v1 = vld [vmem:[%s18332_s0] sm:$0xff]  ;;  %13427 = vmatprep.subr.msk.mxu0 %vm66_vm0, %v51_v0  ;;  %v12289_v21 = vld [vmem:[%s18334_s5 + $0x38] sm:$0xff]  ;;  %v195_v22 = vld [vmem:[%s18334_s5 + $0x10] sm:$0xff]  ;;  %13432 = vmatprep.subr.mxu1 %v196_v20  ;;  %vm1207_vm5 = vcmask 257026   ;;  %vm1536_vm6 = vcmask 259076   ;;  %vm1865_vm7 = vcmask 261126  }
   0x3   :  { %13429 = vmatprep.mubr.msk.f32.mxu0 %vm59_vm1, %v49_v1  ;;  %13428 = vmatpush3.msk.msra.mxu0 %vm66_vm0, %v51_v0  ;;  %v12277_v4 = vld [vmem:[%s18333_s2] ss:$0 sm:$0xff]  ;;  %v12288_v23 = vld [vmem:[%s18334_s5 + $0x30] sm:$0xff]  ;;  %v194_v24 = vld [vmem:[%s18334_s5 + $0x8] sm:$0xff]  ;;  %vm12158_vm8 = vcmask 123904   ;;  %vm12197_vm9 = vcmask 130048  }
   0x4   :  { %13430 = vmatmul.mubr.msk.f32.vlgmr.msra.gmra.mxu0 %vm59_vm1, %v50_v2  ;;  %13443 = vmatprep.subr.mxu0 %v12289_v21  ;;  %v12287_v25 = vld [vmem:[%s18334_s5 + $0x28] sm:$0xff]  ;;  %v193_v26 = vld [vmem:[%s18334_s5] sm:$0xff]  ;;  %v12301_v28 = vld [vmem:[%s18334_s5 + $0x58] sm:$0xff]  ;;  %vm12271_vm10 = vcmask 1024  }
   0x5   :  { %13433 = vmatpush3.msra.mxu1 %v196_v20  ;;  %13444 = vmatpush3.msra.mxu0 %v12289_v21  ;;  %v12286_v27 = vld [vmem:[%s18334_s5 + $0x20] sm:$0xff]  ;;  %v12313_v29 = vld [vmem:[%s18334_s5 + $0x78] sm:$0xff]  ;;  %v12300_v48 = vld [vmem:[%s18334_s5 + $0x50] sm:$0xff] }
   0x6   :  { %13434 = vmatprep.subr.mxu1 %v195_v22  ;;  %13445 = vmatprep.subr.mxu0 %v12288_v23  ;;  %v12281_v37 = vld [vmem:[%s18335_s3] ss:$0 sm:$0xff]  ;;  %v12312_v49 = vld [vmem:[%s18334_s5 + $0x70] sm:$0xff]  ;;  %v12299_v50 = vld [vmem:[%s18334_s5 + $0x48] sm:$0xff] }
   0x7   :  { %13435 = vmatpush3.msra.mxu1 %v195_v22  ;;  %13446 = vmatpush3.msra.mxu0 %v12288_v23  ;;  %v12282_v39 = vld [vmem:[%s18336_s4] ss:$0 sm:$0xff]  ;;  %v12311_v51 = vld [vmem:[%s18334_s5 + $0x68] sm:$0xff]  ;;  %v15774_v54 = vld [vmem:[%s18337_s6 + $0x18] sm:$0xff] }
   0x8   :  { %13436 = vmatprep.subr.mxu1 %v194_v24  ;;  %13447 = vmatprep.subr.mxu0 %v12287_v25  ;;  %v12298_v52 = vld [vmem:[%s18334_s5 + $0x40] sm:$0xff]  ;;  %v15779_v55 = vld [vmem:[%s18337_s6 + $0x38] sm:$0xff]  ;;  %v15788_v57 = vld [vmem:[%s18337_s6 + $0x10] sm:$0xff] }
   0x9   :  { %13437 = vmatpush3.msra.mxu1 %v194_v24  ;;  %13448 = vmatpush3.msra.mxu0 %v12287_v25  ;;  %v12310_v53 = vld [vmem:[%s18334_s5 + $0x60] sm:$0xff]  ;;  %v15793_v58 = vld [vmem:[%s18337_s6 + $0x30] sm:$0xff]  ;;  %v15802_v59 = vld [vmem:[%s18337_s6 + $0x8] sm:$0xff] }
   0xa   :  { %13438 = vmatprep.subr.mxu1 %v193_v26  ;;  %13449 = vmatprep.subr.mxu0 %v12286_v27  ;;  %v15807_v60 = vld [vmem:[%s18337_s6 + $0x28] sm:$0xff]  ;;  %v15816_v61 = vld [vmem:[%s18337_s6] sm:$0xff]  ;;  %v15836_v63 = vld [vmem:[%s18337_s6 + $0x58] sm:$0xff] }
   0xb   :  { %13439 = vmatpush3.msra.mxu1 %v193_v26  ;;  %13450 = vmatpush3.msra.mxu0 %v12286_v27  ;;  %v15823_v62 = vld [vmem:[%s18337_s6 + $0x20] sm:$0xff]  ;;  %v15841_v0 = vld [vmem:[%s18337_s6 + $0x78] sm:$0xff]  ;;  %v15850_v1 = vld [vmem:[%s18337_s6 + $0x50] sm:$0xff] }
   0xc   :  { %13454 = vmatprep.subr.mxu1 %v12301_v28  ;;  %13465 = vmatprep.subr.mxu0 %v12313_v29  ;;  %v15855_v2 = vld [vmem:[%s18337_s6 + $0x70] sm:$0xff] }
  0xc4   :  { %v13431_v3 = vpop.f32.mrf.mxu0 }
  0xc5   :  { %v142_v7 = vadd.f32 %v13431_v3, %v12277_v4  ;;  %v15864_v3 = vld [vmem:[%s18337_s6 + $0x48] sm:$0xff] }
  0xc6   :  { %v136_v5 = vpop.f32.mrf.mxu0 }
  0xc7   :  { %v137_v6 = vadd.f32 %v12277_v4, %v136_v5  ;;  %v151_v9 = vsel %vm147_vm2, %v142_v7, 0.0  ;;  %v15869_v4 = vld [vmem:[%s18337_s6 + $0x68] sm:$0xff]  ;;  %v15878_v5 = vld [vmem:[%s18337_s6 + $0x40] sm:$0xff] }
  0xc9   :  { %v148_v8 = vsel %vm147_vm2, %v137_v6, 0.0 }
  0xca   :  { %149 = vadd.xlane.f32.xlu0 %v148_v8  ;;  %v12291_v8 = vld [vmem:[%s18338_s7 + $0x1] ss:$0 sm:$0xff] }
  0xce   :  { %152 = vadd.xlane.f32.xlu0 %v151_v9 }
 0x153   :  { %v150_v10 = vpop.xlane.xlu0 %149 }
 0x154   :  { %v155_v11 = vmul.f32 0.03125, %v150_v10 }
 0x156   :  { %v157_v12 = vsub.f32 %v137_v6, %v155_v11  ;;  %v15885_v6 = vld [vmem:[%s18337_s6 + $0x60] sm:$0xff] }
 0x157   :  { %v153_v13 = vpop.xlane.xlu0 %152 }
 0x158   :  { %v156_v14 = vmul.f32 0.03125, %v153_v13  ;;  %v159_v15 = vmul.f32 %v157_v12, %v157_v12 }
 0x15a   :  { %v158_v16 = vsub.f32 %v142_v7, %v156_v14  ;;  %v161_v17 = vsel %vm147_vm2, %v159_v15, 0.0  ;;  %v12283_v7 = vld [vmem:[%s18338_s7] ss:$0 sm:$0xff]  ;;  %v12303_v15 = vld [vmem:[%s18338_s7 + $0x2] ss:$0 sm:$0xff] }
 0x15b   :  { %162 = vadd.xlane.f32.xlu1 %v161_v17 }
 0x15c   :  { %v160_v18 = vmul.f32 %v158_v16, %v158_v16 }
 0x15e   :  { %v164_v19 = vsel %vm147_vm2, %v160_v18, 0.0 }
 0x15f   :  { %165 = vadd.xlane.f32.xlu1 %v164_v19 }
 0x1e4   :  { %v163_v30 = vpop.xlane.xlu1 %162 }
 0x1e5   :  { %v167_v31 = vmul.f32 0.03125, %v163_v30 }
 0x1e7   :  { %v169_v32 = vadd.f32 1e-05, %v167_v31 }
 0x1e8   :  { %v166_v33 = vpop.xlane.xlu1 %165 }
 0x1e9   :  { %15036 = vrsqrt.f32 %v169_v32  ;;  %v168_v34 = vmul.f32 0.03125, %v166_v33 }
 0x1eb   :  { %v170_v35 = vadd.f32 1e-05, %v168_v34 }
 0x1ed   :  { %15038 = vrsqrt.f32 %v170_v35 }
 0x1f6   :  { %v15037_v36 = vpop.eup %15036 }
 0x1f7   :  { %v173_v38 = vmul.f32 %v15037_v36, %v157_v12 }
 0x1f9   :  { %v181_v40 = vmul.f32 %v12281_v37, %v173_v38 }
 0x1fa   :  { %v15039_v41 = vpop.eup %15038 }
 0x1fb   :  { %v189_v42 = vadd.f32 %v12282_v39, %v181_v40  ;;  %v174_v43 = vmul.f32 %v15039_v41, %v158_v16  ;;  %v12315_v16 = vld [vmem:[%s18338_s7 + $0x3] ss:$0 sm:$0xff] }
 0x1fd   :  { %v191_v44 = vmax.f32 %v189_v42, 0.0  ;;  %v182_v45 = vmul.f32 %v12281_v37, %v174_v43 }
 0x1ff   :  { %13440 = vmatprep.mubr.msk.f32.mxu1 %vm147_vm2, %v191_v44  ;;  %13451 = vmatprep.mubr.msk.f32.mxu0 %vm147_vm2, %v191_v44  ;;  %v190_v46 = vadd.f32 %v12282_v39, %v182_v45 }
 0x201   :  { %v192_v47 = vmax.f32 %v190_v46, 0.0 }
 0x203   :  { %13441 = vmatmul.mubr.msk.f32.vlgmr.msra.gmra.mxu1 %vm147_vm2, %v192_v47  ;;  %13452 = vmatmul.mubr.msk.f32.vlgmr.msra.gmra.mxu0 %vm147_vm2, %v192_v47 }
 0x204   :  { %13455 = vmatpush3.msra.mxu1 %v12301_v28  ;;  %13466 = vmatpush3.msra.mxu0 %v12313_v29 }
 0x205   :  { %13456 = vmatprep.subr.mxu1 %v12300_v48  ;;  %13462 = vmatprep.mubr.msk.f32.mxu1 %vm147_vm2, %v191_v44 }
 0x206   :  { %13467 = vmatprep.subr.mxu0 %v12312_v49  ;;  %13473 = vmatprep.mubr.msk.f32.mxu0 %vm147_vm2, %v191_v44 }
 0x207   :  { %13457 = vmatpush3.msra.mxu1 %v12300_v48  ;;  %13468 = vmatpush3.msra.mxu0 %v12312_v49 }
 0x208   :  { %13458 = vmatprep.subr.mxu1 %v12299_v50  ;;  %13469 = vmatprep.subr.mxu0 %v12311_v51 }
 0x209   :  { %13459 = vmatpush3.msra.mxu1 %v12299_v50  ;;  %13470 = vmatpush3.msra.mxu0 %v12311_v51 }
 0x20a   :  { %13460 = vmatprep.subr.mxu1 %v12298_v52  ;;  %13471 = vmatprep.subr.mxu0 %v12310_v53 }
 0x20b   :  { %13461 = vmatpush3.msra.mxu1 %v12298_v52  ;;  %13472 = vmatpush3.msra.mxu0 %v12310_v53 }
 0x20c   :  { %13463 = vmatmul.mubr.msk.f32.vlgmr.msra.gmra.mxu1 %vm147_vm2, %v192_v47  ;;  %13474 = vmatmul.mubr.msk.f32.vlgmr.msra.gmra.mxu0 %vm147_vm2, %v192_v47 }
 0x20d   :  { %13476 = vmatprep.subr.mxu1 %v15618_v56  ;;  %13487 = vmatprep.subr.mxu0 %v15618_v56 }
 0x20e   :  { %13477 = vmatpush3.msra.mxu1 %v15774_v54  ;;  %13488 = vmatpush3.msra.mxu0 %v15779_v55 }
 0x20f   :  { %13478 = vmatprep.subr.mxu1 %v15618_v56  ;;  %13489 = vmatprep.subr.mxu0 %v15618_v56 }
 0x210   :  { %13479 = vmatpush3.msra.mxu1 %v15788_v57  ;;  %13490 = vmatpush3.msra.mxu0 %v15793_v58 }
 0x211   :  { %13480 = vmatprep.subr.mxu1 %v15618_v56  ;;  %13491 = vmatprep.subr.mxu0 %v15618_v56 }
 0x212   :  { %13481 = vmatpush3.msra.mxu1 %v15802_v59  ;;  %13492 = vmatpush3.msra.mxu0 %v15807_v60 }
 0x213   :  { %13482 = vmatprep.subr.mxu1 %v15618_v56  ;;  %13493 = vmatprep.subr.mxu0 %v15618_v56 }
 0x214   :  { %13483 = vmatpush3.msra.mxu1 %v15816_v61  ;;  %13484 = vmatprep.mubr.msk.f32.mxu1 %vm15619_vm3, %v15618_v56 }
 0x215   :  { %13494 = vmatpush3.msra.mxu0 %v15823_v62  ;;  %13495 = vmatprep.mubr.msk.f32.mxu0 %vm15619_vm3, %v15618_v56 }
 0x216   :  { %13485 = vmatmul.mubr.f32.vlgmr.msra.gmra.mxu1 %v15618_v56  ;;  %13496 = vmatmul.mubr.f32.vlgmr.msra.gmra.mxu0 %v15618_v56 }
 0x217   :  { %13498 = vmatprep.subr.mxu1 %v15618_v56  ;;  %13509 = vmatprep.subr.mxu0 %v15618_v56 }
 0x218   :  { %13499 = vmatpush3.msra.mxu1 %v15836_v63  ;;  %13510 = vmatpush3.msra.mxu0 %v15841_v0 }
 0x219   :  { %13500 = vmatprep.subr.mxu1 %v15618_v56  ;;  %13511 = vmatprep.subr.mxu0 %v15618_v56 }
 0x21a   :  { %13501 = vmatpush3.msra.mxu1 %v15850_v1  ;;  %13512 = vmatpush3.msra.mxu0 %v15855_v2 }
 0x21b   :  { %13502 = vmatprep.subr.mxu1 %v15618_v56  ;;  %13513 = vmatprep.subr.mxu0 %v15618_v56 }
 0x21c   :  { %13503 = vmatpush3.msra.mxu1 %v15864_v3  ;;  %13514 = vmatpush3.msra.mxu0 %v15869_v4 }
 0x21d   :  { %13504 = vmatprep.subr.mxu1 %v15618_v56  ;;  %13515 = vmatprep.subr.mxu0 %v15618_v56 }
 0x21e   :  { %13505 = vmatpush3.msra.mxu1 %v15878_v5  ;;  %13506 = vmatprep.mubr.msk.f32.mxu1 %vm15619_vm3, %v15618_v56 }
 0x21f   :  { %13516 = vmatpush3.msra.mxu0 %v15885_v6  ;;  %13517 = vmatprep.mubr.msk.f32.mxu0 %vm15619_vm3, %v15618_v56 }
 0x220   :  { %13507 = vmatmul.mubr.f32.vlgmr.msra.gmra.mxu1 %v15618_v56  ;;  %13518 = vmatmul.mubr.f32.vlgmr.msra.gmra.mxu0 %v15618_v56 }
 0x221   :  { %13520 = vmatprep.subr.mxu1 %v15618_v56  ;;  %13531 = vmatprep.subr.mxu0 %v15618_v56 }
 0x222   :  { %13521 = vmatpush3.msra.mxu1 %v15774_v54  ;;  %13532 = vmatpush3.msra.mxu0 %v15779_v55 }
 0x223   :  { %13522 = vmatprep.subr.mxu1 %v15618_v56  ;;  %13533 = vmatprep.subr.mxu0 %v15618_v56 }
 0x224   :  { %13523 = vmatpush3.msra.mxu1 %v15788_v57  ;;  %13534 = vmatpush3.msra.mxu0 %v15793_v58 }
 0x225   :  { %13524 = vmatprep.subr.mxu1 %v15618_v56  ;;  %13535 = vmatprep.subr.mxu0 %v15618_v56 }
 0x226   :  { %13525 = vmatpush3.msra.mxu1 %v15802_v59  ;;  %13536 = vmatpush3.msra.mxu0 %v15807_v60 }
 0x227   :  { %13526 = vmatprep.subr.mxu1 %v15618_v56  ;;  %13537 = vmatprep.subr.mxu0 %v15618_v56 }
 0x228   :  { %13527 = vmatpush3.msra.mxu1 %v15816_v61  ;;  %13538 = vmatpush3.msra.mxu0 %v15823_v62 }
 0x229   :  { %13528 = vmatprep.mubr.msk.f32.mxu1 %vm15619_vm3, %v15618_v56  ;;  %13539 = vmatprep.mubr.msk.f32.mxu0 %vm15619_vm3, %v15618_v56 }
 0x22a   :  { %13542 = vmatprep.subr.mxu1 %v15618_v56  ;;  %13553 = vmatprep.subr.mxu0 %v15618_v56 }
 0x2c3   :  { %v13442_v9 = vpop.f32.mrf.mxu1  ;;  %v13453_v10 = vpop.f32.mrf.mxu0 }
 0x2c4   :  { %v15925_v11 = vadd.f32 %v13442_v9, %v12283_v7  ;;  %v15927_v12 = vadd.f32 %v13453_v10, %v12291_v8 }
 0x2c5   :  { %v276_v13 = vpop.f32.mrf.mxu1  ;;  %v368_v14 = vpop.f32.mrf.mxu0 }
 0x2c6   :  { %v15939_v23 = vadd.f32 %v12283_v7, %v276_v13  ;;  %v15941_v24 = vadd.f32 %v12291_v8, %v368_v14 }
 0x2cc   :  { %v13464_v17 = vpop.f32.mrf.mxu1  ;;  %v13475_v18 = vpop.f32.mrf.mxu0 }
 0x2cd   :  { %v15935_v19 = vadd.f32 %v13464_v17, %v12303_v15  ;;  %v15937_v20 = vadd.f32 %v13475_v18, %v12315_v16 }
 0x2ce   :  { %v461_v21 = vpop.f32.mrf.mxu1  ;;  %v554_v22 = vpop.f32.mrf.mxu0 }
 0x2cf   :  { %v15945_v33 = vadd.f32 %v12315_v16, %v554_v22  ;;  %v15948_v39 = vadd.f32 %v12303_v15, %v461_v21 }
 0x2d6   :  { %v637_v25 = vpop.f32.mrf.mxu1  ;;  %v714_v26 = vpop.f32.mrf.mxu0 }
 0x2d7   :  { %v641_v27 = vadd.f32 %v637_v25, %v15939_v23  ;;  %v718_v28 = vadd.f32 %v714_v26, %v15941_v24 }
 0x2d8   :  { %v13486_v29 = vpop.f32.mrf.mxu1  ;;  %v13497_v30 = vpop.f32.mrf.mxu0 }
 0x2d9   :  { %v12322_v31 = vmul.f32 -1.442695, %v641_v27  ;;  %v12323_v32 = vmul.f32 -1.442695, %v718_v28 }
 0x2db   :  { %15040 = vpow2.f32 %v12322_v31 }
 0x2dc   :  { %15042 = vpow2.f32 %v12323_v32 }
 0x2e0   :  { %v791_v34 = vpop.f32.mrf.mxu1  ;;  %v863_v35 = vpop.f32.mrf.mxu0 }
 0x2e1   :  { %v867_v36 = vadd.f32 %v863_v35, %v15945_v33  ;;  %v795_v41 = vadd.f32 %v791_v34, %v15948_v39 }
 0x2e2   :  { %v13508_v37 = vpop.f32.mrf.mxu1  ;;  %v13519_v38 = vpop.f32.mrf.mxu0 }
 0x2e3   :  { %v12324_v40 = vmul.f32 -1.442695, %v867_v36 }
 0x2e5   :  { %15044 = vpow2.f32 %v12324_v40 }
 0x2e6   :  { %15046 = vtanh.f32 %v795_v41 }
 0x2e8   :  { %v15041_v42 = vpop.eup %15040 }
 0x2e9   :  { %v15043_v43 = vpop.eup %15042  ;;  %v645_v44 = vadd.f32 1.0, %v15041_v42 }
 0x2ea   :  { %v722_v45 = vadd.f32 1.0, %v15043_v43 }
 0x2eb   :  { %15048 = vrcp.f32 %v645_v44 }
 0x2ec   :  { %15050 = vrcp.f32 %v722_v45 }
 0x2f2   :  { %v15045_v46 = vpop.eup %15044 }
 0x2f3   :  { %v15047_v47 = vpop.eup %15046  ;;  %v871_v51 = vadd.f32 1.0, %v15045_v46 }
 0x2f5   :  { %15052 = vrcp.f32 %v871_v51 }
 0x2f8   :  { %v15049_v48 = vpop.eup %15048 }
 0x2f9   :  { %v15051_v49 = vpop.eup %15050  ;;  %v875_v50 = vmul.f32 %v15049_v48, %v15047_v47 }
 0x2fa   :  { %v874_v52 = vmul.f32 0.0, %v15051_v49 }
 0x2fc   :  { %v15951_v53 = vadd.f32 %v875_v50, %v874_v52 }
 0x2fe   :  { %15054 = vtanh.f32 %v15951_v53  ;;  %v1200_v44 = vrot.slane %v15951_v53, 6 }
 0x302   :  { %v15053_v7 = vpop.eup %15052 }
 0x30b   :  { %v15055_v8 = vpop.eup %15054 }
 0x30c   :  { %v878_v9 = vmul.f32 %v15055_v8, %v15053_v7 }
 0x30e   :  { %880 = vst.msk [vmem:[#allocation2] sm:$0x3] %vm879_vm4, %v878_v9  ;;  %13529 = vmatmul.mubr.msk.f32.vlgmr.msra.gmra.mxu1 %vm147_vm2, %v878_v9  ;;  %13540 = vmatmul.mubr.msk.f32.vlgmr.msra.gmra.mxu0 %vm147_vm2, %v878_v9 }
 0x30f   :  { %13543 = vmatpush3.msra.mxu1 %v15836_v63  ;;  %13554 = vmatpush3.msra.mxu0 %v15841_v0 }
 0x310   :  { %13544 = vmatprep.subr.mxu1 %v15618_v56  ;;  %13555 = vmatprep.subr.mxu0 %v15618_v56 }
 0x311   :  { %13545 = vmatpush3.msra.mxu1 %v15850_v1  ;;  %13556 = vmatpush3.msra.mxu0 %v15855_v2 }
 0x312   :  { %13546 = vmatprep.subr.mxu1 %v15618_v56  ;;  %13557 = vmatprep.subr.mxu0 %v15618_v56 }
 0x313   :  { %13547 = vmatpush3.msra.mxu1 %v15864_v3  ;;  %13558 = vmatpush3.msra.mxu0 %v15869_v4 }
 0x314   :  { %13548 = vmatprep.subr.mxu1 %v15618_v56  ;;  %13559 = vmatprep.subr.mxu0 %v15618_v56 }
 0x315   :  { %13549 = vmatpush3.msra.mxu1 %v15878_v5  ;;  %13550 = vmatprep.mubr.msk.f32.mxu1 %vm15619_vm3, %v15618_v56 }
 0x316   :  { %13560 = vmatpush3.msra.mxu0 %v15885_v6  ;;  %13561 = vmatprep.mubr.msk.f32.mxu0 %vm15619_vm3, %v15618_v56 }
 0x317   :  { %13551 = vmatmul.mubr.msk.f32.vlgmr.msra.gmra.mxu1 %vm147_vm2, %v878_v9  ;;  %13562 = vmatmul.mubr.msk.f32.vlgmr.msra.gmra.mxu0 %vm147_vm2, %v878_v9 }
 0x318   :  { %13564 = vmatprep.subr.mxu1 %v15618_v56  ;;  %13575 = vmatprep.subr.mxu0 %v15618_v56 }
 0x319   :  { %13565 = vmatpush3.msra.mxu1 %v15774_v54  ;;  %13576 = vmatpush3.msra.mxu0 %v15779_v55 }
 0x31a   :  { %13566 = vmatprep.subr.mxu1 %v15618_v56  ;;  %13577 = vmatprep.subr.mxu0 %v15618_v56 }
 0x31b   :  { %13567 = vmatpush3.msra.mxu1 %v15788_v57  ;;  %13578 = vmatpush3.msra.mxu0 %v15793_v58 }
 0x31c   :  { %13568 = vmatprep.subr.mxu1 %v15618_v56  ;;  %13579 = vmatprep.subr.mxu0 %v15618_v56 }
 0x31d   :  { %13569 = vmatpush3.msra.mxu1 %v15802_v59  ;;  %13580 = vmatpush3.msra.mxu0 %v15807_v60 }
 0x31e   :  { %13570 = vmatprep.subr.mxu1 %v15618_v56  ;;  %13581 = vmatprep.subr.mxu0 %v15618_v56 }
 0x31f   :  { %13571 = vmatpush3.msra.mxu1 %v15816_v61  ;;  %13582 = vmatpush3.msra.mxu0 %v15823_v62 }
 0x320   :  { %13572 = vmatprep.mubr.msk.f32.mxu1 %vm15619_vm3, %v15618_v56  ;;  %13583 = vmatprep.mubr.msk.f32.mxu0 %vm15619_vm3, %v15618_v56 }
 0x321   :  { %13586 = vmatprep.subr.mxu1 %v15618_v56  ;;  %13597 = vmatprep.subr.mxu0 %v15618_v56 }
 0x3ce   :  { %v950_v10 = vpop.f32.mrf.mxu1  ;;  %v1030_v13 = vpop.f32.mrf.mxu0 }
 0x3cf   :  { %v955_v14 = vrot.slane %v950_v10, 6  ;;  %v1035_v15 = vrot.slane %v1030_v13, 6 }
 0x3d0   :  { %v13530_v16 = vpop.f32.mrf.mxu1  ;;  %v13541_v17 = vpop.f32.mrf.mxu0 }
 0x3d1   :  { %v957_v18 = vadd.f32 %v955_v14, %v15939_v23  ;;  %v1037_v21 = vadd.f32 %v1035_v15, %v15941_v24 }
 0x3d3   :  { %v12326_v22 = vmul.f32 -1.442695, %v957_v18  ;;  %v12328_v25 = vmul.f32 -1.442695, %v1037_v21 }
 0x3d5   :  { %15056 = vpow2.f32 %v12326_v22 }
 0x3d6   :  { %15058 = vpow2.f32 %v12328_v25 }
 0x3d7   :  { %v1110_v26 = vpop.f32.mrf.mxu1  ;;  %v1185_v27 = vpop.f32.mrf.mxu0 }
 0x3d8   :  { %v1190_v28 = vrot.slane %v1185_v27, 6  ;;  %v1115_v32 = vrot.slane %v1110_v26, 6 }
 0x3d9   :  { %v13552_v29 = vpop.f32.mrf.mxu1  ;;  %v13563_v30 = vpop.f32.mrf.mxu0 }
 0x3da   :  { %v1192_v31 = vadd.f32 %v1190_v28, %v15945_v33  ;;  %v1117_v35 = vadd.f32 %v1115_v32, %v15948_v39 }
 0x3dc   :  { %v12331_v34 = vmul.f32 -1.442695, %v1192_v31 }
 0x3de   :  { %15060 = vpow2.f32 %v12331_v34 }
 0x3df   :  { %15062 = vtanh.f32 %v1117_v35 }
 0x3e2   :  { %v15057_v36 = vpop.eup %15056 }
 0x3e3   :  { %v15059_v37 = vpop.eup %15058  ;;  %v961_v38 = vadd.f32 1.0, %v15057_v36 }
 0x3e4   :  { %v1041_v40 = vadd.f32 1.0, %v15059_v37 }
 0x3e5   :  { %15064 = vrcp.f32 %v961_v38 }
 0x3e6   :  { %15066 = vrcp.f32 %v1041_v40 }
 0x3eb   :  { %v15061_v41 = vpop.eup %15060 }
 0x3ec   :  { %v15063_v42 = vpop.eup %15062  ;;  %v1196_v47 = vadd.f32 1.0, %v15061_v41 }
 0x3ee   :  { %15068 = vrcp.f32 %v1196_v47 }
 0x3f2   :  { %v15065_v43 = vpop.eup %15064 }
 0x3f3   :  { %v15067_v45 = vpop.eup %15066  ;;  %v1203_v46 = vmul.f32 %v15065_v43, %v15063_v42 }
 0x3f4   :  { %v1202_v48 = vmul.f32 %v15067_v45, %v1200_v44 }
 0x3f6   :  { %v16004_v49 = vadd.f32 %v1203_v46, %v1202_v48 }
 0x3f8   :  { %15070 = vtanh.f32 %v16004_v49  ;;  %v1529_v41 = vrot.slane %v16004_v49, 6 }
 0x3fb   :  { %v15069_v50 = vpop.eup %15068 }
 0x405   :  { %v15071_v51 = vpop.eup %15070 }
 0x406   :  { %v1206_v52 = vmul.f32 %v15071_v51, %v15069_v50 }
 0x408   :  { %1208 = vst.msk [vmem:[#allocation2] sm:$0xc] %vm1207_vm5, %v1206_v52  ;;  %v1210_v7 = vrot.slane %v1206_v52, 2 }
 0x40a   :  { %13573 = vmatmul.mubr.msk.f32.vlgmr.msra.gmra.mxu1 %vm147_vm2, %v1210_v7  ;;  %13584 = vmatmul.mubr.msk.f32.vlgmr.msra.gmra.mxu0 %vm147_vm2, %v1210_v7 }
 0x40b   :  { %13587 = vmatpush3.msra.mxu1 %v15836_v63  ;;  %13598 = vmatpush3.msra.mxu0 %v15841_v0 }
 0x40c   :  { %13588 = vmatprep.subr.mxu1 %v15618_v56  ;;  %13599 = vmatprep.subr.mxu0 %v15618_v56 }
 0x40d   :  { %13589 = vmatpush3.msra.mxu1 %v15850_v1  ;;  %13600 = vmatpush3.msra.mxu0 %v15855_v2 }
 0x40e   :  { %13590 = vmatprep.subr.mxu1 %v15618_v56  ;;  %13601 = vmatprep.subr.mxu0 %v15618_v56 }
 0x40f   :  { %13591 = vmatpush3.msra.mxu1 %v15864_v3  ;;  %13602 = vmatpush3.msra.mxu0 %v15869_v4 }
 0x410   :  { %13592 = vmatprep.subr.mxu1 %v15618_v56  ;;  %13603 = vmatprep.subr.mxu0 %v15618_v56 }
 0x411   :  { %13593 = vmatpush3.msra.mxu1 %v15878_v5  ;;  %13594 = vmatprep.mubr.msk.f32.mxu1 %vm15619_vm3, %v15618_v56 }
 0x412   :  { %13604 = vmatpush3.msra.mxu0 %v15885_v6  ;;  %13605 = vmatprep.mubr.msk.f32.mxu0 %vm15619_vm3, %v15618_v56 }
 0x413   :  { %13595 = vmatmul.mubr.msk.f32.vlgmr.msra.gmra.mxu1 %vm147_vm2, %v1210_v7  ;;  %13606 = vmatmul.mubr.msk.f32.vlgmr.msra.gmra.mxu0 %vm147_vm2, %v1210_v7 }
 0x414   :  { %13608 = vmatprep.subr.mxu1 %v15618_v56  ;;  %13619 = vmatprep.subr.mxu0 %v15618_v56 }
 0x415   :  { %13609 = vmatpush3.msra.mxu1 %v15774_v54  ;;  %13620 = vmatpush3.msra.mxu0 %v15779_v55 }
 0x416   :  { %13610 = vmatprep.subr.mxu1 %v15618_v56  ;;  %13621 = vmatprep.subr.mxu0 %v15618_v56 }
 0x417   :  { %13611 = vmatpush3.msra.mxu1 %v15788_v57  ;;  %13622 = vmatpush3.msra.mxu0 %v15793_v58 }
 0x418   :  { %13612 = vmatprep.subr.mxu1 %v15618_v56  ;;  %13623 = vmatprep.subr.mxu0 %v15618_v56 }
 0x419   :  { %13613 = vmatpush3.msra.mxu1 %v15802_v59  ;;  %13624 = vmatpush3.msra.mxu0 %v15807_v60 }
 0x41a   :  { %13614 = vmatprep.subr.mxu1 %v15618_v56  ;;  %13625 = vmatprep.subr.mxu0 %v15618_v56 }
 0x41b   :  { %13615 = vmatpush3.msra.mxu1 %v15816_v61  ;;  %13626 = vmatpush3.msra.mxu0 %v15823_v62 }
 0x41c   :  { %13616 = vmatprep.mubr.msk.f32.mxu1 %vm15619_vm3, %v15618_v56  ;;  %13627 = vmatprep.mubr.msk.f32.mxu0 %vm15619_vm3, %v15618_v56 }
 0x41d   :  { %13630 = vmatprep.subr.mxu1 %v15618_v56  ;;  %13641 = vmatprep.subr.mxu0 %v15618_v56 }
 0x4ca   :  { %v1279_v53 = vpop.f32.mrf.mxu1  ;;  %v1359_v8 = vpop.f32.mrf.mxu0 }
 0x4cb   :  { %v1284_v9 = vrot.slane %v1279_v53, 4  ;;  %v1364_v10 = vrot.slane %v1359_v8, 4 }
 0x4cc   :  { %v13574_v13 = vpop.f32.mrf.mxu1  ;;  %v13585_v14 = vpop.f32.mrf.mxu0 }
 0x4cd   :  { %v1286_v15 = vadd.f32 %v1284_v9, %v15939_v23  ;;  %v1366_v16 = vadd.f32 %v1364_v10, %v15941_v24 }
 0x4cf   :  { %v12333_v17 = vmul.f32 -1.442695, %v1286_v15  ;;  %v12335_v18 = vmul.f32 -1.442695, %v1366_v16 }
 0x4d1   :  { %15072 = vpow2.f32 %v12333_v17 }
 0x4d2   :  { %15074 = vpow2.f32 %v12335_v18 }
 0x4d3   :  { %v1439_v21 = vpop.f32.mrf.mxu1  ;;  %v1514_v22 = vpop.f32.mrf.mxu0 }
 0x4d4   :  { %v1519_v25 = vrot.slane %v1514_v22, 4  ;;  %v1444_v29 = vrot.slane %v1439_v21, 4 }
 0x4d5   :  { %v13596_v26 = vpop.f32.mrf.mxu1  ;;  %v13607_v27 = vpop.f32.mrf.mxu0 }
 0x4d6   :  { %v1521_v28 = vadd.f32 %v1519_v25, %v15945_v33  ;;  %v1446_v31 = vadd.f32 %v1444_v29, %v15948_v39 }
 0x4d8   :  { %v12338_v30 = vmul.f32 -1.442695, %v1521_v28 }
 0x4da   :  { %15076 = vpow2.f32 %v12338_v30 }
 0x4db   :  { %15078 = vtanh.f32 %v1446_v31 }
 0x4de   :  { %v15073_v32 = vpop.eup %15072 }
 0x4df   :  { %v15075_v34 = vpop.eup %15074  ;;  %v1290_v35 = vadd.f32 1.0, %v15073_v32 }
 0x4e0   :  { %v1370_v36 = vadd.f32 1.0, %v15075_v34 }
 0x4e1   :  { %15080 = vrcp.f32 %v1290_v35 }
 0x4e2   :  { %15082 = vrcp.f32 %v1370_v36 }
 0x4e7   :  { %v15077_v37 = vpop.eup %15076 }
 0x4e8   :  { %v15079_v38 = vpop.eup %15078  ;;  %v1525_v44 = vadd.f32 1.0, %v15077_v37 }
 0x4ea   :  { %15084 = vrcp.f32 %v1525_v44 }
 0x4ee   :  { %v15081_v40 = vpop.eup %15080 }
 0x4ef   :  { %v15083_v42 = vpop.eup %15082  ;;  %v1532_v43 = vmul.f32 %v15081_v40, %v15079_v38 }
 0x4f0   :  { %v1531_v45 = vmul.f32 %v15083_v42, %v1529_v41 }
 0x4f2   :  { %v16057_v46 = vadd.f32 %v1532_v43, %v1531_v45 }
 0x4f4   :  { %15086 = vtanh.f32 %v16057_v46  ;;  %v1858_v35 = vrot.slane %v16057_v46, 6 }
 0x4f7   :  { %v15085_v47 = vpop.eup %15084 }
 0x501   :  { %v15087_v48 = vpop.eup %15086 }
 0x502   :  { %v1535_v50 = vmul.f32 %v15087_v48, %v15085_v47 }
 0x504   :  { %1537 = vst.msk [vmem:[#allocation2] sm:$0x30] %vm1536_vm6, %v1535_v50  ;;  %v1539_v51 = vrot.slane %v1535_v50, 4 }
 0x506   :  { %13617 = vmatmul.mubr.msk.f32.vlgmr.msra.gmra.mxu1 %vm147_vm2, %v1539_v51  ;;  %13628 = vmatmul.mubr.msk.f32.vlgmr.msra.gmra.mxu0 %vm147_vm2, %v1539_v51 }
 0x507   :  { %13631 = vmatpush3.msra.mxu1 %v15836_v63  ;;  %13642 = vmatpush3.msra.mxu0 %v15841_v0 }
 0x508   :  { %13632 = vmatprep.subr.mxu1 %v15618_v56  ;;  %13643 = vmatprep.subr.mxu0 %v15618_v56 }
 0x509   :  { %13633 = vmatpush3.msra.mxu1 %v15850_v1  ;;  %13644 = vmatpush3.msra.mxu0 %v15855_v2 }
 0x50a   :  { %13634 = vmatprep.subr.mxu1 %v15618_v56  ;;  %13645 = vmatprep.subr.mxu0 %v15618_v56 }
 0x50b   :  { %13635 = vmatpush3.msra.mxu1 %v15864_v3  ;;  %13646 = vmatpush3.msra.mxu0 %v15869_v4 }
 0x50c   :  { %13636 = vmatprep.subr.mxu1 %v15618_v56  ;;  %13647 = vmatprep.subr.mxu0 %v15618_v56 }
 0x50d   :  { %13637 = vmatpush3.msra.mxu1 %v15878_v5  ;;  %13638 = vmatprep.mubr.msk.f32.mxu1 %vm15619_vm3, %v15618_v56 }
 0x50e   :  { %13648 = vmatpush3.msra.mxu0 %v15885_v6  ;;  %13649 = vmatprep.mubr.msk.f32.mxu0 %vm15619_vm3, %v15618_v56 }
 0x50f   :  { %13639 = vmatmul.mubr.msk.f32.vlgmr.msra.gmra.mxu1 %vm147_vm2, %v1539_v51  ;;  %13650 = vmatmul.mubr.msk.f32.vlgmr.msra.gmra.mxu0 %vm147_vm2, %v1539_v51 }
 0x510   :  { %13652 = vmatprep.subr.mxu1 %v15618_v56  ;;  %13663 = vmatprep.subr.mxu0 %v15618_v56 }
 0x511   :  { %13653 = vmatpush3.msra.mxu1 %v15774_v54  ;;  %13664 = vmatpush3.msra.mxu0 %v15779_v55 }
 0x512   :  { %13654 = vmatprep.subr.mxu1 %v15618_v56  ;;  %13665 = vmatprep.subr.mxu0 %v15618_v56 }
 0x513   :  { %13655 = vmatpush3.msra.mxu1 %v15788_v57  ;;  %13666 = vmatpush3.msra.mxu0 %v15793_v58 }
 0x514   :  { %13656 = vmatprep.subr.mxu1 %v15618_v56  ;;  %13667 = vmatprep.subr.mxu0 %v15618_v56 }
 0x515   :  { %13657 = vmatpush3.msra.mxu1 %v15802_v59  ;;  %13668 = vmatpush3.msra.mxu0 %v15807_v60 }
 0x516   :  { %13658 = vmatprep.subr.mxu1 %v15618_v56  ;;  %13669 = vmatprep.subr.mxu0 %v15618_v56 }
 0x517   :  { %13659 = vmatpush3.msra.mxu1 %v15816_v61  ;;  %13670 = vmatpush3.msra.mxu0 %v15823_v62 }
 0x518   :  { %13660 = vmatprep.mubr.msk.f32.mxu1 %vm15619_vm3, %v15618_v56  ;;  %13671 = vmatprep.mubr.msk.f32.mxu0 %vm15619_vm3, %v15618_v56 }
 0x519   :  { %13674 = vmatprep.subr.mxu1 %v15618_v56  ;;  %13685 = vmatprep.subr.mxu0 %v15618_v56 }
 0x5c6   :  { %v1608_v49 = vpop.f32.mrf.mxu1  ;;  %v1688_v52 = vpop.f32.mrf.mxu0 }
 0x5c7   :  { %v1613_v7 = vrot.slane %v1608_v49, 2  ;;  %v1693_v53 = vrot.slane %v1688_v52, 2 }
 0x5c8   :  { %v13618_v8 = vpop.f32.mrf.mxu1  ;;  %v13629_v9 = vpop.f32.mrf.mxu0 }
 0x5c9   :  { %v1615_v10 = vadd.f32 %v1613_v7, %v15939_v23  ;;  %v1695_v13 = vadd.f32 %v1693_v53, %v15941_v24 }
 0x5cb   :  { %v12340_v14 = vmul.f32 -1.442695, %v1615_v10  ;;  %v12342_v15 = vmul.f32 -1.442695, %v1695_v13 }
 0x5cd   :  { %15088 = vpow2.f32 %v12340_v14 }
 0x5ce   :  { %15090 = vpow2.f32 %v12342_v15 }
 0x5cf   :  { %v1768_v16 = vpop.f32.mrf.mxu1  ;;  %v1843_v17 = vpop.f32.mrf.mxu0 }
 0x5d0   :  { %v1848_v18 = vrot.slane %v1843_v17, 2  ;;  %v1773_v26 = vrot.slane %v1768_v16, 2 }
 0x5d1   :  { %v13640_v21 = vpop.f32.mrf.mxu1  ;;  %v13651_v22 = vpop.f32.mrf.mxu0 }
 0x5d2   :  { %v1850_v25 = vadd.f32 %v1848_v18, %v15945_v33  ;;  %v1775_v28 = vadd.f32 %v1773_v26, %v15948_v39 }
 0x5d4   :  { %v12345_v27 = vmul.f32 -1.442695, %v1850_v25 }
 0x5d6   :  { %15092 = vpow2.f32 %v12345_v27 }
 0x5d7   :  { %15094 = vtanh.f32 %v1775_v28 }
 0x5da   :  { %v15089_v29 = vpop.eup %15088 }
 0x5db   :  { %v15091_v30 = vpop.eup %15090  ;;  %v1619_v23 = vadd.f32 1.0, %v15089_v29 }
 0x5dc   :  { %v1699_v24 = vadd.f32 1.0, %v15091_v30 }
 0x5dd   :  { %15096 = vrcp.f32 %v1619_v23 }
 0x5de   :  { %15098 = vrcp.f32 %v1699_v24 }
 0x5e3   :  { %v15093_v31 = vpop.eup %15092 }
 0x5e4   :  { %v15095_v32 = vpop.eup %15094  ;;  %v1854_v33 = vadd.f32 1.0, %v15093_v31 }
 0x5e6   :  { %15100 = vrcp.f32 %v1854_v33 }
 0x5ea   :  { %v15097_v34 = vpop.eup %15096 }
 0x5eb   :  { %v15099_v36 = vpop.eup %15098  ;;  %v1861_v37 = vmul.f32 %v15097_v34, %v15095_v32 }
 0x5ec   :  { %v1860_v38 = vmul.f32 %v15099_v36, %v1858_v35 }
 0x5ee   :  { %v16110_v40 = vadd.f32 %v1861_v37, %v1860_v38 }
 0x5f0   :  { %15102 = vtanh.f32 %v16110_v40  ;;  %v2175_v25 = vrot.slane %v16110_v40, 6 }
 0x5f3   :  { %v15101_v39 = vpop.eup %15100 }
 0x5fd   :  { %v15103_v41 = vpop.eup %15102 }
 0x5fe   :  { %v1864_v42 = vmul.f32 %v15103_v41, %v15101_v39 }
 0x600   :  { %1866 = vst.msk [vmem:[#allocation2] sm:$0xc0] %vm1865_vm7, %v1864_v42  ;;  %v1868_v43 = vrot.slane %v1864_v42, 6 }
 0x602   :  { %13661 = vmatmul.mubr.msk.f32.vlgmr.msra.gmra.mxu1 %vm147_vm2, %v1868_v43  ;;  %13672 = vmatmul.mubr.msk.f32.vlgmr.msra.gmra.mxu0 %vm147_vm2, %v1868_v43 }
 0x603   :  { %13675 = vmatpush3.msra.mxu1 %v15836_v63  ;;  %13686 = vmatpush3.msra.mxu0 %v15841_v0 }
 0x604   :  { %13676 = vmatprep.subr.mxu1 %v15618_v56  ;;  %13687 = vmatprep.subr.mxu0 %v15618_v56 }
 0x605   :  { %13677 = vmatpush3.msra.mxu1 %v15850_v1  ;;  %13688 = vmatpush3.msra.mxu0 %v15855_v2 }
 0x606   :  { %13678 = vmatprep.subr.mxu1 %v15618_v56  ;;  %13689 = vmatprep.subr.mxu0 %v15618_v56 }
 0x607   :  { %13679 = vmatpush3.msra.mxu1 %v15864_v3  ;;  %13690 = vmatpush3.msra.mxu0 %v15869_v4 }
 0x608   :  { %13680 = vmatprep.subr.mxu1 %v15618_v56  ;;  %13691 = vmatprep.subr.mxu0 %v15618_v56 }
 0x609   :  { %13681 = vmatpush3.msra.mxu1 %v15878_v5  ;;  %13682 = vmatprep.mubr.msk.f32.mxu1 %vm15619_vm3, %v15618_v56 }
 0x60a   :  { %13692 = vmatpush3.msra.mxu0 %v15885_v6  ;;  %13693 = vmatprep.mubr.msk.f32.mxu0 %vm15619_vm3, %v15618_v56 }
 0x60b   :  { %13683 = vmatmul.mubr.msk.f32.vlgmr.msra.gmra.mxu1 %vm147_vm2, %v1868_v43  ;;  %13694 = vmatmul.mubr.msk.f32.vlgmr.msra.gmra.mxu0 %vm147_vm2, %v1868_v43 }
 0x60c   :  { %13696 = vmatprep.subr.mxu1 %v15618_v56  ;;  %13707 = vmatprep.subr.mxu0 %v15618_v56 }
 0x60d   :  { %13697 = vmatpush3.msra.mxu1 %v15774_v54  ;;  %13708 = vmatpush3.msra.mxu0 %v15779_v55 }
 0x60e   :  { %13698 = vmatprep.subr.mxu1 %v15618_v56  ;;  %13709 = vmatprep.subr.mxu0 %v15618_v56 }
 0x60f   :  { %13699 = vmatpush3.msra.mxu1 %v15788_v57  ;;  %13710 = vmatpush3.msra.mxu0 %v15793_v58 }
 0x610   :  { %13700 = vmatprep.subr.mxu1 %v15618_v56  ;;  %13711 = vmatprep.subr.mxu0 %v15618_v56 }
 0x611   :  { %13701 = vmatpush3.msra.mxu1 %v15802_v59  ;;  %13712 = vmatpush3.msra.mxu0 %v15807_v60 }
 0x612   :  { %13702 = vmatprep.subr.mxu1 %v15618_v56  ;;  %13713 = vmatprep.subr.mxu0 %v15618_v56 }
 0x613   :  { %13703 = vmatpush3.msra.mxu1 %v15816_v61  ;;  %13714 = vmatpush3.msra.mxu0 %v15823_v62 }
 0x614   :  { %13704 = vmatprep.mubr.msk.f32.mxu1 %vm15619_vm3, %v15618_v56  ;;  %13715 = vmatprep.mubr.msk.f32.mxu0 %vm15619_vm3, %v15618_v56 }
 0x615   :  { %13718 = vmatprep.subr.mxu1 %v15618_v56  ;;  %13729 = vmatprep.subr.mxu0 %v15618_v56 }
 0x6c2   :  { %v1937_v44 = vpop.f32.mrf.mxu1  ;;  %v2014_v45 = vpop.f32.mrf.mxu0 }
 0x6c3   :  { %v1941_v46 = vadd.f32 %v1937_v44, %v15925_v11  ;;  %v2018_v47 = vadd.f32 %v2014_v45, %v15927_v12 }
 0x6c4   :  { %v13662_v48 = vpop.f32.mrf.mxu1  ;;  %v13673_v50 = vpop.f32.mrf.mxu0 }
 0x6c5   :  { %v12347_v51 = vmul.f32 -1.442695, %v1941_v46  ;;  %v12349_v49 = vmul.f32 -1.442695, %v2018_v47 }
 0x6c7   :  { %15104 = vpow2.f32 %v12347_v51 }
 0x6c8   :  { %15106 = vpow2.f32 %v12349_v49 }
 0x6cb   :  { %v2091_v52 = vpop.f32.mrf.mxu1  ;;  %v2163_v7 = vpop.f32.mrf.mxu0 }
 0x6cc   :  { %v2167_v53 = vadd.f32 %v2163_v7, %v15937_v20  ;;  %v2095_v13 = vadd.f32 %v2091_v52, %v15935_v19  ;;  %v16225_v52 = vld [vmem:[%s18337_s6 + $0x58] sm:$0xff] }
 0x6cd   :  { %v13684_v8 = vpop.f32.mrf.mxu1  ;;  %v13695_v9 = vpop.f32.mrf.mxu0  ;;  %v16231_v7 = vld [vmem:[%s18337_s6 + $0x78] sm:$0xff] }
 0x6ce   :  { %v12352_v10 = vmul.f32 -1.442695, %v2167_v53  ;;  %v16239_v53 = vld [vmem:[%s18337_s6 + $0x50] sm:$0xff]  ;;  %v16253_v9 = vld [vmem:[%s18337_s6 + $0x48] sm:$0xff] }
 0x6cf   :  { %v16245_v8 = vld [vmem:[%s18337_s6 + $0x70] sm:$0xff] }
 0x6d0   :  { %15108 = vpow2.f32 %v12352_v10  ;;  %v16259_v10 = vld [vmem:[%s18337_s6 + $0x68] sm:$0xff] }
 0x6d1   :  { %15110 = vtanh.f32 %v2095_v13  ;;  %v16267_v13 = vld [vmem:[%s18337_s6 + $0x40] sm:$0xff] }
 0x6d4   :  { %v15105_v14 = vpop.eup %15104 }
 0x6d5   :  { %v15107_v15 = vpop.eup %15106  ;;  %v1945_v16 = vadd.f32 1.0, %v15105_v14  ;;  %v16275_v14 = vld [vmem:[%s18337_s6 + $0x60] sm:$0xff] }
 0x6d6   :  { %v2022_v17 = vadd.f32 1.0, %v15107_v15  ;;  %v15562_v15 = vld [vmem:[%s18337_s6 + $0x18] sm:$0xff] }
 0x6d7   :  { %15112 = vrcp.f32 %v1945_v16  ;;  %v15563_v16 = vld [vmem:[%s18337_s6 + $0x38] sm:$0xff] }
 0x6d8   :  { %15114 = vrcp.f32 %v2022_v17  ;;  %v15564_v17 = vld [vmem:[%s18337_s6 + $0x10] sm:$0xff] }
 0x6dd   :  { %v15109_v18 = vpop.eup %15108 }
 0x6de   :  { %v15111_v21 = vpop.eup %15110  ;;  %v2171_v28 = vadd.f32 1.0, %v15109_v18  ;;  %v15565_v18 = vld [vmem:[%s18337_s6 + $0x30] sm:$0xff] }
 0x6e0   :  { %15116 = vrcp.f32 %v2171_v28 }
 0x6e4   :  { %v15113_v22 = vpop.eup %15112 }
 0x6e5   :  { %v15115_v26 = vpop.eup %15114  ;;  %v2178_v27 = vmul.f32 %v15113_v22, %v15111_v21  ;;  %v15566_v21 = vld [vmem:[%s18337_s6 + $0x8] sm:$0xff] }
 0x6e6   :  { %v2177_v29 = vmul.f32 %v15115_v26, %v2175_v25  ;;  %v15567_v22 = vld [vmem:[%s18337_s6 + $0x28] sm:$0xff]  ;;  %v15568_v25 = vld [vmem:[%s18337_s6] sm:$0xff] }
 0x6e7   :  { %v15569_v26 = vld [vmem:[%s18337_s6 + $0x20] sm:$0xff] }
 0x6e8   :  { %v16163_v30 = vadd.f32 %v2178_v27, %v2177_v29 }
 0x6ea   :  { %15118 = vtanh.f32 %v16163_v30  ;;  %v2502_v42 = vrot.slane %v16163_v30, 6 }
 0x6ed   :  { %v15117_v23 = vpop.eup %15116 }
 0x6f7   :  { %v15119_v24 = vpop.eup %15118 }
 0x6f8   :  { %v2181_v31 = vmul.f32 %v15119_v24, %v15117_v23 }
 0x6fa   :  { %2182 = vst.msk [vmem:[#allocation2 + $0x8] sm:$0x3] %vm879_vm4, %v2181_v31  ;;  %13705 = vmatmul.mubr.msk.f32.vlgmr.msra.gmra.mxu1 %vm147_vm2, %v2181_v31  ;;  %13716 = vmatmul.mubr.msk.f32.vlgmr.msra.gmra.mxu0 %vm147_vm2, %v2181_v31 }
 0x6fb   :  { %13719 = vmatpush3.msra.mxu1 %v15836_v63  ;;  %13730 = vmatpush3.msra.mxu0 %v15841_v0 }
 0x6fc   :  { %13720 = vmatprep.subr.mxu1 %v15618_v56  ;;  %13731 = vmatprep.subr.mxu0 %v15618_v56 }
 0x6fd   :  { %13721 = vmatpush3.msra.mxu1 %v15850_v1  ;;  %13732 = vmatpush3.msra.mxu0 %v15855_v2 }
 0x6fe   :  { %13722 = vmatprep.subr.mxu1 %v15618_v56  ;;  %13733 = vmatprep.subr.mxu0 %v15618_v56 }
 0x6ff   :  { %13723 = vmatpush3.msra.mxu1 %v15864_v3  ;;  %13734 = vmatpush3.msra.mxu0 %v15869_v4 }
 0x700   :  { %13724 = vmatprep.subr.mxu1 %v15618_v56  ;;  %13735 = vmatprep.subr.mxu0 %v15618_v56 }
 0x701   :  { %13725 = vmatpush3.msra.mxu1 %v15878_v5  ;;  %13726 = vmatprep.mubr.msk.f32.mxu1 %vm15619_vm3, %v15618_v56 }
 0x702   :  { %13736 = vmatpush3.msra.mxu0 %v15885_v6  ;;  %13737 = vmatprep.mubr.msk.f32.mxu0 %vm15619_vm3, %v15618_v56 }
 0x703   :  { %13727 = vmatmul.mubr.msk.f32.vlgmr.msra.gmra.mxu1 %vm147_vm2, %v2181_v31  ;;  %13738 = vmatmul.mubr.msk.f32.vlgmr.msra.gmra.mxu0 %vm147_vm2, %v2181_v31 }
 0x704   :  { %13740 = vmatprep.subr.mxu1 %v15618_v56  ;;  %13751 = vmatprep.subr.mxu0 %v15618_v56 }
 0x705   :  { %13741 = vmatpush3.msra.mxu1 %v15774_v54  ;;  %13752 = vmatpush3.msra.mxu0 %v15779_v55 }
 0x706   :  { %13742 = vmatprep.subr.mxu1 %v15618_v56  ;;  %13753 = vmatprep.subr.mxu0 %v15618_v56 }
 0x707   :  { %13743 = vmatpush3.msra.mxu1 %v15788_v57  ;;  %13754 = vmatpush3.msra.mxu0 %v15793_v58 }
 0x708   :  { %13744 = vmatprep.subr.mxu1 %v15618_v56  ;;  %13755 = vmatprep.subr.mxu0 %v15618_v56 }
 0x709   :  { %13745 = vmatpush3.msra.mxu1 %v15802_v59  ;;  %13756 = vmatpush3.msra.mxu0 %v15807_v60 }
 0x70a   :  { %13746 = vmatprep.subr.mxu1 %v15618_v56  ;;  %13757 = vmatprep.subr.mxu0 %v15618_v56 }
 0x70b   :  { %13747 = vmatpush3.msra.mxu1 %v15816_v61  ;;  %13758 = vmatpush3.msra.mxu0 %v15823_v62 }
 0x70c   :  { %13748 = vmatprep.mubr.msk.f32.mxu1 %vm15619_vm3, %v15618_v56  ;;  %13759 = vmatprep.mubr.msk.f32.mxu0 %vm15619_vm3, %v15618_v56 }
 0x70d   :  { %13762 = vmatprep.subr.mxu1 %v15618_v56  ;;  %13773 = vmatprep.subr.mxu0 %v15618_v56 }
 0x7ba   :  { %v2252_v54 = vpop.f32.mrf.mxu1  ;;  %v2332_v55 = vpop.f32.mrf.mxu0 }
 0x7bb   :  { %v2257_v57 = vrot.slane %v2252_v54, 6  ;;  %v2337_v58 = vrot.slane %v2332_v55, 6 }
 0x7bc   :  { %v13706_v59 = vpop.f32.mrf.mxu1  ;;  %v13717_v60 = vpop.f32.mrf.mxu0 }
 0x7bd   :  { %v2259_v61 = vadd.f32 %v2257_v57, %v15925_v11  ;;  %v2339_v62 = vadd.f32 %v2337_v58, %v15927_v12 }
 0x7bf   :  { %v12354_v63 = vmul.f32 -1.442695, %v2259_v61  ;;  %v12356_v0 = vmul.f32 -1.442695, %v2339_v62 }
 0x7c1   :  { %15120 = vpow2.f32 %v12354_v63 }
 0x7c2   :  { %15122 = vpow2.f32 %v12356_v0 }
 0x7c3   :  { %v2412_v1 = vpop.f32.mrf.mxu1  ;;  %v2487_v2 = vpop.f32.mrf.mxu0 }
 0x7c4   :  { %v2492_v3 = vrot.slane %v2487_v2, 6  ;;  %v2417_v32 = vrot.slane %v2412_v1, 6 }
 0x7c5   :  { %v13728_v4 = vpop.f32.mrf.mxu1  ;;  %v13739_v5 = vpop.f32.mrf.mxu0 }
 0x7c6   :  { %v2494_v6 = vadd.f32 %v2492_v3, %v15937_v20  ;;  %v2419_v35 = vadd.f32 %v2417_v32, %v15935_v19 }
 0x7c8   :  { %v12359_v34 = vmul.f32 -1.442695, %v2494_v6 }
 0x7ca   :  { %15124 = vpow2.f32 %v12359_v34 }
 0x7cb   :  { %15126 = vtanh.f32 %v2419_v35 }
 0x7ce   :  { %v15121_v36 = vpop.eup %15120 }
 0x7cf   :  { %v15123_v37 = vpop.eup %15122  ;;  %v2263_v33 = vadd.f32 1.0, %v15121_v36 }
 0x7d0   :  { %v2343_v38 = vadd.f32 1.0, %v15123_v37 }
 0x7d1   :  { %15128 = vrcp.f32 %v2263_v33 }
 0x7d2   :  { %15130 = vrcp.f32 %v2343_v38 }
 0x7d7   :  { %v15125_v40 = vpop.eup %15124 }
 0x7d8   :  { %v15127_v39 = vpop.eup %15126  ;;  %v2498_v45 = vadd.f32 1.0, %v15125_v40 }
 0x7da   :  { %15132 = vrcp.f32 %v2498_v45  ;;  %v16351_v45 = vld [vmem:[#allocation2] sm:$0xff] }
 0x7de   :  { %v15129_v41 = vpop.eup %15128 }
 0x7df   :  { %v15131_v43 = vpop.eup %15130  ;;  %v2505_v44 = vmul.f32 %v15129_v41, %v15127_v39 }
 0x7e0   :  { %v2504_v46 = vmul.f32 %v15131_v43, %v2502_v42 }
 0x7e2   :  { %v16216_v47 = vadd.f32 %v2505_v44, %v2504_v46  ;;  %v12377_v46 = vld [vmem:[%s18334_s5 + $0x98] sm:$0xff] }
 0x7e4   :  { %15134 = vtanh.f32 %v16216_v47  ;;  %v2830_v36 = vrot.slane %v16216_v47, 6  ;;  %v12389_v47 = vld [vmem:[%s18334_s5 + $0xb8] sm:$0xff] }
 0x7e7   :  { %v15133_v48 = vpop.eup %15132 }
 0x7f1   :  { %v15135_v50 = vpop.eup %15134 }
 0x7f2   :  { %v2508_v51 = vmul.f32 %v15135_v50, %v15133_v48  ;;  %v12376_v48 = vld [vmem:[%s18334_s5 + $0x90] sm:$0xff] }
 0x7f3   :  { %v12388_v50 = vld [vmem:[%s18334_s5 + $0xb0] sm:$0xff] }
 0x7f4   :  { %2509 = vst.msk [vmem:[#allocation2 + $0x8] sm:$0xc] %vm1207_vm5, %v2508_v51  ;;  %v2511_v49 = vrot.slane %v2508_v51, 2  ;;  %v12375_v51 = vld [vmem:[%s18334_s5 + $0x88] sm:$0xff] }
 0x7f6   :  { %13749 = vmatmul.mubr.msk.f32.vlgmr.msra.gmra.mxu1 %vm147_vm2, %v2511_v49  ;;  %13760 = vmatmul.mubr.msk.f32.vlgmr.msra.gmra.mxu0 %vm147_vm2, %v2511_v49 }
 0x7f7   :  { %13763 = vmatpush3.msra.mxu1 %v16225_v52  ;;  %13774 = vmatpush3.msra.mxu0 %v16231_v7 }
 0x7f8   :  { %13764 = vmatprep.subr.mxu1 %v15618_v56  ;;  %13775 = vmatprep.subr.mxu0 %v15618_v56 }
 0x7f9   :  { %13765 = vmatpush3.msra.mxu1 %v16239_v53  ;;  %13776 = vmatpush3.msra.mxu0 %v16245_v8 }
 0x7fa   :  { %13766 = vmatprep.subr.mxu1 %v15618_v56  ;;  %13777 = vmatprep.subr.mxu0 %v15618_v56 }
 0x7fb   :  { %13767 = vmatpush3.msra.mxu1 %v16253_v9  ;;  %13778 = vmatpush3.msra.mxu0 %v16259_v10 }
 0x7fc   :  { %13768 = vmatprep.subr.mxu1 %v15618_v56  ;;  %13779 = vmatprep.subr.mxu0 %v15618_v56 }
 0x7fd   :  { %13769 = vmatpush3.msra.mxu1 %v16267_v13  ;;  %13770 = vmatprep.mubr.msk.f32.mxu1 %vm15619_vm3, %v15618_v56 }
 0x7fe   :  { %13780 = vmatpush3.msra.mxu0 %v16275_v14  ;;  %13781 = vmatprep.mubr.msk.f32.mxu0 %vm15619_vm3, %v15618_v56 }
 0x7ff   :  { %13771 = vmatmul.mubr.msk.f32.vlgmr.msra.gmra.mxu1 %vm147_vm2, %v2511_v49  ;;  %13782 = vmatmul.mubr.msk.f32.vlgmr.msra.gmra.mxu0 %vm147_vm2, %v2511_v49  ;;  %v12387_v49 = vld [vmem:[%s18334_s5 + $0xa8] sm:$0xff] }
 0x800   :  { %13784 = vmatprep.subr.mxu1 %v15618_v56  ;;  %13795 = vmatprep.subr.mxu0 %v15618_v56 }
 0x801   :  { %13785 = vmatpush3.msra.mxu1 %v15562_v15  ;;  %13796 = vmatpush3.msra.mxu0 %v15563_v16 }
 0x802   :  { %13786 = vmatprep.subr.mxu1 %v15618_v56  ;;  %13797 = vmatprep.subr.mxu0 %v15618_v56 }
 0x803   :  { %13787 = vmatpush3.msra.mxu1 %v15564_v17  ;;  %13798 = vmatpush3.msra.mxu0 %v15565_v18 }
 0x804   :  { %13788 = vmatprep.subr.mxu1 %v15618_v56  ;;  %13799 = vmatprep.subr.mxu0 %v15618_v56 }
 0x805   :  { %13789 = vmatpush3.msra.mxu1 %v15566_v21  ;;  %13800 = vmatpush3.msra.mxu0 %v15567_v22 }
 0x806   :  { %13790 = vmatprep.subr.mxu1 %v15618_v56  ;;  %13801 = vmatprep.subr.mxu0 %v15618_v56 }
 0x807   :  { %13791 = vmatpush3.msra.mxu1 %v15568_v25  ;;  %13802 = vmatpush3.msra.mxu0 %v15569_v26 }
 0x808   :  { %13792 = vmatprep.mubr.msk.f32.mxu1 %vm15619_vm3, %v15618_v56  ;;  %13803 = vmatprep.mubr.msk.f32.mxu0 %vm15619_vm3, %v15618_v56 }
 0x809   :  { %13806 = vmatprep.subr.mxu1 %v15618_v56  ;;  %13817 = vmatprep.subr.mxu0 %v15618_v56 }
 0x8b6   :  { %v2580_v27 = vpop.f32.mrf.mxu1  ;;  %v2660_v28 = vpop.f32.mrf.mxu0 }
 0x8b7   :  { %v2585_v29 = vrot.slane %v2580_v27, 4  ;;  %v2665_v30 = vrot.slane %v2660_v28, 4 }
 0x8b8   :  { %v13750_v23 = vpop.f32.mrf.mxu1  ;;  %v13761_v24 = vpop.f32.mrf.mxu0 }
 0x8b9   :  { %v2587_v31 = vadd.f32 %v2585_v29, %v15925_v11  ;;  %v2667_v54 = vadd.f32 %v2665_v30, %v15927_v12 }
 0x8bb   :  { %v12361_v55 = vmul.f32 -1.442695, %v2587_v31  ;;  %v12363_v57 = vmul.f32 -1.442695, %v2667_v54 }
 0x8bd   :  { %15136 = vpow2.f32 %v12361_v55 }
 0x8be   :  { %15138 = vpow2.f32 %v12363_v57 }
 0x8bf   :  { %v2740_v58 = vpop.f32.mrf.mxu1  ;;  %v2815_v59 = vpop.f32.mrf.mxu0 }
 0x8c0   :  { %v2820_v60 = vrot.slane %v2815_v59, 4  ;;  %v2745_v0 = vrot.slane %v2740_v58, 4 }
 0x8c1   :  { %v13772_v61 = vpop.f32.mrf.mxu1  ;;  %v13783_v62 = vpop.f32.mrf.mxu0 }
 0x8c2   :  { %v2822_v63 = vadd.f32 %v2820_v60, %v15937_v20  ;;  %v2747_v2 = vadd.f32 %v2745_v0, %v15935_v19 }
 0x8c4   :  { %v12366_v1 = vmul.f32 -1.442695, %v2822_v63 }
 0x8c6   :  { %15140 = vpow2.f32 %v12366_v1 }
 0x8c7   :  { %15142 = vtanh.f32 %v2747_v2 }
 0x8ca   :  { %v15137_v3 = vpop.eup %15136 }
 0x8cb   :  { %v15139_v4 = vpop.eup %15138  ;;  %v2591_v5 = vadd.f32 1.0, %v15137_v3 }
 0x8cc   :  { %v2671_v6 = vadd.f32 1.0, %v15139_v4  ;;  %v12400_v4 = vld [vmem:[%s18334_s5 + $0xd0] sm:$0xff] }
 0x8cd   :  { %15144 = vrcp.f32 %v2591_v5  ;;  %v12412_v5 = vld [vmem:[%s18334_s5 + $0xf0] sm:$0xff] }
 0x8ce   :  { %15146 = vrcp.f32 %v2671_v6  ;;  %v12399_v6 = vld [vmem:[%s18334_s5 + $0xc8] sm:$0xff] }
 0x8d3   :  { %v15141_v32 = vpop.eup %15140 }
 0x8d4   :  { %v15143_v34 = vpop.eup %15142  ;;  %v2826_v38 = vadd.f32 1.0, %v15141_v32  ;;  %v12411_v32 = vld [vmem:[%s18334_s5 + $0xe8] sm:$0xff] }
 0x8d6   :  { %15148 = vrcp.f32 %v2826_v38  ;;  %v16439_v38 = vld [vmem:[%s18337_s6 + $0xb0] sm:$0xff] }
 0x8da   :  { %v15145_v35 = vpop.eup %15144 }
 0x8db   :  { %v15147_v37 = vpop.eup %15146  ;;  %v2833_v33 = vmul.f32 %v15145_v35, %v15143_v34  ;;  %v12398_v34 = vld [vmem:[%s18334_s5 + $0xc0] sm:$0xff] }
 0x8dc   :  { %v2832_v40 = vmul.f32 %v15147_v37, %v2830_v36  ;;  %v12410_v35 = vld [vmem:[%s18334_s5 + $0xe0] sm:$0xff]  ;;  %v16420_v36 = vld [vmem:[%s18337_s6 + $0x98] sm:$0xff] }
 0x8dd   :  { %v16425_v37 = vld [vmem:[%s18337_s6 + $0xb8] sm:$0xff] }
 0x8de   :  { %v16325_v39 = vadd.f32 %v2833_v33, %v2832_v40  ;;  %v16434_v33 = vld [vmem:[%s18337_s6 + $0x90] sm:$0xff]  ;;  %v16448_v40 = vld [vmem:[%s18337_s6 + $0x88] sm:$0xff] }
 0x8e0   :  { %15150 = vtanh.f32 %v16325_v39  ;;  %v3158_v60 = vrot.slane %v16325_v39, 6  ;;  %v16453_v39 = vld [vmem:[%s18337_s6 + $0xa8] sm:$0xff] }
 0x8e3   :  { %v15149_v41 = vpop.eup %15148 }
 0x8ed   :  { %v15151_v42 = vpop.eup %15150 }
 0x8ee   :  { %v2836_v43 = vmul.f32 %v15151_v42, %v15149_v41  ;;  %v16462_v41 = vld [vmem:[%s18337_s6 + $0x80] sm:$0xff] }
 0x8ef   :  { %v16469_v42 = vld [vmem:[%s18337_s6 + $0xa0] sm:$0xff] }
 0x8f0   :  { %2837 = vst.msk [vmem:[#allocation2 + $0x8] sm:$0x30] %vm1536_vm6, %v2836_v43  ;;  %v2839_v44 = vrot.slane %v2836_v43, 4  ;;  %v16482_v43 = vld [vmem:[%s18337_s6 + $0xd8] sm:$0xff] }
 0x8f2   :  { %13793 = vmatmul.mubr.msk.f32.vlgmr.msra.gmra.mxu1 %vm147_vm2, %v2839_v44  ;;  %13804 = vmatmul.mubr.msk.f32.vlgmr.msra.gmra.mxu0 %vm147_vm2, %v2839_v44 }
 0x8f3   :  { %13807 = vmatpush3.msra.mxu1 %v16225_v52  ;;  %13818 = vmatpush3.msra.mxu0 %v16231_v7  ;;  %v12374_v52 = vld [vmem:[%s18334_s5 + $0x80] sm:$0xff] }
 0x8f4   :  { %13808 = vmatprep.subr.mxu1 %v15618_v56  ;;  %13819 = vmatprep.subr.mxu0 %v15618_v56  ;;  %v12386_v7 = vld [vmem:[%s18334_s5 + $0xa0] sm:$0xff] }
 0x8f5   :  { %13809 = vmatpush3.msra.mxu1 %v16239_v53  ;;  %13820 = vmatpush3.msra.mxu0 %v16245_v8  ;;  %v12401_v53 = vld [vmem:[%s18334_s5 + $0xd8] sm:$0xff] }
 0x8f6   :  { %13810 = vmatprep.subr.mxu1 %v15618_v56  ;;  %13821 = vmatprep.subr.mxu0 %v15618_v56  ;;  %v12413_v8 = vld [vmem:[%s18334_s5 + $0xf8] sm:$0xff] }
 0x8f7   :  { %13811 = vmatpush3.msra.mxu1 %v16253_v9  ;;  %13822 = vmatpush3.msra.mxu0 %v16259_v10 }
 0x8f8   :  { %13812 = vmatprep.subr.mxu1 %v15618_v56  ;;  %13823 = vmatprep.subr.mxu0 %v15618_v56 }
 0x8f9   :  { %13813 = vmatpush3.msra.mxu1 %v16267_v13  ;;  %13814 = vmatprep.mubr.msk.f32.mxu1 %vm15619_vm3, %v15618_v56 }
 0x8fa   :  { %13824 = vmatpush3.msra.mxu0 %v16275_v14  ;;  %13825 = vmatprep.mubr.msk.f32.mxu0 %vm15619_vm3, %v15618_v56 }
 0x8fb   :  { %13815 = vmatmul.mubr.msk.f32.vlgmr.msra.gmra.mxu1 %vm147_vm2, %v2839_v44  ;;  %13826 = vmatmul.mubr.msk.f32.vlgmr.msra.gmra.mxu0 %vm147_vm2, %v2839_v44  ;;  %v16487_v44 = vld [vmem:[%s18337_s6 + $0xf8] sm:$0xff] }
 0x8fc   :  { %13836 = vmatprep.mubr.msk.f32.mxu1 %vm147_vm2, %v16351_v45  ;;  %13847 = vmatprep.mubr.msk.f32.mxu0 %vm147_vm2, %v16351_v45 }
 0x8fd   :  { %13828 = vmatprep.subr.mxu1 %v12377_v46  ;;  %13839 = vmatprep.subr.mxu0 %v12389_v47 }
 0x8fe   :  { %13829 = vmatpush3.msra.mxu1 %v12377_v46  ;;  %13840 = vmatpush3.msra.mxu0 %v12389_v47  ;;  %v16501_v46 = vld [vmem:[%s18337_s6 + $0xf0] sm:$0xff]  ;;  %v16510_v47 = vld [vmem:[%s18337_s6 + $0xc8] sm:$0xff] }
 0x8ff   :  { %13830 = vmatprep.subr.mxu1 %v12376_v48  ;;  %13841 = vmatprep.subr.mxu0 %v12388_v50 }
 0x900   :  { %13831 = vmatpush3.msra.mxu1 %v12376_v48  ;;  %13842 = vmatpush3.msra.mxu0 %v12388_v50  ;;  %v16515_v48 = vld [vmem:[%s18337_s6 + $0xe8] sm:$0xff]  ;;  %v16524_v50 = vld [vmem:[%s18337_s6 + $0xc0] sm:$0xff] }
 0x901   :  { %13832 = vmatprep.subr.mxu1 %v12375_v51  ;;  %13843 = vmatprep.subr.mxu0 %v12387_v49 }
 0x902   :  { %13833 = vmatpush3.msra.mxu1 %v12375_v51  ;;  %13844 = vmatpush3.msra.mxu0 %v12387_v49  ;;  %v16531_v51 = vld [vmem:[%s18337_s6 + $0xe0] sm:$0xff] }
 0x903   :  { %13834 = vmatprep.subr.mxu1 %v12374_v52  ;;  %13845 = vmatprep.subr.mxu0 %v12386_v7  ;;  %v12379_v49 = vld [vmem:[%s18338_s7 + $0x4] ss:$0 sm:$0xff] }
 0x904   :  { %13835 = vmatpush3.msra.mxu1 %v12374_v52  ;;  %13846 = vmatpush3.msra.mxu0 %v12386_v7  ;;  %v12391_v52 = vld [vmem:[%s18338_s7 + $0x5] ss:$0 sm:$0xff] }
 0x905   :  { %13850 = vmatprep.subr.mxu1 %v12401_v53  ;;  %13861 = vmatprep.subr.mxu0 %v12413_v8 }
 0x9b2   :  { %v2908_v9 = vpop.f32.mrf.mxu1  ;;  %v2988_v10 = vpop.f32.mrf.mxu0 }
 0x9b3   :  { %v2913_v13 = vrot.slane %v2908_v9, 2  ;;  %v2993_v14 = vrot.slane %v2988_v10, 2 }
 0x9b4   :  { %v13794_v15 = vpop.f32.mrf.mxu1  ;;  %v13805_v16 = vpop.f32.mrf.mxu0 }
 0x9b5   :  { %v2915_v17 = vadd.f32 %v2913_v13, %v15925_v11  ;;  %v2995_v18 = vadd.f32 %v2993_v14, %v15927_v12  ;;  %v12403_v14 = vld [vmem:[%s18338_s7 + $0x6] ss:$0 sm:$0xff]  ;;  %v12415_v15 = vld [vmem:[%s18338_s7 + $0x7] ss:$0 sm:$0xff] }
 0x9b7   :  { %v12368_v21 = vmul.f32 -1.442695, %v2915_v17  ;;  %v12370_v22 = vmul.f32 -1.442695, %v2995_v18 }
 0x9b9   :  { %15152 = vpow2.f32 %v12368_v21 }
 0x9ba   :  { %15154 = vpow2.f32 %v12370_v22 }
 0x9bb   :  { %v3068_v25 = vpop.f32.mrf.mxu1  ;;  %v3143_v26 = vpop.f32.mrf.mxu0 }
 0x9bc   :  { %v3148_v27 = vrot.slane %v3143_v26, 2  ;;  %v3073_v23 = vrot.slane %v3068_v25, 2 }
 0x9bd   :  { %v13816_v28 = vpop.f32.mrf.mxu1  ;;  %v13827_v29 = vpop.f32.mrf.mxu0 }
 0x9be   :  { %v3150_v30 = vadd.f32 %v3148_v27, %v15937_v20  ;;  %v3075_v31 = vadd.f32 %v3073_v23, %v15935_v19 }
 0x9c0   :  { %v12373_v24 = vmul.f32 -1.442695, %v3150_v30 }
 0x9c2   :  { %15156 = vpow2.f32 %v12373_v24 }
 0x9c3   :  { %15158 = vtanh.f32 %v3075_v31 }
 0x9c6   :  { %v15153_v54 = vpop.eup %15152 }
 0x9c7   :  { %v15155_v55 = vpop.eup %15154  ;;  %v2919_v11 = vadd.f32 1.0, %v15153_v54 }
 0x9c8   :  { %v2999_v12 = vadd.f32 1.0, %v15155_v55 }
 0x9c9   :  { %15160 = vrcp.f32 %v2919_v11 }
 0x9ca   :  { %15162 = vrcp.f32 %v2999_v12 }
 0x9cf   :  { %v15157_v57 = vpop.eup %15156 }
 0x9d0   :  { %v15159_v58 = vpop.eup %15158  ;;  %v3154_v20 = vadd.f32 1.0, %v15157_v57 }
 0x9d2   :  { %15164 = vrcp.f32 %v3154_v20 }
 0x9d6   :  { %v15161_v59 = vpop.eup %15160 }
 0x9d7   :  { %v15163_v61 = vpop.eup %15162  ;;  %v3161_v62 = vmul.f32 %v15161_v59, %v15159_v58 }
 0x9d8   :  { %v3160_v63 = vmul.f32 %v15163_v61, %v3158_v60 }
 0x9da   :  { %v3162_v0 = vadd.f32 %v3161_v62, %v3160_v63 }
 0x9dc   :  { %15166 = vtanh.f32 %v3162_v0 }
 0x9df   :  { %v15165_v19 = vpop.eup %15164 }
 0x9e9   :  { %v15167_v1 = vpop.eup %15166 }
 0x9ea   :  { %v3164_v2 = vmul.f32 %v15167_v1, %v15165_v19 }
 0x9ec   :  { %3165 = vst.msk [vmem:[#allocation2 + $0x8] sm:$0xc0] %vm1865_vm7, %v3164_v2 }
 0x9f3   :  { %v3167_v3 = vld [vmem:[#allocation2 + $0x8] sm:$0xff] }
 0x9f4   :  { %13837 = vmatmul.mubr.msk.f32.vlgmr.msra.gmra.mxu1 %vm147_vm2, %v3167_v3  ;;  %13848 = vmatmul.mubr.msk.f32.vlgmr.msra.gmra.mxu0 %vm147_vm2, %v3167_v3 }
 0x9f5   :  { %13851 = vmatpush3.msra.mxu1 %v12401_v53  ;;  %13862 = vmatpush3.msra.mxu0 %v12413_v8 }
 0x9f6   :  { %13852 = vmatprep.subr.mxu1 %v12400_v4  ;;  %13858 = vmatprep.mubr.msk.f32.mxu1 %vm147_vm2, %v16351_v45 }
 0x9f7   :  { %13863 = vmatprep.subr.mxu0 %v12412_v5  ;;  %13869 = vmatprep.mubr.msk.f32.mxu0 %vm147_vm2, %v16351_v45  ;;  %v16496_v45 = vld [vmem:[%s18337_s6 + $0xd0] sm:$0xff] }
 0x9f8   :  { %13853 = vmatpush3.msra.mxu1 %v12400_v4  ;;  %13864 = vmatpush3.msra.mxu0 %v12412_v5 }
 0x9f9   :  { %13854 = vmatprep.subr.mxu1 %v12399_v6  ;;  %13865 = vmatprep.subr.mxu0 %v12411_v32 }
 0x9fa   :  { %13855 = vmatpush3.msra.mxu1 %v12399_v6  ;;  %13866 = vmatpush3.msra.mxu0 %v12411_v32 }
 0x9fb   :  { %13856 = vmatprep.subr.mxu1 %v12398_v34  ;;  %13867 = vmatprep.subr.mxu0 %v12410_v35 }
 0x9fc   :  { %13857 = vmatpush3.msra.mxu1 %v12398_v34  ;;  %13868 = vmatpush3.msra.mxu0 %v12410_v35 }
 0x9fd   :  { %13859 = vmatmul.mubr.msk.f32.vlgmr.msra.gmra.mxu1 %vm147_vm2, %v3167_v3  ;;  %13870 = vmatmul.mubr.msk.f32.vlgmr.msra.gmra.mxu0 %vm147_vm2, %v3167_v3 }
 0x9fe   :  { %13872 = vmatprep.subr.mxu1 %v15618_v56  ;;  %13883 = vmatprep.subr.mxu0 %v15618_v56 }
 0x9ff   :  { %13873 = vmatpush3.msra.mxu1 %v16420_v36  ;;  %13884 = vmatpush3.msra.mxu0 %v16425_v37 }
 0xa00   :  { %13874 = vmatprep.subr.mxu1 %v15618_v56  ;;  %13885 = vmatprep.subr.mxu0 %v15618_v56 }
 0xa01   :  { %13875 = vmatpush3.msra.mxu1 %v16434_v33  ;;  %13886 = vmatpush3.msra.mxu0 %v16439_v38 }
 0xa02   :  { %13876 = vmatprep.subr.mxu1 %v15618_v56  ;;  %13887 = vmatprep.subr.mxu0 %v15618_v56 }
 0xa03   :  { %13877 = vmatpush3.msra.mxu1 %v16448_v40  ;;  %13888 = vmatpush3.msra.mxu0 %v16453_v39 }
 0xa04   :  { %13878 = vmatprep.subr.mxu1 %v15618_v56  ;;  %13889 = vmatprep.subr.mxu0 %v15618_v56 }
 0xa05   :  { %13879 = vmatpush3.msra.mxu1 %v16462_v41  ;;  %13880 = vmatprep.mubr.msk.f32.mxu1 %vm15619_vm3, %v15618_v56 }
 0xa06   :  { %13890 = vmatpush3.msra.mxu0 %v16469_v42  ;;  %13891 = vmatprep.mubr.msk.f32.mxu0 %vm15619_vm3, %v15618_v56 }
 0xa07   :  { %13881 = vmatmul.mubr.f32.vlgmr.msra.gmra.mxu1 %v15618_v56  ;;  %13892 = vmatmul.mubr.f32.vlgmr.msra.gmra.mxu0 %v15618_v56 }
 0xa08   :  { %13894 = vmatprep.subr.mxu1 %v15618_v56  ;;  %13905 = vmatprep.subr.mxu0 %v15618_v56 }
 0xa09   :  { %13895 = vmatpush3.msra.mxu1 %v16482_v43  ;;  %13906 = vmatpush3.msra.mxu0 %v16487_v44 }
 0xa0a   :  { %13896 = vmatprep.subr.mxu1 %v15618_v56  ;;  %13907 = vmatprep.subr.mxu0 %v15618_v56 }
 0xa0b   :  { %13897 = vmatpush3.msra.mxu1 %v16496_v45  ;;  %13908 = vmatpush3.msra.mxu0 %v16501_v46 }
 0xa0c   :  { %13898 = vmatprep.subr.mxu1 %v15618_v56  ;;  %13909 = vmatprep.subr.mxu0 %v15618_v56 }
 0xa0d   :  { %13899 = vmatpush3.msra.mxu1 %v16510_v47  ;;  %13910 = vmatpush3.msra.mxu0 %v16515_v48 }
 0xa0e   :  { %13900 = vmatprep.subr.mxu1 %v15618_v56  ;;  %13911 = vmatprep.subr.mxu0 %v15618_v56 }
 0xa0f   :  { %13901 = vmatpush3.msra.mxu1 %v16524_v50  ;;  %13902 = vmatprep.mubr.msk.f32.mxu1 %vm15619_vm3, %v15618_v56 }
 0xa10   :  { %13912 = vmatpush3.msra.mxu0 %v16531_v51  ;;  %13913 = vmatprep.mubr.msk.f32.mxu0 %vm15619_vm3, %v15618_v56 }
 0xa11   :  { %13903 = vmatmul.mubr.f32.vlgmr.msra.gmra.mxu1 %v15618_v56  ;;  %13914 = vmatmul.mubr.f32.vlgmr.msra.gmra.mxu0 %v15618_v56 }
 0xa12   :  { %13916 = vmatprep.subr.mxu1 %v15618_v56  ;;  %13927 = vmatprep.subr.mxu0 %v15618_v56 }
 0xa13   :  { %13917 = vmatpush3.msra.mxu1 %v16420_v36  ;;  %13928 = vmatpush3.msra.mxu0 %v16425_v37 }
 0xa14   :  { %13918 = vmatprep.subr.mxu1 %v15618_v56  ;;  %13929 = vmatprep.subr.mxu0 %v15618_v56 }
 0xa15   :  { %13919 = vmatpush3.msra.mxu1 %v16434_v33  ;;  %13930 = vmatpush3.msra.mxu0 %v16439_v38 }
 0xa16   :  { %13920 = vmatprep.subr.mxu1 %v15618_v56  ;;  %13931 = vmatprep.subr.mxu0 %v15618_v56 }
 0xa17   :  { %13921 = vmatpush3.msra.mxu1 %v16448_v40  ;;  %13932 = vmatpush3.msra.mxu0 %v16453_v39 }
 0xa18   :  { %13922 = vmatprep.subr.mxu1 %v15618_v56  ;;  %13933 = vmatprep.subr.mxu0 %v15618_v56 }
 0xa19   :  { %13923 = vmatpush3.msra.mxu1 %v16462_v41  ;;  %13934 = vmatpush3.msra.mxu0 %v16469_v42 }
 0xa1a   :  { %13924 = vmatprep.mubr.msk.f32.mxu1 %vm15619_vm3, %v15618_v56  ;;  %13935 = vmatprep.mubr.msk.f32.mxu0 %vm15619_vm3, %v15618_v56 }
 0xa1b   :  { %13938 = vmatprep.subr.mxu1 %v15618_v56  ;;  %13949 = vmatprep.subr.mxu0 %v15618_v56 }
 0xab4   :  { %v13838_v7 = vpop.f32.mrf.mxu1  ;;  %v13849_v53 = vpop.f32.mrf.mxu0 }
 0xab5   :  { %v16571_v8 = vadd.f32 %v13838_v7, %v12379_v49  ;;  %v16573_v9 = vadd.f32 %v13849_v53, %v12391_v52 }
 0xab6   :  { %v3253_v10 = vpop.f32.mrf.mxu1  ;;  %v3346_v13 = vpop.f32.mrf.mxu0 }
 0xab7   :  { %v16585_v26 = vadd.f32 %v12379_v49, %v3253_v10  ;;  %v16587_v27 = vadd.f32 %v12391_v52, %v3346_v13 }
 0xabd   :  { %v13860_v16 = vpop.f32.mrf.mxu1  ;;  %v13871_v17 = vpop.f32.mrf.mxu0 }
 0xabe   :  { %v16581_v18 = vadd.f32 %v13860_v16, %v12403_v14  ;;  %v16583_v21 = vadd.f32 %v13871_v17, %v12415_v15 }
 0xabf   :  { %v3439_v22 = vpop.f32.mrf.mxu1  ;;  %v3532_v25 = vpop.f32.mrf.mxu0 }
 0xac0   :  { %v16591_v11 = vadd.f32 %v12415_v15, %v3532_v25  ;;  %v16594_v61 = vadd.f32 %v12403_v14, %v3439_v22 }
 0xac7   :  { %v3612_v28 = vpop.f32.mrf.mxu1  ;;  %v3689_v29 = vpop.f32.mrf.mxu0 }
 0xac8   :  { %v3616_v30 = vadd.f32 %v3612_v28, %v16585_v26  ;;  %v3693_v23 = vadd.f32 %v3689_v29, %v16587_v27 }
 0xac9   :  { %v13882_v24 = vpop.f32.mrf.mxu1  ;;  %v13893_v31 = vpop.f32.mrf.mxu0 }
 0xaca   :  { %v12422_v54 = vmul.f32 -1.442695, %v3616_v30  ;;  %v12423_v55 = vmul.f32 -1.442695, %v3693_v23 }
 0xacc   :  { %15168 = vpow2.f32 %v12422_v54 }
 0xacd   :  { %15170 = vpow2.f32 %v12423_v55 }
 0xad1   :  { %v3766_v12 = vpop.f32.mrf.mxu1  ;;  %v3838_v57 = vpop.f32.mrf.mxu0 }
 0xad2   :  { %v3842_v58 = vadd.f32 %v3838_v57, %v16591_v11  ;;  %v3770_v20 = vadd.f32 %v3766_v12, %v16594_v61 }
 0xad3   :  { %v13904_v59 = vpop.f32.mrf.mxu1  ;;  %v13915_v60 = vpop.f32.mrf.mxu0 }
 0xad4   :  { %v12424_v62 = vmul.f32 -1.442695, %v3842_v58 }
 0xad6   :  { %15172 = vpow2.f32 %v12424_v62 }
 0xad7   :  { %15174 = vtanh.f32 %v3770_v20 }
 0xad9   :  { %v15169_v63 = vpop.eup %15168 }
 0xada   :  { %v15171_v0 = vpop.eup %15170  ;;  %v3620_v19 = vadd.f32 1.0, %v15169_v63 }
 0xadb   :  { %v3697_v1 = vadd.f32 1.0, %v15171_v0 }
 0xadc   :  { %15176 = vrcp.f32 %v3620_v19 }
 0xadd   :  { %15178 = vrcp.f32 %v3697_v1 }
 0xae3   :  { %v15173_v2 = vpop.eup %15172 }
 0xae4   :  { %v15175_v3 = vpop.eup %15174  ;;  %v3846_v32 = vadd.f32 1.0, %v15173_v2 }
 0xae6   :  { %15180 = vrcp.f32 %v3846_v32 }
 0xae9   :  { %v15177_v4 = vpop.eup %15176 }
 0xaea   :  { %v15179_v5 = vpop.eup %15178  ;;  %v3850_v6 = vmul.f32 %v15177_v4, %v15175_v3 }
 0xaeb   :  { %v3849_v34 = vmul.f32 0.0, %v15179_v5 }
 0xaed   :  { %v16597_v35 = vadd.f32 %v3850_v6, %v3849_v34 }
 0xaef   :  { %15182 = vtanh.f32 %v16597_v35  ;;  %v4174_v19 = vrot.slane %v16597_v35, 6 }
 0xaf3   :  { %v15181_v49 = vpop.eup %15180 }
 0xafc   :  { %v15183_v52 = vpop.eup %15182 }
 0xafd   :  { %v3853_v7 = vmul.f32 %v15183_v52, %v15181_v49 }
 0xaff   :  { %3854 = vst.msk [vmem:[#allocation3] sm:$0x3] %vm879_vm4, %v3853_v7  ;;  %13925 = vmatmul.mubr.msk.f32.vlgmr.msra.gmra.mxu1 %vm147_vm2, %v3853_v7  ;;  %13936 = vmatmul.mubr.msk.f32.vlgmr.msra.gmra.mxu0 %vm147_vm2, %v3853_v7 }
 0xb00   :  { %13939 = vmatpush3.msra.mxu1 %v16482_v43  ;;  %13950 = vmatpush3.msra.mxu0 %v16487_v44 }
 0xb01   :  { %13940 = vmatprep.subr.mxu1 %v15618_v56  ;;  %13951 = vmatprep.subr.mxu0 %v15618_v56 }
 0xb02   :  { %13941 = vmatpush3.msra.mxu1 %v16496_v45  ;;  %13952 = vmatpush3.msra.mxu0 %v16501_v46 }
 0xb03   :  { %13942 = vmatprep.subr.mxu1 %v15618_v56  ;;  %13953 = vmatprep.subr.mxu0 %v15618_v56 }
 0xb04   :  { %13943 = vmatpush3.msra.mxu1 %v16510_v47  ;;  %13954 = vmatpush3.msra.mxu0 %v16515_v48 }
 0xb05   :  { %13944 = vmatprep.subr.mxu1 %v15618_v56  ;;  %13955 = vmatprep.subr.mxu0 %v15618_v56 }
 0xb06   :  { %13945 = vmatpush3.msra.mxu1 %v16524_v50  ;;  %13946 = vmatprep.mubr.msk.f32.mxu1 %vm15619_vm3, %v15618_v56 }
 0xb07   :  { %13956 = vmatpush3.msra.mxu0 %v16531_v51  ;;  %13957 = vmatprep.mubr.msk.f32.mxu0 %vm15619_vm3, %v15618_v56 }
 0xb08   :  { %13947 = vmatmul.mubr.msk.f32.vlgmr.msra.gmra.mxu1 %vm147_vm2, %v3853_v7  ;;  %13958 = vmatmul.mubr.msk.f32.vlgmr.msra.gmra.mxu0 %vm147_vm2, %v3853_v7 }
 0xb09   :  { %13960 = vmatprep.subr.mxu1 %v15618_v56  ;;  %13971 = vmatprep.subr.mxu0 %v15618_v56 }
 0xb0a   :  { %13961 = vmatpush3.msra.mxu1 %v16420_v36  ;;  %13972 = vmatpush3.msra.mxu0 %v16425_v37 }
 0xb0b   :  { %13962 = vmatprep.subr.mxu1 %v15618_v56  ;;  %13973 = vmatprep.subr.mxu0 %v15618_v56 }
 0xb0c   :  { %13963 = vmatpush3.msra.mxu1 %v16434_v33  ;;  %13974 = vmatpush3.msra.mxu0 %v16439_v38 }
 0xb0d   :  { %13964 = vmatprep.subr.mxu1 %v15618_v56  ;;  %13975 = vmatprep.subr.mxu0 %v15618_v56 }
 0xb0e   :  { %13965 = vmatpush3.msra.mxu1 %v16448_v40  ;;  %13976 = vmatpush3.msra.mxu0 %v16453_v39 }
 0xb0f   :  { %13966 = vmatprep.subr.mxu1 %v15618_v56  ;;  %13977 = vmatprep.subr.mxu0 %v15618_v56 }
 0xb10   :  { %13967 = vmatpush3.msra.mxu1 %v16462_v41  ;;  %13978 = vmatpush3.msra.mxu0 %v16469_v42 }
 0xb11   :  { %13968 = vmatprep.mubr.msk.f32.mxu1 %vm15619_vm3, %v15618_v56  ;;  %13979 = vmatprep.mubr.msk.f32.mxu0 %vm15619_vm3, %v15618_v56 }
 0xb12   :  { %13982 = vmatprep.subr.mxu1 %v15618_v56  ;;  %13993 = vmatprep.subr.mxu0 %v15618_v56 }
 0xbbf   :  { %v3924_v53 = vpop.f32.mrf.mxu1  ;;  %v4004_v10 = vpop.f32.mrf.mxu0 }
 0xbc0   :  { %v3929_v13 = vrot.slane %v3924_v53, 6  ;;  %v4009_v14 = vrot.slane %v4004_v10, 6 }
 0xbc1   :  { %v13926_v15 = vpop.f32.mrf.mxu1  ;;  %v13937_v16 = vpop.f32.mrf.mxu0 }
 0xbc2   :  { %v3931_v17 = vadd.f32 %v3929_v13, %v16585_v26  ;;  %v4011_v22 = vadd.f32 %v4009_v14, %v16587_v27 }
 0xbc4   :  { %v12426_v25 = vmul.f32 -1.442695, %v3931_v17  ;;  %v12428_v28 = vmul.f32 -1.442695, %v4011_v22 }
 0xbc6   :  { %15184 = vpow2.f32 %v12426_v25 }
 0xbc7   :  { %15186 = vpow2.f32 %v12428_v28 }
 0xbc8   :  { %v4084_v29 = vpop.f32.mrf.mxu1  ;;  %v4159_v30 = vpop.f32.mrf.mxu0 }
 0xbc9   :  { %v4164_v23 = vrot.slane %v4159_v30, 6  ;;  %v4089_v55 = vrot.slane %v4084_v29, 6 }
 0xbca   :  { %v13948_v24 = vpop.f32.mrf.mxu1  ;;  %v13959_v31 = vpop.f32.mrf.mxu0 }
 0xbcb   :  { %v4166_v54 = vadd.f32 %v4164_v23, %v16591_v11  ;;  %v4091_v57 = vadd.f32 %v4089_v55, %v16594_v61 }
 0xbcd   :  { %v12431_v12 = vmul.f32 -1.442695, %v4166_v54 }
 0xbcf   :  { %15188 = vpow2.f32 %v12431_v12 }
 0xbd0   :  { %15190 = vtanh.f32 %v4091_v57 }
 0xbd3   :  { %v15185_v58 = vpop.eup %15184 }
 0xbd4   :  { %v15187_v59 = vpop.eup %15186  ;;  %v3935_v60 = vadd.f32 1.0, %v15185_v58 }
 0xbd5   :  { %v4015_v62 = vadd.f32 1.0, %v15187_v59 }
 0xbd6   :  { %15192 = vrcp.f32 %v3935_v60 }
 0xbd7   :  { %15194 = vrcp.f32 %v4015_v62 }
 0xbdc   :  { %v15189_v20 = vpop.eup %15188 }
 0xbdd   :  { %v15191_v63 = vpop.eup %15190  ;;  %v4170_v3 = vadd.f32 1.0, %v15189_v20 }
 0xbdf   :  { %15196 = vrcp.f32 %v4170_v3 }
 0xbe3   :  { %v15193_v0 = vpop.eup %15192 }
 0xbe4   :  { %v15195_v1 = vpop.eup %15194  ;;  %v4177_v2 = vmul.f32 %v15193_v0, %v15191_v63 }
 0xbe5   :  { %v4176_v4 = vmul.f32 %v15195_v1, %v4174_v19 }
 0xbe7   :  { %v16650_v5 = vadd.f32 %v4177_v2, %v4176_v4 }
 0xbe9   :  { %15198 = vtanh.f32 %v16650_v5  ;;  %v4502_v20 = vrot.slane %v16650_v5, 6 }
 0xbec   :  { %v15197_v6 = vpop.eup %15196 }
 0xbf6   :  { %v15199_v32 = vpop.eup %15198 }
 0xbf7   :  { %v4180_v34 = vmul.f32 %v15199_v32, %v15197_v6 }
 0xbf9   :  { %4181 = vst.msk [vmem:[#allocation3] sm:$0xc] %vm1207_vm5, %v4180_v34  ;;  %v4183_v49 = vrot.slane %v4180_v34, 2 }
 0xbfb   :  { %13969 = vmatmul.mubr.msk.f32.vlgmr.msra.gmra.mxu1 %vm147_vm2, %v4183_v49  ;;  %13980 = vmatmul.mubr.msk.f32.vlgmr.msra.gmra.mxu0 %vm147_vm2, %v4183_v49 }
 0xbfc   :  { %13983 = vmatpush3.msra.mxu1 %v16482_v43  ;;  %13994 = vmatpush3.msra.mxu0 %v16487_v44 }
 0xbfd   :  { %13984 = vmatprep.subr.mxu1 %v15618_v56  ;;  %13995 = vmatprep.subr.mxu0 %v15618_v56 }
 0xbfe   :  { %13985 = vmatpush3.msra.mxu1 %v16496_v45  ;;  %13996 = vmatpush3.msra.mxu0 %v16501_v46 }
 0xbff   :  { %13986 = vmatprep.subr.mxu1 %v15618_v56  ;;  %13997 = vmatprep.subr.mxu0 %v15618_v56 }
 0xc00   :  { %13987 = vmatpush3.msra.mxu1 %v16510_v47  ;;  %13998 = vmatpush3.msra.mxu0 %v16515_v48 }
 0xc01   :  { %13988 = vmatprep.subr.mxu1 %v15618_v56  ;;  %13999 = vmatprep.subr.mxu0 %v15618_v56 }
 0xc02   :  { %13989 = vmatpush3.msra.mxu1 %v16524_v50  ;;  %13990 = vmatprep.mubr.msk.f32.mxu1 %vm15619_vm3, %v15618_v56 }
 0xc03   :  { %14000 = vmatpush3.msra.mxu0 %v16531_v51  ;;  %14001 = vmatprep.mubr.msk.f32.mxu0 %vm15619_vm3, %v15618_v56 }
 0xc04   :  { %13991 = vmatmul.mubr.msk.f32.vlgmr.msra.gmra.mxu1 %vm147_vm2, %v4183_v49  ;;  %14002 = vmatmul.mubr.msk.f32.vlgmr.msra.gmra.mxu0 %vm147_vm2, %v4183_v49 }
 0xc05   :  { %14004 = vmatprep.subr.mxu1 %v15618_v56  ;;  %14015 = vmatprep.subr.mxu0 %v15618_v56 }
 0xc06   :  { %14005 = vmatpush3.msra.mxu1 %v16420_v36  ;;  %14016 = vmatpush3.msra.mxu0 %v16425_v37 }
 0xc07   :  { %14006 = vmatprep.subr.mxu1 %v15618_v56  ;;  %14017 = vmatprep.subr.mxu0 %v15618_v56 }
 0xc08   :  { %14007 = vmatpush3.msra.mxu1 %v16434_v33  ;;  %14018 = vmatpush3.msra.mxu0 %v16439_v38 }
 0xc09   :  { %14008 = vmatprep.subr.mxu1 %v15618_v56  ;;  %14019 = vmatprep.subr.mxu0 %v15618_v56 }
 0xc0a   :  { %14009 = vmatpush3.msra.mxu1 %v16448_v40  ;;  %14020 = vmatpush3.msra.mxu0 %v16453_v39 }
 0xc0b   :  { %14010 = vmatprep.subr.mxu1 %v15618_v56  ;;  %14021 = vmatprep.subr.mxu0 %v15618_v56 }
 0xc0c   :  { %14011 = vmatpush3.msra.mxu1 %v16462_v41  ;;  %14022 = vmatpush3.msra.mxu0 %v16469_v42 }
 0xc0d   :  { %14012 = vmatprep.mubr.msk.f32.mxu1 %vm15619_vm3, %v15618_v56  ;;  %14023 = vmatprep.mubr.msk.f32.mxu0 %vm15619_vm3, %v15618_v56 }
 0xc0e   :  { %14026 = vmatprep.subr.mxu1 %v15618_v56  ;;  %14037 = vmatprep.subr.mxu0 %v15618_v56 }
 0xcbb   :  { %v4252_v35 = vpop.f32.mrf.mxu1  ;;  %v4332_v52 = vpop.f32.mrf.mxu0 }
 0xcbc   :  { %v4257_v7 = vrot.slane %v4252_v35, 4  ;;  %v4337_v53 = vrot.slane %v4332_v52, 4 }
 0xcbd   :  { %v13970_v10 = vpop.f32.mrf.mxu1  ;;  %v13981_v13 = vpop.f32.mrf.mxu0 }
 0xcbe   :  { %v4259_v14 = vadd.f32 %v4257_v7, %v16585_v26  ;;  %v4339_v15 = vadd.f32 %v4337_v53, %v16587_v27 }
 0xcc0   :  { %v12433_v16 = vmul.f32 -1.442695, %v4259_v14  ;;  %v12435_v17 = vmul.f32 -1.442695, %v4339_v15 }
 0xcc2   :  { %15200 = vpow2.f32 %v12433_v16 }
 0xcc3   :  { %15202 = vpow2.f32 %v12435_v17 }
 0xcc4   :  { %v4412_v22 = vpop.f32.mrf.mxu1  ;;  %v4487_v25 = vpop.f32.mrf.mxu0 }
 0xcc5   :  { %v4492_v28 = vrot.slane %v4487_v25, 4  ;;  %v4417_v24 = vrot.slane %v4412_v22, 4 }
 0xcc6   :  { %v13992_v29 = vpop.f32.mrf.mxu1  ;;  %v14003_v30 = vpop.f32.mrf.mxu0 }
 0xcc7   :  { %v4494_v23 = vadd.f32 %v4492_v28, %v16591_v11  ;;  %v4419_v54 = vadd.f32 %v4417_v24, %v16594_v61 }
 0xcc9   :  { %v12438_v31 = vmul.f32 -1.442695, %v4494_v23 }
 0xccb   :  { %15204 = vpow2.f32 %v12438_v31 }
 0xccc   :  { %15206 = vtanh.f32 %v4419_v54 }
 0xccf   :  { %v15201_v55 = vpop.eup %15200 }
 0xcd0   :  { %v15203_v12 = vpop.eup %15202  ;;  %v4263_v57 = vadd.f32 1.0, %v15201_v55 }
 0xcd1   :  { %v4343_v58 = vadd.f32 1.0, %v15203_v12 }
 0xcd2   :  { %15208 = vrcp.f32 %v4263_v57 }
 0xcd3   :  { %15210 = vrcp.f32 %v4343_v58 }
 0xcd8   :  { %v15205_v59 = vpop.eup %15204 }
 0xcd9   :  { %v15207_v60 = vpop.eup %15206  ;;  %v4498_v19 = vadd.f32 1.0, %v15205_v59 }
 0xcdb   :  { %15212 = vrcp.f32 %v4498_v19 }
 0xcdf   :  { %v15209_v62 = vpop.eup %15208 }
 0xce0   :  { %v15211_v63 = vpop.eup %15210  ;;  %v4505_v0 = vmul.f32 %v15209_v62, %v15207_v60 }
 0xce1   :  { %v4504_v1 = vmul.f32 %v15211_v63, %v4502_v20 }
 0xce3   :  { %v16703_v2 = vadd.f32 %v4505_v0, %v4504_v1 }
 0xce5   :  { %15214 = vtanh.f32 %v16703_v2  ;;  %v4830_v57 = vrot.slane %v16703_v2, 6 }
 0xce8   :  { %v15213_v3 = vpop.eup %15212 }
 0xcf2   :  { %v15215_v4 = vpop.eup %15214 }
 0xcf3   :  { %v4508_v6 = vmul.f32 %v15215_v4, %v15213_v3 }
 0xcf5   :  { %4509 = vst.msk [vmem:[#allocation3] sm:$0x30] %vm1536_vm6, %v4508_v6  ;;  %v4511_v32 = vrot.slane %v4508_v6, 4 }
 0xcf7   :  { %14013 = vmatmul.mubr.msk.f32.vlgmr.msra.gmra.mxu1 %vm147_vm2, %v4511_v32  ;;  %14024 = vmatmul.mubr.msk.f32.vlgmr.msra.gmra.mxu0 %vm147_vm2, %v4511_v32 }
 0xcf8   :  { %14027 = vmatpush3.msra.mxu1 %v16482_v43  ;;  %14038 = vmatpush3.msra.mxu0 %v16487_v44 }
 0xcf9   :  { %14028 = vmatprep.subr.mxu1 %v15618_v56  ;;  %14039 = vmatprep.subr.mxu0 %v15618_v56 }
 0xcfa   :  { %14029 = vmatpush3.msra.mxu1 %v16496_v45  ;;  %14040 = vmatpush3.msra.mxu0 %v16501_v46 }
 0xcfb   :  { %14030 = vmatprep.subr.mxu1 %v15618_v56  ;;  %14041 = vmatprep.subr.mxu0 %v15618_v56 }
 0xcfc   :  { %14031 = vmatpush3.msra.mxu1 %v16510_v47  ;;  %14042 = vmatpush3.msra.mxu0 %v16515_v48 }
 0xcfd   :  { %14032 = vmatprep.subr.mxu1 %v15618_v56  ;;  %14043 = vmatprep.subr.mxu0 %v15618_v56 }
 0xcfe   :  { %14033 = vmatpush3.msra.mxu1 %v16524_v50  ;;  %14034 = vmatprep.mubr.msk.f32.mxu1 %vm15619_vm3, %v15618_v56 }
 0xcff   :  { %14044 = vmatpush3.msra.mxu0 %v16531_v51  ;;  %14045 = vmatprep.mubr.msk.f32.mxu0 %vm15619_vm3, %v15618_v56 }
 0xd00   :  { %14035 = vmatmul.mubr.msk.f32.vlgmr.msra.gmra.mxu1 %vm147_vm2, %v4511_v32  ;;  %14046 = vmatmul.mubr.msk.f32.vlgmr.msra.gmra.mxu0 %vm147_vm2, %v4511_v32 }
 0xd01   :  { %14048 = vmatprep.subr.mxu1 %v15618_v56  ;;  %14059 = vmatprep.subr.mxu0 %v15618_v56 }
 0xd02   :  { %14049 = vmatpush3.msra.mxu1 %v16420_v36  ;;  %14060 = vmatpush3.msra.mxu0 %v16425_v37 }
 0xd03   :  { %14050 = vmatprep.subr.mxu1 %v15618_v56  ;;  %14061 = vmatprep.subr.mxu0 %v15618_v56 }
 0xd04   :  { %14051 = vmatpush3.msra.mxu1 %v16434_v33  ;;  %14062 = vmatpush3.msra.mxu0 %v16439_v38 }
 0xd05   :  { %14052 = vmatprep.subr.mxu1 %v15618_v56  ;;  %14063 = vmatprep.subr.mxu0 %v15618_v56 }
 0xd06   :  { %14053 = vmatpush3.msra.mxu1 %v16448_v40  ;;  %14064 = vmatpush3.msra.mxu0 %v16453_v39 }
 0xd07   :  { %14054 = vmatprep.subr.mxu1 %v15618_v56  ;;  %14065 = vmatprep.subr.mxu0 %v15618_v56 }
 0xd08   :  { %14055 = vmatpush3.msra.mxu1 %v16462_v41  ;;  %14066 = vmatpush3.msra.mxu0 %v16469_v42 }
 0xd09   :  { %14056 = vmatprep.mubr.msk.f32.mxu1 %vm15619_vm3, %v15618_v56  ;;  %14067 = vmatprep.mubr.msk.f32.mxu0 %vm15619_vm3, %v15618_v56 }
 0xd0a   :  { %14070 = vmatprep.subr.mxu1 %v15618_v56  ;;  %14081 = vmatprep.subr.mxu0 %v15618_v56 }
 0xdb7   :  { %v4580_v5 = vpop.f32.mrf.mxu1  ;;  %v4660_v34 = vpop.f32.mrf.mxu0 }
 0xdb8   :  { %v4585_v49 = vrot.slane %v4580_v5, 2  ;;  %v4665_v35 = vrot.slane %v4660_v34, 2 }
 0xdb9   :  { %v14014_v52 = vpop.f32.mrf.mxu1  ;;  %v14025_v7 = vpop.f32.mrf.mxu0 }
 0xdba   :  { %v4587_v53 = vadd.f32 %v4585_v49, %v16585_v26  ;;  %v4667_v10 = vadd.f32 %v4665_v35, %v16587_v27 }
 0xdbc   :  { %v12440_v13 = vmul.f32 -1.442695, %v4587_v53  ;;  %v12442_v14 = vmul.f32 -1.442695, %v4667_v10 }
 0xdbe   :  { %15216 = vpow2.f32 %v12440_v13 }
 0xdbf   :  { %15218 = vpow2.f32 %v12442_v14 }
 0xdc0   :  { %v4740_v15 = vpop.f32.mrf.mxu1  ;;  %v4815_v16 = vpop.f32.mrf.mxu0 }
 0xdc1   :  { %v4820_v17 = vrot.slane %v4815_v16, 2  ;;  %v4745_v29 = vrot.slane %v4740_v15, 2 }
 0xdc2   :  { %v14036_v22 = vpop.f32.mrf.mxu1  ;;  %v14047_v25 = vpop.f32.mrf.mxu0 }
 0xdc3   :  { %v4822_v28 = vadd.f32 %v4820_v17, %v16591_v11  ;;  %v4747_v23 = vadd.f32 %v4745_v29, %v16594_v61 }
 0xdc5   :  { %v12445_v30 = vmul.f32 -1.442695, %v4822_v28 }
 0xdc7   :  { %15220 = vpow2.f32 %v12445_v30 }
 0xdc8   :  { %15222 = vtanh.f32 %v4747_v23 }
 0xdcb   :  { %v15217_v24 = vpop.eup %15216 }
 0xdcc   :  { %v15219_v31 = vpop.eup %15218  ;;  %v4591_v26 = vadd.f32 1.0, %v15217_v24 }
 0xdcd   :  { %v4671_v27 = vadd.f32 1.0, %v15219_v31 }
 0xdce   :  { %15224 = vrcp.f32 %v4591_v26 }
 0xdcf   :  { %15226 = vrcp.f32 %v4671_v27 }
 0xdd4   :  { %v15221_v54 = vpop.eup %15220 }
 0xdd5   :  { %v15223_v55 = vpop.eup %15222  ;;  %v4826_v11 = vadd.f32 1.0, %v15221_v54 }
 0xdd7   :  { %15228 = vrcp.f32 %v4826_v11 }
 0xddb   :  { %v15225_v12 = vpop.eup %15224 }
 0xddc   :  { %v15227_v58 = vpop.eup %15226  ;;  %v4833_v59 = vmul.f32 %v15225_v12, %v15223_v55 }
 0xddd   :  { %v4832_v60 = vmul.f32 %v15227_v58, %v4830_v57 }
 0xddf   :  { %v16756_v62 = vadd.f32 %v4833_v59, %v4832_v60 }
 0xde1   :  { %15230 = vtanh.f32 %v16756_v62  ;;  %v5146_v28 = vrot.slane %v16756_v62, 6 }
 0xde4   :  { %v15229_v61 = vpop.eup %15228 }
 0xdee   :  { %v15231_v20 = vpop.eup %15230 }
 0xdef   :  { %v4836_v63 = vmul.f32 %v15231_v20, %v15229_v61 }
 0xdf1   :  { %4837 = vst.msk [vmem:[#allocation3] sm:$0xc0] %vm1865_vm7, %v4836_v63  ;;  %v4839_v0 = vrot.slane %v4836_v63, 6 }
 0xdf3   :  { %14057 = vmatmul.mubr.msk.f32.vlgmr.msra.gmra.mxu1 %vm147_vm2, %v4839_v0  ;;  %14068 = vmatmul.mubr.msk.f32.vlgmr.msra.gmra.mxu0 %vm147_vm2, %v4839_v0 }
 0xdf4   :  { %14071 = vmatpush3.msra.mxu1 %v16482_v43  ;;  %14082 = vmatpush3.msra.mxu0 %v16487_v44 }
 0xdf5   :  { %14072 = vmatprep.subr.mxu1 %v15618_v56  ;;  %14083 = vmatprep.subr.mxu0 %v15618_v56 }
 0xdf6   :  { %14073 = vmatpush3.msra.mxu1 %v16496_v45  ;;  %14084 = vmatpush3.msra.mxu0 %v16501_v46 }
 0xdf7   :  { %14074 = vmatprep.subr.mxu1 %v15618_v56  ;;  %14085 = vmatprep.subr.mxu0 %v15618_v56 }
 0xdf8   :  { %14075 = vmatpush3.msra.mxu1 %v16510_v47  ;;  %14086 = vmatpush3.msra.mxu0 %v16515_v48 }
 0xdf9   :  { %14076 = vmatprep.subr.mxu1 %v15618_v56  ;;  %14087 = vmatprep.subr.mxu0 %v15618_v56 }
 0xdfa   :  { %14077 = vmatpush3.msra.mxu1 %v16524_v50  ;;  %14078 = vmatprep.mubr.msk.f32.mxu1 %vm15619_vm3, %v15618_v56 }
 0xdfb   :  { %14088 = vmatpush3.msra.mxu0 %v16531_v51  ;;  %14089 = vmatprep.mubr.msk.f32.mxu0 %vm15619_vm3, %v15618_v56 }
 0xdfc   :  { %14079 = vmatmul.mubr.msk.f32.vlgmr.msra.gmra.mxu1 %vm147_vm2, %v4839_v0  ;;  %14090 = vmatmul.mubr.msk.f32.vlgmr.msra.gmra.mxu0 %vm147_vm2, %v4839_v0 }
 0xdfd   :  { %14092 = vmatprep.subr.mxu1 %v15618_v56  ;;  %14103 = vmatprep.subr.mxu0 %v15618_v56 }
 0xdfe   :  { %14093 = vmatpush3.msra.mxu1 %v16420_v36  ;;  %14104 = vmatpush3.msra.mxu0 %v16425_v37 }
 0xdff   :  { %14094 = vmatprep.subr.mxu1 %v15618_v56  ;;  %14105 = vmatprep.subr.mxu0 %v15618_v56 }
 0xe00   :  { %14095 = vmatpush3.msra.mxu1 %v16434_v33  ;;  %14106 = vmatpush3.msra.mxu0 %v16439_v38 }
 0xe01   :  { %14096 = vmatprep.subr.mxu1 %v15618_v56  ;;  %14107 = vmatprep.subr.mxu0 %v15618_v56 }
 0xe02   :  { %14097 = vmatpush3.msra.mxu1 %v16448_v40  ;;  %14108 = vmatpush3.msra.mxu0 %v16453_v39 }
 0xe03   :  { %14098 = vmatprep.subr.mxu1 %v15618_v56  ;;  %14109 = vmatprep.subr.mxu0 %v15618_v56 }
 0xe04   :  { %14099 = vmatpush3.msra.mxu1 %v16462_v41  ;;  %14110 = vmatpush3.msra.mxu0 %v16469_v42 }
 0xe05   :  { %14100 = vmatprep.mubr.msk.f32.mxu1 %vm15619_vm3, %v15618_v56  ;;  %14111 = vmatprep.mubr.msk.f32.mxu0 %vm15619_vm3, %v15618_v56 }
 0xe06   :  { %14114 = vmatprep.subr.mxu1 %v15618_v56  ;;  %14125 = vmatprep.subr.mxu0 %v15618_v56 }
 0xeb3   :  { %v4908_v19 = vpop.f32.mrf.mxu1  ;;  %v4985_v1 = vpop.f32.mrf.mxu0 }
 0xeb4   :  { %v4912_v2 = vadd.f32 %v4908_v19, %v16571_v8  ;;  %v4989_v3 = vadd.f32 %v4985_v1, %v16573_v9 }
 0xeb5   :  { %v14058_v4 = vpop.f32.mrf.mxu1  ;;  %v14069_v6 = vpop.f32.mrf.mxu0 }
 0xeb6   :  { %v12447_v32 = vmul.f32 -1.442695, %v4912_v2  ;;  %v12449_v5 = vmul.f32 -1.442695, %v4989_v3 }
 0xeb8   :  { %15232 = vpow2.f32 %v12447_v32 }
 0xeb9   :  { %15234 = vpow2.f32 %v12449_v5 }
 0xebc   :  { %v5062_v34 = vpop.f32.mrf.mxu1  ;;  %v5134_v49 = vpop.f32.mrf.mxu0 }
 0xebd   :  { %v5138_v35 = vadd.f32 %v5134_v49, %v16583_v21  ;;  %v5066_v10 = vadd.f32 %v5062_v34, %v16581_v18  ;;  %v16871_v34 = vld [vmem:[%s18337_s6 + $0xd8] sm:$0xff] }
 0xebe   :  { %v14080_v52 = vpop.f32.mrf.mxu1  ;;  %v14091_v7 = vpop.f32.mrf.mxu0  ;;  %v16877_v49 = vld [vmem:[%s18337_s6 + $0xf8] sm:$0xff] }
 0xebf   :  { %v12452_v53 = vmul.f32 -1.442695, %v5138_v35  ;;  %v16885_v35 = vld [vmem:[%s18337_s6 + $0xd0] sm:$0xff]  ;;  %v16899_v7 = vld [vmem:[%s18337_s6 + $0xc8] sm:$0xff] }
 0xec0   :  { %v16891_v52 = vld [vmem:[%s18337_s6 + $0xf0] sm:$0xff] }
 0xec1   :  { %15236 = vpow2.f32 %v12452_v53  ;;  %v16905_v53 = vld [vmem:[%s18337_s6 + $0xe8] sm:$0xff] }
 0xec2   :  { %15238 = vtanh.f32 %v5066_v10  ;;  %v16913_v10 = vld [vmem:[%s18337_s6 + $0xc0] sm:$0xff] }
 0xec5   :  { %v15233_v13 = vpop.eup %15232 }
 0xec6   :  { %v15235_v14 = vpop.eup %15234  ;;  %v4916_v15 = vadd.f32 1.0, %v15233_v13  ;;  %v16921_v13 = vld [vmem:[%s18337_s6 + $0xe0] sm:$0xff] }
 0xec7   :  { %v4993_v16 = vadd.f32 1.0, %v15235_v14  ;;  %v15578_v14 = vld [vmem:[%s18337_s6 + $0x98] sm:$0xff] }
 0xec8   :  { %15240 = vrcp.f32 %v4916_v15  ;;  %v15579_v15 = vld [vmem:[%s18337_s6 + $0xb8] sm:$0xff] }
 0xec9   :  { %15242 = vrcp.f32 %v4993_v16  ;;  %v15580_v16 = vld [vmem:[%s18337_s6 + $0x90] sm:$0xff] }
 0xece   :  { %v15237_v17 = vpop.eup %15236 }
 0xecf   :  { %v15239_v22 = vpop.eup %15238  ;;  %v5142_v23 = vadd.f32 1.0, %v15237_v17  ;;  %v15581_v17 = vld [vmem:[%s18337_s6 + $0xb0] sm:$0xff] }
 0xed1   :  { %15244 = vrcp.f32 %v5142_v23 }
 0xed5   :  { %v15241_v25 = vpop.eup %15240 }
 0xed6   :  { %v15243_v29 = vpop.eup %15242  ;;  %v5149_v30 = vmul.f32 %v15241_v25, %v15239_v22  ;;  %v15582_v22 = vld [vmem:[%s18337_s6 + $0x88] sm:$0xff] }
 0xed7   :  { %v5148_v24 = vmul.f32 %v15243_v29, %v5146_v28  ;;  %v15583_v25 = vld [vmem:[%s18337_s6 + $0xa8] sm:$0xff]  ;;  %v15584_v28 = vld [vmem:[%s18337_s6 + $0x80] sm:$0xff] }
 0xed8   :  { %v15585_v29 = vld [vmem:[%s18337_s6 + $0xa0] sm:$0xff] }
 0xed9   :  { %v16809_v31 = vadd.f32 %v5149_v30, %v5148_v24 }
 0xedb   :  { %15246 = vtanh.f32 %v16809_v31  ;;  %v5473_v63 = vrot.slane %v16809_v31, 6 }
 0xede   :  { %v15245_v26 = vpop.eup %15244 }
 0xee8   :  { %v15247_v27 = vpop.eup %15246 }
 0xee9   :  { %v5152_v54 = vmul.f32 %v15247_v27, %v15245_v26 }
 0xeeb   :  { %5153 = vst.msk [vmem:[#allocation3 + $0x8] sm:$0x3] %vm879_vm4, %v5152_v54  ;;  %14101 = vmatmul.mubr.msk.f32.vlgmr.msra.gmra.mxu1 %vm147_vm2, %v5152_v54  ;;  %14112 = vmatmul.mubr.msk.f32.vlgmr.msra.gmra.mxu0 %vm147_vm2, %v5152_v54 }
 0xeec   :  { %14115 = vmatpush3.msra.mxu1 %v16482_v43  ;;  %14126 = vmatpush3.msra.mxu0 %v16487_v44 }
 0xeed   :  { %14116 = vmatprep.subr.mxu1 %v15618_v56  ;;  %14127 = vmatprep.subr.mxu0 %v15618_v56 }
 0xeee   :  { %14117 = vmatpush3.msra.mxu1 %v16496_v45  ;;  %14128 = vmatpush3.msra.mxu0 %v16501_v46 }
 0xeef   :  { %14118 = vmatprep.subr.mxu1 %v15618_v56  ;;  %14129 = vmatprep.subr.mxu0 %v15618_v56 }
 0xef0   :  { %14119 = vmatpush3.msra.mxu1 %v16510_v47  ;;  %14130 = vmatpush3.msra.mxu0 %v16515_v48 }
 0xef1   :  { %14120 = vmatprep.subr.mxu1 %v15618_v56  ;;  %14131 = vmatprep.subr.mxu0 %v15618_v56 }
 0xef2   :  { %14121 = vmatpush3.msra.mxu1 %v16524_v50  ;;  %14122 = vmatprep.mubr.msk.f32.mxu1 %vm15619_vm3, %v15618_v56 }
 0xef3   :  { %14132 = vmatpush3.msra.mxu0 %v16531_v51  ;;  %14133 = vmatprep.mubr.msk.f32.mxu0 %vm15619_vm3, %v15618_v56 }
 0xef4   :  { %14123 = vmatmul.mubr.msk.f32.vlgmr.msra.gmra.mxu1 %vm147_vm2, %v5152_v54  ;;  %14134 = vmatmul.mubr.msk.f32.vlgmr.msra.gmra.mxu0 %vm147_vm2, %v5152_v54 }
 0xef5   :  { %14136 = vmatprep.subr.mxu1 %v15618_v56  ;;  %14147 = vmatprep.subr.mxu0 %v15618_v56 }
 0xef6   :  { %14137 = vmatpush3.msra.mxu1 %v16420_v36  ;;  %14148 = vmatpush3.msra.mxu0 %v16425_v37 }
 0xef7   :  { %14138 = vmatprep.subr.mxu1 %v15618_v56  ;;  %14149 = vmatprep.subr.mxu0 %v15618_v56 }
 0xef8   :  { %14139 = vmatpush3.msra.mxu1 %v16434_v33  ;;  %14150 = vmatpush3.msra.mxu0 %v16439_v38 }
 0xef9   :  { %14140 = vmatprep.subr.mxu1 %v15618_v56  ;;  %14151 = vmatprep.subr.mxu0 %v15618_v56 }
 0xefa   :  { %14141 = vmatpush3.msra.mxu1 %v16448_v40  ;;  %14152 = vmatpush3.msra.mxu0 %v16453_v39 }
 0xefb   :  { %14142 = vmatprep.subr.mxu1 %v15618_v56  ;;  %14153 = vmatprep.subr.mxu0 %v15618_v56 }
 0xefc   :  { %14143 = vmatpush3.msra.mxu1 %v16462_v41  ;;  %14154 = vmatpush3.msra.mxu0 %v16469_v42 }
 0xefd   :  { %14144 = vmatprep.mubr.msk.f32.mxu1 %vm15619_vm3, %v15618_v56  ;;  %14155 = vmatprep.mubr.msk.f32.mxu0 %vm15619_vm3, %v15618_v56 }
 0xefe   :  { %14158 = vmatprep.subr.mxu1 %v15618_v56  ;;  %14169 = vmatprep.subr.mxu0 %v15618_v56 }
 0xfab   :  { %v5223_v36 = vpop.f32.mrf.mxu1  ;;  %v5303_v37 = vpop.f32.mrf.mxu0 }
 0xfac   :  { %v5228_v33 = vrot.slane %v5223_v36, 6  ;;  %v5308_v38 = vrot.slane %v5303_v37, 6 }
 0xfad   :  { %v14102_v40 = vpop.f32.mrf.mxu1  ;;  %v14113_v39 = vpop.f32.mrf.mxu0 }
 0xfae   :  { %v5230_v41 = vadd.f32 %v5228_v33, %v16571_v8  ;;  %v5310_v42 = vadd.f32 %v5308_v38, %v16573_v9 }
 0xfb0   :  { %v12454_v43 = vmul.f32 -1.442695, %v5230_v41  ;;  %v12456_v44 = vmul.f32 -1.442695, %v5310_v42 }
 0xfb2   :  { %15248 = vpow2.f32 %v12454_v43 }
 0xfb3   :  { %15250 = vpow2.f32 %v12456_v44 }
 0xfb4   :  { %v5383_v45 = vpop.f32.mrf.mxu1  ;;  %v5458_v46 = vpop.f32.mrf.mxu0 }
 0xfb5   :  { %v5463_v47 = vrot.slane %v5458_v46, 6  ;;  %v5388_v55 = vrot.slane %v5383_v45, 6 }
 0xfb6   :  { %v14124_v48 = vpop.f32.mrf.mxu1  ;;  %v14135_v50 = vpop.f32.mrf.mxu0 }
 0xfb7   :  { %v5465_v51 = vadd.f32 %v5463_v47, %v16583_v21  ;;  %v5390_v57 = vadd.f32 %v5388_v55, %v16581_v18 }
 0xfb9   :  { %v12459_v12 = vmul.f32 -1.442695, %v5465_v51 }
 0xfbb   :  { %15252 = vpow2.f32 %v12459_v12 }
 0xfbc   :  { %15254 = vtanh.f32 %v5390_v57 }
 0xfbf   :  { %v15249_v58 = vpop.eup %15248 }
 0xfc0   :  { %v15251_v59 = vpop.eup %15250  ;;  %v5234_v11 = vadd.f32 1.0, %v15249_v58 }
 0xfc1   :  { %v5314_v60 = vadd.f32 1.0, %v15251_v59 }
 0xfc2   :  { %15256 = vrcp.f32 %v5234_v11 }
 0xfc3   :  { %15258 = vrcp.f32 %v5314_v60 }
 0xfc8   :  { %v15253_v62 = vpop.eup %15252 }
 0xfc9   :  { %v15255_v61 = vpop.eup %15254  ;;  %v5469_v1 = vadd.f32 1.0, %v15253_v62 }
 0xfcb   :  { %15260 = vrcp.f32 %v5469_v1  ;;  %v16997_v1 = vld [vmem:[#allocation3] sm:$0xff] }
 0xfcf   :  { %v15257_v20 = vpop.eup %15256 }
 0xfd0   :  { %v15259_v0 = vpop.eup %15258  ;;  %v5476_v19 = vmul.f32 %v15257_v20, %v15255_v61 }
 0xfd1   :  { %v5475_v2 = vmul.f32 %v15259_v0, %v5473_v63 }
 0xfd3   :  { %v16862_v3 = vadd.f32 %v5476_v19, %v5475_v2  ;;  %v12477_v2 = vld [vmem:[%s18334_s5 + $0x118] sm:$0xff] }
 0xfd5   :  { %15262 = vtanh.f32 %v16862_v3  ;;  %v5801_v58 = vrot.slane %v16862_v3, 6  ;;  %v12489_v3 = vld [vmem:[%s18334_s5 + $0x138] sm:$0xff] }
 0xfd8   :  { %v15261_v4 = vpop.eup %15260 }
 0xfe2   :  { %v15263_v6 = vpop.eup %15262 }
 0xfe3   :  { %v5479_v32 = vmul.f32 %v15263_v6, %v15261_v4  ;;  %v12476_v4 = vld [vmem:[%s18334_s5 + $0x110] sm:$0xff] }
 0xfe4   :  { %v12488_v6 = vld [vmem:[%s18334_s5 + $0x130] sm:$0xff] }
 0xfe5   :  { %5480 = vst.msk [vmem:[#allocation3 + $0x8] sm:$0xc] %vm1207_vm5, %v5479_v32  ;;  %v5482_v5 = vrot.slane %v5479_v32, 2  ;;  %v12475_v32 = vld [vmem:[%s18334_s5 + $0x108] sm:$0xff] }
 0xfe7   :  { %14145 = vmatmul.mubr.msk.f32.vlgmr.msra.gmra.mxu1 %vm147_vm2, %v5482_v5  ;;  %14156 = vmatmul.mubr.msk.f32.vlgmr.msra.gmra.mxu0 %vm147_vm2, %v5482_v5 }
 0xfe8   :  { %14159 = vmatpush3.msra.mxu1 %v16871_v34  ;;  %14170 = vmatpush3.msra.mxu0 %v16877_v49 }
 0xfe9   :  { %14160 = vmatprep.subr.mxu1 %v15618_v56  ;;  %14171 = vmatprep.subr.mxu0 %v15618_v56 }
 0xfea   :  { %14161 = vmatpush3.msra.mxu1 %v16885_v35  ;;  %14172 = vmatpush3.msra.mxu0 %v16891_v52 }
 0xfeb   :  { %14162 = vmatprep.subr.mxu1 %v15618_v56  ;;  %14173 = vmatprep.subr.mxu0 %v15618_v56 }
 0xfec   :  { %14163 = vmatpush3.msra.mxu1 %v16899_v7  ;;  %14174 = vmatpush3.msra.mxu0 %v16905_v53 }
 0xfed   :  { %14164 = vmatprep.subr.mxu1 %v15618_v56  ;;  %14175 = vmatprep.subr.mxu0 %v15618_v56 }
 0xfee   :  { %14165 = vmatpush3.msra.mxu1 %v16913_v10  ;;  %14166 = vmatprep.mubr.msk.f32.mxu1 %vm15619_vm3, %v15618_v56 }
 0xfef   :  { %14176 = vmatpush3.msra.mxu0 %v16921_v13  ;;  %14177 = vmatprep.mubr.msk.f32.mxu0 %vm15619_vm3, %v15618_v56 }
 0xff0   :  { %14167 = vmatmul.mubr.msk.f32.vlgmr.msra.gmra.mxu1 %vm147_vm2, %v5482_v5  ;;  %14178 = vmatmul.mubr.msk.f32.vlgmr.msra.gmra.mxu0 %vm147_vm2, %v5482_v5  ;;  %v12487_v5 = vld [vmem:[%s18334_s5 + $0x128] sm:$0xff] }
 0xff1   :  { %14180 = vmatprep.subr.mxu1 %v15618_v56  ;;  %14191 = vmatprep.subr.mxu0 %v15618_v56 }
 0xff2   :  { %14181 = vmatpush3.msra.mxu1 %v15578_v14  ;;  %14192 = vmatpush3.msra.mxu0 %v15579_v15 }
 0xff3   :  { %14182 = vmatprep.subr.mxu1 %v15618_v56  ;;  %14193 = vmatprep.subr.mxu0 %v15618_v56 }
 0xff4   :  { %14183 = vmatpush3.msra.mxu1 %v15580_v16  ;;  %14194 = vmatpush3.msra.mxu0 %v15581_v17 }
 0xff5   :  { %14184 = vmatprep.subr.mxu1 %v15618_v56  ;;  %14195 = vmatprep.subr.mxu0 %v15618_v56 }
 0xff6   :  { %14185 = vmatpush3.msra.mxu1 %v15582_v22  ;;  %14196 = vmatpush3.msra.mxu0 %v15583_v25 }
 0xff7   :  { %14186 = vmatprep.subr.mxu1 %v15618_v56  ;;  %14197 = vmatprep.subr.mxu0 %v15618_v56 }
 0xff8   :  { %14187 = vmatpush3.msra.mxu1 %v15584_v28  ;;  %14198 = vmatpush3.msra.mxu0 %v15585_v29 }
 0xff9   :  { %14188 = vmatprep.mubr.msk.f32.mxu1 %vm15619_vm3, %v15618_v56  ;;  %14199 = vmatprep.mubr.msk.f32.mxu0 %vm15619_vm3, %v15618_v56 }
 0xffa   :  { %14202 = vmatprep.subr.mxu1 %v15618_v56  ;;  %14213 = vmatprep.subr.mxu0 %v15618_v56 }
0x10a7   :  { %v5551_v30 = vpop.f32.mrf.mxu1  ;;  %v5631_v23 = vpop.f32.mrf.mxu0 }
0x10a8   :  { %v5556_v24 = vrot.slane %v5551_v30, 4  ;;  %v5636_v31 = vrot.slane %v5631_v23, 4 }
0x10a9   :  { %v14146_v26 = vpop.f32.mrf.mxu1  ;;  %v14157_v27 = vpop.f32.mrf.mxu0 }
0x10aa   :  { %v5558_v54 = vadd.f32 %v5556_v24, %v16571_v8  ;;  %v5638_v36 = vadd.f32 %v5636_v31, %v16573_v9 }
0x10ac   :  { %v12461_v37 = vmul.f32 -1.442695, %v5558_v54  ;;  %v12463_v33 = vmul.f32 -1.442695, %v5638_v36 }
0x10ae   :  { %15264 = vpow2.f32 %v12461_v37 }
0x10af   :  { %15266 = vpow2.f32 %v12463_v33 }
0x10b0   :  { %v5711_v38 = vpop.f32.mrf.mxu1  ;;  %v5786_v40 = vpop.f32.mrf.mxu0 }
0x10b1   :  { %v5791_v39 = vrot.slane %v5786_v40, 4  ;;  %v5716_v44 = vrot.slane %v5711_v38, 4 }
0x10b2   :  { %v14168_v41 = vpop.f32.mrf.mxu1  ;;  %v14179_v42 = vpop.f32.mrf.mxu0 }
0x10b3   :  { %v5793_v43 = vadd.f32 %v5791_v39, %v16583_v21  ;;  %v5718_v46 = vadd.f32 %v5716_v44, %v16581_v18 }
0x10b5   :  { %v12466_v45 = vmul.f32 -1.442695, %v5793_v43 }
0x10b7   :  { %15268 = vpow2.f32 %v12466_v45 }
0x10b8   :  { %15270 = vtanh.f32 %v5718_v46 }
0x10bb   :  { %v15265_v47 = vpop.eup %15264 }
0x10bc   :  { %v15267_v48 = vpop.eup %15266  ;;  %v5562_v50 = vadd.f32 1.0, %v15265_v47 }
0x10bd   :  { %v5642_v51 = vadd.f32 1.0, %v15267_v48  ;;  %v12500_v48 = vld [vmem:[%s18334_s5 + $0x150] sm:$0xff] }
0x10be   :  { %15272 = vrcp.f32 %v5562_v50  ;;  %v12512_v50 = vld [vmem:[%s18334_s5 + $0x170] sm:$0xff] }
0x10bf   :  { %15274 = vrcp.f32 %v5642_v51  ;;  %v12499_v51 = vld [vmem:[%s18334_s5 + $0x148] sm:$0xff] }
0x10c4   :  { %v15269_v55 = vpop.eup %15268 }
0x10c5   :  { %v15271_v12 = vpop.eup %15270  ;;  %v5797_v60 = vadd.f32 1.0, %v15269_v55  ;;  %v12511_v55 = vld [vmem:[%s18334_s5 + $0x168] sm:$0xff] }
0x10c7   :  { %15276 = vrcp.f32 %v5797_v60  ;;  %v17085_v60 = vld [vmem:[%s18337_s6 + $0x130] sm:$0xff] }
0x10cb   :  { %v15273_v57 = vpop.eup %15272 }
0x10cc   :  { %v15275_v59 = vpop.eup %15274  ;;  %v5804_v11 = vmul.f32 %v15273_v57, %v15271_v12  ;;  %v12498_v12 = vld [vmem:[%s18334_s5 + $0x140] sm:$0xff] }
0x10cd   :  { %v5803_v62 = vmul.f32 %v15275_v59, %v5801_v58  ;;  %v12510_v57 = vld [vmem:[%s18334_s5 + $0x160] sm:$0xff]  ;;  %v17066_v58 = vld [vmem:[%s18337_s6 + $0x118] sm:$0xff] }
0x10ce   :  { %v17071_v59 = vld [vmem:[%s18337_s6 + $0x138] sm:$0xff] }
0x10cf   :  { %v16971_v61 = vadd.f32 %v5804_v11, %v5803_v62  ;;  %v17080_v11 = vld [vmem:[%s18337_s6 + $0x110] sm:$0xff]  ;;  %v17094_v62 = vld [vmem:[%s18337_s6 + $0x108] sm:$0xff] }
0x10d1   :  { %15278 = vtanh.f32 %v16971_v61  ;;  %v6129_v39 = vrot.slane %v16971_v61, 6  ;;  %v17099_v61 = vld [vmem:[%s18337_s6 + $0x128] sm:$0xff] }
0x10d4   :  { %v15277_v20 = vpop.eup %15276 }
0x10de   :  { %v15279_v63 = vpop.eup %15278 }
0x10df   :  { %v5807_v0 = vmul.f32 %v15279_v63, %v15277_v20  ;;  %v17108_v20 = vld [vmem:[%s18337_s6 + $0x100] sm:$0xff] }
0x10e0   :  { %v17115_v63 = vld [vmem:[%s18337_s6 + $0x120] sm:$0xff] }
0x10e1   :  { %5808 = vst.msk [vmem:[#allocation3 + $0x8] sm:$0x30] %vm1536_vm6, %v5807_v0  ;;  %v5810_v19 = vrot.slane %v5807_v0, 4  ;;  %v17128_v0 = vld [vmem:[%s18337_s6 + $0x158] sm:$0xff] }
0x10e3   :  { %14189 = vmatmul.mubr.msk.f32.vlgmr.msra.gmra.mxu1 %vm147_vm2, %v5810_v19  ;;  %14200 = vmatmul.mubr.msk.f32.vlgmr.msra.gmra.mxu0 %vm147_vm2, %v5810_v19 }
0x10e4   :  { %14203 = vmatpush3.msra.mxu1 %v16871_v34  ;;  %14214 = vmatpush3.msra.mxu0 %v16877_v49  ;;  %v12474_v34 = vld [vmem:[%s18334_s5 + $0x100] sm:$0xff] }
0x10e5   :  { %14204 = vmatprep.subr.mxu1 %v15618_v56  ;;  %14215 = vmatprep.subr.mxu0 %v15618_v56  ;;  %v12486_v49 = vld [vmem:[%s18334_s5 + $0x120] sm:$0xff] }
0x10e6   :  { %14205 = vmatpush3.msra.mxu1 %v16885_v35  ;;  %14216 = vmatpush3.msra.mxu0 %v16891_v52  ;;  %v12501_v35 = vld [vmem:[%s18334_s5 + $0x158] sm:$0xff] }
0x10e7   :  { %14206 = vmatprep.subr.mxu1 %v15618_v56  ;;  %14217 = vmatprep.subr.mxu0 %v15618_v56  ;;  %v12513_v52 = vld [vmem:[%s18334_s5 + $0x178] sm:$0xff] }
0x10e8   :  { %14207 = vmatpush3.msra.mxu1 %v16899_v7  ;;  %14218 = vmatpush3.msra.mxu0 %v16905_v53 }
0x10e9   :  { %14208 = vmatprep.subr.mxu1 %v15618_v56  ;;  %14219 = vmatprep.subr.mxu0 %v15618_v56 }
0x10ea   :  { %14209 = vmatpush3.msra.mxu1 %v16913_v10  ;;  %14210 = vmatprep.mubr.msk.f32.mxu1 %vm15619_vm3, %v15618_v56 }
0x10eb   :  { %14220 = vmatpush3.msra.mxu0 %v16921_v13  ;;  %14221 = vmatprep.mubr.msk.f32.mxu0 %vm15619_vm3, %v15618_v56 }
0x10ec   :  { %14211 = vmatmul.mubr.msk.f32.vlgmr.msra.gmra.mxu1 %vm147_vm2, %v5810_v19  ;;  %14222 = vmatmul.mubr.msk.f32.vlgmr.msra.gmra.mxu0 %vm147_vm2, %v5810_v19  ;;  %v17133_v19 = vld [vmem:[%s18337_s6 + $0x178] sm:$0xff] }
0x10ed   :  { %14232 = vmatprep.mubr.msk.f32.mxu1 %vm147_vm2, %v16997_v1  ;;  %14243 = vmatprep.mubr.msk.f32.mxu0 %vm147_vm2, %v16997_v1 }
0x10ee   :  { %14224 = vmatprep.subr.mxu1 %v12477_v2  ;;  %14235 = vmatprep.subr.mxu0 %v12489_v3 }
0x10ef   :  { %14225 = vmatpush3.msra.mxu1 %v12477_v2  ;;  %14236 = vmatpush3.msra.mxu0 %v12489_v3  ;;  %v17147_v2 = vld [vmem:[%s18337_s6 + $0x170] sm:$0xff]  ;;  %v17156_v3 = vld [vmem:[%s18337_s6 + $0x148] sm:$0xff] }
0x10f0   :  { %14226 = vmatprep.subr.mxu1 %v12476_v4  ;;  %14237 = vmatprep.subr.mxu0 %v12488_v6 }
0x10f1   :  { %14227 = vmatpush3.msra.mxu1 %v12476_v4  ;;  %14238 = vmatpush3.msra.mxu0 %v12488_v6  ;;  %v17161_v4 = vld [vmem:[%s18337_s6 + $0x168] sm:$0xff]  ;;  %v17170_v6 = vld [vmem:[%s18337_s6 + $0x140] sm:$0xff] }
0x10f2   :  { %14228 = vmatprep.subr.mxu1 %v12475_v32  ;;  %14239 = vmatprep.subr.mxu0 %v12487_v5 }
0x10f3   :  { %14229 = vmatpush3.msra.mxu1 %v12475_v32  ;;  %14240 = vmatpush3.msra.mxu0 %v12487_v5  ;;  %v17177_v32 = vld [vmem:[%s18337_s6 + $0x160] sm:$0xff]  ;;  %v12479_v5 = vld [vmem:[%s18338_s7 + $0x8] ss:$0 sm:$0xff] }
0x10f4   :  { %14230 = vmatprep.subr.mxu1 %v12474_v34  ;;  %14241 = vmatprep.subr.mxu0 %v12486_v49 }
0x10f5   :  { %14231 = vmatpush3.msra.mxu1 %v12474_v34  ;;  %14242 = vmatpush3.msra.mxu0 %v12486_v49  ;;  %v12491_v34 = vld [vmem:[%s18338_s7 + $0x9] ss:$0 sm:$0xff] }
0x10f6   :  { %14246 = vmatprep.subr.mxu1 %v12501_v35  ;;  %14257 = vmatprep.subr.mxu0 %v12513_v52 }
0x11a3   :  { %v5879_v7 = vpop.f32.mrf.mxu1  ;;  %v5959_v53 = vpop.f32.mrf.mxu0 }
0x11a4   :  { %v5884_v10 = vrot.slane %v5879_v7, 2  ;;  %v5964_v13 = vrot.slane %v5959_v53, 2 }
0x11a5   :  { %v14190_v14 = vpop.f32.mrf.mxu1  ;;  %v14201_v15 = vpop.f32.mrf.mxu0 }
0x11a6   :  { %v5886_v16 = vadd.f32 %v5884_v10, %v16571_v8  ;;  %v5966_v17 = vadd.f32 %v5964_v13, %v16573_v9  ;;  %v12503_v13 = vld [vmem:[%s18338_s7 + $0xa] ss:$0 sm:$0xff]  ;;  %v12515_v14 = vld [vmem:[%s18338_s7 + $0xb] ss:$0 sm:$0xff] }
0x11a8   :  { %v12468_v22 = vmul.f32 -1.442695, %v5886_v16  ;;  %v12470_v25 = vmul.f32 -1.442695, %v5966_v17 }
0x11aa   :  { %15280 = vpow2.f32 %v12468_v22 }
0x11ab   :  { %15282 = vpow2.f32 %v12470_v25 }
0x11ac   :  { %v6039_v28 = vpop.f32.mrf.mxu1  ;;  %v6114_v29 = vpop.f32.mrf.mxu0 }
0x11ad   :  { %v6119_v30 = vrot.slane %v6114_v29, 2  ;;  %v6044_v26 = vrot.slane %v6039_v28, 2 }
0x11ae   :  { %v14212_v23 = vpop.f32.mrf.mxu1  ;;  %v14223_v24 = vpop.f32.mrf.mxu0 }
0x11af   :  { %v6121_v31 = vadd.f32 %v6119_v30, %v16583_v21  ;;  %v6046_v54 = vadd.f32 %v6044_v26, %v16581_v18 }
0x11b1   :  { %v12473_v27 = vmul.f32 -1.442695, %v6121_v31 }
0x11b3   :  { %15284 = vpow2.f32 %v12473_v27 }
0x11b4   :  { %15286 = vtanh.f32 %v6046_v54 }
0x11b7   :  { %v15281_v36 = vpop.eup %15280 }
0x11b8   :  { %v15283_v37 = vpop.eup %15282  ;;  %v5890_v8 = vadd.f32 1.0, %v15281_v36 }
0x11b9   :  { %v5970_v9 = vadd.f32 1.0, %v15283_v37 }
0x11ba   :  { %15288 = vrcp.f32 %v5890_v8 }
0x11bb   :  { %15290 = vrcp.f32 %v5970_v9 }
0x11c0   :  { %v15285_v33 = vpop.eup %15284 }
0x11c1   :  { %v15287_v38 = vpop.eup %15286  ;;  %v6125_v21 = vadd.f32 1.0, %v15285_v33 }
0x11c3   :  { %15292 = vrcp.f32 %v6125_v21 }
0x11c7   :  { %v15289_v40 = vpop.eup %15288 }
0x11c8   :  { %v15291_v41 = vpop.eup %15290  ;;  %v6132_v42 = vmul.f32 %v15289_v40, %v15287_v38 }
0x11c9   :  { %v6131_v43 = vmul.f32 %v15291_v41, %v6129_v39 }
0x11cb   :  { %v6133_v44 = vadd.f32 %v6132_v42, %v6131_v43 }
0x11cd   :  { %15294 = vtanh.f32 %v6133_v44 }
0x11d0   :  { %v15293_v18 = vpop.eup %15292 }
0x11da   :  { %v15295_v45 = vpop.eup %15294 }
0x11db   :  { %v6135_v46 = vmul.f32 %v15295_v45, %v15293_v18 }
0x11dd   :  { %6136 = vst.msk [vmem:[#allocation3 + $0x8] sm:$0xc0] %vm1865_vm7, %v6135_v46 }
0x11e4   :  { %v6138_v47 = vld [vmem:[#allocation3 + $0x8] sm:$0xff] }
0x11e5   :  { %14233 = vmatmul.mubr.msk.f32.vlgmr.msra.gmra.mxu1 %vm147_vm2, %v6138_v47  ;;  %14244 = vmatmul.mubr.msk.f32.vlgmr.msra.gmra.mxu0 %vm147_vm2, %v6138_v47 }
0x11e6   :  { %14247 = vmatpush3.msra.mxu1 %v12501_v35  ;;  %14258 = vmatpush3.msra.mxu0 %v12513_v52 }
0x11e7   :  { %14248 = vmatprep.subr.mxu1 %v12500_v48  ;;  %14254 = vmatprep.mubr.msk.f32.mxu1 %vm147_vm2, %v16997_v1 }
0x11e8   :  { %14259 = vmatprep.subr.mxu0 %v12512_v50  ;;  %14265 = vmatprep.mubr.msk.f32.mxu0 %vm147_vm2, %v16997_v1  ;;  %v17142_v1 = vld [vmem:[%s18337_s6 + $0x150] sm:$0xff] }
0x11e9   :  { %14249 = vmatpush3.msra.mxu1 %v12500_v48  ;;  %14260 = vmatpush3.msra.mxu0 %v12512_v50 }
0x11ea   :  { %14250 = vmatprep.subr.mxu1 %v12499_v51  ;;  %14261 = vmatprep.subr.mxu0 %v12511_v55 }
0x11eb   :  { %14251 = vmatpush3.msra.mxu1 %v12499_v51  ;;  %14262 = vmatpush3.msra.mxu0 %v12511_v55 }
0x11ec   :  { %14252 = vmatprep.subr.mxu1 %v12498_v12  ;;  %14263 = vmatprep.subr.mxu0 %v12510_v57 }
0x11ed   :  { %14253 = vmatpush3.msra.mxu1 %v12498_v12  ;;  %14264 = vmatpush3.msra.mxu0 %v12510_v57 }
0x11ee   :  { %14255 = vmatmul.mubr.msk.f32.vlgmr.msra.gmra.mxu1 %vm147_vm2, %v6138_v47  ;;  %14266 = vmatmul.mubr.msk.f32.vlgmr.msra.gmra.mxu0 %vm147_vm2, %v6138_v47 }
0x11ef   :  { %14268 = vmatprep.subr.mxu1 %v15618_v56  ;;  %14279 = vmatprep.subr.mxu0 %v15618_v56 }
0x11f0   :  { %14269 = vmatpush3.msra.mxu1 %v17066_v58  ;;  %14280 = vmatpush3.msra.mxu0 %v17071_v59 }
0x11f1   :  { %14270 = vmatprep.subr.mxu1 %v15618_v56  ;;  %14281 = vmatprep.subr.mxu0 %v15618_v56 }
0x11f2   :  { %14271 = vmatpush3.msra.mxu1 %v17080_v11  ;;  %14282 = vmatpush3.msra.mxu0 %v17085_v60 }
0x11f3   :  { %14272 = vmatprep.subr.mxu1 %v15618_v56  ;;  %14283 = vmatprep.subr.mxu0 %v15618_v56 }
0x11f4   :  { %14273 = vmatpush3.msra.mxu1 %v17094_v62  ;;  %14284 = vmatpush3.msra.mxu0 %v17099_v61 }
0x11f5   :  { %14274 = vmatprep.subr.mxu1 %v15618_v56  ;;  %14285 = vmatprep.subr.mxu0 %v15618_v56 }
0x11f6   :  { %14275 = vmatpush3.msra.mxu1 %v17108_v20  ;;  %14276 = vmatprep.mubr.msk.f32.mxu1 %vm15619_vm3, %v15618_v56 }
0x11f7   :  { %14286 = vmatpush3.msra.mxu0 %v17115_v63  ;;  %14287 = vmatprep.mubr.msk.f32.mxu0 %vm15619_vm3, %v15618_v56 }
0x11f8   :  { %14277 = vmatmul.mubr.f32.vlgmr.msra.gmra.mxu1 %v15618_v56  ;;  %14288 = vmatmul.mubr.f32.vlgmr.msra.gmra.mxu0 %v15618_v56 }
0x11f9   :  { %14290 = vmatprep.subr.mxu1 %v15618_v56  ;;  %14301 = vmatprep.subr.mxu0 %v15618_v56 }
0x11fa   :  { %14291 = vmatpush3.msra.mxu1 %v17128_v0  ;;  %14302 = vmatpush3.msra.mxu0 %v17133_v19 }
0x11fb   :  { %14292 = vmatprep.subr.mxu1 %v15618_v56  ;;  %14303 = vmatprep.subr.mxu0 %v15618_v56 }
0x11fc   :  { %14293 = vmatpush3.msra.mxu1 %v17142_v1  ;;  %14304 = vmatpush3.msra.mxu0 %v17147_v2 }
0x11fd   :  { %14294 = vmatprep.subr.mxu1 %v15618_v56  ;;  %14305 = vmatprep.subr.mxu0 %v15618_v56 }
0x11fe   :  { %14295 = vmatpush3.msra.mxu1 %v17156_v3  ;;  %14306 = vmatpush3.msra.mxu0 %v17161_v4 }
0x11ff   :  { %14296 = vmatprep.subr.mxu1 %v15618_v56  ;;  %14307 = vmatprep.subr.mxu0 %v15618_v56 }
0x1200   :  { %14297 = vmatpush3.msra.mxu1 %v17170_v6  ;;  %14298 = vmatprep.mubr.msk.f32.mxu1 %vm15619_vm3, %v15618_v56 }
0x1201   :  { %14308 = vmatpush3.msra.mxu0 %v17177_v32  ;;  %14309 = vmatprep.mubr.msk.f32.mxu0 %vm15619_vm3, %v15618_v56 }
0x1202   :  { %14299 = vmatmul.mubr.f32.vlgmr.msra.gmra.mxu1 %v15618_v56  ;;  %14310 = vmatmul.mubr.f32.vlgmr.msra.gmra.mxu0 %v15618_v56 }
0x1203   :  { %14312 = vmatprep.subr.mxu1 %v15618_v56  ;;  %14323 = vmatprep.subr.mxu0 %v15618_v56 }
0x1204   :  { %14313 = vmatpush3.msra.mxu1 %v17066_v58  ;;  %14324 = vmatpush3.msra.mxu0 %v17071_v59 }
0x1205   :  { %14314 = vmatprep.subr.mxu1 %v15618_v56  ;;  %14325 = vmatprep.subr.mxu0 %v15618_v56 }
0x1206   :  { %14315 = vmatpush3.msra.mxu1 %v17080_v11  ;;  %14326 = vmatpush3.msra.mxu0 %v17085_v60 }
0x1207   :  { %14316 = vmatprep.subr.mxu1 %v15618_v56  ;;  %14327 = vmatprep.subr.mxu0 %v15618_v56 }
0x1208   :  { %14317 = vmatpush3.msra.mxu1 %v17094_v62  ;;  %14328 = vmatpush3.msra.mxu0 %v17099_v61 }
0x1209   :  { %14318 = vmatprep.subr.mxu1 %v15618_v56  ;;  %14329 = vmatprep.subr.mxu0 %v15618_v56 }
0x120a   :  { %14319 = vmatpush3.msra.mxu1 %v17108_v20  ;;  %14330 = vmatpush3.msra.mxu0 %v17115_v63 }
0x120b   :  { %14320 = vmatprep.mubr.msk.f32.mxu1 %vm15619_vm3, %v15618_v56  ;;  %14331 = vmatprep.mubr.msk.f32.mxu0 %vm15619_vm3, %v15618_v56 }
0x120c   :  { %14334 = vmatprep.subr.mxu1 %v15618_v56  ;;  %14345 = vmatprep.subr.mxu0 %v15618_v56 }
0x12a5   :  { %v14234_v49 = vpop.f32.mrf.mxu1  ;;  %v14245_v35 = vpop.f32.mrf.mxu0 }
0x12a6   :  { %v17217_v52 = vadd.f32 %v14234_v49, %v12479_v5  ;;  %v17219_v7 = vadd.f32 %v14245_v35, %v12491_v34 }
0x12a7   :  { %v6224_v53 = vpop.f32.mrf.mxu1  ;;  %v6317_v10 = vpop.f32.mrf.mxu0 }
0x12a8   :  { %v17231_v29 = vadd.f32 %v12479_v5, %v6224_v53  ;;  %v17233_v30 = vadd.f32 %v12491_v34, %v6317_v10 }
0x12ae   :  { %v14256_v15 = vpop.f32.mrf.mxu1  ;;  %v14267_v16 = vpop.f32.mrf.mxu0 }
0x12af   :  { %v17227_v17 = vadd.f32 %v14256_v15, %v12503_v13  ;;  %v17229_v22 = vadd.f32 %v14267_v16, %v12515_v14 }
0x12b0   :  { %v6410_v25 = vpop.f32.mrf.mxu1  ;;  %v6503_v28 = vpop.f32.mrf.mxu0 }
0x12b1   :  { %v17237_v8 = vadd.f32 %v12515_v14, %v6503_v28  ;;  %v17240_v41 = vadd.f32 %v12503_v13, %v6410_v25 }
0x12b8   :  { %v6583_v23 = vpop.f32.mrf.mxu1  ;;  %v6660_v24 = vpop.f32.mrf.mxu0 }
0x12b9   :  { %v6587_v31 = vadd.f32 %v6583_v23, %v17231_v29  ;;  %v6664_v26 = vadd.f32 %v6660_v24, %v17233_v30 }
0x12ba   :  { %v14278_v27 = vpop.f32.mrf.mxu1  ;;  %v14289_v54 = vpop.f32.mrf.mxu0 }
0x12bb   :  { %v12522_v36 = vmul.f32 -1.442695, %v6587_v31  ;;  %v12523_v37 = vmul.f32 -1.442695, %v6664_v26 }
0x12bd   :  { %15296 = vpow2.f32 %v12522_v36 }
0x12be   :  { %15298 = vpow2.f32 %v12523_v37 }
0x12c2   :  { %v6737_v9 = vpop.f32.mrf.mxu1  ;;  %v6809_v33 = vpop.f32.mrf.mxu0 }
0x12c3   :  { %v6813_v38 = vadd.f32 %v6809_v33, %v17237_v8  ;;  %v6741_v21 = vadd.f32 %v6737_v9, %v17240_v41 }
0x12c4   :  { %v14300_v40 = vpop.f32.mrf.mxu1  ;;  %v14311_v39 = vpop.f32.mrf.mxu0 }
0x12c5   :  { %v12524_v42 = vmul.f32 -1.442695, %v6813_v38 }
0x12c7   :  { %15300 = vpow2.f32 %v12524_v42 }
0x12c8   :  { %15302 = vtanh.f32 %v6741_v21 }
0x12ca   :  { %v15297_v43 = vpop.eup %15296 }
0x12cb   :  { %v15299_v44 = vpop.eup %15298  ;;  %v6591_v18 = vadd.f32 1.0, %v15297_v43 }
0x12cc   :  { %v6668_v45 = vadd.f32 1.0, %v15299_v44 }
0x12cd   :  { %15304 = vrcp.f32 %v6591_v18 }
0x12ce   :  { %15306 = vrcp.f32 %v6668_v45 }
0x12d4   :  { %v15301_v46 = vpop.eup %15300 }
0x12d5   :  { %v15303_v47 = vpop.eup %15302  ;;  %v6817_v55 = vadd.f32 1.0, %v15301_v46 }
0x12d7   :  { %15308 = vrcp.f32 %v6817_v55 }
0x12da   :  { %v15305_v48 = vpop.eup %15304 }
0x12db   :  { %v15307_v50 = vpop.eup %15306  ;;  %v6821_v51 = vmul.f32 %v15305_v48, %v15303_v47 }
0x12dc   :  { %v6820_v12 = vmul.f32 0.0, %v15307_v50 }
0x12de   :  { %v17243_v57 = vadd.f32 %v6821_v51, %v6820_v12 }
0x12e0   :  { %15310 = vtanh.f32 %v17243_v57  ;;  %v7145_v18 = vrot.slane %v17243_v57, 6 }
0x12e4   :  { %v15309_v5 = vpop.eup %15308 }
0x12ed   :  { %v15311_v34 = vpop.eup %15310 }
0x12ee   :  { %v6824_v49 = vmul.f32 %v15311_v34, %v15309_v5 }
0x12f0   :  { %6825 = vst.msk [vmem:[#allocation2] sm:$0x3] %vm879_vm4, %v6824_v49  ;;  %14321 = vmatmul.mubr.msk.f32.vlgmr.msra.gmra.mxu1 %vm147_vm2, %v6824_v49  ;;  %14332 = vmatmul.mubr.msk.f32.vlgmr.msra.gmra.mxu0 %vm147_vm2, %v6824_v49 }
0x12f1   :  { %14335 = vmatpush3.msra.mxu1 %v17128_v0  ;;  %14346 = vmatpush3.msra.mxu0 %v17133_v19 }
0x12f2   :  { %14336 = vmatprep.subr.mxu1 %v15618_v56  ;;  %14347 = vmatprep.subr.mxu0 %v15618_v56 }
0x12f3   :  { %14337 = vmatpush3.msra.mxu1 %v17142_v1  ;;  %14348 = vmatpush3.msra.mxu0 %v17147_v2 }
0x12f4   :  { %14338 = vmatprep.subr.mxu1 %v15618_v56  ;;  %14349 = vmatprep.subr.mxu0 %v15618_v56 }
0x12f5   :  { %14339 = vmatpush3.msra.mxu1 %v17156_v3  ;;  %14350 = vmatpush3.msra.mxu0 %v17161_v4 }
0x12f6   :  { %14340 = vmatprep.subr.mxu1 %v15618_v56  ;;  %14351 = vmatprep.subr.mxu0 %v15618_v56 }
0x12f7   :  { %14341 = vmatpush3.msra.mxu1 %v17170_v6  ;;  %14342 = vmatprep.mubr.msk.f32.mxu1 %vm15619_vm3, %v15618_v56 }
0x12f8   :  { %14352 = vmatpush3.msra.mxu0 %v17177_v32  ;;  %14353 = vmatprep.mubr.msk.f32.mxu0 %vm15619_vm3, %v15618_v56 }
0x12f9   :  { %14343 = vmatmul.mubr.msk.f32.vlgmr.msra.gmra.mxu1 %vm147_vm2, %v6824_v49  ;;  %14354 = vmatmul.mubr.msk.f32.vlgmr.msra.gmra.mxu0 %vm147_vm2, %v6824_v49 }
0x12fa   :  { %14356 = vmatprep.subr.mxu1 %v15618_v56  ;;  %14367 = vmatprep.subr.mxu0 %v15618_v56 }
0x12fb   :  { %14357 = vmatpush3.msra.mxu1 %v17066_v58  ;;  %14368 = vmatpush3.msra.mxu0 %v17071_v59 }
0x12fc   :  { %14358 = vmatprep.subr.mxu1 %v15618_v56  ;;  %14369 = vmatprep.subr.mxu0 %v15618_v56 }
0x12fd   :  { %14359 = vmatpush3.msra.mxu1 %v17080_v11  ;;  %14370 = vmatpush3.msra.mxu0 %v17085_v60 }
0x12fe   :  { %14360 = vmatprep.subr.mxu1 %v15618_v56  ;;  %14371 = vmatprep.subr.mxu0 %v15618_v56 }
0x12ff   :  { %14361 = vmatpush3.msra.mxu1 %v17094_v62  ;;  %14372 = vmatpush3.msra.mxu0 %v17099_v61 }
0x1300   :  { %14362 = vmatprep.subr.mxu1 %v15618_v56  ;;  %14373 = vmatprep.subr.mxu0 %v15618_v56 }
0x1301   :  { %14363 = vmatpush3.msra.mxu1 %v17108_v20  ;;  %14374 = vmatpush3.msra.mxu0 %v17115_v63 }
0x1302   :  { %14364 = vmatprep.mubr.msk.f32.mxu1 %vm15619_vm3, %v15618_v56  ;;  %14375 = vmatprep.mubr.msk.f32.mxu0 %vm15619_vm3, %v15618_v56 }
0x1303   :  { %14378 = vmatprep.subr.mxu1 %v15618_v56  ;;  %14389 = vmatprep.subr.mxu0 %v15618_v56 }
0x13b0   :  { %v6895_v35 = vpop.f32.mrf.mxu1  ;;  %v6975_v53 = vpop.f32.mrf.mxu0 }
0x13b1   :  { %v6900_v10 = vrot.slane %v6895_v35, 6  ;;  %v6980_v13 = vrot.slane %v6975_v53, 6 }
0x13b2   :  { %v14322_v14 = vpop.f32.mrf.mxu1  ;;  %v14333_v15 = vpop.f32.mrf.mxu0 }
0x13b3   :  { %v6902_v16 = vadd.f32 %v6900_v10, %v17231_v29  ;;  %v6982_v25 = vadd.f32 %v6980_v13, %v17233_v30 }
0x13b5   :  { %v12526_v28 = vmul.f32 -1.442695, %v6902_v16  ;;  %v12528_v23 = vmul.f32 -1.442695, %v6982_v25 }
0x13b7   :  { %15312 = vpow2.f32 %v12526_v28 }
0x13b8   :  { %15314 = vpow2.f32 %v12528_v23 }
0x13b9   :  { %v7055_v24 = vpop.f32.mrf.mxu1  ;;  %v7130_v31 = vpop.f32.mrf.mxu0 }
0x13ba   :  { %v7135_v26 = vrot.slane %v7130_v31, 6  ;;  %v7060_v37 = vrot.slane %v7055_v24, 6 }
0x13bb   :  { %v14344_v27 = vpop.f32.mrf.mxu1  ;;  %v14355_v54 = vpop.f32.mrf.mxu0 }
0x13bc   :  { %v7137_v36 = vadd.f32 %v7135_v26, %v17237_v8  ;;  %v7062_v33 = vadd.f32 %v7060_v37, %v17240_v41 }
0x13be   :  { %v12531_v9 = vmul.f32 -1.442695, %v7137_v36 }
0x13c0   :  { %15316 = vpow2.f32 %v12531_v9 }
0x13c1   :  { %15318 = vtanh.f32 %v7062_v33 }
0x13c4   :  { %v15313_v38 = vpop.eup %15312 }
0x13c5   :  { %v15315_v40 = vpop.eup %15314  ;;  %v6906_v39 = vadd.f32 1.0, %v15313_v38 }
0x13c6   :  { %v6986_v42 = vadd.f32 1.0, %v15315_v40 }
0x13c7   :  { %15320 = vrcp.f32 %v6906_v39 }
0x13c8   :  { %15322 = vrcp.f32 %v6986_v42 }
0x13cd   :  { %v15317_v21 = vpop.eup %15316 }
0x13ce   :  { %v15319_v43 = vpop.eup %15318  ;;  %v7141_v47 = vadd.f32 1.0, %v15317_v21 }
0x13d0   :  { %15324 = vrcp.f32 %v7141_v47 }
0x13d4   :  { %v15321_v44 = vpop.eup %15320 }
0x13d5   :  { %v15323_v45 = vpop.eup %15322  ;;  %v7148_v46 = vmul.f32 %v15321_v44, %v15319_v43 }
0x13d6   :  { %v7147_v48 = vmul.f32 %v15323_v45, %v7145_v18 }
0x13d8   :  { %v17296_v50 = vadd.f32 %v7148_v46, %v7147_v48 }
0x13da   :  { %15326 = vtanh.f32 %v17296_v50  ;;  %v7473_v21 = vrot.slane %v17296_v50, 6 }
0x13dd   :  { %v15325_v51 = vpop.eup %15324 }
0x13e7   :  { %v15327_v55 = vpop.eup %15326 }
0x13e8   :  { %v7151_v12 = vmul.f32 %v15327_v55, %v15325_v51 }
0x13ea   :  { %7152 = vst.msk [vmem:[#allocation2] sm:$0xc] %vm1207_vm5, %v7151_v12  ;;  %v7154_v5 = vrot.slane %v7151_v12, 2 }
0x13ec   :  { %14365 = vmatmul.mubr.msk.f32.vlgmr.msra.gmra.mxu1 %vm147_vm2, %v7154_v5  ;;  %14376 = vmatmul.mubr.msk.f32.vlgmr.msra.gmra.mxu0 %vm147_vm2, %v7154_v5 }
0x13ed   :  { %14379 = vmatpush3.msra.mxu1 %v17128_v0  ;;  %14390 = vmatpush3.msra.mxu0 %v17133_v19 }
0x13ee   :  { %14380 = vmatprep.subr.mxu1 %v15618_v56  ;;  %14391 = vmatprep.subr.mxu0 %v15618_v56 }
0x13ef   :  { %14381 = vmatpush3.msra.mxu1 %v17142_v1  ;;  %14392 = vmatpush3.msra.mxu0 %v17147_v2 }
0x13f0   :  { %14382 = vmatprep.subr.mxu1 %v15618_v56  ;;  %14393 = vmatprep.subr.mxu0 %v15618_v56 }
0x13f1   :  { %14383 = vmatpush3.msra.mxu1 %v17156_v3  ;;  %14394 = vmatpush3.msra.mxu0 %v17161_v4 }
0x13f2   :  { %14384 = vmatprep.subr.mxu1 %v15618_v56  ;;  %14395 = vmatprep.subr.mxu0 %v15618_v56 }
0x13f3   :  { %14385 = vmatpush3.msra.mxu1 %v17170_v6  ;;  %14386 = vmatprep.mubr.msk.f32.mxu1 %vm15619_vm3, %v15618_v56 }
0x13f4   :  { %14396 = vmatpush3.msra.mxu0 %v17177_v32  ;;  %14397 = vmatprep.mubr.msk.f32.mxu0 %vm15619_vm3, %v15618_v56 }
0x13f5   :  { %14387 = vmatmul.mubr.msk.f32.vlgmr.msra.gmra.mxu1 %vm147_vm2, %v7154_v5  ;;  %14398 = vmatmul.mubr.msk.f32.vlgmr.msra.gmra.mxu0 %vm147_vm2, %v7154_v5 }
0x13f6   :  { %14400 = vmatprep.subr.mxu1 %v15618_v56  ;;  %14411 = vmatprep.subr.mxu0 %v15618_v56 }
0x13f7   :  { %14401 = vmatpush3.msra.mxu1 %v17066_v58  ;;  %14412 = vmatpush3.msra.mxu0 %v17071_v59 }
0x13f8   :  { %14402 = vmatprep.subr.mxu1 %v15618_v56  ;;  %14413 = vmatprep.subr.mxu0 %v15618_v56 }
0x13f9   :  { %14403 = vmatpush3.msra.mxu1 %v17080_v11  ;;  %14414 = vmatpush3.msra.mxu0 %v17085_v60 }
0x13fa   :  { %14404 = vmatprep.subr.mxu1 %v15618_v56  ;;  %14415 = vmatprep.subr.mxu0 %v15618_v56 }
0x13fb   :  { %14405 = vmatpush3.msra.mxu1 %v17094_v62  ;;  %14416 = vmatpush3.msra.mxu0 %v17099_v61 }
0x13fc   :  { %14406 = vmatprep.subr.mxu1 %v15618_v56  ;;  %14417 = vmatprep.subr.mxu0 %v15618_v56 }
0x13fd   :  { %14407 = vmatpush3.msra.mxu1 %v17108_v20  ;;  %14418 = vmatpush3.msra.mxu0 %v17115_v63 }
0x13fe   :  { %14408 = vmatprep.mubr.msk.f32.mxu1 %vm15619_vm3, %v15618_v56  ;;  %14419 = vmatprep.mubr.msk.f32.mxu0 %vm15619_vm3, %v15618_v56 }
0x13ff   :  { %14422 = vmatprep.subr.mxu1 %v15618_v56  ;;  %14433 = vmatprep.subr.mxu0 %v15618_v56 }
0x14ac   :  { %v7223_v57 = vpop.f32.mrf.mxu1  ;;  %v7303_v34 = vpop.f32.mrf.mxu0 }
0x14ad   :  { %v7228_v49 = vrot.slane %v7223_v57, 4  ;;  %v7308_v35 = vrot.slane %v7303_v34, 4 }
0x14ae   :  { %v14366_v53 = vpop.f32.mrf.mxu1  ;;  %v14377_v10 = vpop.f32.mrf.mxu0 }
0x14af   :  { %v7230_v13 = vadd.f32 %v7228_v49, %v17231_v29  ;;  %v7310_v14 = vadd.f32 %v7308_v35, %v17233_v30 }
0x14b1   :  { %v12533_v15 = vmul.f32 -1.442695, %v7230_v13  ;;  %v12535_v16 = vmul.f32 -1.442695, %v7310_v14 }
0x14b3   :  { %15328 = vpow2.f32 %v12533_v15 }
0x14b4   :  { %15330 = vpow2.f32 %v12535_v16 }
0x14b5   :  { %v7383_v25 = vpop.f32.mrf.mxu1  ;;  %v7458_v28 = vpop.f32.mrf.mxu0 }
0x14b6   :  { %v7463_v23 = vrot.slane %v7458_v28, 4  ;;  %v7388_v27 = vrot.slane %v7383_v25, 4 }
0x14b7   :  { %v14388_v24 = vpop.f32.mrf.mxu1  ;;  %v14399_v31 = vpop.f32.mrf.mxu0 }
0x14b8   :  { %v7465_v26 = vadd.f32 %v7463_v23, %v17237_v8  ;;  %v7390_v36 = vadd.f32 %v7388_v27, %v17240_v41 }
0x14ba   :  { %v12538_v54 = vmul.f32 -1.442695, %v7465_v26 }
0x14bc   :  { %15332 = vpow2.f32 %v12538_v54 }
0x14bd   :  { %15334 = vtanh.f32 %v7390_v36 }
0x14c0   :  { %v15329_v37 = vpop.eup %15328 }
0x14c1   :  { %v15331_v9 = vpop.eup %15330  ;;  %v7234_v33 = vadd.f32 1.0, %v15329_v37 }
0x14c2   :  { %v7314_v38 = vadd.f32 1.0, %v15331_v9 }
0x14c3   :  { %15336 = vrcp.f32 %v7234_v33 }
0x14c4   :  { %15338 = vrcp.f32 %v7314_v38 }
0x14c9   :  { %v15333_v40 = vpop.eup %15332 }
0x14ca   :  { %v15335_v39 = vpop.eup %15334  ;;  %v7469_v18 = vadd.f32 1.0, %v15333_v40 }
0x14cc   :  { %15340 = vrcp.f32 %v7469_v18 }
0x14d0   :  { %v15337_v42 = vpop.eup %15336 }
0x14d1   :  { %v15339_v43 = vpop.eup %15338  ;;  %v7476_v44 = vmul.f32 %v15337_v42, %v15335_v39 }
0x14d2   :  { %v7475_v45 = vmul.f32 %v15339_v43, %v7473_v21 }
0x14d4   :  { %v17349_v46 = vadd.f32 %v7476_v44, %v7475_v45 }
0x14d6   :  { %15342 = vtanh.f32 %v17349_v46  ;;  %v7801_v33 = vrot.slane %v17349_v46, 6 }
0x14d9   :  { %v15341_v47 = vpop.eup %15340 }
0x14e3   :  { %v15343_v48 = vpop.eup %15342 }
0x14e4   :  { %v7479_v51 = vmul.f32 %v15343_v48, %v15341_v47 }
0x14e6   :  { %7480 = vst.msk [vmem:[#allocation2] sm:$0x30] %vm1536_vm6, %v7479_v51  ;;  %v7482_v55 = vrot.slane %v7479_v51, 4 }
0x14e8   :  { %14409 = vmatmul.mubr.msk.f32.vlgmr.msra.gmra.mxu1 %vm147_vm2, %v7482_v55  ;;  %14420 = vmatmul.mubr.msk.f32.vlgmr.msra.gmra.mxu0 %vm147_vm2, %v7482_v55 }
0x14e9   :  { %14423 = vmatpush3.msra.mxu1 %v17128_v0  ;;  %14434 = vmatpush3.msra.mxu0 %v17133_v19 }
0x14ea   :  { %14424 = vmatprep.subr.mxu1 %v15618_v56  ;;  %14435 = vmatprep.subr.mxu0 %v15618_v56 }
0x14eb   :  { %14425 = vmatpush3.msra.mxu1 %v17142_v1  ;;  %14436 = vmatpush3.msra.mxu0 %v17147_v2 }
0x14ec   :  { %14426 = vmatprep.subr.mxu1 %v15618_v56  ;;  %14437 = vmatprep.subr.mxu0 %v15618_v56 }
0x14ed   :  { %14427 = vmatpush3.msra.mxu1 %v17156_v3  ;;  %14438 = vmatpush3.msra.mxu0 %v17161_v4 }
0x14ee   :  { %14428 = vmatprep.subr.mxu1 %v15618_v56  ;;  %14439 = vmatprep.subr.mxu0 %v15618_v56 }
0x14ef   :  { %14429 = vmatpush3.msra.mxu1 %v17170_v6  ;;  %14430 = vmatprep.mubr.msk.f32.mxu1 %vm15619_vm3, %v15618_v56 }
0x14f0   :  { %14440 = vmatpush3.msra.mxu0 %v17177_v32  ;;  %14441 = vmatprep.mubr.msk.f32.mxu0 %vm15619_vm3, %v15618_v56 }
0x14f1   :  { %14431 = vmatmul.mubr.msk.f32.vlgmr.msra.gmra.mxu1 %vm147_vm2, %v7482_v55  ;;  %14442 = vmatmul.mubr.msk.f32.vlgmr.msra.gmra.mxu0 %vm147_vm2, %v7482_v55 }
0x14f2   :  { %14444 = vmatprep.subr.mxu1 %v15618_v56  ;;  %14455 = vmatprep.subr.mxu0 %v15618_v56 }
0x14f3   :  { %14445 = vmatpush3.msra.mxu1 %v17066_v58  ;;  %14456 = vmatpush3.msra.mxu0 %v17071_v59 }
0x14f4   :  { %14446 = vmatprep.subr.mxu1 %v15618_v56  ;;  %14457 = vmatprep.subr.mxu0 %v15618_v56 }
0x14f5   :  { %14447 = vmatpush3.msra.mxu1 %v17080_v11  ;;  %14458 = vmatpush3.msra.mxu0 %v17085_v60 }
0x14f6   :  { %14448 = vmatprep.subr.mxu1 %v15618_v56  ;;  %14459 = vmatprep.subr.mxu0 %v15618_v56 }
0x14f7   :  { %14449 = vmatpush3.msra.mxu1 %v17094_v62  ;;  %14460 = vmatpush3.msra.mxu0 %v17099_v61 }
0x14f8   :  { %14450 = vmatprep.subr.mxu1 %v15618_v56  ;;  %14461 = vmatprep.subr.mxu0 %v15618_v56 }
0x14f9   :  { %14451 = vmatpush3.msra.mxu1 %v17108_v20  ;;  %14462 = vmatpush3.msra.mxu0 %v17115_v63 }
0x14fa   :  { %14452 = vmatprep.mubr.msk.f32.mxu1 %vm15619_vm3, %v15618_v56  ;;  %14463 = vmatprep.mubr.msk.f32.mxu0 %vm15619_vm3, %v15618_v56 }
0x14fb   :  { %14466 = vmatprep.subr.mxu1 %v15618_v56  ;;  %14477 = vmatprep.subr.mxu0 %v15618_v56 }
0x15a8   :  { %v7551_v50 = vpop.f32.mrf.mxu1  ;;  %v7631_v12 = vpop.f32.mrf.mxu0 }
0x15a9   :  { %v7556_v5 = vrot.slane %v7551_v50, 2  ;;  %v7636_v57 = vrot.slane %v7631_v12, 2 }
0x15aa   :  { %v14410_v34 = vpop.f32.mrf.mxu1  ;;  %v14421_v49 = vpop.f32.mrf.mxu0 }
0x15ab   :  { %v7558_v35 = vadd.f32 %v7556_v5, %v17231_v29  ;;  %v7638_v53 = vadd.f32 %v7636_v57, %v17233_v30 }
0x15ad   :  { %v12540_v10 = vmul.f32 -1.442695, %v7558_v35  ;;  %v12542_v13 = vmul.f32 -1.442695, %v7638_v53 }
0x15af   :  { %15344 = vpow2.f32 %v12540_v10 }
0x15b0   :  { %15346 = vpow2.f32 %v12542_v13 }
0x15b1   :  { %v7711_v14 = vpop.f32.mrf.mxu1  ;;  %v7786_v15 = vpop.f32.mrf.mxu0 }
0x15b2   :  { %v7791_v16 = vrot.slane %v7786_v15, 2  ;;  %v7716_v24 = vrot.slane %v7711_v14, 2 }
0x15b3   :  { %v14432_v25 = vpop.f32.mrf.mxu1  ;;  %v14443_v28 = vpop.f32.mrf.mxu0 }
0x15b4   :  { %v7793_v23 = vadd.f32 %v7791_v16, %v17237_v8  ;;  %v7718_v26 = vadd.f32 %v7716_v24, %v17240_v41 }
0x15b6   :  { %v12545_v31 = vmul.f32 -1.442695, %v7793_v23 }
0x15b8   :  { %15348 = vpow2.f32 %v12545_v31 }
0x15b9   :  { %15350 = vtanh.f32 %v7718_v26 }
0x15bc   :  { %v15345_v27 = vpop.eup %15344 }
0x15bd   :  { %v15347_v54 = vpop.eup %15346  ;;  %v7562_v29 = vadd.f32 1.0, %v15345_v27 }
0x15be   :  { %v7642_v30 = vadd.f32 1.0, %v15347_v54 }
0x15bf   :  { %15352 = vrcp.f32 %v7562_v29 }
0x15c0   :  { %15354 = vrcp.f32 %v7642_v30 }
0x15c5   :  { %v15349_v36 = vpop.eup %15348 }
0x15c6   :  { %v15351_v37 = vpop.eup %15350  ;;  %v7797_v8 = vadd.f32 1.0, %v15349_v36 }
0x15c8   :  { %15356 = vrcp.f32 %v7797_v8 }
0x15cc   :  { %v15353_v9 = vpop.eup %15352 }
0x15cd   :  { %v15355_v38 = vpop.eup %15354  ;;  %v7804_v40 = vmul.f32 %v15353_v9, %v15351_v37 }
0x15ce   :  { %v7803_v39 = vmul.f32 %v15355_v38, %v7801_v33 }
0x15d0   :  { %v17402_v42 = vadd.f32 %v7804_v40, %v7803_v39 }
0x15d2   :  { %15358 = vtanh.f32 %v17402_v42  ;;  %v8117_v23 = vrot.slane %v17402_v42, 6 }
0x15d5   :  { %v15357_v41 = vpop.eup %15356 }
0x15df   :  { %v15359_v21 = vpop.eup %15358 }
0x15e0   :  { %v7807_v43 = vmul.f32 %v15359_v21, %v15357_v41 }
0x15e2   :  { %7808 = vst.msk [vmem:[#allocation2] sm:$0xc0] %vm1865_vm7, %v7807_v43  ;;  %v7810_v44 = vrot.slane %v7807_v43, 6 }
0x15e4   :  { %14453 = vmatmul.mubr.msk.f32.vlgmr.msra.gmra.mxu1 %vm147_vm2, %v7810_v44  ;;  %14464 = vmatmul.mubr.msk.f32.vlgmr.msra.gmra.mxu0 %vm147_vm2, %v7810_v44 }
0x15e5   :  { %14467 = vmatpush3.msra.mxu1 %v17128_v0  ;;  %14478 = vmatpush3.msra.mxu0 %v17133_v19 }
0x15e6   :  { %14468 = vmatprep.subr.mxu1 %v15618_v56  ;;  %14479 = vmatprep.subr.mxu0 %v15618_v56 }
0x15e7   :  { %14469 = vmatpush3.msra.mxu1 %v17142_v1  ;;  %14480 = vmatpush3.msra.mxu0 %v17147_v2 }
0x15e8   :  { %14470 = vmatprep.subr.mxu1 %v15618_v56  ;;  %14481 = vmatprep.subr.mxu0 %v15618_v56 }
0x15e9   :  { %14471 = vmatpush3.msra.mxu1 %v17156_v3  ;;  %14482 = vmatpush3.msra.mxu0 %v17161_v4 }
0x15ea   :  { %14472 = vmatprep.subr.mxu1 %v15618_v56  ;;  %14483 = vmatprep.subr.mxu0 %v15618_v56 }
0x15eb   :  { %14473 = vmatpush3.msra.mxu1 %v17170_v6  ;;  %14474 = vmatprep.mubr.msk.f32.mxu1 %vm15619_vm3, %v15618_v56 }
0x15ec   :  { %14484 = vmatpush3.msra.mxu0 %v17177_v32  ;;  %14485 = vmatprep.mubr.msk.f32.mxu0 %vm15619_vm3, %v15618_v56 }
0x15ed   :  { %14475 = vmatmul.mubr.msk.f32.vlgmr.msra.gmra.mxu1 %vm147_vm2, %v7810_v44  ;;  %14486 = vmatmul.mubr.msk.f32.vlgmr.msra.gmra.mxu0 %vm147_vm2, %v7810_v44 }
0x15ee   :  { %14488 = vmatprep.subr.mxu1 %v15618_v56  ;;  %14499 = vmatprep.subr.mxu0 %v15618_v56 }
0x15ef   :  { %14489 = vmatpush3.msra.mxu1 %v17066_v58  ;;  %14500 = vmatpush3.msra.mxu0 %v17071_v59 }
0x15f0   :  { %14490 = vmatprep.subr.mxu1 %v15618_v56  ;;  %14501 = vmatprep.subr.mxu0 %v15618_v56 }
0x15f1   :  { %14491 = vmatpush3.msra.mxu1 %v17080_v11  ;;  %14502 = vmatpush3.msra.mxu0 %v17085_v60 }
0x15f2   :  { %14492 = vmatprep.subr.mxu1 %v15618_v56  ;;  %14503 = vmatprep.subr.mxu0 %v15618_v56 }
0x15f3   :  { %14493 = vmatpush3.msra.mxu1 %v17094_v62  ;;  %14504 = vmatpush3.msra.mxu0 %v17099_v61 }
0x15f4   :  { %14494 = vmatprep.subr.mxu1 %v15618_v56  ;;  %14505 = vmatprep.subr.mxu0 %v15618_v56 }
0x15f5   :  { %14495 = vmatpush3.msra.mxu1 %v17108_v20  ;;  %14506 = vmatpush3.msra.mxu0 %v17115_v63 }
0x15f6   :  { %14496 = vmatprep.mubr.msk.f32.mxu1 %vm15619_vm3, %v15618_v56  ;;  %14507 = vmatprep.mubr.msk.f32.mxu0 %vm15619_vm3, %v15618_v56 }
0x15f7   :  { %14510 = vmatprep.subr.mxu1 %v15618_v56  ;;  %14521 = vmatprep.subr.mxu0 %v15618_v56 }
0x16a4   :  { %v7879_v18 = vpop.f32.mrf.mxu1  ;;  %v7956_v45 = vpop.f32.mrf.mxu0 }
0x16a5   :  { %v7883_v46 = vadd.f32 %v7879_v18, %v17217_v52  ;;  %v7960_v47 = vadd.f32 %v7956_v45, %v17219_v7 }
0x16a6   :  { %v14454_v48 = vpop.f32.mrf.mxu1  ;;  %v14465_v51 = vpop.f32.mrf.mxu0 }
0x16a7   :  { %v12547_v55 = vmul.f32 -1.442695, %v7883_v46  ;;  %v12549_v50 = vmul.f32 -1.442695, %v7960_v47 }
0x16a9   :  { %15360 = vpow2.f32 %v12547_v55 }
0x16aa   :  { %15362 = vpow2.f32 %v12549_v50 }
0x16ad   :  { %v8033_v12 = vpop.f32.mrf.mxu1  ;;  %v8105_v5 = vpop.f32.mrf.mxu0 }
0x16ae   :  { %v8109_v57 = vadd.f32 %v8105_v5, %v17229_v22  ;;  %v8037_v53 = vadd.f32 %v8033_v12, %v17227_v17  ;;  %v17517_v12 = vld [vmem:[%s18337_s6 + $0x158] sm:$0xff] }
0x16af   :  { %v14476_v34 = vpop.f32.mrf.mxu1  ;;  %v14487_v49 = vpop.f32.mrf.mxu0  ;;  %v17523_v5 = vld [vmem:[%s18337_s6 + $0x178] sm:$0xff] }
0x16b0   :  { %v12552_v35 = vmul.f32 -1.442695, %v8109_v57  ;;  %v17531_v57 = vld [vmem:[%s18337_s6 + $0x150] sm:$0xff]  ;;  %v17545_v49 = vld [vmem:[%s18337_s6 + $0x148] sm:$0xff] }
0x16b1   :  { %v17537_v34 = vld [vmem:[%s18337_s6 + $0x170] sm:$0xff] }
0x16b2   :  { %15364 = vpow2.f32 %v12552_v35  ;;  %v17551_v35 = vld [vmem:[%s18337_s6 + $0x168] sm:$0xff] }
0x16b3   :  { %15366 = vtanh.f32 %v8037_v53  ;;  %v17559_v53 = vld [vmem:[%s18337_s6 + $0x140] sm:$0xff] }
0x16b6   :  { %v15361_v10 = vpop.eup %15360 }
0x16b7   :  { %v15363_v13 = vpop.eup %15362  ;;  %v7887_v14 = vadd.f32 1.0, %v15361_v10  ;;  %v17567_v10 = vld [vmem:[%s18337_s6 + $0x160] sm:$0xff] }
0x16b8   :  { %v7964_v15 = vadd.f32 1.0, %v15363_v13  ;;  %v15594_v13 = vld [vmem:[%s18337_s6 + $0x118] sm:$0xff] }
0x16b9   :  { %15368 = vrcp.f32 %v7887_v14  ;;  %v15595_v14 = vld [vmem:[%s18337_s6 + $0x138] sm:$0xff] }
0x16ba   :  { %15370 = vrcp.f32 %v7964_v15  ;;  %v15596_v15 = vld [vmem:[%s18337_s6 + $0x110] sm:$0xff] }
0x16bf   :  { %v15365_v16 = vpop.eup %15364 }
0x16c0   :  { %v15367_v25 = vpop.eup %15366  ;;  %v8113_v26 = vadd.f32 1.0, %v15365_v16  ;;  %v15597_v16 = vld [vmem:[%s18337_s6 + $0x130] sm:$0xff] }
0x16c2   :  { %15372 = vrcp.f32 %v8113_v26 }
0x16c6   :  { %v15369_v28 = vpop.eup %15368 }
0x16c7   :  { %v15371_v24 = vpop.eup %15370  ;;  %v8120_v31 = vmul.f32 %v15369_v28, %v15367_v25  ;;  %v15598_v25 = vld [vmem:[%s18337_s6 + $0x108] sm:$0xff] }
0x16c8   :  { %v8119_v27 = vmul.f32 %v15371_v24, %v8117_v23  ;;  %v15599_v28 = vld [vmem:[%s18337_s6 + $0x128] sm:$0xff]  ;;  %v15600_v23 = vld [vmem:[%s18337_s6 + $0x100] sm:$0xff] }
0x16c9   :  { %v15601_v24 = vld [vmem:[%s18337_s6 + $0x120] sm:$0xff] }
0x16ca   :  { %v17455_v54 = vadd.f32 %v8120_v31, %v8119_v27 }
0x16cc   :  { %15374 = vtanh.f32 %v17455_v54  ;;  %v8444_v43 = vrot.slane %v17455_v54, 6 }
0x16cf   :  { %v15373_v29 = vpop.eup %15372 }
0x16d9   :  { %v15375_v30 = vpop.eup %15374 }
0x16da   :  { %v8123_v36 = vmul.f32 %v15375_v30, %v15373_v29 }
0x16dc   :  { %8124 = vst.msk [vmem:[#allocation2 + $0x8] sm:$0x3] %vm879_vm4, %v8123_v36  ;;  %14497 = vmatmul.mubr.msk.f32.vlgmr.msra.gmra.mxu1 %vm147_vm2, %v8123_v36  ;;  %14508 = vmatmul.mubr.msk.f32.vlgmr.msra.gmra.mxu0 %vm147_vm2, %v8123_v36 }
0x16dd   :  { %14511 = vmatpush3.msra.mxu1 %v17128_v0  ;;  %14522 = vmatpush3.msra.mxu0 %v17133_v19 }
0x16de   :  { %14512 = vmatprep.subr.mxu1 %v15618_v56  ;;  %14523 = vmatprep.subr.mxu0 %v15618_v56 }
0x16df   :  { %14513 = vmatpush3.msra.mxu1 %v17142_v1  ;;  %14524 = vmatpush3.msra.mxu0 %v17147_v2 }
0x16e0   :  { %14514 = vmatprep.subr.mxu1 %v15618_v56  ;;  %14525 = vmatprep.subr.mxu0 %v15618_v56 }
0x16e1   :  { %14515 = vmatpush3.msra.mxu1 %v17156_v3  ;;  %14526 = vmatpush3.msra.mxu0 %v17161_v4 }
0x16e2   :  { %14516 = vmatprep.subr.mxu1 %v15618_v56  ;;  %14527 = vmatprep.subr.mxu0 %v15618_v56 }
0x16e3   :  { %14517 = vmatpush3.msra.mxu1 %v17170_v6  ;;  %14518 = vmatprep.mubr.msk.f32.mxu1 %vm15619_vm3, %v15618_v56 }
0x16e4   :  { %14528 = vmatpush3.msra.mxu0 %v17177_v32  ;;  %14529 = vmatprep.mubr.msk.f32.mxu0 %vm15619_vm3, %v15618_v56 }
0x16e5   :  { %14519 = vmatmul.mubr.msk.f32.vlgmr.msra.gmra.mxu1 %vm147_vm2, %v8123_v36  ;;  %14530 = vmatmul.mubr.msk.f32.vlgmr.msra.gmra.mxu0 %vm147_vm2, %v8123_v36 }
0x16e6   :  { %14532 = vmatprep.subr.mxu1 %v15618_v56  ;;  %14543 = vmatprep.subr.mxu0 %v15618_v56 }
0x16e7   :  { %14533 = vmatpush3.msra.mxu1 %v17066_v58  ;;  %14544 = vmatpush3.msra.mxu0 %v17071_v59 }
0x16e8   :  { %14534 = vmatprep.subr.mxu1 %v15618_v56  ;;  %14545 = vmatprep.subr.mxu0 %v15618_v56 }
0x16e9   :  { %14535 = vmatpush3.msra.mxu1 %v17080_v11  ;;  %14546 = vmatpush3.msra.mxu0 %v17085_v60 }
0x16ea   :  { %14536 = vmatprep.subr.mxu1 %v15618_v56  ;;  %14547 = vmatprep.subr.mxu0 %v15618_v56 }
0x16eb   :  { %14537 = vmatpush3.msra.mxu1 %v17094_v62  ;;  %14548 = vmatpush3.msra.mxu0 %v17099_v61 }
0x16ec   :  { %14538 = vmatprep.subr.mxu1 %v15618_v56  ;;  %14549 = vmatprep.subr.mxu0 %v15618_v56 }
0x16ed   :  { %14539 = vmatpush3.msra.mxu1 %v17108_v20  ;;  %14550 = vmatpush3.msra.mxu0 %v17115_v63 }
0x16ee   :  { %14540 = vmatprep.mubr.msk.f32.mxu1 %vm15619_vm3, %v15618_v56  ;;  %14551 = vmatprep.mubr.msk.f32.mxu0 %vm15619_vm3, %v15618_v56 }
0x16ef   :  { %14554 = vmatprep.subr.mxu1 %v15618_v56  ;;  %14565 = vmatprep.subr.mxu0 %v15618_v56 }
0x179c   :  { %v8194_v58 = vpop.f32.mrf.mxu1  ;;  %v8274_v59 = vpop.f32.mrf.mxu0 }
0x179d   :  { %v8199_v11 = vrot.slane %v8194_v58, 6  ;;  %v8279_v60 = vrot.slane %v8274_v59, 6 }
0x179e   :  { %v14498_v62 = vpop.f32.mrf.mxu1  ;;  %v14509_v61 = vpop.f32.mrf.mxu0 }
0x179f   :  { %v8201_v20 = vadd.f32 %v8199_v11, %v17217_v52  ;;  %v8281_v63 = vadd.f32 %v8279_v60, %v17219_v7 }
0x17a1   :  { %v12554_v0 = vmul.f32 -1.442695, %v8201_v20  ;;  %v12556_v19 = vmul.f32 -1.442695, %v8281_v63 }
0x17a3   :  { %15376 = vpow2.f32 %v12554_v0 }
0x17a4   :  { %15378 = vpow2.f32 %v12556_v19 }
0x17a5   :  { %v8354_v1 = vpop.f32.mrf.mxu1  ;;  %v8429_v2 = vpop.f32.mrf.mxu0 }
0x17a6   :  { %v8434_v3 = vrot.slane %v8429_v2, 6  ;;  %v8359_v37 = vrot.slane %v8354_v1, 6 }
0x17a7   :  { %v14520_v4 = vpop.f32.mrf.mxu1  ;;  %v14531_v6 = vpop.f32.mrf.mxu0 }
0x17a8   :  { %v8436_v32 = vadd.f32 %v8434_v3, %v17229_v22  ;;  %v8361_v33 = vadd.f32 %v8359_v37, %v17227_v17 }
0x17aa   :  { %v12559_v9 = vmul.f32 -1.442695, %v8436_v32 }
0x17ac   :  { %15380 = vpow2.f32 %v12559_v9 }
0x17ad   :  { %15382 = vtanh.f32 %v8361_v33 }
0x17b0   :  { %v15377_v38 = vpop.eup %15376 }
0x17b1   :  { %v15379_v40 = vpop.eup %15378  ;;  %v8205_v8 = vadd.f32 1.0, %v15377_v38 }
0x17b2   :  { %v8285_v39 = vadd.f32 1.0, %v15379_v40 }
0x17b3   :  { %15384 = vrcp.f32 %v8205_v8 }
0x17b4   :  { %15386 = vrcp.f32 %v8285_v39 }
0x17b9   :  { %v15381_v42 = vpop.eup %15380 }
0x17ba   :  { %v15383_v41 = vpop.eup %15382  ;;  %v8440_v45 = vadd.f32 1.0, %v15381_v42 }
0x17bc   :  { %15388 = vrcp.f32 %v8440_v45  ;;  %v17643_v45 = vld [vmem:[#allocation2] sm:$0xff] }
0x17c0   :  { %v15385_v21 = vpop.eup %15384 }
0x17c1   :  { %v15387_v44 = vpop.eup %15386  ;;  %v8447_v18 = vmul.f32 %v15385_v21, %v15383_v41 }
0x17c2   :  { %v8446_v46 = vmul.f32 %v15387_v44, %v8444_v43 }
0x17c4   :  { %v17508_v47 = vadd.f32 %v8447_v18, %v8446_v46  ;;  %v12577_v46 = vld [vmem:[%s18334_s5 + $0x198] sm:$0xff] }
0x17c6   :  { %15390 = vtanh.f32 %v17508_v47  ;;  %v8772_v38 = vrot.slane %v17508_v47, 6  ;;  %v12589_v47 = vld [vmem:[%s18334_s5 + $0x1b8] sm:$0xff] }
0x17c9   :  { %v15389_v48 = vpop.eup %15388 }
0x17d3   :  { %v15391_v51 = vpop.eup %15390 }
0x17d4   :  { %v8450_v55 = vmul.f32 %v15391_v51, %v15389_v48  ;;  %v12576_v48 = vld [vmem:[%s18334_s5 + $0x190] sm:$0xff] }
0x17d5   :  { %v12588_v51 = vld [vmem:[%s18334_s5 + $0x1b0] sm:$0xff] }
0x17d6   :  { %8451 = vst.msk [vmem:[#allocation2 + $0x8] sm:$0xc] %vm1207_vm5, %v8450_v55  ;;  %v8453_v50 = vrot.slane %v8450_v55, 2  ;;  %v12575_v55 = vld [vmem:[%s18334_s5 + $0x188] sm:$0xff] }
0x17d8   :  { %14541 = vmatmul.mubr.msk.f32.vlgmr.msra.gmra.mxu1 %vm147_vm2, %v8453_v50  ;;  %14552 = vmatmul.mubr.msk.f32.vlgmr.msra.gmra.mxu0 %vm147_vm2, %v8453_v50 }
0x17d9   :  { %14555 = vmatpush3.msra.mxu1 %v17517_v12  ;;  %14566 = vmatpush3.msra.mxu0 %v17523_v5 }
0x17da   :  { %14556 = vmatprep.subr.mxu1 %v15618_v56  ;;  %14567 = vmatprep.subr.mxu0 %v15618_v56 }
0x17db   :  { %14557 = vmatpush3.msra.mxu1 %v17531_v57  ;;  %14568 = vmatpush3.msra.mxu0 %v17537_v34 }
0x17dc   :  { %14558 = vmatprep.subr.mxu1 %v15618_v56  ;;  %14569 = vmatprep.subr.mxu0 %v15618_v56 }
0x17dd   :  { %14559 = vmatpush3.msra.mxu1 %v17545_v49  ;;  %14570 = vmatpush3.msra.mxu0 %v17551_v35 }
0x17de   :  { %14560 = vmatprep.subr.mxu1 %v15618_v56  ;;  %14571 = vmatprep.subr.mxu0 %v15618_v56 }
0x17df   :  { %14561 = vmatpush3.msra.mxu1 %v17559_v53  ;;  %14562 = vmatprep.mubr.msk.f32.mxu1 %vm15619_vm3, %v15618_v56 }
0x17e0   :  { %14572 = vmatpush3.msra.mxu0 %v17567_v10  ;;  %14573 = vmatprep.mubr.msk.f32.mxu0 %vm15619_vm3, %v15618_v56 }
0x17e1   :  { %14563 = vmatmul.mubr.msk.f32.vlgmr.msra.gmra.mxu1 %vm147_vm2, %v8453_v50  ;;  %14574 = vmatmul.mubr.msk.f32.vlgmr.msra.gmra.mxu0 %vm147_vm2, %v8453_v50  ;;  %v12587_v50 = vld [vmem:[%s18334_s5 + $0x1a8] sm:$0xff] }
0x17e2   :  { %14576 = vmatprep.subr.mxu1 %v15618_v56  ;;  %14587 = vmatprep.subr.mxu0 %v15618_v56 }
0x17e3   :  { %14577 = vmatpush3.msra.mxu1 %v15594_v13  ;;  %14588 = vmatpush3.msra.mxu0 %v15595_v14 }
0x17e4   :  { %14578 = vmatprep.subr.mxu1 %v15618_v56  ;;  %14589 = vmatprep.subr.mxu0 %v15618_v56 }
0x17e5   :  { %14579 = vmatpush3.msra.mxu1 %v15596_v15  ;;  %14590 = vmatpush3.msra.mxu0 %v15597_v16 }
0x17e6   :  { %14580 = vmatprep.subr.mxu1 %v15618_v56  ;;  %14591 = vmatprep.subr.mxu0 %v15618_v56 }
0x17e7   :  { %14581 = vmatpush3.msra.mxu1 %v15598_v25  ;;  %14592 = vmatpush3.msra.mxu0 %v15599_v28 }
0x17e8   :  { %14582 = vmatprep.subr.mxu1 %v15618_v56  ;;  %14593 = vmatprep.subr.mxu0 %v15618_v56 }
0x17e9   :  { %14583 = vmatpush3.msra.mxu1 %v15600_v23  ;;  %14594 = vmatpush3.msra.mxu0 %v15601_v24 }
0x17ea   :  { %14584 = vmatprep.mubr.msk.f32.mxu1 %vm15619_vm3, %v15618_v56  ;;  %14595 = vmatprep.mubr.msk.f32.mxu0 %vm15619_vm3, %v15618_v56 }
0x17eb   :  { %14598 = vmatprep.subr.mxu1 %v15618_v56  ;;  %14609 = vmatprep.subr.mxu0 %v15618_v56 }
0x1898   :  { %v8522_v31 = vpop.f32.mrf.mxu1  ;;  %v8602_v26 = vpop.f32.mrf.mxu0 }
0x1899   :  { %v8527_v27 = vrot.slane %v8522_v31, 4  ;;  %v8607_v54 = vrot.slane %v8602_v26, 4 }
0x189a   :  { %v14542_v29 = vpop.f32.mrf.mxu1  ;;  %v14553_v30 = vpop.f32.mrf.mxu0 }
0x189b   :  { %v8529_v36 = vadd.f32 %v8527_v27, %v17217_v52  ;;  %v8609_v58 = vadd.f32 %v8607_v54, %v17219_v7 }
0x189d   :  { %v12561_v59 = vmul.f32 -1.442695, %v8529_v36  ;;  %v12563_v11 = vmul.f32 -1.442695, %v8609_v58 }
0x189f   :  { %15392 = vpow2.f32 %v12561_v59 }
0x18a0   :  { %15394 = vpow2.f32 %v12563_v11 }
0x18a1   :  { %v8682_v60 = vpop.f32.mrf.mxu1  ;;  %v8757_v62 = vpop.f32.mrf.mxu0 }
0x18a2   :  { %v8762_v61 = vrot.slane %v8757_v62, 4  ;;  %v8687_v19 = vrot.slane %v8682_v60, 4 }
0x18a3   :  { %v14564_v20 = vpop.f32.mrf.mxu1  ;;  %v14575_v63 = vpop.f32.mrf.mxu0 }
0x18a4   :  { %v8764_v0 = vadd.f32 %v8762_v61, %v17229_v22  ;;  %v8689_v2 = vadd.f32 %v8687_v19, %v17227_v17 }
0x18a6   :  { %v12566_v1 = vmul.f32 -1.442695, %v8764_v0 }
0x18a8   :  { %15396 = vpow2.f32 %v12566_v1 }
0x18a9   :  { %15398 = vtanh.f32 %v8689_v2 }
0x18ac   :  { %v15393_v3 = vpop.eup %15392 }
0x18ad   :  { %v15395_v4 = vpop.eup %15394  ;;  %v8533_v6 = vadd.f32 1.0, %v15393_v3 }
0x18ae   :  { %v8613_v32 = vadd.f32 1.0, %v15395_v4  ;;  %v12600_v4 = vld [vmem:[%s18334_s5 + $0x1d0] sm:$0xff] }
0x18af   :  { %15400 = vrcp.f32 %v8533_v6  ;;  %v12612_v6 = vld [vmem:[%s18334_s5 + $0x1f0] sm:$0xff] }
0x18b0   :  { %15402 = vrcp.f32 %v8613_v32  ;;  %v12599_v32 = vld [vmem:[%s18334_s5 + $0x1c8] sm:$0xff] }
0x18b5   :  { %v15397_v37 = vpop.eup %15396 }
0x18b6   :  { %v15399_v9 = vpop.eup %15398  ;;  %v8768_v39 = vadd.f32 1.0, %v15397_v37  ;;  %v12611_v37 = vld [vmem:[%s18334_s5 + $0x1e8] sm:$0xff] }
0x18b8   :  { %15404 = vrcp.f32 %v8768_v39  ;;  %v17731_v39 = vld [vmem:[%s18337_s6 + $0x1b0] sm:$0xff] }
0x18bc   :  { %v15401_v33 = vpop.eup %15400 }
0x18bd   :  { %v15403_v40 = vpop.eup %15402  ;;  %v8775_v8 = vmul.f32 %v15401_v33, %v15399_v9  ;;  %v12598_v9 = vld [vmem:[%s18334_s5 + $0x1c0] sm:$0xff] }
0x18be   :  { %v8774_v42 = vmul.f32 %v15403_v40, %v8772_v38  ;;  %v12610_v33 = vld [vmem:[%s18334_s5 + $0x1e0] sm:$0xff]  ;;  %v17712_v38 = vld [vmem:[%s18337_s6 + $0x198] sm:$0xff] }
0x18bf   :  { %v17717_v40 = vld [vmem:[%s18337_s6 + $0x1b8] sm:$0xff] }
0x18c0   :  { %v17617_v41 = vadd.f32 %v8775_v8, %v8774_v42  ;;  %v17726_v8 = vld [vmem:[%s18337_s6 + $0x190] sm:$0xff]  ;;  %v17740_v42 = vld [vmem:[%s18337_s6 + $0x188] sm:$0xff] }
0x18c2   :  { %15406 = vtanh.f32 %v17617_v41  ;;  %v9100_v61 = vrot.slane %v17617_v41, 6  ;;  %v17745_v41 = vld [vmem:[%s18337_s6 + $0x1a8] sm:$0xff] }
0x18c5   :  { %v15405_v21 = vpop.eup %15404 }
0x18cf   :  { %v15407_v43 = vpop.eup %15406 }
0x18d0   :  { %v8778_v44 = vmul.f32 %v15407_v43, %v15405_v21  ;;  %v17754_v21 = vld [vmem:[%s18337_s6 + $0x180] sm:$0xff] }
0x18d1   :  { %v17761_v43 = vld [vmem:[%s18337_s6 + $0x1a0] sm:$0xff] }
0x18d2   :  { %8779 = vst.msk [vmem:[#allocation2 + $0x8] sm:$0x30] %vm1536_vm6, %v8778_v44  ;;  %v8781_v18 = vrot.slane %v8778_v44, 4  ;;  %v17774_v44 = vld [vmem:[%s18337_s6 + $0x1d8] sm:$0xff] }
0x18d4   :  { %14585 = vmatmul.mubr.msk.f32.vlgmr.msra.gmra.mxu1 %vm147_vm2, %v8781_v18  ;;  %14596 = vmatmul.mubr.msk.f32.vlgmr.msra.gmra.mxu0 %vm147_vm2, %v8781_v18 }
0x18d5   :  { %14599 = vmatpush3.msra.mxu1 %v17517_v12  ;;  %14610 = vmatpush3.msra.mxu0 %v17523_v5  ;;  %v12574_v12 = vld [vmem:[%s18334_s5 + $0x180] sm:$0xff] }
0x18d6   :  { %14600 = vmatprep.subr.mxu1 %v15618_v56  ;;  %14611 = vmatprep.subr.mxu0 %v15618_v56  ;;  %v12586_v5 = vld [vmem:[%s18334_s5 + $0x1a0] sm:$0xff] }
0x18d7   :  { %14601 = vmatpush3.msra.mxu1 %v17531_v57  ;;  %14612 = vmatpush3.msra.mxu0 %v17537_v34  ;;  %v12601_v57 = vld [vmem:[%s18334_s5 + $0x1d8] sm:$0xff] }
0x18d8   :  { %14602 = vmatprep.subr.mxu1 %v15618_v56  ;;  %14613 = vmatprep.subr.mxu0 %v15618_v56  ;;  %v12613_v34 = vld [vmem:[%s18334_s5 + $0x1f8] sm:$0xff] }
0x18d9   :  { %14603 = vmatpush3.msra.mxu1 %v17545_v49  ;;  %14614 = vmatpush3.msra.mxu0 %v17551_v35 }
0x18da   :  { %14604 = vmatprep.subr.mxu1 %v15618_v56  ;;  %14615 = vmatprep.subr.mxu0 %v15618_v56 }
0x18db   :  { %14605 = vmatpush3.msra.mxu1 %v17559_v53  ;;  %14606 = vmatprep.mubr.msk.f32.mxu1 %vm15619_vm3, %v15618_v56 }
0x18dc   :  { %14616 = vmatpush3.msra.mxu0 %v17567_v10  ;;  %14617 = vmatprep.mubr.msk.f32.mxu0 %vm15619_vm3, %v15618_v56 }
0x18dd   :  { %14607 = vmatmul.mubr.msk.f32.vlgmr.msra.gmra.mxu1 %vm147_vm2, %v8781_v18  ;;  %14618 = vmatmul.mubr.msk.f32.vlgmr.msra.gmra.mxu0 %vm147_vm2, %v8781_v18  ;;  %v17779_v18 = vld [vmem:[%s18337_s6 + $0x1f8] sm:$0xff] }
0x18de   :  { %14628 = vmatprep.mubr.msk.f32.mxu1 %vm147_vm2, %v17643_v45  ;;  %14639 = vmatprep.mubr.msk.f32.mxu0 %vm147_vm2, %v17643_v45 }
0x18df   :  { %14620 = vmatprep.subr.mxu1 %v12577_v46  ;;  %14631 = vmatprep.subr.mxu0 %v12589_v47 }
0x18e0   :  { %14621 = vmatpush3.msra.mxu1 %v12577_v46  ;;  %14632 = vmatpush3.msra.mxu0 %v12589_v47  ;;  %v17793_v46 = vld [vmem:[%s18337_s6 + $0x1f0] sm:$0xff]  ;;  %v17802_v47 = vld [vmem:[%s18337_s6 + $0x1c8] sm:$0xff] }
0x18e1   :  { %14622 = vmatprep.subr.mxu1 %v12576_v48  ;;  %14633 = vmatprep.subr.mxu0 %v12588_v51 }
0x18e2   :  { %14623 = vmatpush3.msra.mxu1 %v12576_v48  ;;  %14634 = vmatpush3.msra.mxu0 %v12588_v51  ;;  %v17807_v48 = vld [vmem:[%s18337_s6 + $0x1e8] sm:$0xff]  ;;  %v17816_v51 = vld [vmem:[%s18337_s6 + $0x1c0] sm:$0xff] }
0x18e3   :  { %14624 = vmatprep.subr.mxu1 %v12575_v55  ;;  %14635 = vmatprep.subr.mxu0 %v12587_v50 }
0x18e4   :  { %14625 = vmatpush3.msra.mxu1 %v12575_v55  ;;  %14636 = vmatpush3.msra.mxu0 %v12587_v50  ;;  %v17823_v55 = vld [vmem:[%s18337_s6 + $0x1e0] sm:$0xff]  ;;  %v12579_v50 = vld [vmem:[%s18338_s7 + $0xc] ss:$0 sm:$0xff] }
0x18e5   :  { %14626 = vmatprep.subr.mxu1 %v12574_v12  ;;  %14637 = vmatprep.subr.mxu0 %v12586_v5 }
0x18e6   :  { %14627 = vmatpush3.msra.mxu1 %v12574_v12  ;;  %14638 = vmatpush3.msra.mxu0 %v12586_v5  ;;  %v12591_v12 = vld [vmem:[%s18338_s7 + $0xd] ss:$0 sm:$0xff] }
0x18e7   :  { %14642 = vmatprep.subr.mxu1 %v12601_v57  ;;  %14653 = vmatprep.subr.mxu0 %v12613_v34 }
0x1994   :  { %v8850_v49 = vpop.f32.mrf.mxu1  ;;  %v8930_v35 = vpop.f32.mrf.mxu0 }
0x1995   :  { %v8855_v53 = vrot.slane %v8850_v49, 2  ;;  %v8935_v10 = vrot.slane %v8930_v35, 2 }
0x1996   :  { %v14586_v13 = vpop.f32.mrf.mxu1  ;;  %v14597_v14 = vpop.f32.mrf.mxu0 }
0x1997   :  { %v8857_v15 = vadd.f32 %v8855_v53, %v17217_v52  ;;  %v8937_v16 = vadd.f32 %v8935_v10, %v17219_v7  ;;  %v12603_v10 = vld [vmem:[%s18338_s7 + $0xe] ss:$0 sm:$0xff]  ;;  %v12615_v13 = vld [vmem:[%s18338_s7 + $0xf] ss:$0 sm:$0xff] }
0x1999   :  { %v12568_v25 = vmul.f32 -1.442695, %v8857_v15  ;;  %v12570_v28 = vmul.f32 -1.442695, %v8937_v16 }
0x199b   :  { %15408 = vpow2.f32 %v12568_v25 }
0x199c   :  { %15410 = vpow2.f32 %v12570_v28 }
0x199d   :  { %v9010_v23 = vpop.f32.mrf.mxu1  ;;  %v9085_v24 = vpop.f32.mrf.mxu0 }
0x199e   :  { %v9090_v31 = vrot.slane %v9085_v24, 2  ;;  %v9015_v29 = vrot.slane %v9010_v23, 2 }
0x199f   :  { %v14608_v26 = vpop.f32.mrf.mxu1  ;;  %v14619_v27 = vpop.f32.mrf.mxu0 }
0x19a0   :  { %v9092_v54 = vadd.f32 %v9090_v31, %v17229_v22  ;;  %v9017_v36 = vadd.f32 %v9015_v29, %v17227_v17 }
0x19a2   :  { %v12573_v30 = vmul.f32 -1.442695, %v9092_v54 }
0x19a4   :  { %15412 = vpow2.f32 %v12573_v30 }
0x19a5   :  { %15414 = vtanh.f32 %v9017_v36 }
0x19a8   :  { %v15409_v58 = vpop.eup %15408 }
0x19a9   :  { %v15411_v59 = vpop.eup %15410  ;;  %v8861_v52 = vadd.f32 1.0, %v15409_v58 }
0x19aa   :  { %v8941_v7 = vadd.f32 1.0, %v15411_v59 }
0x19ab   :  { %15416 = vrcp.f32 %v8861_v52 }
0x19ac   :  { %15418 = vrcp.f32 %v8941_v7 }
0x19b1   :  { %v15413_v11 = vpop.eup %15412 }
0x19b2   :  { %v15415_v60 = vpop.eup %15414  ;;  %v9096_v22 = vadd.f32 1.0, %v15413_v11 }
0x19b4   :  { %15420 = vrcp.f32 %v9096_v22 }
0x19b8   :  { %v15417_v62 = vpop.eup %15416 }
0x19b9   :  { %v15419_v20 = vpop.eup %15418  ;;  %v9103_v63 = vmul.f32 %v15417_v62, %v15415_v60 }
0x19ba   :  { %v9102_v0 = vmul.f32 %v15419_v20, %v9100_v61 }
0x19bc   :  { %v9104_v19 = vadd.f32 %v9103_v63, %v9102_v0 }
0x19be   :  { %15422 = vtanh.f32 %v9104_v19 }
0x19c1   :  { %v15421_v17 = vpop.eup %15420 }
0x19cb   :  { %v15423_v1 = vpop.eup %15422 }
0x19cc   :  { %v9106_v2 = vmul.f32 %v15423_v1, %v15421_v17 }
0x19ce   :  { %9107 = vst.msk [vmem:[#allocation2 + $0x8] sm:$0xc0] %vm1865_vm7, %v9106_v2 }
0x19d5   :  { %v9109_v3 = vld [vmem:[#allocation2 + $0x8] sm:$0xff] }
0x19d6   :  { %14629 = vmatmul.mubr.msk.f32.vlgmr.msra.gmra.mxu1 %vm147_vm2, %v9109_v3  ;;  %14640 = vmatmul.mubr.msk.f32.vlgmr.msra.gmra.mxu0 %vm147_vm2, %v9109_v3 }
0x19d7   :  { %14643 = vmatpush3.msra.mxu1 %v12601_v57  ;;  %14654 = vmatpush3.msra.mxu0 %v12613_v34 }
0x19d8   :  { %14644 = vmatprep.subr.mxu1 %v12600_v4  ;;  %14650 = vmatprep.mubr.msk.f32.mxu1 %vm147_vm2, %v17643_v45 }
0x19d9   :  { %14655 = vmatprep.subr.mxu0 %v12612_v6  ;;  %14661 = vmatprep.mubr.msk.f32.mxu0 %vm147_vm2, %v17643_v45  ;;  %v17788_v45 = vld [vmem:[%s18337_s6 + $0x1d0] sm:$0xff] }
0x19da   :  { %14645 = vmatpush3.msra.mxu1 %v12600_v4  ;;  %14656 = vmatpush3.msra.mxu0 %v12612_v6 }
0x19db   :  { %14646 = vmatprep.subr.mxu1 %v12599_v32  ;;  %14657 = vmatprep.subr.mxu0 %v12611_v37 }
0x19dc   :  { %14647 = vmatpush3.msra.mxu1 %v12599_v32  ;;  %14658 = vmatpush3.msra.mxu0 %v12611_v37 }
0x19dd   :  { %14648 = vmatprep.subr.mxu1 %v12598_v9  ;;  %14659 = vmatprep.subr.mxu0 %v12610_v33 }
0x19de   :  { %14649 = vmatpush3.msra.mxu1 %v12598_v9  ;;  %14660 = vmatpush3.msra.mxu0 %v12610_v33 }
0x19df   :  { %14651 = vmatmul.mubr.msk.f32.vlgmr.msra.gmra.mxu1 %vm147_vm2, %v9109_v3  ;;  %14662 = vmatmul.mubr.msk.f32.vlgmr.msra.gmra.mxu0 %vm147_vm2, %v9109_v3 }
0x19e0   :  { %14664 = vmatprep.subr.mxu1 %v15618_v56  ;;  %14675 = vmatprep.subr.mxu0 %v15618_v56 }
0x19e1   :  { %14665 = vmatpush3.msra.mxu1 %v17712_v38  ;;  %14676 = vmatpush3.msra.mxu0 %v17717_v40 }
0x19e2   :  { %14666 = vmatprep.subr.mxu1 %v15618_v56  ;;  %14677 = vmatprep.subr.mxu0 %v15618_v56 }
0x19e3   :  { %14667 = vmatpush3.msra.mxu1 %v17726_v8  ;;  %14678 = vmatpush3.msra.mxu0 %v17731_v39 }
0x19e4   :  { %14668 = vmatprep.subr.mxu1 %v15618_v56  ;;  %14679 = vmatprep.subr.mxu0 %v15618_v56 }
0x19e5   :  { %14669 = vmatpush3.msra.mxu1 %v17740_v42  ;;  %14680 = vmatpush3.msra.mxu0 %v17745_v41 }
0x19e6   :  { %14670 = vmatprep.subr.mxu1 %v15618_v56  ;;  %14681 = vmatprep.subr.mxu0 %v15618_v56 }
0x19e7   :  { %14671 = vmatpush3.msra.mxu1 %v17754_v21  ;;  %14672 = vmatprep.mubr.msk.f32.mxu1 %vm15619_vm3, %v15618_v56 }
0x19e8   :  { %14682 = vmatpush3.msra.mxu0 %v17761_v43  ;;  %14683 = vmatprep.mubr.msk.f32.mxu0 %vm15619_vm3, %v15618_v56 }
0x19e9   :  { %14673 = vmatmul.mubr.f32.vlgmr.msra.gmra.mxu1 %v15618_v56  ;;  %14684 = vmatmul.mubr.f32.vlgmr.msra.gmra.mxu0 %v15618_v56 }
0x19ea   :  { %14686 = vmatprep.subr.mxu1 %v15618_v56  ;;  %14697 = vmatprep.subr.mxu0 %v15618_v56 }
0x19eb   :  { %14687 = vmatpush3.msra.mxu1 %v17774_v44  ;;  %14698 = vmatpush3.msra.mxu0 %v17779_v18 }
0x19ec   :  { %14688 = vmatprep.subr.mxu1 %v15618_v56  ;;  %14699 = vmatprep.subr.mxu0 %v15618_v56 }
0x19ed   :  { %14689 = vmatpush3.msra.mxu1 %v17788_v45  ;;  %14700 = vmatpush3.msra.mxu0 %v17793_v46 }
0x19ee   :  { %14690 = vmatprep.subr.mxu1 %v15618_v56  ;;  %14701 = vmatprep.subr.mxu0 %v15618_v56 }
0x19ef   :  { %14691 = vmatpush3.msra.mxu1 %v17802_v47  ;;  %14702 = vmatpush3.msra.mxu0 %v17807_v48 }
0x19f0   :  { %14692 = vmatprep.subr.mxu1 %v15618_v56  ;;  %14703 = vmatprep.subr.mxu0 %v15618_v56 }
0x19f1   :  { %14693 = vmatpush3.msra.mxu1 %v17816_v51  ;;  %14694 = vmatprep.mubr.msk.f32.mxu1 %vm15619_vm3, %v15618_v56 }
0x19f2   :  { %14704 = vmatpush3.msra.mxu0 %v17823_v55  ;;  %14705 = vmatprep.mubr.msk.f32.mxu0 %vm15619_vm3, %v15618_v56 }
0x19f3   :  { %14695 = vmatmul.mubr.f32.vlgmr.msra.gmra.mxu1 %v15618_v56  ;;  %14706 = vmatmul.mubr.f32.vlgmr.msra.gmra.mxu0 %v15618_v56 }
0x19f4   :  { %14708 = vmatprep.subr.mxu1 %v15618_v56  ;;  %14719 = vmatprep.subr.mxu0 %v15618_v56 }
0x19f5   :  { %14709 = vmatpush3.msra.mxu1 %v17712_v38  ;;  %14720 = vmatpush3.msra.mxu0 %v17717_v40 }
0x19f6   :  { %14710 = vmatprep.subr.mxu1 %v15618_v56  ;;  %14721 = vmatprep.subr.mxu0 %v15618_v56 }
0x19f7   :  { %14711 = vmatpush3.msra.mxu1 %v17726_v8  ;;  %14722 = vmatpush3.msra.mxu0 %v17731_v39 }
0x19f8   :  { %14712 = vmatprep.subr.mxu1 %v15618_v56  ;;  %14723 = vmatprep.subr.mxu0 %v15618_v56 }
0x19f9   :  { %14713 = vmatpush3.msra.mxu1 %v17740_v42  ;;  %14724 = vmatpush3.msra.mxu0 %v17745_v41 }
0x19fa   :  { %14714 = vmatprep.subr.mxu1 %v15618_v56  ;;  %14725 = vmatprep.subr.mxu0 %v15618_v56 }
0x19fb   :  { %14715 = vmatpush3.msra.mxu1 %v17754_v21  ;;  %14726 = vmatpush3.msra.mxu0 %v17761_v43 }
0x19fc   :  { %14716 = vmatprep.mubr.msk.f32.mxu1 %vm15619_vm3, %v15618_v56  ;;  %14727 = vmatprep.mubr.msk.f32.mxu0 %vm15619_vm3, %v15618_v56 }
0x19fd   :  { %14730 = vmatprep.subr.mxu1 %v15618_v56  ;;  %14741 = vmatprep.subr.mxu0 %v15618_v56 }
0x1a96   :  { %v14630_v5 = vpop.f32.mrf.mxu1  ;;  %v14641_v57 = vpop.f32.mrf.mxu0 }
0x1a97   :  { %v17863_v34 = vadd.f32 %v14630_v5, %v12579_v50  ;;  %v17865_v49 = vadd.f32 %v14641_v57, %v12591_v12 }
0x1a98   :  { %v9195_v35 = vpop.f32.mrf.mxu1  ;;  %v9288_v53 = vpop.f32.mrf.mxu0 }
0x1a99   :  { %v17877_v24 = vadd.f32 %v12579_v50, %v9195_v35  ;;  %v17879_v31 = vadd.f32 %v12591_v12, %v9288_v53 }
0x1a9f   :  { %v14652_v14 = vpop.f32.mrf.mxu1  ;;  %v14663_v15 = vpop.f32.mrf.mxu0 }
0x1aa0   :  { %v17873_v16 = vadd.f32 %v14652_v14, %v12603_v10  ;;  %v17875_v25 = vadd.f32 %v14663_v15, %v12615_v13 }
0x1aa1   :  { %v9381_v28 = vpop.f32.mrf.mxu1  ;;  %v9474_v23 = vpop.f32.mrf.mxu0 }
0x1aa2   :  { %v17883_v52 = vadd.f32 %v12615_v13, %v9474_v23  ;;  %v17886_v20 = vadd.f32 %v12603_v10, %v9381_v28 }
0x1aa9   :  { %v9554_v26 = vpop.f32.mrf.mxu1  ;;  %v9631_v27 = vpop.f32.mrf.mxu0 }
0x1aaa   :  { %v9558_v54 = vadd.f32 %v9554_v26, %v17877_v24  ;;  %v9635_v29 = vadd.f32 %v9631_v27, %v17879_v31 }
0x1aab   :  { %v14674_v30 = vpop.f32.mrf.mxu1  ;;  %v14685_v36 = vpop.f32.mrf.mxu0 }
0x1aac   :  { %v12622_v58 = vmul.f32 -1.442695, %v9558_v54  ;;  %v12623_v59 = vmul.f32 -1.442695, %v9635_v29 }
0x1aae   :  { %15424 = vpow2.f32 %v12622_v58 }
0x1aaf   :  { %15426 = vpow2.f32 %v12623_v59 }
0x1ab3   :  { %v9708_v7 = vpop.f32.mrf.mxu1  ;;  %v9780_v11 = vpop.f32.mrf.mxu0 }
0x1ab4   :  { %v9784_v60 = vadd.f32 %v9780_v11, %v17883_v52  ;;  %v9712_v22 = vadd.f32 %v9708_v7, %v17886_v20 }
0x1ab5   :  { %v14696_v62 = vpop.f32.mrf.mxu1  ;;  %v14707_v61 = vpop.f32.mrf.mxu0 }
0x1ab6   :  { %v12624_v63 = vmul.f32 -1.442695, %v9784_v60 }
0x1ab8   :  { %15428 = vpow2.f32 %v12624_v63 }
0x1ab9   :  { %15430 = vtanh.f32 %v9712_v22 }
0x1abb   :  { %v15425_v0 = vpop.eup %15424 }
0x1abc   :  { %v15427_v19 = vpop.eup %15426  ;;  %v9562_v17 = vadd.f32 1.0, %v15425_v0 }
0x1abd   :  { %v9639_v1 = vadd.f32 1.0, %v15427_v19 }
0x1abe   :  { %15432 = vrcp.f32 %v9562_v17 }
0x1abf   :  { %15434 = vrcp.f32 %v9639_v1 }
0x1ac5   :  { %v15429_v2 = vpop.eup %15428 }
0x1ac6   :  { %v15431_v3 = vpop.eup %15430  ;;  %v9788_v37 = vadd.f32 1.0, %v15429_v2 }
0x1ac8   :  { %15436 = vrcp.f32 %v9788_v37 }
0x1acb   :  { %v15433_v4 = vpop.eup %15432 }
0x1acc   :  { %v15435_v6 = vpop.eup %15434  ;;  %v9792_v32 = vmul.f32 %v15433_v4, %v15431_v3 }
0x1acd   :  { %v9791_v9 = vmul.f32 0.0, %v15435_v6 }
0x1acf   :  { %v17889_v33 = vadd.f32 %v9792_v32, %v9791_v9 }
0x1ad1   :  { %15438 = vtanh.f32 %v17889_v33  ;;  %v10115_v17 = vrot.slane %v17889_v33, 6 }
0x1ad5   :  { %v15437_v50 = vpop.eup %15436 }
0x1ade   :  { %v15439_v12 = vpop.eup %15438 }
0x1adf   :  { %v9795_v5 = vmul.f32 %v15439_v12, %v15437_v50 }
0x1ae1   :  { %14717 = vmatmul.mubr.msk.f32.vlgmr.msra.gmra.mxu1 %vm147_vm2, %v9795_v5  ;;  %14728 = vmatmul.mubr.msk.f32.vlgmr.msra.gmra.mxu0 %vm147_vm2, %v9795_v5 }
0x1ae2   :  { %14731 = vmatpush3.msra.mxu1 %v17774_v44  ;;  %14742 = vmatpush3.msra.mxu0 %v17779_v18 }
0x1ae3   :  { %14732 = vmatprep.subr.mxu1 %v15618_v56  ;;  %14743 = vmatprep.subr.mxu0 %v15618_v56 }
0x1ae4   :  { %14733 = vmatpush3.msra.mxu1 %v17788_v45  ;;  %14744 = vmatpush3.msra.mxu0 %v17793_v46 }
0x1ae5   :  { %14734 = vmatprep.subr.mxu1 %v15618_v56  ;;  %14745 = vmatprep.subr.mxu0 %v15618_v56 }
0x1ae6   :  { %14735 = vmatpush3.msra.mxu1 %v17802_v47  ;;  %14746 = vmatpush3.msra.mxu0 %v17807_v48 }
0x1ae7   :  { %14736 = vmatprep.subr.mxu1 %v15618_v56  ;;  %14747 = vmatprep.subr.mxu0 %v15618_v56 }
0x1ae8   :  { %14737 = vmatpush3.msra.mxu1 %v17816_v51  ;;  %14738 = vmatprep.mubr.msk.f32.mxu1 %vm15619_vm3, %v15618_v56 }
0x1ae9   :  { %14748 = vmatpush3.msra.mxu0 %v17823_v55  ;;  %14749 = vmatprep.mubr.msk.f32.mxu0 %vm15619_vm3, %v15618_v56 }
0x1aea   :  { %14739 = vmatmul.mubr.msk.f32.vlgmr.msra.gmra.mxu1 %vm147_vm2, %v9795_v5  ;;  %14750 = vmatmul.mubr.msk.f32.vlgmr.msra.gmra.mxu0 %vm147_vm2, %v9795_v5 }
0x1aeb   :  { %14752 = vmatprep.subr.mxu1 %v15618_v56  ;;  %14763 = vmatprep.subr.mxu0 %v15618_v56 }
0x1aec   :  { %14753 = vmatpush3.msra.mxu1 %v17712_v38  ;;  %14764 = vmatpush3.msra.mxu0 %v17717_v40 }
0x1aed   :  { %14754 = vmatprep.subr.mxu1 %v15618_v56  ;;  %14765 = vmatprep.subr.mxu0 %v15618_v56 }
0x1aee   :  { %14755 = vmatpush3.msra.mxu1 %v17726_v8  ;;  %14766 = vmatpush3.msra.mxu0 %v17731_v39 }
0x1aef   :  { %14756 = vmatprep.subr.mxu1 %v15618_v56  ;;  %14767 = vmatprep.subr.mxu0 %v15618_v56 }
0x1af0   :  { %14757 = vmatpush3.msra.mxu1 %v17740_v42  ;;  %14768 = vmatpush3.msra.mxu0 %v17745_v41 }
0x1af1   :  { %14758 = vmatprep.subr.mxu1 %v15618_v56  ;;  %14769 = vmatprep.subr.mxu0 %v15618_v56 }
0x1af2   :  { %14759 = vmatpush3.msra.mxu1 %v17754_v21  ;;  %14770 = vmatpush3.msra.mxu0 %v17761_v43 }
0x1af3   :  { %14760 = vmatprep.mubr.msk.f32.mxu1 %vm15619_vm3, %v15618_v56  ;;  %14771 = vmatprep.mubr.msk.f32.mxu0 %vm15619_vm3, %v15618_v56 }
0x1af4   :  { %14774 = vmatprep.subr.mxu1 %v15618_v56  ;;  %14785 = vmatprep.subr.mxu0 %v15618_v56 }
0x1ba1   :  { %v9865_v57 = vpop.f32.mrf.mxu1  ;;  %v9945_v35 = vpop.f32.mrf.mxu0 }
0x1ba2   :  { %v9870_v53 = vrot.slane %v9865_v57, 6  ;;  %v9950_v10 = vrot.slane %v9945_v35, 6 }
0x1ba3   :  { %v14718_v13 = vpop.f32.mrf.mxu1  ;;  %v14729_v14 = vpop.f32.mrf.mxu0 }
0x1ba4   :  { %v9872_v15 = vadd.f32 %v9870_v53, %v17877_v24  ;;  %v9952_v28 = vadd.f32 %v9950_v10, %v17879_v31 }
0x1ba6   :  { %v12626_v23 = vmul.f32 -1.442695, %v9872_v15  ;;  %v12628_v26 = vmul.f32 -1.442695, %v9952_v28 }
0x1ba8   :  { %15440 = vpow2.f32 %v12626_v23 }
0x1ba9   :  { %15442 = vpow2.f32 %v12628_v26 }
0x1baa   :  { %v10025_v27 = vpop.f32.mrf.mxu1  ;;  %v10100_v54 = vpop.f32.mrf.mxu0 }
0x1bab   :  { %v10105_v29 = vrot.slane %v10100_v54, 6  ;;  %v10030_v59 = vrot.slane %v10025_v27, 6 }
0x1bac   :  { %v14740_v30 = vpop.f32.mrf.mxu1  ;;  %v14751_v36 = vpop.f32.mrf.mxu0 }
0x1bad   :  { %v10107_v58 = vadd.f32 %v10105_v29, %v17883_v52  ;;  %v10032_v11 = vadd.f32 %v10030_v59, %v17886_v20 }
0x1baf   :  { %v12631_v7 = vmul.f32 -1.442695, %v10107_v58 }
0x1bb1   :  { %15444 = vpow2.f32 %v12631_v7 }
0x1bb2   :  { %15446 = vtanh.f32 %v10032_v11 }
0x1bb5   :  { %v15441_v60 = vpop.eup %15440 }
0x1bb6   :  { %v15443_v62 = vpop.eup %15442  ;;  %v9876_v61 = vadd.f32 1.0, %v15441_v60 }
0x1bb7   :  { %v9956_v63 = vadd.f32 1.0, %v15443_v62 }
0x1bb8   :  { %15448 = vrcp.f32 %v9876_v61 }
0x1bb9   :  { %15450 = vrcp.f32 %v9956_v63 }
0x1bbe   :  { %v15445_v22 = vpop.eup %15444 }
0x1bbf   :  { %v15447_v0 = vpop.eup %15446  ;;  %v10111_v3 = vadd.f32 1.0, %v15445_v22 }
0x1bc1   :  { %15452 = vrcp.f32 %v10111_v3 }
0x1bc5   :  { %v15449_v19 = vpop.eup %15448 }
0x1bc6   :  { %v15451_v1 = vpop.eup %15450  ;;  %v10118_v2 = vmul.f32 %v15449_v19, %v15447_v0 }
0x1bc7   :  { %v10117_v4 = vmul.f32 %v15451_v1, %v10115_v17 }
0x1bc9   :  { %v17941_v6 = vadd.f32 %v10118_v2, %v10117_v4 }
0x1bcb   :  { %15454 = vtanh.f32 %v17941_v6  ;;  %v10442_v22 = vrot.slane %v17941_v6, 6 }
0x1bce   :  { %v15453_v32 = vpop.eup %15452 }
0x1bd8   :  { %v15455_v37 = vpop.eup %15454 }
0x1bd9   :  { %v10121_v9 = vmul.f32 %v15455_v37, %v15453_v32 }
0x1bdb   :  { %v10123_v50 = vrot.slane %v10121_v9, 2 }
0x1bdd   :  { %14761 = vmatmul.mubr.msk.f32.vlgmr.msra.gmra.mxu1 %vm147_vm2, %v10123_v50  ;;  %14772 = vmatmul.mubr.msk.f32.vlgmr.msra.gmra.mxu0 %vm147_vm2, %v10123_v50 }
0x1bde   :  { %14775 = vmatpush3.msra.mxu1 %v17774_v44  ;;  %14786 = vmatpush3.msra.mxu0 %v17779_v18 }
0x1bdf   :  { %14776 = vmatprep.subr.mxu1 %v15618_v56  ;;  %14787 = vmatprep.subr.mxu0 %v15618_v56 }
0x1be0   :  { %14777 = vmatpush3.msra.mxu1 %v17788_v45  ;;  %14788 = vmatpush3.msra.mxu0 %v17793_v46 }
0x1be1   :  { %14778 = vmatprep.subr.mxu1 %v15618_v56  ;;  %14789 = vmatprep.subr.mxu0 %v15618_v56 }
0x1be2   :  { %14779 = vmatpush3.msra.mxu1 %v17802_v47  ;;  %14790 = vmatpush3.msra.mxu0 %v17807_v48 }
0x1be3   :  { %14780 = vmatprep.subr.mxu1 %v15618_v56  ;;  %14791 = vmatprep.subr.mxu0 %v15618_v56 }
0x1be4   :  { %14781 = vmatpush3.msra.mxu1 %v17816_v51  ;;  %14782 = vmatprep.mubr.msk.f32.mxu1 %vm15619_vm3, %v15618_v56 }
0x1be5   :  { %14792 = vmatpush3.msra.mxu0 %v17823_v55  ;;  %14793 = vmatprep.mubr.msk.f32.mxu0 %vm15619_vm3, %v15618_v56 }
0x1be6   :  { %14783 = vmatmul.mubr.msk.f32.vlgmr.msra.gmra.mxu1 %vm147_vm2, %v10123_v50  ;;  %14794 = vmatmul.mubr.msk.f32.vlgmr.msra.gmra.mxu0 %vm147_vm2, %v10123_v50 }
0x1be7   :  { %14796 = vmatprep.subr.mxu1 %v15618_v56  ;;  %14807 = vmatprep.subr.mxu0 %v15618_v56 }
0x1be8   :  { %14797 = vmatpush3.msra.mxu1 %v17712_v38  ;;  %14808 = vmatpush3.msra.mxu0 %v17717_v40 }
0x1be9   :  { %14798 = vmatprep.subr.mxu1 %v15618_v56  ;;  %14809 = vmatprep.subr.mxu0 %v15618_v56 }
0x1bea   :  { %14799 = vmatpush3.msra.mxu1 %v17726_v8  ;;  %14810 = vmatpush3.msra.mxu0 %v17731_v39 }
0x1beb   :  { %14800 = vmatprep.subr.mxu1 %v15618_v56  ;;  %14811 = vmatprep.subr.mxu0 %v15618_v56 }
0x1bec   :  { %14801 = vmatpush3.msra.mxu1 %v17740_v42  ;;  %14812 = vmatpush3.msra.mxu0 %v17745_v41 }
0x1bed   :  { %14802 = vmatprep.subr.mxu1 %v15618_v56  ;;  %14813 = vmatprep.subr.mxu0 %v15618_v56 }
0x1bee   :  { %14803 = vmatpush3.msra.mxu1 %v17754_v21  ;;  %14814 = vmatpush3.msra.mxu0 %v17761_v43 }
0x1bef   :  { %14804 = vmatprep.mubr.msk.f32.mxu1 %vm15619_vm3, %v15618_v56  ;;  %14815 = vmatprep.mubr.msk.f32.mxu0 %vm15619_vm3, %v15618_v56 }
0x1bf0   :  { %14818 = vmatprep.subr.mxu1 %v15618_v56  ;;  %14829 = vmatprep.subr.mxu0 %v15618_v56 }
0x1c9d   :  { %v10192_v33 = vpop.f32.mrf.mxu1  ;;  %v10272_v12 = vpop.f32.mrf.mxu0 }
0x1c9e   :  { %v10197_v5 = vrot.slane %v10192_v33, 4  ;;  %v10277_v57 = vrot.slane %v10272_v12, 4 }
0x1c9f   :  { %v14762_v35 = vpop.f32.mrf.mxu1  ;;  %v14773_v53 = vpop.f32.mrf.mxu0 }
0x1ca0   :  { %v10199_v10 = vadd.f32 %v10197_v5, %v17877_v24  ;;  %v10279_v13 = vadd.f32 %v10277_v57, %v17879_v31 }
0x1ca2   :  { %v12633_v14 = vmul.f32 -1.442695, %v10199_v10  ;;  %v12635_v15 = vmul.f32 -1.442695, %v10279_v13 }
0x1ca4   :  { %15456 = vpow2.f32 %v12633_v14 }
0x1ca5   :  { %15458 = vpow2.f32 %v12635_v15 }
0x1ca6   :  { %v10352_v28 = vpop.f32.mrf.mxu1  ;;  %v10427_v23 = vpop.f32.mrf.mxu0 }
0x1ca7   :  { %v10432_v26 = vrot.slane %v10427_v23, 4  ;;  %v10357_v30 = vrot.slane %v10352_v28, 4 }
0x1ca8   :  { %v14784_v27 = vpop.f32.mrf.mxu1  ;;  %v14795_v54 = vpop.f32.mrf.mxu0 }
0x1ca9   :  { %v10434_v29 = vadd.f32 %v10432_v26, %v17883_v52  ;;  %v10359_v58 = vadd.f32 %v10357_v30, %v17886_v20 }
0x1cab   :  { %v12638_v36 = vmul.f32 -1.442695, %v10434_v29 }
0x1cad   :  { %15460 = vpow2.f32 %v12638_v36 }
0x1cae   :  { %15462 = vtanh.f32 %v10359_v58 }
0x1cb1   :  { %v15457_v59 = vpop.eup %15456 }
0x1cb2   :  { %v15459_v7 = vpop.eup %15458  ;;  %v10203_v11 = vadd.f32 1.0, %v15457_v59 }
0x1cb3   :  { %v10283_v60 = vadd.f32 1.0, %v15459_v7 }
0x1cb4   :  { %15464 = vrcp.f32 %v10203_v11 }
0x1cb5   :  { %15466 = vrcp.f32 %v10283_v60 }
0x1cba   :  { %v15461_v62 = vpop.eup %15460 }
0x1cbb   :  { %v15463_v61 = vpop.eup %15462  ;;  %v10438_v17 = vadd.f32 1.0, %v15461_v62 }
0x1cbd   :  { %15468 = vrcp.f32 %v10438_v17 }
0x1cc1   :  { %v15465_v63 = vpop.eup %15464 }
0x1cc2   :  { %v15467_v0 = vpop.eup %15466  ;;  %v10445_v19 = vmul.f32 %v15465_v63, %v15463_v61 }
0x1cc3   :  { %v10444_v1 = vmul.f32 %v15467_v0, %v10442_v22 }
0x1cc5   :  { %v17993_v2 = vadd.f32 %v10445_v19, %v10444_v1 }
0x1cc7   :  { %15470 = vtanh.f32 %v17993_v2  ;;  %v10769_v11 = vrot.slane %v17993_v2, 6 }
0x1cca   :  { %v15469_v3 = vpop.eup %15468 }
0x1cd4   :  { %v15471_v4 = vpop.eup %15470 }
0x1cd5   :  { %v10448_v32 = vmul.f32 %v15471_v4, %v15469_v3 }
0x1cd7   :  { %v10450_v37 = vrot.slane %v10448_v32, 4 }
0x1cd9   :  { %14805 = vmatmul.mubr.msk.f32.vlgmr.msra.gmra.mxu1 %vm147_vm2, %v10450_v37  ;;  %14816 = vmatmul.mubr.msk.f32.vlgmr.msra.gmra.mxu0 %vm147_vm2, %v10450_v37 }
0x1cda   :  { %14819 = vmatpush3.msra.mxu1 %v17774_v44  ;;  %14830 = vmatpush3.msra.mxu0 %v17779_v18 }
0x1cdb   :  { %14820 = vmatprep.subr.mxu1 %v15618_v56  ;;  %14831 = vmatprep.subr.mxu0 %v15618_v56 }
0x1cdc   :  { %14821 = vmatpush3.msra.mxu1 %v17788_v45  ;;  %14832 = vmatpush3.msra.mxu0 %v17793_v46 }
0x1cdd   :  { %14822 = vmatprep.subr.mxu1 %v15618_v56  ;;  %14833 = vmatprep.subr.mxu0 %v15618_v56 }
0x1cde   :  { %14823 = vmatpush3.msra.mxu1 %v17802_v47  ;;  %14834 = vmatpush3.msra.mxu0 %v17807_v48 }
0x1cdf   :  { %14824 = vmatprep.subr.mxu1 %v15618_v56  ;;  %14835 = vmatprep.subr.mxu0 %v15618_v56 }
0x1ce0   :  { %14825 = vmatpush3.msra.mxu1 %v17816_v51  ;;  %14826 = vmatprep.mubr.msk.f32.mxu1 %vm15619_vm3, %v15618_v56 }
0x1ce1   :  { %14836 = vmatpush3.msra.mxu0 %v17823_v55  ;;  %14837 = vmatprep.mubr.msk.f32.mxu0 %vm15619_vm3, %v15618_v56 }
0x1ce2   :  { %14827 = vmatmul.mubr.msk.f32.vlgmr.msra.gmra.mxu1 %vm147_vm2, %v10450_v37  ;;  %14838 = vmatmul.mubr.msk.f32.vlgmr.msra.gmra.mxu0 %vm147_vm2, %v10450_v37 }
0x1ce3   :  { %14840 = vmatprep.subr.mxu1 %v15618_v56  ;;  %14851 = vmatprep.subr.mxu0 %v15618_v56 }
0x1ce4   :  { %14841 = vmatpush3.msra.mxu1 %v17712_v38  ;;  %14852 = vmatpush3.msra.mxu0 %v17717_v40 }
0x1ce5   :  { %14842 = vmatprep.subr.mxu1 %v15618_v56  ;;  %14853 = vmatprep.subr.mxu0 %v15618_v56 }
0x1ce6   :  { %14843 = vmatpush3.msra.mxu1 %v17726_v8  ;;  %14854 = vmatpush3.msra.mxu0 %v17731_v39 }
0x1ce7   :  { %14844 = vmatprep.subr.mxu1 %v15618_v56  ;;  %14855 = vmatprep.subr.mxu0 %v15618_v56 }
0x1ce8   :  { %14845 = vmatpush3.msra.mxu1 %v17740_v42  ;;  %14856 = vmatpush3.msra.mxu0 %v17745_v41 }
0x1ce9   :  { %14846 = vmatprep.subr.mxu1 %v15618_v56  ;;  %14857 = vmatprep.subr.mxu0 %v15618_v56 }
0x1cea   :  { %14847 = vmatpush3.msra.mxu1 %v17754_v21  ;;  %14858 = vmatpush3.msra.mxu0 %v17761_v43 }
0x1ceb   :  { %14848 = vmatprep.mubr.msk.f32.mxu1 %vm15619_vm3, %v15618_v56  ;;  %14859 = vmatprep.mubr.msk.f32.mxu0 %vm15619_vm3, %v15618_v56 }
0x1cec   :  { %14862 = vmatprep.subr.mxu1 %v15618_v56  ;;  %14873 = vmatprep.subr.mxu0 %v15618_v56 }
0x1d99   :  { %v10519_v6 = vpop.f32.mrf.mxu1  ;;  %v10599_v9 = vpop.f32.mrf.mxu0 }
0x1d9a   :  { %v10524_v50 = vrot.slane %v10519_v6, 2  ;;  %v10604_v33 = vrot.slane %v10599_v9, 2 }
0x1d9b   :  { %v14806_v12 = vpop.f32.mrf.mxu1  ;;  %v14817_v5 = vpop.f32.mrf.mxu0 }
0x1d9c   :  { %v10526_v57 = vadd.f32 %v10524_v50, %v17877_v24  ;;  %v10606_v35 = vadd.f32 %v10604_v33, %v17879_v31 }
0x1d9e   :  { %v12640_v53 = vmul.f32 -1.442695, %v10526_v57  ;;  %v12642_v10 = vmul.f32 -1.442695, %v10606_v35 }
0x1da0   :  { %15472 = vpow2.f32 %v12640_v53 }
0x1da1   :  { %15474 = vpow2.f32 %v12642_v10 }
0x1da2   :  { %v10679_v13 = vpop.f32.mrf.mxu1  ;;  %v10754_v14 = vpop.f32.mrf.mxu0 }
0x1da3   :  { %v10759_v15 = vrot.slane %v10754_v14, 2  ;;  %v10684_v27 = vrot.slane %v10679_v13, 2 }
0x1da4   :  { %v14828_v28 = vpop.f32.mrf.mxu1  ;;  %v14839_v23 = vpop.f32.mrf.mxu0 }
0x1da5   :  { %v10761_v26 = vadd.f32 %v10759_v15, %v17883_v52  ;;  %v10686_v29 = vadd.f32 %v10684_v27, %v17886_v20 }
0x1da7   :  { %v12645_v54 = vmul.f32 -1.442695, %v10761_v26 }
0x1da9   :  { %15476 = vpow2.f32 %v12645_v54 }
0x1daa   :  { %15478 = vtanh.f32 %v10686_v29 }
0x1dad   :  { %v15473_v30 = vpop.eup %15472 }
0x1dae   :  { %v15475_v36 = vpop.eup %15474  ;;  %v10530_v24 = vadd.f32 1.0, %v15473_v30 }
0x1daf   :  { %v10610_v31 = vadd.f32 1.0, %v15475_v36 }
0x1db0   :  { %15480 = vrcp.f32 %v10530_v24 }
0x1db1   :  { %15482 = vrcp.f32 %v10610_v31 }
0x1db6   :  { %v15477_v58 = vpop.eup %15476 }
0x1db7   :  { %v15479_v59 = vpop.eup %15478  ;;  %v10765_v52 = vadd.f32 1.0, %v15477_v58 }
0x1db9   :  { %15484 = vrcp.f32 %v10765_v52 }
0x1dbd   :  { %v15481_v7 = vpop.eup %15480 }
0x1dbe   :  { %v15483_v60 = vpop.eup %15482  ;;  %v10772_v62 = vmul.f32 %v15481_v7, %v15479_v59 }
0x1dbf   :  { %v10771_v61 = vmul.f32 %v15483_v60, %v10769_v11 }
0x1dc1   :  { %v18045_v63 = vadd.f32 %v10772_v62, %v10771_v61 }
0x1dc3   :  { %15486 = vtanh.f32 %v18045_v63  ;;  %v11084_v26 = vrot.slane %v18045_v63, 6 }
0x1dc6   :  { %v15485_v20 = vpop.eup %15484 }
0x1dd0   :  { %v15487_v22 = vpop.eup %15486 }
0x1dd1   :  { %v10775_v0 = vmul.f32 %v15487_v22, %v15485_v20 }
0x1dd3   :  { %v10777_v19 = vrot.slane %v10775_v0, 6 }
0x1dd5   :  { %14849 = vmatmul.mubr.msk.f32.vlgmr.msra.gmra.mxu1 %vm147_vm2, %v10777_v19  ;;  %14860 = vmatmul.mubr.msk.f32.vlgmr.msra.gmra.mxu0 %vm147_vm2, %v10777_v19 }
0x1dd6   :  { %14863 = vmatpush3.msra.mxu1 %v17774_v44  ;;  %14874 = vmatpush3.msra.mxu0 %v17779_v18 }
0x1dd7   :  { %14864 = vmatprep.subr.mxu1 %v15618_v56  ;;  %14875 = vmatprep.subr.mxu0 %v15618_v56 }
0x1dd8   :  { %14865 = vmatpush3.msra.mxu1 %v17788_v45  ;;  %14876 = vmatpush3.msra.mxu0 %v17793_v46 }
0x1dd9   :  { %14866 = vmatprep.subr.mxu1 %v15618_v56  ;;  %14877 = vmatprep.subr.mxu0 %v15618_v56 }
0x1dda   :  { %14867 = vmatpush3.msra.mxu1 %v17802_v47  ;;  %14878 = vmatpush3.msra.mxu0 %v17807_v48 }
0x1ddb   :  { %14868 = vmatprep.subr.mxu1 %v15618_v56  ;;  %14879 = vmatprep.subr.mxu0 %v15618_v56 }
0x1ddc   :  { %14869 = vmatpush3.msra.mxu1 %v17816_v51  ;;  %14870 = vmatprep.mubr.msk.f32.mxu1 %vm15619_vm3, %v15618_v56 }
0x1ddd   :  { %14880 = vmatpush3.msra.mxu0 %v17823_v55  ;;  %14881 = vmatprep.mubr.msk.f32.mxu0 %vm15619_vm3, %v15618_v56 }
0x1dde   :  { %14871 = vmatmul.mubr.msk.f32.vlgmr.msra.gmra.mxu1 %vm147_vm2, %v10777_v19  ;;  %14882 = vmatmul.mubr.msk.f32.vlgmr.msra.gmra.mxu0 %vm147_vm2, %v10777_v19 }
0x1ddf   :  { %14884 = vmatprep.subr.mxu1 %v15618_v56  ;;  %14895 = vmatprep.subr.mxu0 %v15618_v56 }
0x1de0   :  { %14885 = vmatpush3.msra.mxu1 %v17712_v38  ;;  %14896 = vmatpush3.msra.mxu0 %v17717_v40 }
0x1de1   :  { %14886 = vmatprep.subr.mxu1 %v15618_v56  ;;  %14897 = vmatprep.subr.mxu0 %v15618_v56 }
0x1de2   :  { %14887 = vmatpush3.msra.mxu1 %v17726_v8  ;;  %14898 = vmatpush3.msra.mxu0 %v17731_v39 }
0x1de3   :  { %14888 = vmatprep.subr.mxu1 %v15618_v56  ;;  %14899 = vmatprep.subr.mxu0 %v15618_v56 }
0x1de4   :  { %14889 = vmatpush3.msra.mxu1 %v17740_v42  ;;  %14900 = vmatpush3.msra.mxu0 %v17745_v41 }
0x1de5   :  { %14890 = vmatprep.subr.mxu1 %v15618_v56  ;;  %14901 = vmatprep.subr.mxu0 %v15618_v56 }
0x1de6   :  { %14891 = vmatpush3.msra.mxu1 %v17754_v21  ;;  %14902 = vmatpush3.msra.mxu0 %v17761_v43 }
0x1de7   :  { %14892 = vmatprep.mubr.msk.f32.mxu1 %vm15619_vm3, %v15618_v56  ;;  %14903 = vmatprep.mubr.msk.f32.mxu0 %vm15619_vm3, %v15618_v56 }
0x1de8   :  { %14906 = vmatprep.subr.mxu1 %v15618_v56  ;;  %14917 = vmatprep.subr.mxu0 %v15618_v56 }
0x1e95   :  { %v10846_v17 = vpop.f32.mrf.mxu1  ;;  %v10923_v1 = vpop.f32.mrf.mxu0 }
0x1e96   :  { %v10850_v2 = vadd.f32 %v10846_v17, %v17863_v34  ;;  %v10927_v3 = vadd.f32 %v10923_v1, %v17865_v49 }
0x1e97   :  { %v14850_v4 = vpop.f32.mrf.mxu1  ;;  %v14861_v32 = vpop.f32.mrf.mxu0 }
0x1e98   :  { %v12647_v37 = vmul.f32 -1.442695, %v10850_v2  ;;  %v12649_v6 = vmul.f32 -1.442695, %v10927_v3 }
0x1e9a   :  { %15488 = vpow2.f32 %v12647_v37 }
0x1e9b   :  { %15490 = vpow2.f32 %v12649_v6 }
0x1e9e   :  { %v11000_v9 = vpop.f32.mrf.mxu1  ;;  %v11072_v50 = vpop.f32.mrf.mxu0 }
0x1e9f   :  { %v11076_v33 = vadd.f32 %v11072_v50, %v17875_v25  ;;  %v11004_v35 = vadd.f32 %v11000_v9, %v17873_v16  ;;  %v18157_v9 = vld [vmem:[%s18337_s6 + $0x1d8] sm:$0xff] }
0x1ea0   :  { %v14872_v12 = vpop.f32.mrf.mxu1  ;;  %v14883_v5 = vpop.f32.mrf.mxu0  ;;  %v18163_v50 = vld [vmem:[%s18337_s6 + $0x1f8] sm:$0xff] }
0x1ea1   :  { %v12652_v57 = vmul.f32 -1.442695, %v11076_v33  ;;  %v18171_v33 = vld [vmem:[%s18337_s6 + $0x1d0] sm:$0xff]  ;;  %v18185_v5 = vld [vmem:[%s18337_s6 + $0x1c8] sm:$0xff] }
0x1ea2   :  { %v18177_v12 = vld [vmem:[%s18337_s6 + $0x1f0] sm:$0xff] }
0x1ea3   :  { %15492 = vpow2.f32 %v12652_v57  ;;  %v18191_v57 = vld [vmem:[%s18337_s6 + $0x1e8] sm:$0xff] }
0x1ea4   :  { %15494 = vtanh.f32 %v11004_v35  ;;  %v18199_v35 = vld [vmem:[%s18337_s6 + $0x1c0] sm:$0xff] }
0x1ea7   :  { %v15489_v53 = vpop.eup %15488 }
0x1ea8   :  { %v15491_v10 = vpop.eup %15490  ;;  %v10854_v13 = vadd.f32 1.0, %v15489_v53  ;;  %v18207_v53 = vld [vmem:[%s18337_s6 + $0x1e0] sm:$0xff] }
0x1ea9   :  { %v10931_v14 = vadd.f32 1.0, %v15491_v10  ;;  %v15610_v10 = vld [vmem:[%s18337_s6 + $0x198] sm:$0xff] }
0x1eaa   :  { %15496 = vrcp.f32 %v10854_v13  ;;  %v15611_v13 = vld [vmem:[%s18337_s6 + $0x1b8] sm:$0xff] }
0x1eab   :  { %15498 = vrcp.f32 %v10931_v14  ;;  %v15612_v14 = vld [vmem:[%s18337_s6 + $0x190] sm:$0xff] }
0x1eb0   :  { %v15493_v15 = vpop.eup %15492 }
0x1eb1   :  { %v15495_v28 = vpop.eup %15494  ;;  %v11080_v29 = vadd.f32 1.0, %v15493_v15  ;;  %v15613_v15 = vld [vmem:[%s18337_s6 + $0x1b0] sm:$0xff] }
0x1eb3   :  { %15500 = vrcp.f32 %v11080_v29 }
0x1eb7   :  { %v15497_v23 = vpop.eup %15496 }
0x1eb8   :  { %v15499_v27 = vpop.eup %15498  ;;  %v11087_v54 = vmul.f32 %v15497_v23, %v15495_v28  ;;  %v15614_v28 = vld [vmem:[%s18337_s6 + $0x188] sm:$0xff] }
0x1eb9   :  { %v11086_v30 = vmul.f32 %v15499_v27, %v11084_v26  ;;  %v15615_v23 = vld [vmem:[%s18337_s6 + $0x1a8] sm:$0xff]  ;;  %v15616_v26 = vld [vmem:[%s18337_s6 + $0x180] sm:$0xff] }
0x1eba   :  { %v15617_v27 = vld [vmem:[%s18337_s6 + $0x1a0] sm:$0xff] }
0x1ebb   :  { %v18097_v36 = vadd.f32 %v11087_v54, %v11086_v30 }
0x1ebd   :  { %15502 = vtanh.f32 %v18097_v36  ;;  %v11410_v0 = vrot.slane %v18097_v36, 6 }
0x1ec0   :  { %v15501_v24 = vpop.eup %15500 }
0x1eca   :  { %v15503_v31 = vpop.eup %15502 }
0x1ecb   :  { %v11090_v58 = vmul.f32 %v15503_v31, %v15501_v24 }
0x1ecd   :  { %14893 = vmatmul.mubr.msk.f32.vlgmr.msra.gmra.mxu1 %vm147_vm2, %v11090_v58  ;;  %14904 = vmatmul.mubr.msk.f32.vlgmr.msra.gmra.mxu0 %vm147_vm2, %v11090_v58 }
0x1ece   :  { %14907 = vmatpush3.msra.mxu1 %v17774_v44  ;;  %14918 = vmatpush3.msra.mxu0 %v17779_v18 }
0x1ecf   :  { %14908 = vmatprep.subr.mxu1 %v15618_v56  ;;  %14919 = vmatprep.subr.mxu0 %v15618_v56 }
0x1ed0   :  { %14909 = vmatpush3.msra.mxu1 %v17788_v45  ;;  %14920 = vmatpush3.msra.mxu0 %v17793_v46 }
0x1ed1   :  { %14910 = vmatprep.subr.mxu1 %v15618_v56  ;;  %14921 = vmatprep.subr.mxu0 %v15618_v56 }
0x1ed2   :  { %14911 = vmatpush3.msra.mxu1 %v17802_v47  ;;  %14922 = vmatpush3.msra.mxu0 %v17807_v48 }
0x1ed3   :  { %14912 = vmatprep.subr.mxu1 %v15618_v56  ;;  %14923 = vmatprep.subr.mxu0 %v15618_v56 }
0x1ed4   :  { %14913 = vmatpush3.msra.mxu1 %v17816_v51  ;;  %14914 = vmatprep.mubr.msk.f32.mxu1 %vm15619_vm3, %v15618_v56 }
0x1ed5   :  { %14924 = vmatpush3.msra.mxu0 %v17823_v55  ;;  %14925 = vmatprep.mubr.msk.f32.mxu0 %vm15619_vm3, %v15618_v56 }
0x1ed6   :  { %14915 = vmatmul.mubr.msk.f32.vlgmr.msra.gmra.mxu1 %vm147_vm2, %v11090_v58  ;;  %14926 = vmatmul.mubr.msk.f32.vlgmr.msra.gmra.mxu0 %vm147_vm2, %v11090_v58 }
0x1ed7   :  { %14928 = vmatprep.subr.mxu1 %v15618_v56  ;;  %14939 = vmatprep.subr.mxu0 %v15618_v56 }
0x1ed8   :  { %14929 = vmatpush3.msra.mxu1 %v17712_v38  ;;  %14940 = vmatpush3.msra.mxu0 %v17717_v40 }
0x1ed9   :  { %14930 = vmatprep.subr.mxu1 %v15618_v56  ;;  %14941 = vmatprep.subr.mxu0 %v15618_v56 }
0x1eda   :  { %14931 = vmatpush3.msra.mxu1 %v17726_v8  ;;  %14942 = vmatpush3.msra.mxu0 %v17731_v39 }
0x1edb   :  { %14932 = vmatprep.subr.mxu1 %v15618_v56  ;;  %14943 = vmatprep.subr.mxu0 %v15618_v56 }
0x1edc   :  { %14933 = vmatpush3.msra.mxu1 %v17740_v42  ;;  %14944 = vmatpush3.msra.mxu0 %v17745_v41 }
0x1edd   :  { %14934 = vmatprep.subr.mxu1 %v15618_v56  ;;  %14945 = vmatprep.subr.mxu0 %v15618_v56 }
0x1ede   :  { %14935 = vmatpush3.msra.mxu1 %v17754_v21  ;;  %14946 = vmatpush3.msra.mxu0 %v17761_v43 }
0x1edf   :  { %14936 = vmatprep.mubr.msk.f32.mxu1 %vm15619_vm3, %v15618_v56  ;;  %14947 = vmatprep.mubr.msk.f32.mxu0 %vm15619_vm3, %v15618_v56 }
0x1ee0   :  { %14950 = vmatprep.subr.mxu1 %v15618_v56  ;;  %14961 = vmatprep.subr.mxu0 %v15618_v56 }
0x1f8d   :  { %v11160_v38 = vpop.f32.mrf.mxu1  ;;  %v11240_v40 = vpop.f32.mrf.mxu0 }
0x1f8e   :  { %v11165_v8 = vrot.slane %v11160_v38, 6  ;;  %v11245_v39 = vrot.slane %v11240_v40, 6 }
0x1f8f   :  { %v14894_v42 = vpop.f32.mrf.mxu1  ;;  %v14905_v41 = vpop.f32.mrf.mxu0 }
0x1f90   :  { %v11167_v21 = vadd.f32 %v11165_v8, %v17863_v34  ;;  %v11247_v43 = vadd.f32 %v11245_v39, %v17865_v49 }
0x1f92   :  { %v12654_v44 = vmul.f32 -1.442695, %v11167_v21  ;;  %v12656_v18 = vmul.f32 -1.442695, %v11247_v43 }
0x1f94   :  { %15504 = vpow2.f32 %v12654_v44 }
0x1f95   :  { %15506 = vpow2.f32 %v12656_v18 }
0x1f96   :  { %v11320_v45 = vpop.f32.mrf.mxu1  ;;  %v11395_v46 = vpop.f32.mrf.mxu0 }
0x1f97   :  { %v11400_v47 = vrot.slane %v11395_v46, 6  ;;  %v11325_v59 = vrot.slane %v11320_v45, 6 }
0x1f98   :  { %v14916_v48 = vpop.f32.mrf.mxu1  ;;  %v14927_v51 = vpop.f32.mrf.mxu0 }
0x1f99   :  { %v11402_v55 = vadd.f32 %v11400_v47, %v17875_v25  ;;  %v11327_v11 = vadd.f32 %v11325_v59, %v17873_v16 }
0x1f9b   :  { %v12659_v7 = vmul.f32 -1.442695, %v11402_v55 }
0x1f9d   :  { %15508 = vpow2.f32 %v12659_v7 }
0x1f9e   :  { %15510 = vtanh.f32 %v11327_v11 }
0x1fa1   :  { %v15505_v60 = vpop.eup %15504 }
0x1fa2   :  { %v15507_v62 = vpop.eup %15506  ;;  %v11171_v52 = vadd.f32 1.0, %v15505_v60 }
0x1fa3   :  { %v11251_v61 = vadd.f32 1.0, %v15507_v62 }
0x1fa4   :  { %15512 = vrcp.f32 %v11171_v52 }
0x1fa5   :  { %15514 = vrcp.f32 %v11251_v61 }
0x1faa   :  { %v15509_v63 = vpop.eup %15508 }
0x1fab   :  { %v15511_v20 = vpop.eup %15510  ;;  %v11406_v1 = vadd.f32 1.0, %v15509_v63 }
0x1fad   :  { %15516 = vrcp.f32 %v11406_v1  ;;  %v12074_v1 = vld [vmem:[%s18339_s8 + $0x18] sm:$0xff] }
0x1fb1   :  { %v15513_v22 = vpop.eup %15512 }
0x1fb2   :  { %v15515_v19 = vpop.eup %15514  ;;  %v11413_v17 = vmul.f32 %v15513_v22, %v15511_v20 }
0x1fb3   :  { %v11412_v2 = vmul.f32 %v15515_v19, %v11410_v0 }
0x1fb5   :  { %v18149_v3 = vadd.f32 %v11413_v17, %v11412_v2  ;;  %v12073_v2 = vld [vmem:[%s18339_s8 + $0x10] sm:$0xff] }
0x1fb7   :  { %15518 = vtanh.f32 %v18149_v3  ;;  %v11737_v60 = vrot.slane %v18149_v3, 6  ;;  %v12072_v3 = vld [vmem:[%s18339_s8 + $0x8] sm:$0xff] }
0x1fba   :  { %v15517_v4 = vpop.eup %15516 }
0x1fc4   :  { %v15519_v32 = vpop.eup %15518 }
0x1fc5   :  { %v11416_v37 = vmul.f32 %v15519_v32, %v15517_v4  ;;  %v12071_v4 = vld [vmem:[%s18339_s8] sm:$0xff] }
0x1fc7   :  { %v11418_v6 = vrot.slane %v11416_v37, 2 }
0x1fc9   :  { %14937 = vmatmul.mubr.msk.f32.vlgmr.msra.gmra.mxu1 %vm147_vm2, %v11418_v6  ;;  %14948 = vmatmul.mubr.msk.f32.vlgmr.msra.gmra.mxu0 %vm147_vm2, %v11418_v6 }
0x1fca   :  { %14951 = vmatpush3.msra.mxu1 %v18157_v9  ;;  %14962 = vmatpush3.msra.mxu0 %v18163_v50 }
0x1fcb   :  { %14952 = vmatprep.subr.mxu1 %v15618_v56  ;;  %14963 = vmatprep.subr.mxu0 %v15618_v56 }
0x1fcc   :  { %14953 = vmatpush3.msra.mxu1 %v18171_v33  ;;  %14964 = vmatpush3.msra.mxu0 %v18177_v12 }
0x1fcd   :  { %14954 = vmatprep.subr.mxu1 %v15618_v56  ;;  %14965 = vmatprep.subr.mxu0 %v15618_v56 }
0x1fce   :  { %14955 = vmatpush3.msra.mxu1 %v18185_v5  ;;  %14966 = vmatpush3.msra.mxu0 %v18191_v57 }
0x1fcf   :  { %14956 = vmatprep.subr.mxu1 %v15618_v56  ;;  %14967 = vmatprep.subr.mxu0 %v15618_v56 }
0x1fd0   :  { %14957 = vmatpush3.msra.mxu1 %v18199_v35  ;;  %14958 = vmatprep.mubr.msk.f32.mxu1 %vm15619_vm3, %v15618_v56 }
0x1fd1   :  { %14968 = vmatpush3.msra.mxu0 %v18207_v53  ;;  %14969 = vmatprep.mubr.msk.f32.mxu0 %vm15619_vm3, %v15618_v56 }
0x1fd2   :  { %14959 = vmatmul.mubr.msk.f32.vlgmr.msra.gmra.mxu1 %vm147_vm2, %v11418_v6  ;;  %14970 = vmatmul.mubr.msk.f32.vlgmr.msra.gmra.mxu0 %vm147_vm2, %v11418_v6 }
0x1fd3   :  { %14972 = vmatprep.subr.mxu1 %v15618_v56  ;;  %14983 = vmatprep.subr.mxu0 %v15618_v56 }
0x1fd4   :  { %14973 = vmatpush3.msra.mxu1 %v15610_v10  ;;  %14984 = vmatpush3.msra.mxu0 %v15611_v13 }
0x1fd5   :  { %14974 = vmatprep.subr.mxu1 %v15618_v56  ;;  %14985 = vmatprep.subr.mxu0 %v15618_v56 }
0x1fd6   :  { %14975 = vmatpush3.msra.mxu1 %v15612_v14  ;;  %14986 = vmatpush3.msra.mxu0 %v15613_v15 }
0x1fd7   :  { %14976 = vmatprep.subr.mxu1 %v15618_v56  ;;  %14987 = vmatprep.subr.mxu0 %v15618_v56 }
0x1fd8   :  { %14977 = vmatpush3.msra.mxu1 %v15614_v28  ;;  %14988 = vmatpush3.msra.mxu0 %v15615_v23 }
0x1fd9   :  { %14978 = vmatprep.subr.mxu1 %v15618_v56  ;;  %14989 = vmatprep.subr.mxu0 %v15618_v56 }
0x1fda   :  { %14979 = vmatpush3.msra.mxu1 %v15616_v26  ;;  %14990 = vmatpush3.msra.mxu0 %v15617_v27 }
0x1fdb   :  { %14980 = vmatprep.mubr.msk.f32.mxu1 %vm15619_vm3, %v15618_v56  ;;  %14991 = vmatprep.mubr.msk.f32.mxu0 %vm15619_vm3, %v15618_v56 }
0x1fdc   :  { %14994 = vmatprep.subr.mxu1 %v15618_v56  ;;  %15005 = vmatprep.subr.mxu0 %v15618_v56 }
0x2089   :  { %v11487_v54 = vpop.f32.mrf.mxu1  ;;  %v11567_v29 = vpop.f32.mrf.mxu0 }
0x208a   :  { %v11492_v30 = vrot.slane %v11487_v54, 4  ;;  %v11572_v36 = vrot.slane %v11567_v29, 4 }
0x208b   :  { %v14938_v24 = vpop.f32.mrf.mxu1  ;;  %v14949_v31 = vpop.f32.mrf.mxu0 }
0x208c   :  { %v11494_v58 = vadd.f32 %v11492_v30, %v17863_v34  ;;  %v11574_v38 = vadd.f32 %v11572_v36, %v17865_v49 }
0x208e   :  { %v12661_v40 = vmul.f32 -1.442695, %v11494_v58  ;;  %v12663_v8 = vmul.f32 -1.442695, %v11574_v38 }
0x2090   :  { %15520 = vpow2.f32 %v12661_v40 }
0x2091   :  { %15522 = vpow2.f32 %v12663_v8 }
0x2092   :  { %v11647_v39 = vpop.f32.mrf.mxu1  ;;  %v11722_v42 = vpop.f32.mrf.mxu0 }
0x2093   :  { %v11727_v41 = vrot.slane %v11722_v42, 4  ;;  %v11652_v18 = vrot.slane %v11647_v39, 4 }
0x2094   :  { %v14960_v21 = vpop.f32.mrf.mxu1  ;;  %v14971_v43 = vpop.f32.mrf.mxu0 }
0x2095   :  { %v11729_v44 = vadd.f32 %v11727_v41, %v17875_v25  ;;  %v11654_v46 = vadd.f32 %v11652_v18, %v17873_v16  ;;  %v12674_v21 = vld [vmem:[%s18340_s9] ss:$0 sm:$0xff] }
0x2097   :  { %v12666_v45 = vmul.f32 -1.442695, %v11729_v44 }
0x2099   :  { %15524 = vpow2.f32 %v12666_v45 }
0x209a   :  { %15526 = vtanh.f32 %v11654_v46 }
0x209d   :  { %v15521_v47 = vpop.eup %15520 }
0x209e   :  { %v15523_v48 = vpop.eup %15522  ;;  %v11498_v51 = vadd.f32 1.0, %v15521_v47 }
0x209f   :  { %v11578_v55 = vadd.f32 1.0, %v15523_v48 }
0x20a0   :  { %15528 = vrcp.f32 %v11498_v51 }
0x20a1   :  { %15530 = vrcp.f32 %v11578_v55 }
0x20a6   :  { %v15525_v59 = vpop.eup %15524 }
0x20a7   :  { %v15527_v7 = vpop.eup %15526  ;;  %v11733_v61 = vadd.f32 1.0, %v15525_v59  ;;  %v12189_v59 = vld [vmem:[%s18341_s12 + $0x8] sm:$0xff] }
0x20a9   :  { %15532 = vrcp.f32 %v11733_v61 }
0x20ad   :  { %v15529_v11 = vpop.eup %15528 }
0x20ae   :  { %v15531_v62 = vpop.eup %15530  ;;  %v11740_v52 = vmul.f32 %v15529_v11, %v15527_v7  ;;  %v12188_v7 = vld [vmem:[%s18341_s12] sm:$0xff]  ;;  %v19_v11 = vstv %s18342_s13 }
0x20af   :  { %v11739_v63 = vmul.f32 %v15531_v62, %v11737_v60  ;;  %20 = vst [vmem:[#allocation4] sm:$0x1] %v19_v11 }
0x20b1   :  { %v18257_v20 = vadd.f32 %v11740_v52, %v11739_v63  ;;  %v12676_v63 = vld [vmem:[%s18343_s10] ss:$0 sm:$0xff] }
0x20b3   :  { %15534 = vtanh.f32 %v18257_v20  ;;  %v12064_v31 = vrot.slane %v18257_v20, 6 }
0x20b6   :  { %v15533_v22 = vpop.eup %15532 }
0x20c0   :  { %v15535_v0 = vpop.eup %15534 }
0x20c1   :  { %v11743_v19 = vmul.f32 %v15535_v0, %v15533_v22 }
0x20c3   :  { %v11745_v17 = vrot.slane %v11743_v19, 4 }
0x20c5   :  { %14981 = vmatmul.mubr.msk.f32.vlgmr.msra.gmra.mxu1 %vm147_vm2, %v11745_v17  ;;  %14992 = vmatmul.mubr.msk.f32.vlgmr.msra.gmra.mxu0 %vm147_vm2, %v11745_v17 }
0x20c6   :  { %14995 = vmatpush3.msra.mxu1 %v18157_v9  ;;  %15006 = vmatpush3.msra.mxu0 %v18163_v50 }
0x20c7   :  { %14996 = vmatprep.subr.mxu1 %v15618_v56  ;;  %15007 = vmatprep.subr.mxu0 %v15618_v56 }
0x20c8   :  { %14997 = vmatpush3.msra.mxu1 %v18171_v33  ;;  %15008 = vmatpush3.msra.mxu0 %v18177_v12 }
0x20c9   :  { %14998 = vmatprep.subr.mxu1 %v15618_v56  ;;  %15009 = vmatprep.subr.mxu0 %v15618_v56 }
0x20ca   :  { %14999 = vmatpush3.msra.mxu1 %v18185_v5  ;;  %15010 = vmatpush3.msra.mxu0 %v18191_v57 }
0x20cb   :  { %15000 = vmatprep.subr.mxu1 %v15618_v56  ;;  %15011 = vmatprep.subr.mxu0 %v15618_v56 }
0x20cc   :  { %15001 = vmatpush3.msra.mxu1 %v18199_v35  ;;  %15002 = vmatprep.mubr.msk.f32.mxu1 %vm15619_vm3, %v15618_v56 }
0x20cd   :  { %15012 = vmatpush3.msra.mxu0 %v18207_v53  ;;  %15013 = vmatprep.mubr.msk.f32.mxu0 %vm15619_vm3, %v15618_v56 }
0x20ce   :  { %15003 = vmatmul.mubr.msk.f32.vlgmr.msra.gmra.mxu1 %vm147_vm2, %v11745_v17  ;;  %15014 = vmatmul.mubr.msk.f32.vlgmr.msra.gmra.mxu0 %vm147_vm2, %v11745_v17  ;;  %v12678_v17 = vld [vmem:[#allocation4] ss:$0 sm:$0xff] }
0x20cf   :  { %15016 = vmatprep.subr.mxu1 %v15618_v56  ;;  %15024 = vmatprep.mubr.msk.f32.mxu1 %vm15619_vm3, %v15618_v56 }
0x20d0   :  { %15027 = vmatprep.subr.mxu0 %v15618_v56  ;;  %15031 = vmatprep.mubr.msk.f32.mxu0 %vm15619_vm3, %v15618_v56 }
0x20d1   :  { %15017 = vmatpush3.msra.mxu1 %v12074_v1  ;;  %15028 = vmatpush3.msra.mxu0 %v12189_v59 }
0x20d2   :  { %15018 = vmatprep.subr.mxu1 %v15618_v56  ;;  %15029 = vmatprep.subr.mxu0 %v15618_v56 }
0x20d3   :  { %15019 = vmatpush3.msra.mxu1 %v12073_v2  ;;  %15030 = vmatpush3.msra.mxu0 %v12188_v7 }
0x20d4   :  { %15020 = vmatprep.subr.mxu1 %v15618_v56 }
0x20d5   :  { %15021 = vmatpush3.msra.mxu1 %v12072_v3 }
0x20d6   :  { %15022 = vmatprep.subr.mxu1 %v15618_v56  ;;  %v12677_v56 = vld [vmem:[%s18344_s11] ss:$0 sm:$0xff] }
0x20d7   :  { %15023 = vmatpush3.msra.mxu1 %v12071_v4 }
0x2185   :  { %v11814_v32 = vpop.f32.mrf.mxu1  ;;  %v11894_v37 = vpop.f32.mrf.mxu0 }
0x2186   :  { %v11819_v6 = vrot.slane %v11814_v32, 2  ;;  %v11899_v9 = vrot.slane %v11894_v37, 2 }
0x2187   :  { %v14982_v50 = vpop.f32.mrf.mxu1  ;;  %v14993_v33 = vpop.f32.mrf.mxu0 }
0x2188   :  { %v11821_v12 = vadd.f32 %v11819_v6, %v17863_v34  ;;  %v11901_v5 = vadd.f32 %v11899_v9, %v17865_v49 }
0x218a   :  { %v12668_v57 = vmul.f32 -1.442695, %v11821_v12  ;;  %v12670_v35 = vmul.f32 -1.442695, %v11901_v5 }
0x218c   :  { %15536 = vpow2.f32 %v12668_v57 }
0x218d   :  { %15538 = vpow2.f32 %v12670_v35 }
0x218e   :  { %v11974_v53 = vpop.f32.mrf.mxu1  ;;  %v12049_v10 = vpop.f32.mrf.mxu0 }
0x218f   :  { %v12054_v13 = vrot.slane %v12049_v10, 2  ;;  %v11979_v23 = vrot.slane %v11974_v53, 2 }
0x2190   :  { %v15004_v14 = vpop.f32.mrf.mxu1  ;;  %v15015_v15 = vpop.f32.mrf.mxu0 }
0x2191   :  { %v12056_v28 = vadd.f32 %v12054_v13, %v17875_v25  ;;  %v11981_v27 = vadd.f32 %v11979_v23, %v17873_v16 }
0x2193   :  { %v12673_v26 = vmul.f32 -1.442695, %v12056_v28 }
0x2195   :  { %15540 = vpow2.f32 %v12673_v26 }
0x2196   :  { %15542 = vtanh.f32 %v11981_v27 }
0x2199   :  { %v15537_v54 = vpop.eup %15536 }
0x219a   :  { %v15539_v29 = vpop.eup %15538  ;;  %v11825_v34 = vadd.f32 1.0, %v15537_v54 }
0x219b   :  { %v11905_v49 = vadd.f32 1.0, %v15539_v29 }
0x219c   :  { %15544 = vrcp.f32 %v11825_v34 }
0x219d   :  { %15546 = vrcp.f32 %v11905_v49 }
0x21a2   :  { %v15541_v30 = vpop.eup %15540 }
0x21a3   :  { %v15543_v36 = vpop.eup %15542  ;;  %v12060_v25 = vadd.f32 1.0, %v15541_v30 }
0x21a5   :  { %15548 = vrcp.f32 %v12060_v25 }
0x21a9   :  { %v15545_v24 = vpop.eup %15544 }
0x21aa   :  { %v15547_v58 = vpop.eup %15546  ;;  %v12067_v38 = vmul.f32 %v15545_v24, %v15543_v36 }
0x21ab   :  { %v12066_v40 = vmul.f32 %v15547_v58, %v12064_v31 }
0x21ad   :  { %v12068_v8 = vadd.f32 %v12067_v38, %v12066_v40 }
0x21af   :  { %15550 = vtanh.f32 %v12068_v8 }
0x21b2   :  { %v15549_v16 = vpop.eup %15548 }
0x21bc   :  { %v15551_v39 = vpop.eup %15550 }
0x21bd   :  { %v12070_v42 = vmul.f32 %v15551_v39, %v15549_v16 }
0x21bf   :  { %v12083_v41 = vrot.slane %v12070_v42, 6 }
0x21c1   :  { %15025 = vmatmul.mubr.msk.f32.vlgmr.msra.gmra.mxu1 %vm147_vm2, %v12083_v41 }
0x2281   :  { %v12152_v43 = vpop.f32.mrf.mxu1 }
0x2282   :  { %v12153_v44 = vadd.f32 %v12674_v21, %v12152_v43 }
0x2283   :  { %v15026_v18 = vpop.f32.mrf.mxu1 }
0x2284   :  { %v12159_v45 = vsel %vm12158_vm8, %v12153_v44, 0.0 }
0x2285   :  { %12160 = vadd.xlane.f32.xlu0 %v12159_v45 }
0x230e   :  { %v12161_v46 = vpop.xlane.xlu0 %12160 }
0x230f   :  { %v12163_v47 = vmul.f32 0.0625, %v12161_v46 }
0x2311   :  { %v12164_v48 = vsub.f32 %v12153_v44, %v12163_v47 }
0x2313   :  { %v12165_v51 = vmul.f32 %v12164_v48, %v12164_v48 }
0x2315   :  { %v12166_v55 = vsel %vm12158_vm8, %v12165_v51, 0.0 }
0x2316   :  { %12167 = vadd.xlane.f32.xlu1 %v12166_v55 }
0x239f   :  { %v12168_v60 = vpop.xlane.xlu1 %12167 }
0x23a0   :  { %v12169_v62 = vmul.f32 0.0625, %v12168_v60 }
0x23a2   :  { %v12170_v52 = vadd.f32 1e-05, %v12169_v62 }
0x23a4   :  { %15552 = vrsqrt.f32 %v12170_v52 }
0x23b1   :  { %v15553_v61 = vpop.eup %15552 }
0x23b2   :  { %v12172_v20 = vmul.f32 %v15553_v61, %v12164_v48 }
0x23b4   :  { %v12179_v22 = vmul.f32 %v12676_v63, %v12172_v20 }
0x23b6   :  { %v12186_v0 = vadd.f32 %v12677_v56, %v12179_v22 }
0x23b8   :  { %v12187_v19 = vmax.f32 %v12186_v0, 0.0 }
0x23ba   :  { %15032 = vmatmul.mubr.msk.f32.vlgmr.msra.gmra.mxu0 %vm12197_vm9, %v12187_v19 }
0x247a   :  { %v12267_v1 = vpop.f32.mrf.mxu0 }
0x247b   :  { %v12268_v2 = vadd.f32 %v12678_v17, %v12267_v1 }
0x247c   :  { %v15033_v3 = vpop.f32.mrf.mxu0 }
0x247d   :  { %12272 = vst.msk [vmem:[%s18345_s14] sm:$0x3] %vm12271_vm10, %v12268_v2 }

</bundles_post_ra>
